<compile_context>
chip_gen: v6e
topology: v6e:2x2x1
jax: 0.10.0
libtpu: 0.0.40
codegen_flags: <defaults>
</compile_context>

<pallas_src>
import functools

import jax
import jax.numpy as jnp
from jax.experimental import pallas as pl
from jax.experimental.pallas import tpu as pltpu

_BN_EPS = 1e-5
_LEAKY = 0.1


# ----------------------------- fused Pallas kernel -----------------------------

def _node_rnn_kernel(*refs, kernel_size, conv_channels, n_hidden, n_layer,
                     batch_tile):
    K = kernel_size
    H = n_hidden
    TB = batch_tile
    n_conv = len(conv_channels)
    T = conv_channels[-1]            # GRU sequence length = last conv channels
    G3 = 3 * H

    # ---- parse the flat ref list (structure is static for a given config) ----
    it = iter(refs)
    x_ref = next(it)                                     # (TB, W) input block
    scal_ref = next(it)                                  # SMEM scalar pack
    sel_refs = [next(it) for _ in range(n_conv - 1)]     # pool selection mats
    gru_refs = [tuple(next(it) for _ in range(5)) for _ in range(n_layer)]
    head_ref = next(it)                                  # (3, 2H) scale/shift/w
    o_ref = next(it)                                     # (1, 1, TB) out block
    seq_ref = next(it)                                   # VMEM scratch (2,T*TB,H)

    def leaky(v):
        return jnp.where(v > 0.0, v, _LEAKY * v)

    # ---------------- conv tower: channel-major, all TB samples at once -------
    # Activations are a list of per-channel (TB, width) tiles; each conv tap is
    # a scalar-from-SMEM * tile FMA (the contraction dims K*Cin <= 18 are far
    # too small for the MXU), so samples never mix and no per-sample unroll.
    acts = [x_ref[...]]                                  # stage 0: Cin = 1
    cin = 1
    row = 0                                              # row offset in scal pack
    for si, cout in enumerate(conv_channels):
        w_in = acts[0].shape[1]
        w_out = w_in - K + 1
        bcol = cin * K                                   # bias column in pack
        shifted = [[acts[c][:, m:m + w_out] for m in range(K)]
                   for c in range(cin)]
        ys = []
        for o in range(cout):
            y = None
            for c in range(cin):
                for m in range(K):
                    term = scal_ref[row + o, c * K + m] * shifted[c][m]
                    y = term if y is None else y + term
            ys.append(y)
        if si < n_conv - 1:
            # MaxPool2d((1,K), stride K): running max over K shifts, then pick
            # every K-th column with a precomputed one-hot matmul (bias commutes
            # with max so it is added after); LeakyReLU + folded eval-mode BN.
            w2 = w_out - K + 1
            m2s = []
            for o in range(cout):
                m2 = ys[o][:, 0:w2]
                for j in range(1, K):
                    m2 = jnp.maximum(m2, ys[o][:, j:j + w2])
                m2s.append(m2)
            stacked = jnp.concatenate(m2s, axis=0)                  # (cout*TB, w2)
            pooled = jnp.dot(stacked, sel_refs[si][...],
                             preferred_element_type=jnp.float32)    # (cout*TB, wp)
            nxt = []
            for o in range(cout):
                blk = pooled[o * TB:(o + 1) * TB, :] + scal_ref[row + o, bcol]
                blk = leaky(blk)
                nxt.append(blk * scal_ref[row + o, bcol + 1]
                           + scal_ref[row + o, bcol + 2])
            acts = nxt
        else:                                            # last stage: conv+bias
            acts = [ys[o] + scal_ref[row + o, bcol] for o in range(cout)]
        row += cout
        cin = cout

    # GRU input: (T*TB, F), rows ordered (timestep, sample) -- exactly the
    # out.squeeze() that nn.GRU(batch_first=True) consumes, batch-tiled.
    x_seq = jnp.concatenate(acts, axis=0)

    # ---------------- bidirectional GRU (PyTorch gate order r,z,n) ------------
    h_f = jnp.zeros((TB, H), jnp.float32)
    h_b = jnp.zeros((TB, H), jnp.float32)
    for li in range(n_layer):
        wif_ref, wib_ref, whf_ref, whb_ref, bias_ref = gru_refs[li]
        bi_f = bias_ref[0:1, :]
        bh_f = bias_ref[1:2, :]
        bi_b = bias_ref[2:3, :]
        bh_b = bias_ref[3:4, :]
        # Hoisted input projection: one matmul per direction for ALL timesteps
        # and ALL TB samples; per-gate slices hoisted out of the time loop.
        gi_f = jnp.dot(x_seq, wif_ref[...],
                       preferred_element_type=jnp.float32) + bi_f    # (T*TB, 3H)
        gi_b = jnp.dot(x_seq, wib_ref[...],
                       preferred_element_type=jnp.float32) + bi_b
        gif_r, gif_z, gif_n = gi_f[:, 0:H], gi_f[:, H:2 * H], gi_f[:, 2 * H:G3]
        gib_r, gib_z, gib_n = gi_b[:, 0:H], gi_b[:, H:2 * H], gi_b[:, 2 * H:G3]
        wh_f = whf_ref[...]                                # (H, 3H)
        wh_b = whb_ref[...]
        h_f = jnp.zeros((TB, H), jnp.float32)
        h_b = jnp.zeros((TB, H), jnp.float32)
        last = li == n_layer - 1
        for t in range(T):
            sf = slice(t * TB, (t + 1) * TB)               # forward time t
            sb = slice((T - 1 - t) * TB, (T - t) * TB)     # backward time T-1-t
            # forward direction
            gh = jnp.dot(h_f, wh_f, preferred_element_type=jnp.float32) + bh_f
            r = jax.nn.sigmoid(gif_r[sf] + gh[:, 0:H])
            z = jax.nn.sigmoid(gif_z[sf] + gh[:, H:2 * H])
            n = jnp.tanh(gif_n[sf] + r * gh[:, 2 * H:G3])
            h_f = (1.0 - z) * n + z * h_f
            # backward direction
            gh = jnp.dot(h_b, wh_b, preferred_element_type=jnp.float32) + bh_b
            r = jax.nn.sigmoid(gib_r[sb] + gh[:, 0:H])
            z = jax.nn.sigmoid(gib_z[sb] + gh[:, H:2 * H])
            n = jnp.tanh(gib_n[sb] + r * gh[:, 2 * H:G3])
            h_b = (1.0 - z) * n + z * h_b

            if not last:                                   # stash layer outputs
                seq_ref[0, sf, :] = h_f
                seq_ref[1, sb, :] = h_b
        if not last:
            x_seq = jnp.concatenate([seq_ref[0], seq_ref[1]], axis=1)  # (T*TB, 2H)

    # torch.cat((out[:, -1, :H], out[:, 0, H:]), 1) == final fwd ++ final bwd.
    zcat = jnp.concatenate([h_f, h_b], axis=1)             # (TB, 2H)

    # ---------------- head: LeakyReLU -> folded BN1d -> Linear -> Sigmoid -----
    a = leaky(zcat)
    a = a * head_ref[0:1, :] + head_ref[1:2, :]
    logit = jax.lax.dot_general(head_ref[2:3, :], a,
                                dimension_numbers=(((1,), (1,)), ((), ())),
                                preferred_element_type=jnp.float32)   # (1, TB)
    logit = logit + scal_ref[row, 0]                        # head bias (SMEM)
    o_ref[0] = jax.nn.sigmoid(logit)                        # lane-dense row


# ----------------------------- wrapper -----------------------------

def node_rnn_forward(params, in_sig, *, kernel_size, n_hidden, n_layer,
                     batch_tile=None):
    """in_sig: (B, 1, 1, W) NCHW, as in the PyTorch module. Returns (B, 1)."""
    K, H = kernel_size, n_hidden
    convs = params["convs"]
    n_conv = len(convs)
    conv_channels = tuple(int(lp["w"].shape[0]) for lp in convs)
    B = in_sig.shape[0]
    W = in_sig.shape[-1]
    T = conv_channels[-1]

    # Batch tile: fill MXU rows (target ~64 on v5e, ~128 on v6e/v7x) while
    # keeping >= 2 grid steps so both v7x TensorCores get work.
    if batch_tile is None:
        half = max(8, (B + 1) // 2)
        batch_tile = min(128, ((half + 7) // 8) * 8)
    TB = batch_tile
    assert TB % 8 == 0, "batch tile must be a multiple of 8 sublanes"
    G = -(-B // TB)
    Bp = G * TB

    x = in_sig.reshape(B, W).astype(jnp.float32)
    if Bp != B:
        x = jnp.concatenate([x, jnp.zeros((Bp - B, W), jnp.float32)], axis=0)

    inputs = [x]
    specs = [pl.BlockSpec((TB, W), lambda g: (g, 0))]

    def add_vmem(arr):
        arr = jnp.asarray(arr, jnp.float32)
        assert arr.ndim == 2
        inputs.append(arr)
        specs.append(pl.BlockSpec(arr.shape, lambda g: (0, 0)))

    # --- SMEM scalar pack: per conv stage [w | bias | bn scale | bn shift],
    # --- plus a final row holding the head (dense) bias.
    cins = [1] + list(conv_channels[:-1])
    col_w = max(c * K + 3 for c in cins)
    rows = []
    for i, lp in enumerate(convs):
        cout, cin = conv_channels[i], cins[i]
        ent = [lp["w"].reshape(cout, cin * K), lp["b"].reshape(cout, 1)]
        if i < n_conv - 1:                               # fold eval-mode BN2d
            s = lp["gamma"] * jax.lax.rsqrt(lp["var"] + _BN_EPS)
            ent += [s.reshape(cout, 1),
                    (lp["beta"] - lp["mean"] * s).reshape(cout, 1)]
        blk = jnp.concatenate(ent, axis=1)
        rows.append(jnp.pad(blk, ((0, 0), (0, col_w - blk.shape[1]))))
    rows.append(jnp.zeros((1, col_w), jnp.float32)
                .at[0, 0].set(params["head"]["b"][0]))
    scal = jnp.concatenate(rows, axis=0).astype(jnp.float32)
    inputs.append(scal)
    specs.append(pl.BlockSpec(memory_space=pltpu.MemorySpace.SMEM))

    # --- precomputed max-pool "pick every K-th column" selection matrices.
    w_cur = W
    for _ in range(n_conv - 1):
        w_out = w_cur - K + 1
        w2, wp = w_out - K + 1, w_out // K
        rr = jax.lax.broadcasted_iota(jnp.int32, (w2, wp), 0)
        pp = jax.lax.broadcasted_iota(jnp.int32, (w2, wp), 1)
        add_vmem(jnp.where(rr == pp * K, 1.0, 0.0))
        w_cur = wp

    # --- GRU: torch (3H, Din) weights -> (Din, 3H); biases packed (4, 3H).
    for lp in params["gru"]:
        add_vmem(lp["w_ih_f"].T)
        add_vmem(lp["w_ih_b"].T)
        add_vmem(lp["w_hh_f"].T)
        add_vmem(lp["w_hh_b"].T)
        add_vmem(jnp.stack([lp["b_ih_f"], lp["b_hh_f"],
                            lp["b_ih_b"], lp["b_hh_b"]], axis=0))

    # --- head: folded BN1d scale/shift + dense weight row, packed (3, 2H).
    hp = params["head"]
    s = hp["gamma"] * jax.lax.rsqrt(hp["var"] + _BN_EPS)
    add_vmem(jnp.stack([s, hp["beta"] - hp["mean"] * s,
                        hp["w"].reshape(-1)], axis=0))

    kernel = functools.partial(
        _node_rnn_kernel, kernel_size=K, conv_channels=conv_channels,
        n_hidden=H, n_layer=n_layer, batch_tile=TB)
    out = pl.pallas_call(
        kernel,
        grid=(G,),
        out_shape=jax.ShapeDtypeStruct((G, 1, TB), jnp.float32),
        in_specs=specs,
        out_specs=pl.BlockSpec((1, 1, TB), lambda g: (g, 0, 0)),
        scratch_shapes=[pltpu.VMEM((2, T * TB, H), jnp.float32)],
        compiler_params=pltpu.CompilerParams(
            dimension_semantics=("parallel",)),
    )(*inputs)
    return out.reshape(Bp, 1)[:B]


# ----------------------------- pure-JAX reference -----------------------------

def _gru_cell(x, h, w_ih, w_hh, b_ih, b_hh):
    Hh = h.shape[1]
    gi = x @ w_ih.T + b_ih
    gh = h @ w_hh.T + b_hh
    r = jax.nn.sigmoid(gi[:, :Hh] + gh[:, :Hh])
    z = jax.nn.sigmoid(gi[:, Hh:2 * Hh] + gh[:, Hh:2 * Hh])
    n = jnp.tanh(gi[:, 2 * Hh:] + r * gh[:, 2 * Hh:])
    return (1.0 - z) * n + z * h


def node_rnn_reference(params, in_sig, *, kernel_size, n_hidden, n_layer):
    """Eval-mode forward mirroring the PyTorch module (correctness check)."""
    K, H = kernel_size, n_hidden
    B, W = in_sig.shape[0], in_sig.shape[-1]
    x = in_sig.reshape(B, 1, W).astype(jnp.float32)
    convs = params["convs"]
    for i, lp in enumerate(convs):
        wout = x.shape[-1] - K + 1
        cols = jnp.stack([x[:, :, m:m + wout] for m in range(K)], axis=3)
        y = jnp.einsum("bcjm,ocm->boj", cols, lp["w"]) + lp["b"][None, :, None]
        if i < len(convs) - 1:
            wp = wout // K
            y = y[:, :, :wp * K].reshape(B, y.shape[1], wp, K).max(axis=3)
            y = jnp.where(y > 0, y, _LEAKY * y)
            s = lp["gamma"] * jax.lax.rsqrt(lp["var"] + _BN_EPS)
            t = lp["beta"] - lp["mean"] * s
            y = y * s[None, :, None] + t[None, :, None]
        x = y
    seq = x                                              # (B, T, F)
    for lp in params["gru"]:
        T = seq.shape[1]
        h_f = jnp.zeros((B, H), jnp.float32)
        h_b = jnp.zeros((B, H), jnp.float32)
        outs_f, outs_b = [], []
        for t in range(T):
            h_f = _gru_cell(seq[:, t], h_f, lp["w_ih_f"], lp["w_hh_f"],
                            lp["b_ih_f"], lp["b_hh_f"])
            outs_f.append(h_f)
            h_b = _gru_cell(seq[:, T - 1 - t], h_b, lp["w_ih_b"], lp["w_hh_b"],
                            lp["b_ih_b"], lp["b_hh_b"])
            outs_b.append(h_b)
        seq = jnp.concatenate([jnp.stack(outs_f, axis=1),
                               jnp.stack(outs_b[::-1], axis=1)], axis=2)
    z = jnp.concatenate([seq[:, -1, :H], seq[:, 0, H:]], axis=1)
    z = jnp.where(z > 0, z, _LEAKY * z)
    hp = params["head"]
    s = hp["gamma"] * jax.lax.rsqrt(hp["var"] + _BN_EPS)
    z = z * s + (hp["beta"] - hp["mean"] * s)
    return jax.nn.sigmoid(z @ hp["w"].T + hp["b"])


# ----------------------------- deterministic parameter init -----------------------------
# Parameters kept in PyTorch layouts (Conv2d (Cout,Cin,K), GRU (3H,Din), ...)
# so real checkpoints could be dropped in; the wrapper does all layout folding.

def init_params(key, *, conv_channels, kernel_size, feat_dim, n_hidden, n_layer):
    keys = iter(jax.random.split(key, 128))

    def nrm(shape, scale=0.1):
        return (scale * jax.random.normal(next(keys), shape)).astype(jnp.float32)

    convs = []
    cin = 1
    for i, cout in enumerate(conv_channels):
        lp = {"w": nrm((cout, cin, kernel_size)), "b": nrm((cout,))}
        if i < len(conv_channels) - 1:                   # BatchNorm2d on pooled stages
            lp.update({
                "gamma": 1.0 + nrm((cout,), 0.05),
                "beta": nrm((cout,), 0.05),
                "mean": nrm((cout,), 0.05),
                "var": 1.0 + jnp.abs(nrm((cout,), 0.05)),
            })
        convs.append(lp)
        cin = cout

    gru = []
    din = feat_dim
    for _ in range(n_layer):
        lp = {}
        for d in ("f", "b"):                             # forward / backward dirs
            lp["w_ih_" + d] = nrm((3 * n_hidden, din))
            lp["w_hh_" + d] = nrm((3 * n_hidden, n_hidden))
            lp["b_ih_" + d] = nrm((3 * n_hidden,))
            lp["b_hh_" + d] = nrm((3 * n_hidden,))
        gru.append(lp)
        din = 2 * n_hidden

    head = {
        "gamma": 1.0 + nrm((2 * n_hidden,), 0.05),
        "beta": nrm((2 * n_hidden,), 0.05),
        "mean": nrm((2 * n_hidden,), 0.05),
        "var": 1.0 + jnp.abs(nrm((2 * n_hidden,), 0.05)),
        "w": nrm((1, 2 * n_hidden)),
        "b": nrm((1,)),
    }
    return {"convs": convs, "gru": gru, "head": head}


# ----------------------------- main -----------------------------

if __name__ == "__main__":
    B = 16                         # 2 grid steps of TB=8 samples each
    W_in = 98                      # input signal length (NCHW: (B, 1, 1, W_in))
    kernel_size = 3
    conv1d_layers = [6, 5, 8]      # last entry becomes the GRU sequence length
    n_hidden = 32
    n_layer = 2

    # feat_dim exactly as computed in NodeRNN.__init__
    feat_dim = W_in
    for _ in range(len(conv1d_layers) - 1):
        feat_dim = (feat_dim - kernel_size + 1) // kernel_size
    feat_dim = feat_dim - kernel_size + 1

    key = jax.random.PRNGKey(0)
    k_param, k_in = jax.random.split(key)
    params = init_params(k_param, conv_channels=conv1d_layers,
                         kernel_size=kernel_size, feat_dim=feat_dim,
                         n_hidden=n_hidden, n_layer=n_layer)
    in_sig = jax.random.normal(k_in, (B, 1, 1, W_in), dtype=jnp.float32)

    fwd = jax.jit(functools.partial(node_rnn_forward, kernel_size=kernel_size,
                                    n_hidden=n_hidden, n_layer=n_layer))
    out = jax.block_until_ready(fwd(params, in_sig))
    assert out.shape == (B, 1), out.shape
    assert bool(jnp.all(jnp.isfinite(out))), "non-finite output"

    with jax.default_matmul_precision("highest"):
        ref = node_rnn_reference(params, in_sig, kernel_size=kernel_size,
                                 n_hidden=n_hidden, n_layer=n_layer)
    max_err = float(jnp.max(jnp.abs(out - ref)))
    assert max_err < 5e-3, f"mismatch vs pure-JAX reference: {max_err}"
    print("KERNEL_OK")
</pallas_src>

<mosaic_0001>
module attributes {stable_mosaic.version = 11 : i64} {
  func.func @_node_rnn_kernel(%arg0: i32, %arg1: memref<8x98xf32, #tpu.memory_space<vmem>>, %arg2: memref<20x21xf32, #tpu.memory_space<smem>>, %arg3: memref<94x32xf32, #tpu.memory_space<vmem>>, %arg4: memref<28x10xf32, #tpu.memory_space<vmem>>, %arg5: memref<8x96xf32, #tpu.memory_space<vmem>>, %arg6: memref<8x96xf32, #tpu.memory_space<vmem>>, %arg7: memref<32x96xf32, #tpu.memory_space<vmem>>, %arg8: memref<32x96xf32, #tpu.memory_space<vmem>>, %arg9: memref<4x96xf32, #tpu.memory_space<vmem>>, %arg10: memref<64x96xf32, #tpu.memory_space<vmem>>, %arg11: memref<64x96xf32, #tpu.memory_space<vmem>>, %arg12: memref<32x96xf32, #tpu.memory_space<vmem>>, %arg13: memref<32x96xf32, #tpu.memory_space<vmem>>, %arg14: memref<4x96xf32, #tpu.memory_space<vmem>>, %arg15: memref<3x64xf32, #tpu.memory_space<vmem>>, %arg16: memref<1x1x8xf32, #tpu.memory_space<vmem>>, %arg17: memref<2x64x32xf32, #tpu.memory_space<vmem>>) attributes {dimension_semantics = [#tpu.dimension_semantics<parallel>], iteration_bounds = array<i64: 2>, scalar_prefetch = 0 : i64, scratch_operands = 1 : i64, tpu.core_type = #tpu.core_type<tc>, window_params = [{transform_indices = @transform_0, window_bounds = array<i64: 8, 98>}, {transform_indices = @transform_1, window_bounds = array<i64: 20, 21>}, {pipeline_mode = #tpu.pipeline_mode<synchronous>, transform_indices = @transform_2, window_bounds = array<i64: 94, 32>}, {pipeline_mode = #tpu.pipeline_mode<synchronous>, transform_indices = @transform_3, window_bounds = array<i64: 28, 10>}, {pipeline_mode = #tpu.pipeline_mode<synchronous>, transform_indices = @transform_4, window_bounds = array<i64: 8, 96>}, {pipeline_mode = #tpu.pipeline_mode<synchronous>, transform_indices = @transform_5, window_bounds = array<i64: 8, 96>}, {pipeline_mode = #tpu.pipeline_mode<synchronous>, transform_indices = @transform_6, window_bounds = array<i64: 32, 96>}, {pipeline_mode = #tpu.pipeline_mode<synchronous>, transform_indices = @transform_7, window_bounds = array<i64: 32, 96>}, {pipeline_mode = #tpu.pipeline_mode<synchronous>, transform_indices = @transform_8, window_bounds = array<i64: 4, 96>}, {pipeline_mode = #tpu.pipeline_mode<synchronous>, transform_indices = @transform_9, window_bounds = array<i64: 64, 96>}, {pipeline_mode = #tpu.pipeline_mode<synchronous>, transform_indices = @transform_10, window_bounds = array<i64: 64, 96>}, {pipeline_mode = #tpu.pipeline_mode<synchronous>, transform_indices = @transform_11, window_bounds = array<i64: 32, 96>}, {pipeline_mode = #tpu.pipeline_mode<synchronous>, transform_indices = @transform_12, window_bounds = array<i64: 32, 96>}, {pipeline_mode = #tpu.pipeline_mode<synchronous>, transform_indices = @transform_13, window_bounds = array<i64: 4, 96>}, {pipeline_mode = #tpu.pipeline_mode<synchronous>, transform_indices = @transform_14, window_bounds = array<i64: 3, 64>}, {transform_indices = @transform_15, window_bounds = array<i64: 1, 1, 8>}]} {
    %c0 = arith.constant 0 : index
    %c0_0 = arith.constant 0 : index
    %0 = vector.load %arg1[%c0, %c0_0] : memref<8x98xf32, #tpu.memory_space<vmem>>, vector<8x98xf32>
    %1 = vector.extract_strided_slice %0 {offsets = [0, 0], sizes = [8, 96], strides = [1, 1]} : vector<8x98xf32> to vector<8x96xf32>
    %2 = vector.extract_strided_slice %0 {offsets = [0, 1], sizes = [8, 96], strides = [1, 1]} : vector<8x98xf32> to vector<8x96xf32>
    %3 = vector.extract_strided_slice %0 {offsets = [0, 2], sizes = [8, 96], strides = [1, 1]} : vector<8x98xf32> to vector<8x96xf32>
    %c0_1 = arith.constant 0 : index
    %c0_2 = arith.constant 0 : index
    %4 = memref.load %arg2[%c0_1, %c0_2] : memref<20x21xf32, #tpu.memory_space<smem>>
    %5 = vector.broadcast %4 : f32 to vector<8x96xf32>
    %6 = arith.mulf %5, %1 : vector<8x96xf32>
    %c0_3 = arith.constant 0 : index
    %c1 = arith.constant 1 : index
    %7 = memref.load %arg2[%c0_3, %c1] : memref<20x21xf32, #tpu.memory_space<smem>>
    %8 = vector.broadcast %7 : f32 to vector<8x96xf32>
    %9 = arith.mulf %8, %2 : vector<8x96xf32>
    %10 = arith.addf %6, %9 : vector<8x96xf32>
    %c0_4 = arith.constant 0 : index
    %c2 = arith.constant 2 : index
    %11 = memref.load %arg2[%c0_4, %c2] : memref<20x21xf32, #tpu.memory_space<smem>>
    %12 = vector.broadcast %11 : f32 to vector<8x96xf32>
    %13 = arith.mulf %12, %3 : vector<8x96xf32>
    %14 = arith.addf %10, %13 : vector<8x96xf32>
    %c1_5 = arith.constant 1 : index
    %c0_6 = arith.constant 0 : index
    %15 = memref.load %arg2[%c1_5, %c0_6] : memref<20x21xf32, #tpu.memory_space<smem>>
    %16 = vector.broadcast %15 : f32 to vector<8x96xf32>
    %17 = arith.mulf %16, %1 : vector<8x96xf32>
    %c1_7 = arith.constant 1 : index
    %c1_8 = arith.constant 1 : index
    %18 = memref.load %arg2[%c1_7, %c1_8] : memref<20x21xf32, #tpu.memory_space<smem>>
    %19 = vector.broadcast %18 : f32 to vector<8x96xf32>
    %20 = arith.mulf %19, %2 : vector<8x96xf32>
    %21 = arith.addf %17, %20 : vector<8x96xf32>
    %c1_9 = arith.constant 1 : index
    %c2_10 = arith.constant 2 : index
    %22 = memref.load %arg2[%c1_9, %c2_10] : memref<20x21xf32, #tpu.memory_space<smem>>
    %23 = vector.broadcast %22 : f32 to vector<8x96xf32>
    %24 = arith.mulf %23, %3 : vector<8x96xf32>
    %25 = arith.addf %21, %24 : vector<8x96xf32>
    %c2_11 = arith.constant 2 : index
    %c0_12 = arith.constant 0 : index
    %26 = memref.load %arg2[%c2_11, %c0_12] : memref<20x21xf32, #tpu.memory_space<smem>>
    %27 = vector.broadcast %26 : f32 to vector<8x96xf32>
    %28 = arith.mulf %27, %1 : vector<8x96xf32>
    %c2_13 = arith.constant 2 : index
    %c1_14 = arith.constant 1 : index
    %29 = memref.load %arg2[%c2_13, %c1_14] : memref<20x21xf32, #tpu.memory_space<smem>>
    %30 = vector.broadcast %29 : f32 to vector<8x96xf32>
    %31 = arith.mulf %30, %2 : vector<8x96xf32>
    %32 = arith.addf %28, %31 : vector<8x96xf32>
    %c2_15 = arith.constant 2 : index
    %c2_16 = arith.constant 2 : index
    %33 = memref.load %arg2[%c2_15, %c2_16] : memref<20x21xf32, #tpu.memory_space<smem>>
    %34 = vector.broadcast %33 : f32 to vector<8x96xf32>
    %35 = arith.mulf %34, %3 : vector<8x96xf32>
    %36 = arith.addf %32, %35 : vector<8x96xf32>
    %c3 = arith.constant 3 : index
    %c0_17 = arith.constant 0 : index
    %37 = memref.load %arg2[%c3, %c0_17] : memref<20x21xf32, #tpu.memory_space<smem>>
    %38 = vector.broadcast %37 : f32 to vector<8x96xf32>
    %39 = arith.mulf %38, %1 : vector<8x96xf32>
    %c3_18 = arith.constant 3 : index
    %c1_19 = arith.constant 1 : index
    %40 = memref.load %arg2[%c3_18, %c1_19] : memref<20x21xf32, #tpu.memory_space<smem>>
    %41 = vector.broadcast %40 : f32 to vector<8x96xf32>
    %42 = arith.mulf %41, %2 : vector<8x96xf32>
    %43 = arith.addf %39, %42 : vector<8x96xf32>
    %c3_20 = arith.constant 3 : index
    %c2_21 = arith.constant 2 : index
    %44 = memref.load %arg2[%c3_20, %c2_21] : memref<20x21xf32, #tpu.memory_space<smem>>
    %45 = vector.broadcast %44 : f32 to vector<8x96xf32>
    %46 = arith.mulf %45, %3 : vector<8x96xf32>
    %47 = arith.addf %43, %46 : vector<8x96xf32>
    %c4 = arith.constant 4 : index
    %c0_22 = arith.constant 0 : index
    %48 = memref.load %arg2[%c4, %c0_22] : memref<20x21xf32, #tpu.memory_space<smem>>
    %49 = vector.broadcast %48 : f32 to vector<8x96xf32>
    %50 = arith.mulf %49, %1 : vector<8x96xf32>
    %c4_23 = arith.constant 4 : index
    %c1_24 = arith.constant 1 : index
    %51 = memref.load %arg2[%c4_23, %c1_24] : memref<20x21xf32, #tpu.memory_space<smem>>
    %52 = vector.broadcast %51 : f32 to vector<8x96xf32>
    %53 = arith.mulf %52, %2 : vector<8x96xf32>
    %54 = arith.addf %50, %53 : vector<8x96xf32>
    %c4_25 = arith.constant 4 : index
    %c2_26 = arith.constant 2 : index
    %55 = memref.load %arg2[%c4_25, %c2_26] : memref<20x21xf32, #tpu.memory_space<smem>>
    %56 = vector.broadcast %55 : f32 to vector<8x96xf32>
    %57 = arith.mulf %56, %3 : vector<8x96xf32>
    %58 = arith.addf %54, %57 : vector<8x96xf32>
    %c5 = arith.constant 5 : index
    %c0_27 = arith.constant 0 : index
    %59 = memref.load %arg2[%c5, %c0_27] : memref<20x21xf32, #tpu.memory_space<smem>>
    %60 = vector.broadcast %59 : f32 to vector<8x96xf32>
    %61 = arith.mulf %60, %1 : vector<8x96xf32>
    %c5_28 = arith.constant 5 : index
    %c1_29 = arith.constant 1 : index
    %62 = memref.load %arg2[%c5_28, %c1_29] : memref<20x21xf32, #tpu.memory_space<smem>>
    %63 = vector.broadcast %62 : f32 to vector<8x96xf32>
    %64 = arith.mulf %63, %2 : vector<8x96xf32>
    %65 = arith.addf %61, %64 : vector<8x96xf32>
    %c5_30 = arith.constant 5 : index
    %c2_31 = arith.constant 2 : index
    %66 = memref.load %arg2[%c5_30, %c2_31] : memref<20x21xf32, #tpu.memory_space<smem>>
    %67 = vector.broadcast %66 : f32 to vector<8x96xf32>
    %68 = arith.mulf %67, %3 : vector<8x96xf32>
    %69 = arith.addf %65, %68 : vector<8x96xf32>
    %70 = vector.extract_strided_slice %14 {offsets = [0, 0], sizes = [8, 94], strides = [1, 1]} : vector<8x96xf32> to vector<8x94xf32>
    %71 = vector.extract_strided_slice %14 {offsets = [0, 1], sizes = [8, 94], strides = [1, 1]} : vector<8x96xf32> to vector<8x94xf32>
    %72 = arith.maximumf %70, %71 : vector<8x94xf32>
    %73 = vector.extract_strided_slice %14 {offsets = [0, 2], sizes = [8, 94], strides = [1, 1]} : vector<8x96xf32> to vector<8x94xf32>
    %74 = arith.maximumf %72, %73 : vector<8x94xf32>
    %75 = vector.extract_strided_slice %25 {offsets = [0, 0], sizes = [8, 94], strides = [1, 1]} : vector<8x96xf32> to vector<8x94xf32>
    %76 = vector.extract_strided_slice %25 {offsets = [0, 1], sizes = [8, 94], strides = [1, 1]} : vector<8x96xf32> to vector<8x94xf32>
    %77 = arith.maximumf %75, %76 : vector<8x94xf32>
    %78 = vector.extract_strided_slice %25 {offsets = [0, 2], sizes = [8, 94], strides = [1, 1]} : vector<8x96xf32> to vector<8x94xf32>
    %79 = arith.maximumf %77, %78 : vector<8x94xf32>
    %80 = vector.extract_strided_slice %36 {offsets = [0, 0], sizes = [8, 94], strides = [1, 1]} : vector<8x96xf32> to vector<8x94xf32>
    %81 = vector.extract_strided_slice %36 {offsets = [0, 1], sizes = [8, 94], strides = [1, 1]} : vector<8x96xf32> to vector<8x94xf32>
    %82 = arith.maximumf %80, %81 : vector<8x94xf32>
    %83 = vector.extract_strided_slice %36 {offsets = [0, 2], sizes = [8, 94], strides = [1, 1]} : vector<8x96xf32> to vector<8x94xf32>
    %84 = arith.maximumf %82, %83 : vector<8x94xf32>
    %85 = vector.extract_strided_slice %47 {offsets = [0, 0], sizes = [8, 94], strides = [1, 1]} : vector<8x96xf32> to vector<8x94xf32>
    %86 = vector.extract_strided_slice %47 {offsets = [0, 1], sizes = [8, 94], strides = [1, 1]} : vector<8x96xf32> to vector<8x94xf32>
    %87 = arith.maximumf %85, %86 : vector<8x94xf32>
    %88 = vector.extract_strided_slice %47 {offsets = [0, 2], sizes = [8, 94], strides = [1, 1]} : vector<8x96xf32> to vector<8x94xf32>
    %89 = arith.maximumf %87, %88 : vector<8x94xf32>
    %90 = vector.extract_strided_slice %58 {offsets = [0, 0], sizes = [8, 94], strides = [1, 1]} : vector<8x96xf32> to vector<8x94xf32>
    %91 = vector.extract_strided_slice %58 {offsets = [0, 1], sizes = [8, 94], strides = [1, 1]} : vector<8x96xf32> to vector<8x94xf32>
    %92 = arith.maximumf %90, %91 : vector<8x94xf32>
    %93 = vector.extract_strided_slice %58 {offsets = [0, 2], sizes = [8, 94], strides = [1, 1]} : vector<8x96xf32> to vector<8x94xf32>
    %94 = arith.maximumf %92, %93 : vector<8x94xf32>
    %95 = vector.extract_strided_slice %69 {offsets = [0, 0], sizes = [8, 94], strides = [1, 1]} : vector<8x96xf32> to vector<8x94xf32>
    %96 = vector.extract_strided_slice %69 {offsets = [0, 1], sizes = [8, 94], strides = [1, 1]} : vector<8x96xf32> to vector<8x94xf32>
    %97 = arith.maximumf %95, %96 : vector<8x94xf32>
    %98 = vector.extract_strided_slice %69 {offsets = [0, 2], sizes = [8, 94], strides = [1, 1]} : vector<8x96xf32> to vector<8x94xf32>
    %99 = arith.maximumf %97, %98 : vector<8x94xf32>
    %100 = tpu.concatenate %74, %79, %84, %89, %94, %99 in 0 : vector<8x94xf32>, vector<8x94xf32>, vector<8x94xf32>, vector<8x94xf32>, vector<8x94xf32>, vector<8x94xf32> -> vector<48x94xf32>
    %c0_32 = arith.constant 0 : index
    %c0_33 = arith.constant 0 : index
    %101 = vector.load %arg3[%c0_32, %c0_33] : memref<94x32xf32, #tpu.memory_space<vmem>>, vector<94x32xf32>
    %cst = arith.constant dense<0.000000e+00> : vector<48x32xf32>
    %102 = tpu.matmul %100, %101, %cst {dimension_numbers = #tpu.dot_dimension_numbers<[1], [0], [0], [1], [0, 0, 1, 1], [], []>} : vector<48x94xf32>, vector<94x32xf32>, vector<48x32xf32> -> vector<48x32xf32>
    %103 = vector.extract_strided_slice %102 {offsets = [0, 0], sizes = [8, 32], strides = [1, 1]} : vector<48x32xf32> to vector<8x32xf32>
    %c0_34 = arith.constant 0 : index
    %c3_35 = arith.constant 3 : index
    %104 = memref.load %arg2[%c0_34, %c3_35] : memref<20x21xf32, #tpu.memory_space<smem>>
    %105 = vector.broadcast %104 : f32 to vector<8x32xf32>
    %106 = arith.addf %103, %105 : vector<8x32xf32>
    %cst_36 = arith.constant 0.000000e+00 : f32
    %107 = vector.broadcast %cst_36 : f32 to vector<8x32xf32>
    %108 = arith.cmpf ogt, %106, %107 : vector<8x32xf32>
    %cst_37 = arith.constant 1.000000e-01 : f32
    %109 = vector.broadcast %cst_37 : f32 to vector<8x32xf32>
    %110 = arith.mulf %109, %106 : vector<8x32xf32>
    %111 = arith.select %108, %106, %110 : vector<8x32xi1>, vector<8x32xf32>
    %c0_38 = arith.constant 0 : index
    %c4_39 = arith.constant 4 : index
    %112 = memref.load %arg2[%c0_38, %c4_39] : memref<20x21xf32, #tpu.memory_space<smem>>
    %113 = vector.broadcast %112 : f32 to vector<8x32xf32>
    %114 = arith.mulf %111, %113 : vector<8x32xf32>
    %c0_40 = arith.constant 0 : index
    %c5_41 = arith.constant 5 : index
    %115 = memref.load %arg2[%c0_40, %c5_41] : memref<20x21xf32, #tpu.memory_space<smem>>
    %116 = vector.broadcast %115 : f32 to vector<8x32xf32>
    %117 = arith.addf %114, %116 : vector<8x32xf32>
    %118 = vector.extract_strided_slice %102 {offsets = [8, 0], sizes = [8, 32], strides = [1, 1]} : vector<48x32xf32> to vector<8x32xf32>
    %c1_42 = arith.constant 1 : index
    %c3_43 = arith.constant 3 : index
    %119 = memref.load %arg2[%c1_42, %c3_43] : memref<20x21xf32, #tpu.memory_space<smem>>
    %120 = vector.broadcast %119 : f32 to vector<8x32xf32>
    %121 = arith.addf %118, %120 : vector<8x32xf32>
    %cst_44 = arith.constant 0.000000e+00 : f32
    %122 = vector.broadcast %cst_44 : f32 to vector<8x32xf32>
    %123 = arith.cmpf ogt, %121, %122 : vector<8x32xf32>
    %cst_45 = arith.constant 1.000000e-01 : f32
    %124 = vector.broadcast %cst_45 : f32 to vector<8x32xf32>
    %125 = arith.mulf %124, %121 : vector<8x32xf32>
    %126 = arith.select %123, %121, %125 : vector<8x32xi1>, vector<8x32xf32>
    %c1_46 = arith.constant 1 : index
    %c4_47 = arith.constant 4 : index
    %127 = memref.load %arg2[%c1_46, %c4_47] : memref<20x21xf32, #tpu.memory_space<smem>>
    %128 = vector.broadcast %127 : f32 to vector<8x32xf32>
    %129 = arith.mulf %126, %128 : vector<8x32xf32>
    %c1_48 = arith.constant 1 : index
    %c5_49 = arith.constant 5 : index
    %130 = memref.load %arg2[%c1_48, %c5_49] : memref<20x21xf32, #tpu.memory_space<smem>>
    %131 = vector.broadcast %130 : f32 to vector<8x32xf32>
    %132 = arith.addf %129, %131 : vector<8x32xf32>
    %133 = vector.extract_strided_slice %102 {offsets = [16, 0], sizes = [8, 32], strides = [1, 1]} : vector<48x32xf32> to vector<8x32xf32>
    %c2_50 = arith.constant 2 : index
    %c3_51 = arith.constant 3 : index
    %134 = memref.load %arg2[%c2_50, %c3_51] : memref<20x21xf32, #tpu.memory_space<smem>>
    %135 = vector.broadcast %134 : f32 to vector<8x32xf32>
    %136 = arith.addf %133, %135 : vector<8x32xf32>
    %cst_52 = arith.constant 0.000000e+00 : f32
    %137 = vector.broadcast %cst_52 : f32 to vector<8x32xf32>
    %138 = arith.cmpf ogt, %136, %137 : vector<8x32xf32>
    %cst_53 = arith.constant 1.000000e-01 : f32
    %139 = vector.broadcast %cst_53 : f32 to vector<8x32xf32>
    %140 = arith.mulf %139, %136 : vector<8x32xf32>
    %141 = arith.select %138, %136, %140 : vector<8x32xi1>, vector<8x32xf32>
    %c2_54 = arith.constant 2 : index
    %c4_55 = arith.constant 4 : index
    %142 = memref.load %arg2[%c2_54, %c4_55] : memref<20x21xf32, #tpu.memory_space<smem>>
    %143 = vector.broadcast %142 : f32 to vector<8x32xf32>
    %144 = arith.mulf %141, %143 : vector<8x32xf32>
    %c2_56 = arith.constant 2 : index
    %c5_57 = arith.constant 5 : index
    %145 = memref.load %arg2[%c2_56, %c5_57] : memref<20x21xf32, #tpu.memory_space<smem>>
    %146 = vector.broadcast %145 : f32 to vector<8x32xf32>
    %147 = arith.addf %144, %146 : vector<8x32xf32>
    %148 = vector.extract_strided_slice %102 {offsets = [24, 0], sizes = [8, 32], strides = [1, 1]} : vector<48x32xf32> to vector<8x32xf32>
    %c3_58 = arith.constant 3 : index
    %c3_59 = arith.constant 3 : index
    %149 = memref.load %arg2[%c3_58, %c3_59] : memref<20x21xf32, #tpu.memory_space<smem>>
    %150 = vector.broadcast %149 : f32 to vector<8x32xf32>
    %151 = arith.addf %148, %150 : vector<8x32xf32>
    %cst_60 = arith.constant 0.000000e+00 : f32
    %152 = vector.broadcast %cst_60 : f32 to vector<8x32xf32>
    %153 = arith.cmpf ogt, %151, %152 : vector<8x32xf32>
    %cst_61 = arith.constant 1.000000e-01 : f32
    %154 = vector.broadcast %cst_61 : f32 to vector<8x32xf32>
    %155 = arith.mulf %154, %151 : vector<8x32xf32>
    %156 = arith.select %153, %151, %155 : vector<8x32xi1>, vector<8x32xf32>
    %c3_62 = arith.constant 3 : index
    %c4_63 = arith.constant 4 : index
    %157 = memref.load %arg2[%c3_62, %c4_63] : memref<20x21xf32, #tpu.memory_space<smem>>
    %158 = vector.broadcast %157 : f32 to vector<8x32xf32>
    %159 = arith.mulf %156, %158 : vector<8x32xf32>
    %c3_64 = arith.constant 3 : index
    %c5_65 = arith.constant 5 : index
    %160 = memref.load %arg2[%c3_64, %c5_65] : memref<20x21xf32, #tpu.memory_space<smem>>
    %161 = vector.broadcast %160 : f32 to vector<8x32xf32>
    %162 = arith.addf %159, %161 : vector<8x32xf32>
    %163 = vector.extract_strided_slice %102 {offsets = [32, 0], sizes = [8, 32], strides = [1, 1]} : vector<48x32xf32> to vector<8x32xf32>
    %c4_66 = arith.constant 4 : index
    %c3_67 = arith.constant 3 : index
    %164 = memref.load %arg2[%c4_66, %c3_67] : memref<20x21xf32, #tpu.memory_space<smem>>
    %165 = vector.broadcast %164 : f32 to vector<8x32xf32>
    %166 = arith.addf %163, %165 : vector<8x32xf32>
    %cst_68 = arith.constant 0.000000e+00 : f32
    %167 = vector.broadcast %cst_68 : f32 to vector<8x32xf32>
    %168 = arith.cmpf ogt, %166, %167 : vector<8x32xf32>
    %cst_69 = arith.constant 1.000000e-01 : f32
    %169 = vector.broadcast %cst_69 : f32 to vector<8x32xf32>
    %170 = arith.mulf %169, %166 : vector<8x32xf32>
    %171 = arith.select %168, %166, %170 : vector<8x32xi1>, vector<8x32xf32>
    %c4_70 = arith.constant 4 : index
    %c4_71 = arith.constant 4 : index
    %172 = memref.load %arg2[%c4_70, %c4_71] : memref<20x21xf32, #tpu.memory_space<smem>>
    %173 = vector.broadcast %172 : f32 to vector<8x32xf32>
    %174 = arith.mulf %171, %173 : vector<8x32xf32>
    %c4_72 = arith.constant 4 : index
    %c5_73 = arith.constant 5 : index
    %175 = memref.load %arg2[%c4_72, %c5_73] : memref<20x21xf32, #tpu.memory_space<smem>>
    %176 = vector.broadcast %175 : f32 to vector<8x32xf32>
    %177 = arith.addf %174, %176 : vector<8x32xf32>
    %178 = vector.extract_strided_slice %102 {offsets = [40, 0], sizes = [8, 32], strides = [1, 1]} : vector<48x32xf32> to vector<8x32xf32>
    %c5_74 = arith.constant 5 : index
    %c3_75 = arith.constant 3 : index
    %179 = memref.load %arg2[%c5_74, %c3_75] : memref<20x21xf32, #tpu.memory_space<smem>>
    %180 = vector.broadcast %179 : f32 to vector<8x32xf32>
    %181 = arith.addf %178, %180 : vector<8x32xf32>
    %cst_76 = arith.constant 0.000000e+00 : f32
    %182 = vector.broadcast %cst_76 : f32 to vector<8x32xf32>
    %183 = arith.cmpf ogt, %181, %182 : vector<8x32xf32>
    %cst_77 = arith.constant 1.000000e-01 : f32
    %184 = vector.broadcast %cst_77 : f32 to vector<8x32xf32>
    %185 = arith.mulf %184, %181 : vector<8x32xf32>
    %186 = arith.select %183, %181, %185 : vector<8x32xi1>, vector<8x32xf32>
    %c5_78 = arith.constant 5 : index
    %c4_79 = arith.constant 4 : index
    %187 = memref.load %arg2[%c5_78, %c4_79] : memref<20x21xf32, #tpu.memory_space<smem>>
    %188 = vector.broadcast %187 : f32 to vector<8x32xf32>
    %189 = arith.mulf %186, %188 : vector<8x32xf32>
    %c5_80 = arith.constant 5 : index
    %c5_81 = arith.constant 5 : index
    %190 = memref.load %arg2[%c5_80, %c5_81] : memref<20x21xf32, #tpu.memory_space<smem>>
    %191 = vector.broadcast %190 : f32 to vector<8x32xf32>
    %192 = arith.addf %189, %191 : vector<8x32xf32>
    %193 = vector.extract_strided_slice %117 {offsets = [0, 0], sizes = [8, 30], strides = [1, 1]} : vector<8x32xf32> to vector<8x30xf32>
    %194 = vector.extract_strided_slice %117 {offsets = [0, 1], sizes = [8, 30], strides = [1, 1]} : vector<8x32xf32> to vector<8x30xf32>
    %195 = vector.extract_strided_slice %117 {offsets = [0, 2], sizes = [8, 30], strides = [1, 1]} : vector<8x32xf32> to vector<8x30xf32>
    %196 = vector.extract_strided_slice %132 {offsets = [0, 0], sizes = [8, 30], strides = [1, 1]} : vector<8x32xf32> to vector<8x30xf32>
    %197 = vector.extract_strided_slice %132 {offsets = [0, 1], sizes = [8, 30], strides = [1, 1]} : vector<8x32xf32> to vector<8x30xf32>
    %198 = vector.extract_strided_slice %132 {offsets = [0, 2], sizes = [8, 30], strides = [1, 1]} : vector<8x32xf32> to vector<8x30xf32>
    %199 = vector.extract_strided_slice %147 {offsets = [0, 0], sizes = [8, 30], strides = [1, 1]} : vector<8x32xf32> to vector<8x30xf32>
    %200 = vector.extract_strided_slice %147 {offsets = [0, 1], sizes = [8, 30], strides = [1, 1]} : vector<8x32xf32> to vector<8x30xf32>
    %201 = vector.extract_strided_slice %147 {offsets = [0, 2], sizes = [8, 30], strides = [1, 1]} : vector<8x32xf32> to vector<8x30xf32>
    %202 = vector.extract_strided_slice %162 {offsets = [0, 0], sizes = [8, 30], strides = [1, 1]} : vector<8x32xf32> to vector<8x30xf32>
    %203 = vector.extract_strided_slice %162 {offsets = [0, 1], sizes = [8, 30], strides = [1, 1]} : vector<8x32xf32> to vector<8x30xf32>
    %204 = vector.extract_strided_slice %162 {offsets = [0, 2], sizes = [8, 30], strides = [1, 1]} : vector<8x32xf32> to vector<8x30xf32>
    %205 = vector.extract_strided_slice %177 {offsets = [0, 0], sizes = [8, 30], strides = [1, 1]} : vector<8x32xf32> to vector<8x30xf32>
    %206 = vector.extract_strided_slice %177 {offsets = [0, 1], sizes = [8, 30], strides = [1, 1]} : vector<8x32xf32> to vector<8x30xf32>
    %207 = vector.extract_strided_slice %177 {offsets = [0, 2], sizes = [8, 30], strides = [1, 1]} : vector<8x32xf32> to vector<8x30xf32>
    %208 = vector.extract_strided_slice %192 {offsets = [0, 0], sizes = [8, 30], strides = [1, 1]} : vector<8x32xf32> to vector<8x30xf32>
    %209 = vector.extract_strided_slice %192 {offsets = [0, 1], sizes = [8, 30], strides = [1, 1]} : vector<8x32xf32> to vector<8x30xf32>
    %210 = vector.extract_strided_slice %192 {offsets = [0, 2], sizes = [8, 30], strides = [1, 1]} : vector<8x32xf32> to vector<8x30xf32>
    %c6 = arith.constant 6 : index
    %c0_82 = arith.constant 0 : index
    %211 = memref.load %arg2[%c6, %c0_82] : memref<20x21xf32, #tpu.memory_space<smem>>
    %212 = vector.broadcast %211 : f32 to vector<8x30xf32>
    %213 = arith.mulf %212, %193 : vector<8x30xf32>
    %c6_83 = arith.constant 6 : index
    %c1_84 = arith.constant 1 : index
    %214 = memref.load %arg2[%c6_83, %c1_84] : memref<20x21xf32, #tpu.memory_space<smem>>
    %215 = vector.broadcast %214 : f32 to vector<8x30xf32>
    %216 = arith.mulf %215, %194 : vector<8x30xf32>
    %217 = arith.addf %213, %216 : vector<8x30xf32>
    %c6_85 = arith.constant 6 : index
    %c2_86 = arith.constant 2 : index
    %218 = memref.load %arg2[%c6_85, %c2_86] : memref<20x21xf32, #tpu.memory_space<smem>>
    %219 = vector.broadcast %218 : f32 to vector<8x30xf32>
    %220 = arith.mulf %219, %195 : vector<8x30xf32>
    %221 = arith.addf %217, %220 : vector<8x30xf32>
    %c6_87 = arith.constant 6 : index
    %c3_88 = arith.constant 3 : index
    %222 = memref.load %arg2[%c6_87, %c3_88] : memref<20x21xf32, #tpu.memory_space<smem>>
    %223 = vector.broadcast %222 : f32 to vector<8x30xf32>
    %224 = arith.mulf %223, %196 : vector<8x30xf32>
    %225 = arith.addf %221, %224 : vector<8x30xf32>
    %c6_89 = arith.constant 6 : index
    %c4_90 = arith.constant 4 : index
    %226 = memref.load %arg2[%c6_89, %c4_90] : memref<20x21xf32, #tpu.memory_space<smem>>
    %227 = vector.broadcast %226 : f32 to vector<8x30xf32>
    %228 = arith.mulf %227, %197 : vector<8x30xf32>
    %229 = arith.addf %225, %228 : vector<8x30xf32>
    %c6_91 = arith.constant 6 : index
    %c5_92 = arith.constant 5 : index
    %230 = memref.load %arg2[%c6_91, %c5_92] : memref<20x21xf32, #tpu.memory_space<smem>>
    %231 = vector.broadcast %230 : f32 to vector<8x30xf32>
    %232 = arith.mulf %231, %198 : vector<8x30xf32>
    %233 = arith.addf %229, %232 : vector<8x30xf32>
    %c6_93 = arith.constant 6 : index
    %c6_94 = arith.constant 6 : index
    %234 = memref.load %arg2[%c6_93, %c6_94] : memref<20x21xf32, #tpu.memory_space<smem>>
    %235 = vector.broadcast %234 : f32 to vector<8x30xf32>
    %236 = arith.mulf %235, %199 : vector<8x30xf32>
    %237 = arith.addf %233, %236 : vector<8x30xf32>
    %c6_95 = arith.constant 6 : index
    %c7 = arith.constant 7 : index
    %238 = memref.load %arg2[%c6_95, %c7] : memref<20x21xf32, #tpu.memory_space<smem>>
    %239 = vector.broadcast %238 : f32 to vector<8x30xf32>
    %240 = arith.mulf %239, %200 : vector<8x30xf32>
    %241 = arith.addf %237, %240 : vector<8x30xf32>
    %c6_96 = arith.constant 6 : index
    %c8 = arith.constant 8 : index
    %242 = memref.load %arg2[%c6_96, %c8] : memref<20x21xf32, #tpu.memory_space<smem>>
    %243 = vector.broadcast %242 : f32 to vector<8x30xf32>
    %244 = arith.mulf %243, %201 : vector<8x30xf32>
    %245 = arith.addf %241, %244 : vector<8x30xf32>
    %c6_97 = arith.constant 6 : index
    %c9 = arith.constant 9 : index
    %246 = memref.load %arg2[%c6_97, %c9] : memref<20x21xf32, #tpu.memory_space<smem>>
    %247 = vector.broadcast %246 : f32 to vector<8x30xf32>
    %248 = arith.mulf %247, %202 : vector<8x30xf32>
    %249 = arith.addf %245, %248 : vector<8x30xf32>
    %c6_98 = arith.constant 6 : index
    %c10 = arith.constant 10 : index
    %250 = memref.load %arg2[%c6_98, %c10] : memref<20x21xf32, #tpu.memory_space<smem>>
    %251 = vector.broadcast %250 : f32 to vector<8x30xf32>
    %252 = arith.mulf %251, %203 : vector<8x30xf32>
    %253 = arith.addf %249, %252 : vector<8x30xf32>
    %c6_99 = arith.constant 6 : index
    %c11 = arith.constant 11 : index
    %254 = memref.load %arg2[%c6_99, %c11] : memref<20x21xf32, #tpu.memory_space<smem>>
    %255 = vector.broadcast %254 : f32 to vector<8x30xf32>
    %256 = arith.mulf %255, %204 : vector<8x30xf32>
    %257 = arith.addf %253, %256 : vector<8x30xf32>
    %c6_100 = arith.constant 6 : index
    %c12 = arith.constant 12 : index
    %258 = memref.load %arg2[%c6_100, %c12] : memref<20x21xf32, #tpu.memory_space<smem>>
    %259 = vector.broadcast %258 : f32 to vector<8x30xf32>
    %260 = arith.mulf %259, %205 : vector<8x30xf32>
    %261 = arith.addf %257, %260 : vector<8x30xf32>
    %c6_101 = arith.constant 6 : index
    %c13 = arith.constant 13 : index
    %262 = memref.load %arg2[%c6_101, %c13] : memref<20x21xf32, #tpu.memory_space<smem>>
    %263 = vector.broadcast %262 : f32 to vector<8x30xf32>
    %264 = arith.mulf %263, %206 : vector<8x30xf32>
    %265 = arith.addf %261, %264 : vector<8x30xf32>
    %c6_102 = arith.constant 6 : index
    %c14 = arith.constant 14 : index
    %266 = memref.load %arg2[%c6_102, %c14] : memref<20x21xf32, #tpu.memory_space<smem>>
    %267 = vector.broadcast %266 : f32 to vector<8x30xf32>
    %268 = arith.mulf %267, %207 : vector<8x30xf32>
    %269 = arith.addf %265, %268 : vector<8x30xf32>
    %c6_103 = arith.constant 6 : index
    %c15 = arith.constant 15 : index
    %270 = memref.load %arg2[%c6_103, %c15] : memref<20x21xf32, #tpu.memory_space<smem>>
    %271 = vector.broadcast %270 : f32 to vector<8x30xf32>
    %272 = arith.mulf %271, %208 : vector<8x30xf32>
    %273 = arith.addf %269, %272 : vector<8x30xf32>
    %c6_104 = arith.constant 6 : index
    %c16 = arith.constant 16 : index
    %274 = memref.load %arg2[%c6_104, %c16] : memref<20x21xf32, #tpu.memory_space<smem>>
    %275 = vector.broadcast %274 : f32 to vector<8x30xf32>
    %276 = arith.mulf %275, %209 : vector<8x30xf32>
    %277 = arith.addf %273, %276 : vector<8x30xf32>
    %c6_105 = arith.constant 6 : index
    %c17 = arith.constant 17 : index
    %278 = memref.load %arg2[%c6_105, %c17] : memref<20x21xf32, #tpu.memory_space<smem>>
    %279 = vector.broadcast %278 : f32 to vector<8x30xf32>
    %280 = arith.mulf %279, %210 : vector<8x30xf32>
    %281 = arith.addf %277, %280 : vector<8x30xf32>
    %c7_106 = arith.constant 7 : index
    %c0_107 = arith.constant 0 : index
    %282 = memref.load %arg2[%c7_106, %c0_107] : memref<20x21xf32, #tpu.memory_space<smem>>
    %283 = vector.broadcast %282 : f32 to vector<8x30xf32>
    %284 = arith.mulf %283, %193 : vector<8x30xf32>
    %c7_108 = arith.constant 7 : index
    %c1_109 = arith.constant 1 : index
    %285 = memref.load %arg2[%c7_108, %c1_109] : memref<20x21xf32, #tpu.memory_space<smem>>
    %286 = vector.broadcast %285 : f32 to vector<8x30xf32>
    %287 = arith.mulf %286, %194 : vector<8x30xf32>
    %288 = arith.addf %284, %287 : vector<8x30xf32>
    %c7_110 = arith.constant 7 : index
    %c2_111 = arith.constant 2 : index
    %289 = memref.load %arg2[%c7_110, %c2_111] : memref<20x21xf32, #tpu.memory_space<smem>>
    %290 = vector.broadcast %289 : f32 to vector<8x30xf32>
    %291 = arith.mulf %290, %195 : vector<8x30xf32>
    %292 = arith.addf %288, %291 : vector<8x30xf32>
    %c7_112 = arith.constant 7 : index
    %c3_113 = arith.constant 3 : index
    %293 = memref.load %arg2[%c7_112, %c3_113] : memref<20x21xf32, #tpu.memory_space<smem>>
    %294 = vector.broadcast %293 : f32 to vector<8x30xf32>
    %295 = arith.mulf %294, %196 : vector<8x30xf32>
    %296 = arith.addf %292, %295 : vector<8x30xf32>
    %c7_114 = arith.constant 7 : index
    %c4_115 = arith.constant 4 : index
    %297 = memref.load %arg2[%c7_114, %c4_115] : memref<20x21xf32, #tpu.memory_space<smem>>
    %298 = vector.broadcast %297 : f32 to vector<8x30xf32>
    %299 = arith.mulf %298, %197 : vector<8x30xf32>
    %300 = arith.addf %296, %299 : vector<8x30xf32>
    %c7_116 = arith.constant 7 : index
    %c5_117 = arith.constant 5 : index
    %301 = memref.load %arg2[%c7_116, %c5_117] : memref<20x21xf32, #tpu.memory_space<smem>>
    %302 = vector.broadcast %301 : f32 to vector<8x30xf32>
    %303 = arith.mulf %302, %198 : vector<8x30xf32>
    %304 = arith.addf %300, %303 : vector<8x30xf32>
    %c7_118 = arith.constant 7 : index
    %c6_119 = arith.constant 6 : index
    %305 = memref.load %arg2[%c7_118, %c6_119] : memref<20x21xf32, #tpu.memory_space<smem>>
    %306 = vector.broadcast %305 : f32 to vector<8x30xf32>
    %307 = arith.mulf %306, %199 : vector<8x30xf32>
    %308 = arith.addf %304, %307 : vector<8x30xf32>
    %c7_120 = arith.constant 7 : index
    %c7_121 = arith.constant 7 : index
    %309 = memref.load %arg2[%c7_120, %c7_121] : memref<20x21xf32, #tpu.memory_space<smem>>
    %310 = vector.broadcast %309 : f32 to vector<8x30xf32>
    %311 = arith.mulf %310, %200 : vector<8x30xf32>
    %312 = arith.addf %308, %311 : vector<8x30xf32>
    %c7_122 = arith.constant 7 : index
    %c8_123 = arith.constant 8 : index
    %313 = memref.load %arg2[%c7_122, %c8_123] : memref<20x21xf32, #tpu.memory_space<smem>>
    %314 = vector.broadcast %313 : f32 to vector<8x30xf32>
    %315 = arith.mulf %314, %201 : vector<8x30xf32>
    %316 = arith.addf %312, %315 : vector<8x30xf32>
    %c7_124 = arith.constant 7 : index
    %c9_125 = arith.constant 9 : index
    %317 = memref.load %arg2[%c7_124, %c9_125] : memref<20x21xf32, #tpu.memory_space<smem>>
    %318 = vector.broadcast %317 : f32 to vector<8x30xf32>
    %319 = arith.mulf %318, %202 : vector<8x30xf32>
    %320 = arith.addf %316, %319 : vector<8x30xf32>
    %c7_126 = arith.constant 7 : index
    %c10_127 = arith.constant 10 : index
    %321 = memref.load %arg2[%c7_126, %c10_127] : memref<20x21xf32, #tpu.memory_space<smem>>
    %322 = vector.broadcast %321 : f32 to vector<8x30xf32>
    %323 = arith.mulf %322, %203 : vector<8x30xf32>
    %324 = arith.addf %320, %323 : vector<8x30xf32>
    %c7_128 = arith.constant 7 : index
    %c11_129 = arith.constant 11 : index
    %325 = memref.load %arg2[%c7_128, %c11_129] : memref<20x21xf32, #tpu.memory_space<smem>>
    %326 = vector.broadcast %325 : f32 to vector<8x30xf32>
    %327 = arith.mulf %326, %204 : vector<8x30xf32>
    %328 = arith.addf %324, %327 : vector<8x30xf32>
    %c7_130 = arith.constant 7 : index
    %c12_131 = arith.constant 12 : index
    %329 = memref.load %arg2[%c7_130, %c12_131] : memref<20x21xf32, #tpu.memory_space<smem>>
    %330 = vector.broadcast %329 : f32 to vector<8x30xf32>
    %331 = arith.mulf %330, %205 : vector<8x30xf32>
    %332 = arith.addf %328, %331 : vector<8x30xf32>
    %c7_132 = arith.constant 7 : index
    %c13_133 = arith.constant 13 : index
    %333 = memref.load %arg2[%c7_132, %c13_133] : memref<20x21xf32, #tpu.memory_space<smem>>
    %334 = vector.broadcast %333 : f32 to vector<8x30xf32>
    %335 = arith.mulf %334, %206 : vector<8x30xf32>
    %336 = arith.addf %332, %335 : vector<8x30xf32>
    %c7_134 = arith.constant 7 : index
    %c14_135 = arith.constant 14 : index
    %337 = memref.load %arg2[%c7_134, %c14_135] : memref<20x21xf32, #tpu.memory_space<smem>>
    %338 = vector.broadcast %337 : f32 to vector<8x30xf32>
    %339 = arith.mulf %338, %207 : vector<8x30xf32>
    %340 = arith.addf %336, %339 : vector<8x30xf32>
    %c7_136 = arith.constant 7 : index
    %c15_137 = arith.constant 15 : index
    %341 = memref.load %arg2[%c7_136, %c15_137] : memref<20x21xf32, #tpu.memory_space<smem>>
    %342 = vector.broadcast %341 : f32 to vector<8x30xf32>
    %343 = arith.mulf %342, %208 : vector<8x30xf32>
    %344 = arith.addf %340, %343 : vector<8x30xf32>
    %c7_138 = arith.constant 7 : index
    %c16_139 = arith.constant 16 : index
    %345 = memref.load %arg2[%c7_138, %c16_139] : memref<20x21xf32, #tpu.memory_space<smem>>
    %346 = vector.broadcast %345 : f32 to vector<8x30xf32>
    %347 = arith.mulf %346, %209 : vector<8x30xf32>
    %348 = arith.addf %344, %347 : vector<8x30xf32>
    %c7_140 = arith.constant 7 : index
    %c17_141 = arith.constant 17 : index
    %349 = memref.load %arg2[%c7_140, %c17_141] : memref<20x21xf32, #tpu.memory_space<smem>>
    %350 = vector.broadcast %349 : f32 to vector<8x30xf32>
    %351 = arith.mulf %350, %210 : vector<8x30xf32>
    %352 = arith.addf %348, %351 : vector<8x30xf32>
    %c8_142 = arith.constant 8 : index
    %c0_143 = arith.constant 0 : index
    %353 = memref.load %arg2[%c8_142, %c0_143] : memref<20x21xf32, #tpu.memory_space<smem>>
    %354 = vector.broadcast %353 : f32 to vector<8x30xf32>
    %355 = arith.mulf %354, %193 : vector<8x30xf32>
    %c8_144 = arith.constant 8 : index
    %c1_145 = arith.constant 1 : index
    %356 = memref.load %arg2[%c8_144, %c1_145] : memref<20x21xf32, #tpu.memory_space<smem>>
    %357 = vector.broadcast %356 : f32 to vector<8x30xf32>
    %358 = arith.mulf %357, %194 : vector<8x30xf32>
    %359 = arith.addf %355, %358 : vector<8x30xf32>
    %c8_146 = arith.constant 8 : index
    %c2_147 = arith.constant 2 : index
    %360 = memref.load %arg2[%c8_146, %c2_147] : memref<20x21xf32, #tpu.memory_space<smem>>
    %361 = vector.broadcast %360 : f32 to vector<8x30xf32>
    %362 = arith.mulf %361, %195 : vector<8x30xf32>
    %363 = arith.addf %359, %362 : vector<8x30xf32>
    %c8_148 = arith.constant 8 : index
    %c3_149 = arith.constant 3 : index
    %364 = memref.load %arg2[%c8_148, %c3_149] : memref<20x21xf32, #tpu.memory_space<smem>>
    %365 = vector.broadcast %364 : f32 to vector<8x30xf32>
    %366 = arith.mulf %365, %196 : vector<8x30xf32>
    %367 = arith.addf %363, %366 : vector<8x30xf32>
    %c8_150 = arith.constant 8 : index
    %c4_151 = arith.constant 4 : index
    %368 = memref.load %arg2[%c8_150, %c4_151] : memref<20x21xf32, #tpu.memory_space<smem>>
    %369 = vector.broadcast %368 : f32 to vector<8x30xf32>
    %370 = arith.mulf %369, %197 : vector<8x30xf32>
    %371 = arith.addf %367, %370 : vector<8x30xf32>
    %c8_152 = arith.constant 8 : index
    %c5_153 = arith.constant 5 : index
    %372 = memref.load %arg2[%c8_152, %c5_153] : memref<20x21xf32, #tpu.memory_space<smem>>
    %373 = vector.broadcast %372 : f32 to vector<8x30xf32>
    %374 = arith.mulf %373, %198 : vector<8x30xf32>
    %375 = arith.addf %371, %374 : vector<8x30xf32>
    %c8_154 = arith.constant 8 : index
    %c6_155 = arith.constant 6 : index
    %376 = memref.load %arg2[%c8_154, %c6_155] : memref<20x21xf32, #tpu.memory_space<smem>>
    %377 = vector.broadcast %376 : f32 to vector<8x30xf32>
    %378 = arith.mulf %377, %199 : vector<8x30xf32>
    %379 = arith.addf %375, %378 : vector<8x30xf32>
    %c8_156 = arith.constant 8 : index
    %c7_157 = arith.constant 7 : index
    %380 = memref.load %arg2[%c8_156, %c7_157] : memref<20x21xf32, #tpu.memory_space<smem>>
    %381 = vector.broadcast %380 : f32 to vector<8x30xf32>
    %382 = arith.mulf %381, %200 : vector<8x30xf32>
    %383 = arith.addf %379, %382 : vector<8x30xf32>
    %c8_158 = arith.constant 8 : index
    %c8_159 = arith.constant 8 : index
    %384 = memref.load %arg2[%c8_158, %c8_159] : memref<20x21xf32, #tpu.memory_space<smem>>
    %385 = vector.broadcast %384 : f32 to vector<8x30xf32>
    %386 = arith.mulf %385, %201 : vector<8x30xf32>
    %387 = arith.addf %383, %386 : vector<8x30xf32>
    %c8_160 = arith.constant 8 : index
    %c9_161 = arith.constant 9 : index
    %388 = memref.load %arg2[%c8_160, %c9_161] : memref<20x21xf32, #tpu.memory_space<smem>>
    %389 = vector.broadcast %388 : f32 to vector<8x30xf32>
    %390 = arith.mulf %389, %202 : vector<8x30xf32>
    %391 = arith.addf %387, %390 : vector<8x30xf32>
    %c8_162 = arith.constant 8 : index
    %c10_163 = arith.constant 10 : index
    %392 = memref.load %arg2[%c8_162, %c10_163] : memref<20x21xf32, #tpu.memory_space<smem>>
    %393 = vector.broadcast %392 : f32 to vector<8x30xf32>
    %394 = arith.mulf %393, %203 : vector<8x30xf32>
    %395 = arith.addf %391, %394 : vector<8x30xf32>
    %c8_164 = arith.constant 8 : index
    %c11_165 = arith.constant 11 : index
    %396 = memref.load %arg2[%c8_164, %c11_165] : memref<20x21xf32, #tpu.memory_space<smem>>
    %397 = vector.broadcast %396 : f32 to vector<8x30xf32>
    %398 = arith.mulf %397, %204 : vector<8x30xf32>
    %399 = arith.addf %395, %398 : vector<8x30xf32>
    %c8_166 = arith.constant 8 : index
    %c12_167 = arith.constant 12 : index
    %400 = memref.load %arg2[%c8_166, %c12_167] : memref<20x21xf32, #tpu.memory_space<smem>>
    %401 = vector.broadcast %400 : f32 to vector<8x30xf32>
    %402 = arith.mulf %401, %205 : vector<8x30xf32>
    %403 = arith.addf %399, %402 : vector<8x30xf32>
    %c8_168 = arith.constant 8 : index
    %c13_169 = arith.constant 13 : index
    %404 = memref.load %arg2[%c8_168, %c13_169] : memref<20x21xf32, #tpu.memory_space<smem>>
    %405 = vector.broadcast %404 : f32 to vector<8x30xf32>
    %406 = arith.mulf %405, %206 : vector<8x30xf32>
    %407 = arith.addf %403, %406 : vector<8x30xf32>
    %c8_170 = arith.constant 8 : index
    %c14_171 = arith.constant 14 : index
    %408 = memref.load %arg2[%c8_170, %c14_171] : memref<20x21xf32, #tpu.memory_space<smem>>
    %409 = vector.broadcast %408 : f32 to vector<8x30xf32>
    %410 = arith.mulf %409, %207 : vector<8x30xf32>
    %411 = arith.addf %407, %410 : vector<8x30xf32>
    %c8_172 = arith.constant 8 : index
    %c15_173 = arith.constant 15 : index
    %412 = memref.load %arg2[%c8_172, %c15_173] : memref<20x21xf32, #tpu.memory_space<smem>>
    %413 = vector.broadcast %412 : f32 to vector<8x30xf32>
    %414 = arith.mulf %413, %208 : vector<8x30xf32>
    %415 = arith.addf %411, %414 : vector<8x30xf32>
    %c8_174 = arith.constant 8 : index
    %c16_175 = arith.constant 16 : index
    %416 = memref.load %arg2[%c8_174, %c16_175] : memref<20x21xf32, #tpu.memory_space<smem>>
    %417 = vector.broadcast %416 : f32 to vector<8x30xf32>
    %418 = arith.mulf %417, %209 : vector<8x30xf32>
    %419 = arith.addf %415, %418 : vector<8x30xf32>
    %c8_176 = arith.constant 8 : index
    %c17_177 = arith.constant 17 : index
    %420 = memref.load %arg2[%c8_176, %c17_177] : memref<20x21xf32, #tpu.memory_space<smem>>
    %421 = vector.broadcast %420 : f32 to vector<8x30xf32>
    %422 = arith.mulf %421, %210 : vector<8x30xf32>
    %423 = arith.addf %419, %422 : vector<8x30xf32>
    %c9_178 = arith.constant 9 : index
    %c0_179 = arith.constant 0 : index
    %424 = memref.load %arg2[%c9_178, %c0_179] : memref<20x21xf32, #tpu.memory_space<smem>>
    %425 = vector.broadcast %424 : f32 to vector<8x30xf32>
    %426 = arith.mulf %425, %193 : vector<8x30xf32>
    %c9_180 = arith.constant 9 : index
    %c1_181 = arith.constant 1 : index
    %427 = memref.load %arg2[%c9_180, %c1_181] : memref<20x21xf32, #tpu.memory_space<smem>>
    %428 = vector.broadcast %427 : f32 to vector<8x30xf32>
    %429 = arith.mulf %428, %194 : vector<8x30xf32>
    %430 = arith.addf %426, %429 : vector<8x30xf32>
    %c9_182 = arith.constant 9 : index
    %c2_183 = arith.constant 2 : index
    %431 = memref.load %arg2[%c9_182, %c2_183] : memref<20x21xf32, #tpu.memory_space<smem>>
    %432 = vector.broadcast %431 : f32 to vector<8x30xf32>
    %433 = arith.mulf %432, %195 : vector<8x30xf32>
    %434 = arith.addf %430, %433 : vector<8x30xf32>
    %c9_184 = arith.constant 9 : index
    %c3_185 = arith.constant 3 : index
    %435 = memref.load %arg2[%c9_184, %c3_185] : memref<20x21xf32, #tpu.memory_space<smem>>
    %436 = vector.broadcast %435 : f32 to vector<8x30xf32>
    %437 = arith.mulf %436, %196 : vector<8x30xf32>
    %438 = arith.addf %434, %437 : vector<8x30xf32>
    %c9_186 = arith.constant 9 : index
    %c4_187 = arith.constant 4 : index
    %439 = memref.load %arg2[%c9_186, %c4_187] : memref<20x21xf32, #tpu.memory_space<smem>>
    %440 = vector.broadcast %439 : f32 to vector<8x30xf32>
    %441 = arith.mulf %440, %197 : vector<8x30xf32>
    %442 = arith.addf %438, %441 : vector<8x30xf32>
    %c9_188 = arith.constant 9 : index
    %c5_189 = arith.constant 5 : index
    %443 = memref.load %arg2[%c9_188, %c5_189] : memref<20x21xf32, #tpu.memory_space<smem>>
    %444 = vector.broadcast %443 : f32 to vector<8x30xf32>
    %445 = arith.mulf %444, %198 : vector<8x30xf32>
    %446 = arith.addf %442, %445 : vector<8x30xf32>
    %c9_190 = arith.constant 9 : index
    %c6_191 = arith.constant 6 : index
    %447 = memref.load %arg2[%c9_190, %c6_191] : memref<20x21xf32, #tpu.memory_space<smem>>
    %448 = vector.broadcast %447 : f32 to vector<8x30xf32>
    %449 = arith.mulf %448, %199 : vector<8x30xf32>
    %450 = arith.addf %446, %449 : vector<8x30xf32>
    %c9_192 = arith.constant 9 : index
    %c7_193 = arith.constant 7 : index
    %451 = memref.load %arg2[%c9_192, %c7_193] : memref<20x21xf32, #tpu.memory_space<smem>>
    %452 = vector.broadcast %451 : f32 to vector<8x30xf32>
    %453 = arith.mulf %452, %200 : vector<8x30xf32>
    %454 = arith.addf %450, %453 : vector<8x30xf32>
    %c9_194 = arith.constant 9 : index
    %c8_195 = arith.constant 8 : index
    %455 = memref.load %arg2[%c9_194, %c8_195] : memref<20x21xf32, #tpu.memory_space<smem>>
    %456 = vector.broadcast %455 : f32 to vector<8x30xf32>
    %457 = arith.mulf %456, %201 : vector<8x30xf32>
    %458 = arith.addf %454, %457 : vector<8x30xf32>
    %c9_196 = arith.constant 9 : index
    %c9_197 = arith.constant 9 : index
    %459 = memref.load %arg2[%c9_196, %c9_197] : memref<20x21xf32, #tpu.memory_space<smem>>
    %460 = vector.broadcast %459 : f32 to vector<8x30xf32>
    %461 = arith.mulf %460, %202 : vector<8x30xf32>
    %462 = arith.addf %458, %461 : vector<8x30xf32>
    %c9_198 = arith.constant 9 : index
    %c10_199 = arith.constant 10 : index
    %463 = memref.load %arg2[%c9_198, %c10_199] : memref<20x21xf32, #tpu.memory_space<smem>>
    %464 = vector.broadcast %463 : f32 to vector<8x30xf32>
    %465 = arith.mulf %464, %203 : vector<8x30xf32>
    %466 = arith.addf %462, %465 : vector<8x30xf32>
    %c9_200 = arith.constant 9 : index
    %c11_201 = arith.constant 11 : index
    %467 = memref.load %arg2[%c9_200, %c11_201] : memref<20x21xf32, #tpu.memory_space<smem>>
    %468 = vector.broadcast %467 : f32 to vector<8x30xf32>
    %469 = arith.mulf %468, %204 : vector<8x30xf32>
    %470 = arith.addf %466, %469 : vector<8x30xf32>
    %c9_202 = arith.constant 9 : index
    %c12_203 = arith.constant 12 : index
    %471 = memref.load %arg2[%c9_202, %c12_203] : memref<20x21xf32, #tpu.memory_space<smem>>
    %472 = vector.broadcast %471 : f32 to vector<8x30xf32>
    %473 = arith.mulf %472, %205 : vector<8x30xf32>
    %474 = arith.addf %470, %473 : vector<8x30xf32>
    %c9_204 = arith.constant 9 : index
    %c13_205 = arith.constant 13 : index
    %475 = memref.load %arg2[%c9_204, %c13_205] : memref<20x21xf32, #tpu.memory_space<smem>>
    %476 = vector.broadcast %475 : f32 to vector<8x30xf32>
    %477 = arith.mulf %476, %206 : vector<8x30xf32>
    %478 = arith.addf %474, %477 : vector<8x30xf32>
    %c9_206 = arith.constant 9 : index
    %c14_207 = arith.constant 14 : index
    %479 = memref.load %arg2[%c9_206, %c14_207] : memref<20x21xf32, #tpu.memory_space<smem>>
    %480 = vector.broadcast %479 : f32 to vector<8x30xf32>
    %481 = arith.mulf %480, %207 : vector<8x30xf32>
    %482 = arith.addf %478, %481 : vector<8x30xf32>
    %c9_208 = arith.constant 9 : index
    %c15_209 = arith.constant 15 : index
    %483 = memref.load %arg2[%c9_208, %c15_209] : memref<20x21xf32, #tpu.memory_space<smem>>
    %484 = vector.broadcast %483 : f32 to vector<8x30xf32>
    %485 = arith.mulf %484, %208 : vector<8x30xf32>
    %486 = arith.addf %482, %485 : vector<8x30xf32>
    %c9_210 = arith.constant 9 : index
    %c16_211 = arith.constant 16 : index
    %487 = memref.load %arg2[%c9_210, %c16_211] : memref<20x21xf32, #tpu.memory_space<smem>>
    %488 = vector.broadcast %487 : f32 to vector<8x30xf32>
    %489 = arith.mulf %488, %209 : vector<8x30xf32>
    %490 = arith.addf %486, %489 : vector<8x30xf32>
    %c9_212 = arith.constant 9 : index
    %c17_213 = arith.constant 17 : index
    %491 = memref.load %arg2[%c9_212, %c17_213] : memref<20x21xf32, #tpu.memory_space<smem>>
    %492 = vector.broadcast %491 : f32 to vector<8x30xf32>
    %493 = arith.mulf %492, %210 : vector<8x30xf32>
    %494 = arith.addf %490, %493 : vector<8x30xf32>
    %c10_214 = arith.constant 10 : index
    %c0_215 = arith.constant 0 : index
    %495 = memref.load %arg2[%c10_214, %c0_215] : memref<20x21xf32, #tpu.memory_space<smem>>
    %496 = vector.broadcast %495 : f32 to vector<8x30xf32>
    %497 = arith.mulf %496, %193 : vector<8x30xf32>
    %c10_216 = arith.constant 10 : index
    %c1_217 = arith.constant 1 : index
    %498 = memref.load %arg2[%c10_216, %c1_217] : memref<20x21xf32, #tpu.memory_space<smem>>
    %499 = vector.broadcast %498 : f32 to vector<8x30xf32>
    %500 = arith.mulf %499, %194 : vector<8x30xf32>
    %501 = arith.addf %497, %500 : vector<8x30xf32>
    %c10_218 = arith.constant 10 : index
    %c2_219 = arith.constant 2 : index
    %502 = memref.load %arg2[%c10_218, %c2_219] : memref<20x21xf32, #tpu.memory_space<smem>>
    %503 = vector.broadcast %502 : f32 to vector<8x30xf32>
    %504 = arith.mulf %503, %195 : vector<8x30xf32>
    %505 = arith.addf %501, %504 : vector<8x30xf32>
    %c10_220 = arith.constant 10 : index
    %c3_221 = arith.constant 3 : index
    %506 = memref.load %arg2[%c10_220, %c3_221] : memref<20x21xf32, #tpu.memory_space<smem>>
    %507 = vector.broadcast %506 : f32 to vector<8x30xf32>
    %508 = arith.mulf %507, %196 : vector<8x30xf32>
    %509 = arith.addf %505, %508 : vector<8x30xf32>
    %c10_222 = arith.constant 10 : index
    %c4_223 = arith.constant 4 : index
    %510 = memref.load %arg2[%c10_222, %c4_223] : memref<20x21xf32, #tpu.memory_space<smem>>
    %511 = vector.broadcast %510 : f32 to vector<8x30xf32>
    %512 = arith.mulf %511, %197 : vector<8x30xf32>
    %513 = arith.addf %509, %512 : vector<8x30xf32>
    %c10_224 = arith.constant 10 : index
    %c5_225 = arith.constant 5 : index
    %514 = memref.load %arg2[%c10_224, %c5_225] : memref<20x21xf32, #tpu.memory_space<smem>>
    %515 = vector.broadcast %514 : f32 to vector<8x30xf32>
    %516 = arith.mulf %515, %198 : vector<8x30xf32>
    %517 = arith.addf %513, %516 : vector<8x30xf32>
    %c10_226 = arith.constant 10 : index
    %c6_227 = arith.constant 6 : index
    %518 = memref.load %arg2[%c10_226, %c6_227] : memref<20x21xf32, #tpu.memory_space<smem>>
    %519 = vector.broadcast %518 : f32 to vector<8x30xf32>
    %520 = arith.mulf %519, %199 : vector<8x30xf32>
    %521 = arith.addf %517, %520 : vector<8x30xf32>
    %c10_228 = arith.constant 10 : index
    %c7_229 = arith.constant 7 : index
    %522 = memref.load %arg2[%c10_228, %c7_229] : memref<20x21xf32, #tpu.memory_space<smem>>
    %523 = vector.broadcast %522 : f32 to vector<8x30xf32>
    %524 = arith.mulf %523, %200 : vector<8x30xf32>
    %525 = arith.addf %521, %524 : vector<8x30xf32>
    %c10_230 = arith.constant 10 : index
    %c8_231 = arith.constant 8 : index
    %526 = memref.load %arg2[%c10_230, %c8_231] : memref<20x21xf32, #tpu.memory_space<smem>>
    %527 = vector.broadcast %526 : f32 to vector<8x30xf32>
    %528 = arith.mulf %527, %201 : vector<8x30xf32>
    %529 = arith.addf %525, %528 : vector<8x30xf32>
    %c10_232 = arith.constant 10 : index
    %c9_233 = arith.constant 9 : index
    %530 = memref.load %arg2[%c10_232, %c9_233] : memref<20x21xf32, #tpu.memory_space<smem>>
    %531 = vector.broadcast %530 : f32 to vector<8x30xf32>
    %532 = arith.mulf %531, %202 : vector<8x30xf32>
    %533 = arith.addf %529, %532 : vector<8x30xf32>
    %c10_234 = arith.constant 10 : index
    %c10_235 = arith.constant 10 : index
    %534 = memref.load %arg2[%c10_234, %c10_235] : memref<20x21xf32, #tpu.memory_space<smem>>
    %535 = vector.broadcast %534 : f32 to vector<8x30xf32>
    %536 = arith.mulf %535, %203 : vector<8x30xf32>
    %537 = arith.addf %533, %536 : vector<8x30xf32>
    %c10_236 = arith.constant 10 : index
    %c11_237 = arith.constant 11 : index
    %538 = memref.load %arg2[%c10_236, %c11_237] : memref<20x21xf32, #tpu.memory_space<smem>>
    %539 = vector.broadcast %538 : f32 to vector<8x30xf32>
    %540 = arith.mulf %539, %204 : vector<8x30xf32>
    %541 = arith.addf %537, %540 : vector<8x30xf32>
    %c10_238 = arith.constant 10 : index
    %c12_239 = arith.constant 12 : index
    %542 = memref.load %arg2[%c10_238, %c12_239] : memref<20x21xf32, #tpu.memory_space<smem>>
    %543 = vector.broadcast %542 : f32 to vector<8x30xf32>
    %544 = arith.mulf %543, %205 : vector<8x30xf32>
    %545 = arith.addf %541, %544 : vector<8x30xf32>
    %c10_240 = arith.constant 10 : index
    %c13_241 = arith.constant 13 : index
    %546 = memref.load %arg2[%c10_240, %c13_241] : memref<20x21xf32, #tpu.memory_space<smem>>
    %547 = vector.broadcast %546 : f32 to vector<8x30xf32>
    %548 = arith.mulf %547, %206 : vector<8x30xf32>
    %549 = arith.addf %545, %548 : vector<8x30xf32>
    %c10_242 = arith.constant 10 : index
    %c14_243 = arith.constant 14 : index
    %550 = memref.load %arg2[%c10_242, %c14_243] : memref<20x21xf32, #tpu.memory_space<smem>>
    %551 = vector.broadcast %550 : f32 to vector<8x30xf32>
    %552 = arith.mulf %551, %207 : vector<8x30xf32>
    %553 = arith.addf %549, %552 : vector<8x30xf32>
    %c10_244 = arith.constant 10 : index
    %c15_245 = arith.constant 15 : index
    %554 = memref.load %arg2[%c10_244, %c15_245] : memref<20x21xf32, #tpu.memory_space<smem>>
    %555 = vector.broadcast %554 : f32 to vector<8x30xf32>
    %556 = arith.mulf %555, %208 : vector<8x30xf32>
    %557 = arith.addf %553, %556 : vector<8x30xf32>
    %c10_246 = arith.constant 10 : index
    %c16_247 = arith.constant 16 : index
    %558 = memref.load %arg2[%c10_246, %c16_247] : memref<20x21xf32, #tpu.memory_space<smem>>
    %559 = vector.broadcast %558 : f32 to vector<8x30xf32>
    %560 = arith.mulf %559, %209 : vector<8x30xf32>
    %561 = arith.addf %557, %560 : vector<8x30xf32>
    %c10_248 = arith.constant 10 : index
    %c17_249 = arith.constant 17 : index
    %562 = memref.load %arg2[%c10_248, %c17_249] : memref<20x21xf32, #tpu.memory_space<smem>>
    %563 = vector.broadcast %562 : f32 to vector<8x30xf32>
    %564 = arith.mulf %563, %210 : vector<8x30xf32>
    %565 = arith.addf %561, %564 : vector<8x30xf32>
    %566 = vector.extract_strided_slice %281 {offsets = [0, 0], sizes = [8, 28], strides = [1, 1]} : vector<8x30xf32> to vector<8x28xf32>
    %567 = vector.extract_strided_slice %281 {offsets = [0, 1], sizes = [8, 28], strides = [1, 1]} : vector<8x30xf32> to vector<8x28xf32>
    %568 = arith.maximumf %566, %567 : vector<8x28xf32>
    %569 = vector.extract_strided_slice %281 {offsets = [0, 2], sizes = [8, 28], strides = [1, 1]} : vector<8x30xf32> to vector<8x28xf32>
    %570 = arith.maximumf %568, %569 : vector<8x28xf32>
    %571 = vector.extract_strided_slice %352 {offsets = [0, 0], sizes = [8, 28], strides = [1, 1]} : vector<8x30xf32> to vector<8x28xf32>
    %572 = vector.extract_strided_slice %352 {offsets = [0, 1], sizes = [8, 28], strides = [1, 1]} : vector<8x30xf32> to vector<8x28xf32>
    %573 = arith.maximumf %571, %572 : vector<8x28xf32>
    %574 = vector.extract_strided_slice %352 {offsets = [0, 2], sizes = [8, 28], strides = [1, 1]} : vector<8x30xf32> to vector<8x28xf32>
    %575 = arith.maximumf %573, %574 : vector<8x28xf32>
    %576 = vector.extract_strided_slice %423 {offsets = [0, 0], sizes = [8, 28], strides = [1, 1]} : vector<8x30xf32> to vector<8x28xf32>
    %577 = vector.extract_strided_slice %423 {offsets = [0, 1], sizes = [8, 28], strides = [1, 1]} : vector<8x30xf32> to vector<8x28xf32>
    %578 = arith.maximumf %576, %577 : vector<8x28xf32>
    %579 = vector.extract_strided_slice %423 {offsets = [0, 2], sizes = [8, 28], strides = [1, 1]} : vector<8x30xf32> to vector<8x28xf32>
    %580 = arith.maximumf %578, %579 : vector<8x28xf32>
    %581 = vector.extract_strided_slice %494 {offsets = [0, 0], sizes = [8, 28], strides = [1, 1]} : vector<8x30xf32> to vector<8x28xf32>
    %582 = vector.extract_strided_slice %494 {offsets = [0, 1], sizes = [8, 28], strides = [1, 1]} : vector<8x30xf32> to vector<8x28xf32>
    %583 = arith.maximumf %581, %582 : vector<8x28xf32>
    %584 = vector.extract_strided_slice %494 {offsets = [0, 2], sizes = [8, 28], strides = [1, 1]} : vector<8x30xf32> to vector<8x28xf32>
    %585 = arith.maximumf %583, %584 : vector<8x28xf32>
    %586 = vector.extract_strided_slice %565 {offsets = [0, 0], sizes = [8, 28], strides = [1, 1]} : vector<8x30xf32> to vector<8x28xf32>
    %587 = vector.extract_strided_slice %565 {offsets = [0, 1], sizes = [8, 28], strides = [1, 1]} : vector<8x30xf32> to vector<8x28xf32>
    %588 = arith.maximumf %586, %587 : vector<8x28xf32>
    %589 = vector.extract_strided_slice %565 {offsets = [0, 2], sizes = [8, 28], strides = [1, 1]} : vector<8x30xf32> to vector<8x28xf32>
    %590 = arith.maximumf %588, %589 : vector<8x28xf32>
    %591 = tpu.concatenate %570, %575, %580, %585, %590 in 0 : vector<8x28xf32>, vector<8x28xf32>, vector<8x28xf32>, vector<8x28xf32>, vector<8x28xf32> -> vector<40x28xf32>
    %c0_250 = arith.constant 0 : index
    %c0_251 = arith.constant 0 : index
    %592 = vector.load %arg4[%c0_250, %c0_251] : memref<28x10xf32, #tpu.memory_space<vmem>>, vector<28x10xf32>
    %cst_252 = arith.constant dense<0.000000e+00> : vector<40x10xf32>
    %593 = tpu.matmul %591, %592, %cst_252 {dimension_numbers = #tpu.dot_dimension_numbers<[1], [0], [0], [1], [0, 0, 1, 1], [], []>} : vector<40x28xf32>, vector<28x10xf32>, vector<40x10xf32> -> vector<40x10xf32>
    %594 = vector.extract_strided_slice %593 {offsets = [0, 0], sizes = [8, 10], strides = [1, 1]} : vector<40x10xf32> to vector<8x10xf32>
    %c6_253 = arith.constant 6 : index
    %c18 = arith.constant 18 : index
    %595 = memref.load %arg2[%c6_253, %c18] : memref<20x21xf32, #tpu.memory_space<smem>>
    %596 = vector.broadcast %595 : f32 to vector<8x10xf32>
    %597 = arith.addf %594, %596 : vector<8x10xf32>
    %cst_254 = arith.constant 0.000000e+00 : f32
    %598 = vector.broadcast %cst_254 : f32 to vector<8x10xf32>
    %599 = arith.cmpf ogt, %597, %598 : vector<8x10xf32>
    %cst_255 = arith.constant 1.000000e-01 : f32
    %600 = vector.broadcast %cst_255 : f32 to vector<8x10xf32>
    %601 = arith.mulf %600, %597 : vector<8x10xf32>
    %602 = arith.select %599, %597, %601 : vector<8x10xi1>, vector<8x10xf32>
    %c6_256 = arith.constant 6 : index
    %c19 = arith.constant 19 : index
    %603 = memref.load %arg2[%c6_256, %c19] : memref<20x21xf32, #tpu.memory_space<smem>>
    %604 = vector.broadcast %603 : f32 to vector<8x10xf32>
    %605 = arith.mulf %602, %604 : vector<8x10xf32>
    %c6_257 = arith.constant 6 : index
    %c20 = arith.constant 20 : index
    %606 = memref.load %arg2[%c6_257, %c20] : memref<20x21xf32, #tpu.memory_space<smem>>
    %607 = vector.broadcast %606 : f32 to vector<8x10xf32>
    %608 = arith.addf %605, %607 : vector<8x10xf32>
    %609 = vector.extract_strided_slice %593 {offsets = [8, 0], sizes = [8, 10], strides = [1, 1]} : vector<40x10xf32> to vector<8x10xf32>
    %c7_258 = arith.constant 7 : index
    %c18_259 = arith.constant 18 : index
    %610 = memref.load %arg2[%c7_258, %c18_259] : memref<20x21xf32, #tpu.memory_space<smem>>
    %611 = vector.broadcast %610 : f32 to vector<8x10xf32>
    %612 = arith.addf %609, %611 : vector<8x10xf32>
    %cst_260 = arith.constant 0.000000e+00 : f32
    %613 = vector.broadcast %cst_260 : f32 to vector<8x10xf32>
    %614 = arith.cmpf ogt, %612, %613 : vector<8x10xf32>
    %cst_261 = arith.constant 1.000000e-01 : f32
    %615 = vector.broadcast %cst_261 : f32 to vector<8x10xf32>
    %616 = arith.mulf %615, %612 : vector<8x10xf32>
    %617 = arith.select %614, %612, %616 : vector<8x10xi1>, vector<8x10xf32>
    %c7_262 = arith.constant 7 : index
    %c19_263 = arith.constant 19 : index
    %618 = memref.load %arg2[%c7_262, %c19_263] : memref<20x21xf32, #tpu.memory_space<smem>>
    %619 = vector.broadcast %618 : f32 to vector<8x10xf32>
    %620 = arith.mulf %617, %619 : vector<8x10xf32>
    %c7_264 = arith.constant 7 : index
    %c20_265 = arith.constant 20 : index
    %621 = memref.load %arg2[%c7_264, %c20_265] : memref<20x21xf32, #tpu.memory_space<smem>>
    %622 = vector.broadcast %621 : f32 to vector<8x10xf32>
    %623 = arith.addf %620, %622 : vector<8x10xf32>
    %624 = vector.extract_strided_slice %593 {offsets = [16, 0], sizes = [8, 10], strides = [1, 1]} : vector<40x10xf32> to vector<8x10xf32>
    %c8_266 = arith.constant 8 : index
    %c18_267 = arith.constant 18 : index
    %625 = memref.load %arg2[%c8_266, %c18_267] : memref<20x21xf32, #tpu.memory_space<smem>>
    %626 = vector.broadcast %625 : f32 to vector<8x10xf32>
    %627 = arith.addf %624, %626 : vector<8x10xf32>
    %cst_268 = arith.constant 0.000000e+00 : f32
    %628 = vector.broadcast %cst_268 : f32 to vector<8x10xf32>
    %629 = arith.cmpf ogt, %627, %628 : vector<8x10xf32>
    %cst_269 = arith.constant 1.000000e-01 : f32
    %630 = vector.broadcast %cst_269 : f32 to vector<8x10xf32>
    %631 = arith.mulf %630, %627 : vector<8x10xf32>
    %632 = arith.select %629, %627, %631 : vector<8x10xi1>, vector<8x10xf32>
    %c8_270 = arith.constant 8 : index
    %c19_271 = arith.constant 19 : index
    %633 = memref.load %arg2[%c8_270, %c19_271] : memref<20x21xf32, #tpu.memory_space<smem>>
    %634 = vector.broadcast %633 : f32 to vector<8x10xf32>
    %635 = arith.mulf %632, %634 : vector<8x10xf32>
    %c8_272 = arith.constant 8 : index
    %c20_273 = arith.constant 20 : index
    %636 = memref.load %arg2[%c8_272, %c20_273] : memref<20x21xf32, #tpu.memory_space<smem>>
    %637 = vector.broadcast %636 : f32 to vector<8x10xf32>
    %638 = arith.addf %635, %637 : vector<8x10xf32>
    %639 = vector.extract_strided_slice %593 {offsets = [24, 0], sizes = [8, 10], strides = [1, 1]} : vector<40x10xf32> to vector<8x10xf32>
    %c9_274 = arith.constant 9 : index
    %c18_275 = arith.constant 18 : index
    %640 = memref.load %arg2[%c9_274, %c18_275] : memref<20x21xf32, #tpu.memory_space<smem>>
    %641 = vector.broadcast %640 : f32 to vector<8x10xf32>
    %642 = arith.addf %639, %641 : vector<8x10xf32>
    %cst_276 = arith.constant 0.000000e+00 : f32
    %643 = vector.broadcast %cst_276 : f32 to vector<8x10xf32>
    %644 = arith.cmpf ogt, %642, %643 : vector<8x10xf32>
    %cst_277 = arith.constant 1.000000e-01 : f32
    %645 = vector.broadcast %cst_277 : f32 to vector<8x10xf32>
    %646 = arith.mulf %645, %642 : vector<8x10xf32>
    %647 = arith.select %644, %642, %646 : vector<8x10xi1>, vector<8x10xf32>
    %c9_278 = arith.constant 9 : index
    %c19_279 = arith.constant 19 : index
    %648 = memref.load %arg2[%c9_278, %c19_279] : memref<20x21xf32, #tpu.memory_space<smem>>
    %649 = vector.broadcast %648 : f32 to vector<8x10xf32>
    %650 = arith.mulf %647, %649 : vector<8x10xf32>
    %c9_280 = arith.constant 9 : index
    %c20_281 = arith.constant 20 : index
    %651 = memref.load %arg2[%c9_280, %c20_281] : memref<20x21xf32, #tpu.memory_space<smem>>
    %652 = vector.broadcast %651 : f32 to vector<8x10xf32>
    %653 = arith.addf %650, %652 : vector<8x10xf32>
    %654 = vector.extract_strided_slice %593 {offsets = [32, 0], sizes = [8, 10], strides = [1, 1]} : vector<40x10xf32> to vector<8x10xf32>
    %c10_282 = arith.constant 10 : index
    %c18_283 = arith.constant 18 : index
    %655 = memref.load %arg2[%c10_282, %c18_283] : memref<20x21xf32, #tpu.memory_space<smem>>
    %656 = vector.broadcast %655 : f32 to vector<8x10xf32>
    %657 = arith.addf %654, %656 : vector<8x10xf32>
    %cst_284 = arith.constant 0.000000e+00 : f32
    %658 = vector.broadcast %cst_284 : f32 to vector<8x10xf32>
    %659 = arith.cmpf ogt, %657, %658 : vector<8x10xf32>
    %cst_285 = arith.constant 1.000000e-01 : f32
    %660 = vector.broadcast %cst_285 : f32 to vector<8x10xf32>
    %661 = arith.mulf %660, %657 : vector<8x10xf32>
    %662 = arith.select %659, %657, %661 : vector<8x10xi1>, vector<8x10xf32>
    %c10_286 = arith.constant 10 : index
    %c19_287 = arith.constant 19 : index
    %663 = memref.load %arg2[%c10_286, %c19_287] : memref<20x21xf32, #tpu.memory_space<smem>>
    %664 = vector.broadcast %663 : f32 to vector<8x10xf32>
    %665 = arith.mulf %662, %664 : vector<8x10xf32>
    %c10_288 = arith.constant 10 : index
    %c20_289 = arith.constant 20 : index
    %666 = memref.load %arg2[%c10_288, %c20_289] : memref<20x21xf32, #tpu.memory_space<smem>>
    %667 = vector.broadcast %666 : f32 to vector<8x10xf32>
    %668 = arith.addf %665, %667 : vector<8x10xf32>
    %669 = vector.extract_strided_slice %608 {offsets = [0, 0], sizes = [8, 8], strides = [1, 1]} : vector<8x10xf32> to vector<8x8xf32>
    %670 = vector.extract_strided_slice %608 {offsets = [0, 1], sizes = [8, 8], strides = [1, 1]} : vector<8x10xf32> to vector<8x8xf32>
    %671 = vector.extract_strided_slice %608 {offsets = [0, 2], sizes = [8, 8], strides = [1, 1]} : vector<8x10xf32> to vector<8x8xf32>
    %672 = vector.extract_strided_slice %623 {offsets = [0, 0], sizes = [8, 8], strides = [1, 1]} : vector<8x10xf32> to vector<8x8xf32>
    %673 = vector.extract_strided_slice %623 {offsets = [0, 1], sizes = [8, 8], strides = [1, 1]} : vector<8x10xf32> to vector<8x8xf32>
    %674 = vector.extract_strided_slice %623 {offsets = [0, 2], sizes = [8, 8], strides = [1, 1]} : vector<8x10xf32> to vector<8x8xf32>
    %675 = vector.extract_strided_slice %638 {offsets = [0, 0], sizes = [8, 8], strides = [1, 1]} : vector<8x10xf32> to vector<8x8xf32>
    %676 = vector.extract_strided_slice %638 {offsets = [0, 1], sizes = [8, 8], strides = [1, 1]} : vector<8x10xf32> to vector<8x8xf32>
    %677 = vector.extract_strided_slice %638 {offsets = [0, 2], sizes = [8, 8], strides = [1, 1]} : vector<8x10xf32> to vector<8x8xf32>
    %678 = vector.extract_strided_slice %653 {offsets = [0, 0], sizes = [8, 8], strides = [1, 1]} : vector<8x10xf32> to vector<8x8xf32>
    %679 = vector.extract_strided_slice %653 {offsets = [0, 1], sizes = [8, 8], strides = [1, 1]} : vector<8x10xf32> to vector<8x8xf32>
    %680 = vector.extract_strided_slice %653 {offsets = [0, 2], sizes = [8, 8], strides = [1, 1]} : vector<8x10xf32> to vector<8x8xf32>
    %681 = vector.extract_strided_slice %668 {offsets = [0, 0], sizes = [8, 8], strides = [1, 1]} : vector<8x10xf32> to vector<8x8xf32>
    %682 = vector.extract_strided_slice %668 {offsets = [0, 1], sizes = [8, 8], strides = [1, 1]} : vector<8x10xf32> to vector<8x8xf32>
    %683 = vector.extract_strided_slice %668 {offsets = [0, 2], sizes = [8, 8], strides = [1, 1]} : vector<8x10xf32> to vector<8x8xf32>
    %c11_290 = arith.constant 11 : index
    %c0_291 = arith.constant 0 : index
    %684 = memref.load %arg2[%c11_290, %c0_291] : memref<20x21xf32, #tpu.memory_space<smem>>
    %685 = vector.broadcast %684 : f32 to vector<8x8xf32>
    %686 = arith.mulf %685, %669 : vector<8x8xf32>
    %c11_292 = arith.constant 11 : index
    %c1_293 = arith.constant 1 : index
    %687 = memref.load %arg2[%c11_292, %c1_293] : memref<20x21xf32, #tpu.memory_space<smem>>
    %688 = vector.broadcast %687 : f32 to vector<8x8xf32>
    %689 = arith.mulf %688, %670 : vector<8x8xf32>
    %690 = arith.addf %686, %689 : vector<8x8xf32>
    %c11_294 = arith.constant 11 : index
    %c2_295 = arith.constant 2 : index
    %691 = memref.load %arg2[%c11_294, %c2_295] : memref<20x21xf32, #tpu.memory_space<smem>>
    %692 = vector.broadcast %691 : f32 to vector<8x8xf32>
    %693 = arith.mulf %692, %671 : vector<8x8xf32>
    %694 = arith.addf %690, %693 : vector<8x8xf32>
    %c11_296 = arith.constant 11 : index
    %c3_297 = arith.constant 3 : index
    %695 = memref.load %arg2[%c11_296, %c3_297] : memref<20x21xf32, #tpu.memory_space<smem>>
    %696 = vector.broadcast %695 : f32 to vector<8x8xf32>
    %697 = arith.mulf %696, %672 : vector<8x8xf32>
    %698 = arith.addf %694, %697 : vector<8x8xf32>
    %c11_298 = arith.constant 11 : index
    %c4_299 = arith.constant 4 : index
    %699 = memref.load %arg2[%c11_298, %c4_299] : memref<20x21xf32, #tpu.memory_space<smem>>
    %700 = vector.broadcast %699 : f32 to vector<8x8xf32>
    %701 = arith.mulf %700, %673 : vector<8x8xf32>
    %702 = arith.addf %698, %701 : vector<8x8xf32>
    %c11_300 = arith.constant 11 : index
    %c5_301 = arith.constant 5 : index
    %703 = memref.load %arg2[%c11_300, %c5_301] : memref<20x21xf32, #tpu.memory_space<smem>>
    %704 = vector.broadcast %703 : f32 to vector<8x8xf32>
    %705 = arith.mulf %704, %674 : vector<8x8xf32>
    %706 = arith.addf %702, %705 : vector<8x8xf32>
    %c11_302 = arith.constant 11 : index
    %c6_303 = arith.constant 6 : index
    %707 = memref.load %arg2[%c11_302, %c6_303] : memref<20x21xf32, #tpu.memory_space<smem>>
    %708 = vector.broadcast %707 : f32 to vector<8x8xf32>
    %709 = arith.mulf %708, %675 : vector<8x8xf32>
    %710 = arith.addf %706, %709 : vector<8x8xf32>
    %c11_304 = arith.constant 11 : index
    %c7_305 = arith.constant 7 : index
    %711 = memref.load %arg2[%c11_304, %c7_305] : memref<20x21xf32, #tpu.memory_space<smem>>
    %712 = vector.broadcast %711 : f32 to vector<8x8xf32>
    %713 = arith.mulf %712, %676 : vector<8x8xf32>
    %714 = arith.addf %710, %713 : vector<8x8xf32>
    %c11_306 = arith.constant 11 : index
    %c8_307 = arith.constant 8 : index
    %715 = memref.load %arg2[%c11_306, %c8_307] : memref<20x21xf32, #tpu.memory_space<smem>>
    %716 = vector.broadcast %715 : f32 to vector<8x8xf32>
    %717 = arith.mulf %716, %677 : vector<8x8xf32>
    %718 = arith.addf %714, %717 : vector<8x8xf32>
    %c11_308 = arith.constant 11 : index
    %c9_309 = arith.constant 9 : index
    %719 = memref.load %arg2[%c11_308, %c9_309] : memref<20x21xf32, #tpu.memory_space<smem>>
    %720 = vector.broadcast %719 : f32 to vector<8x8xf32>
    %721 = arith.mulf %720, %678 : vector<8x8xf32>
    %722 = arith.addf %718, %721 : vector<8x8xf32>
    %c11_310 = arith.constant 11 : index
    %c10_311 = arith.constant 10 : index
    %723 = memref.load %arg2[%c11_310, %c10_311] : memref<20x21xf32, #tpu.memory_space<smem>>
    %724 = vector.broadcast %723 : f32 to vector<8x8xf32>
    %725 = arith.mulf %724, %679 : vector<8x8xf32>
    %726 = arith.addf %722, %725 : vector<8x8xf32>
    %c11_312 = arith.constant 11 : index
    %c11_313 = arith.constant 11 : index
    %727 = memref.load %arg2[%c11_312, %c11_313] : memref<20x21xf32, #tpu.memory_space<smem>>
    %728 = vector.broadcast %727 : f32 to vector<8x8xf32>
    %729 = arith.mulf %728, %680 : vector<8x8xf32>
    %730 = arith.addf %726, %729 : vector<8x8xf32>
    %c11_314 = arith.constant 11 : index
    %c12_315 = arith.constant 12 : index
    %731 = memref.load %arg2[%c11_314, %c12_315] : memref<20x21xf32, #tpu.memory_space<smem>>
    %732 = vector.broadcast %731 : f32 to vector<8x8xf32>
    %733 = arith.mulf %732, %681 : vector<8x8xf32>
    %734 = arith.addf %730, %733 : vector<8x8xf32>
    %c11_316 = arith.constant 11 : index
    %c13_317 = arith.constant 13 : index
    %735 = memref.load %arg2[%c11_316, %c13_317] : memref<20x21xf32, #tpu.memory_space<smem>>
    %736 = vector.broadcast %735 : f32 to vector<8x8xf32>
    %737 = arith.mulf %736, %682 : vector<8x8xf32>
    %738 = arith.addf %734, %737 : vector<8x8xf32>
    %c11_318 = arith.constant 11 : index
    %c14_319 = arith.constant 14 : index
    %739 = memref.load %arg2[%c11_318, %c14_319] : memref<20x21xf32, #tpu.memory_space<smem>>
    %740 = vector.broadcast %739 : f32 to vector<8x8xf32>
    %741 = arith.mulf %740, %683 : vector<8x8xf32>
    %742 = arith.addf %738, %741 : vector<8x8xf32>
    %c12_320 = arith.constant 12 : index
    %c0_321 = arith.constant 0 : index
    %743 = memref.load %arg2[%c12_320, %c0_321] : memref<20x21xf32, #tpu.memory_space<smem>>
    %744 = vector.broadcast %743 : f32 to vector<8x8xf32>
    %745 = arith.mulf %744, %669 : vector<8x8xf32>
    %c12_322 = arith.constant 12 : index
    %c1_323 = arith.constant 1 : index
    %746 = memref.load %arg2[%c12_322, %c1_323] : memref<20x21xf32, #tpu.memory_space<smem>>
    %747 = vector.broadcast %746 : f32 to vector<8x8xf32>
    %748 = arith.mulf %747, %670 : vector<8x8xf32>
    %749 = arith.addf %745, %748 : vector<8x8xf32>
    %c12_324 = arith.constant 12 : index
    %c2_325 = arith.constant 2 : index
    %750 = memref.load %arg2[%c12_324, %c2_325] : memref<20x21xf32, #tpu.memory_space<smem>>
    %751 = vector.broadcast %750 : f32 to vector<8x8xf32>
    %752 = arith.mulf %751, %671 : vector<8x8xf32>
    %753 = arith.addf %749, %752 : vector<8x8xf32>
    %c12_326 = arith.constant 12 : index
    %c3_327 = arith.constant 3 : index
    %754 = memref.load %arg2[%c12_326, %c3_327] : memref<20x21xf32, #tpu.memory_space<smem>>
    %755 = vector.broadcast %754 : f32 to vector<8x8xf32>
    %756 = arith.mulf %755, %672 : vector<8x8xf32>
    %757 = arith.addf %753, %756 : vector<8x8xf32>
    %c12_328 = arith.constant 12 : index
    %c4_329 = arith.constant 4 : index
    %758 = memref.load %arg2[%c12_328, %c4_329] : memref<20x21xf32, #tpu.memory_space<smem>>
    %759 = vector.broadcast %758 : f32 to vector<8x8xf32>
    %760 = arith.mulf %759, %673 : vector<8x8xf32>
    %761 = arith.addf %757, %760 : vector<8x8xf32>
    %c12_330 = arith.constant 12 : index
    %c5_331 = arith.constant 5 : index
    %762 = memref.load %arg2[%c12_330, %c5_331] : memref<20x21xf32, #tpu.memory_space<smem>>
    %763 = vector.broadcast %762 : f32 to vector<8x8xf32>
    %764 = arith.mulf %763, %674 : vector<8x8xf32>
    %765 = arith.addf %761, %764 : vector<8x8xf32>
    %c12_332 = arith.constant 12 : index
    %c6_333 = arith.constant 6 : index
    %766 = memref.load %arg2[%c12_332, %c6_333] : memref<20x21xf32, #tpu.memory_space<smem>>
    %767 = vector.broadcast %766 : f32 to vector<8x8xf32>
    %768 = arith.mulf %767, %675 : vector<8x8xf32>
    %769 = arith.addf %765, %768 : vector<8x8xf32>
    %c12_334 = arith.constant 12 : index
    %c7_335 = arith.constant 7 : index
    %770 = memref.load %arg2[%c12_334, %c7_335] : memref<20x21xf32, #tpu.memory_space<smem>>
    %771 = vector.broadcast %770 : f32 to vector<8x8xf32>
    %772 = arith.mulf %771, %676 : vector<8x8xf32>
    %773 = arith.addf %769, %772 : vector<8x8xf32>
    %c12_336 = arith.constant 12 : index
    %c8_337 = arith.constant 8 : index
    %774 = memref.load %arg2[%c12_336, %c8_337] : memref<20x21xf32, #tpu.memory_space<smem>>
    %775 = vector.broadcast %774 : f32 to vector<8x8xf32>
    %776 = arith.mulf %775, %677 : vector<8x8xf32>
    %777 = arith.addf %773, %776 : vector<8x8xf32>
    %c12_338 = arith.constant 12 : index
    %c9_339 = arith.constant 9 : index
    %778 = memref.load %arg2[%c12_338, %c9_339] : memref<20x21xf32, #tpu.memory_space<smem>>
    %779 = vector.broadcast %778 : f32 to vector<8x8xf32>
    %780 = arith.mulf %779, %678 : vector<8x8xf32>
    %781 = arith.addf %777, %780 : vector<8x8xf32>
    %c12_340 = arith.constant 12 : index
    %c10_341 = arith.constant 10 : index
    %782 = memref.load %arg2[%c12_340, %c10_341] : memref<20x21xf32, #tpu.memory_space<smem>>
    %783 = vector.broadcast %782 : f32 to vector<8x8xf32>
    %784 = arith.mulf %783, %679 : vector<8x8xf32>
    %785 = arith.addf %781, %784 : vector<8x8xf32>
    %c12_342 = arith.constant 12 : index
    %c11_343 = arith.constant 11 : index
    %786 = memref.load %arg2[%c12_342, %c11_343] : memref<20x21xf32, #tpu.memory_space<smem>>
    %787 = vector.broadcast %786 : f32 to vector<8x8xf32>
    %788 = arith.mulf %787, %680 : vector<8x8xf32>
    %789 = arith.addf %785, %788 : vector<8x8xf32>
    %c12_344 = arith.constant 12 : index
    %c12_345 = arith.constant 12 : index
    %790 = memref.load %arg2[%c12_344, %c12_345] : memref<20x21xf32, #tpu.memory_space<smem>>
    %791 = vector.broadcast %790 : f32 to vector<8x8xf32>
    %792 = arith.mulf %791, %681 : vector<8x8xf32>
    %793 = arith.addf %789, %792 : vector<8x8xf32>
    %c12_346 = arith.constant 12 : index
    %c13_347 = arith.constant 13 : index
    %794 = memref.load %arg2[%c12_346, %c13_347] : memref<20x21xf32, #tpu.memory_space<smem>>
    %795 = vector.broadcast %794 : f32 to vector<8x8xf32>
    %796 = arith.mulf %795, %682 : vector<8x8xf32>
    %797 = arith.addf %793, %796 : vector<8x8xf32>
    %c12_348 = arith.constant 12 : index
    %c14_349 = arith.constant 14 : index
    %798 = memref.load %arg2[%c12_348, %c14_349] : memref<20x21xf32, #tpu.memory_space<smem>>
    %799 = vector.broadcast %798 : f32 to vector<8x8xf32>
    %800 = arith.mulf %799, %683 : vector<8x8xf32>
    %801 = arith.addf %797, %800 : vector<8x8xf32>
    %c13_350 = arith.constant 13 : index
    %c0_351 = arith.constant 0 : index
    %802 = memref.load %arg2[%c13_350, %c0_351] : memref<20x21xf32, #tpu.memory_space<smem>>
    %803 = vector.broadcast %802 : f32 to vector<8x8xf32>
    %804 = arith.mulf %803, %669 : vector<8x8xf32>
    %c13_352 = arith.constant 13 : index
    %c1_353 = arith.constant 1 : index
    %805 = memref.load %arg2[%c13_352, %c1_353] : memref<20x21xf32, #tpu.memory_space<smem>>
    %806 = vector.broadcast %805 : f32 to vector<8x8xf32>
    %807 = arith.mulf %806, %670 : vector<8x8xf32>
    %808 = arith.addf %804, %807 : vector<8x8xf32>
    %c13_354 = arith.constant 13 : index
    %c2_355 = arith.constant 2 : index
    %809 = memref.load %arg2[%c13_354, %c2_355] : memref<20x21xf32, #tpu.memory_space<smem>>
    %810 = vector.broadcast %809 : f32 to vector<8x8xf32>
    %811 = arith.mulf %810, %671 : vector<8x8xf32>
    %812 = arith.addf %808, %811 : vector<8x8xf32>
    %c13_356 = arith.constant 13 : index
    %c3_357 = arith.constant 3 : index
    %813 = memref.load %arg2[%c13_356, %c3_357] : memref<20x21xf32, #tpu.memory_space<smem>>
    %814 = vector.broadcast %813 : f32 to vector<8x8xf32>
    %815 = arith.mulf %814, %672 : vector<8x8xf32>
    %816 = arith.addf %812, %815 : vector<8x8xf32>
    %c13_358 = arith.constant 13 : index
    %c4_359 = arith.constant 4 : index
    %817 = memref.load %arg2[%c13_358, %c4_359] : memref<20x21xf32, #tpu.memory_space<smem>>
    %818 = vector.broadcast %817 : f32 to vector<8x8xf32>
    %819 = arith.mulf %818, %673 : vector<8x8xf32>
    %820 = arith.addf %816, %819 : vector<8x8xf32>
    %c13_360 = arith.constant 13 : index
    %c5_361 = arith.constant 5 : index
    %821 = memref.load %arg2[%c13_360, %c5_361] : memref<20x21xf32, #tpu.memory_space<smem>>
    %822 = vector.broadcast %821 : f32 to vector<8x8xf32>
    %823 = arith.mulf %822, %674 : vector<8x8xf32>
    %824 = arith.addf %820, %823 : vector<8x8xf32>
    %c13_362 = arith.constant 13 : index
    %c6_363 = arith.constant 6 : index
    %825 = memref.load %arg2[%c13_362, %c6_363] : memref<20x21xf32, #tpu.memory_space<smem>>
    %826 = vector.broadcast %825 : f32 to vector<8x8xf32>
    %827 = arith.mulf %826, %675 : vector<8x8xf32>
    %828 = arith.addf %824, %827 : vector<8x8xf32>
    %c13_364 = arith.constant 13 : index
    %c7_365 = arith.constant 7 : index
    %829 = memref.load %arg2[%c13_364, %c7_365] : memref<20x21xf32, #tpu.memory_space<smem>>
    %830 = vector.broadcast %829 : f32 to vector<8x8xf32>
    %831 = arith.mulf %830, %676 : vector<8x8xf32>
    %832 = arith.addf %828, %831 : vector<8x8xf32>
    %c13_366 = arith.constant 13 : index
    %c8_367 = arith.constant 8 : index
    %833 = memref.load %arg2[%c13_366, %c8_367] : memref<20x21xf32, #tpu.memory_space<smem>>
    %834 = vector.broadcast %833 : f32 to vector<8x8xf32>
    %835 = arith.mulf %834, %677 : vector<8x8xf32>
    %836 = arith.addf %832, %835 : vector<8x8xf32>
    %c13_368 = arith.constant 13 : index
    %c9_369 = arith.constant 9 : index
    %837 = memref.load %arg2[%c13_368, %c9_369] : memref<20x21xf32, #tpu.memory_space<smem>>
    %838 = vector.broadcast %837 : f32 to vector<8x8xf32>
    %839 = arith.mulf %838, %678 : vector<8x8xf32>
    %840 = arith.addf %836, %839 : vector<8x8xf32>
    %c13_370 = arith.constant 13 : index
    %c10_371 = arith.constant 10 : index
    %841 = memref.load %arg2[%c13_370, %c10_371] : memref<20x21xf32, #tpu.memory_space<smem>>
    %842 = vector.broadcast %841 : f32 to vector<8x8xf32>
    %843 = arith.mulf %842, %679 : vector<8x8xf32>
    %844 = arith.addf %840, %843 : vector<8x8xf32>
    %c13_372 = arith.constant 13 : index
    %c11_373 = arith.constant 11 : index
    %845 = memref.load %arg2[%c13_372, %c11_373] : memref<20x21xf32, #tpu.memory_space<smem>>
    %846 = vector.broadcast %845 : f32 to vector<8x8xf32>
    %847 = arith.mulf %846, %680 : vector<8x8xf32>
    %848 = arith.addf %844, %847 : vector<8x8xf32>
    %c13_374 = arith.constant 13 : index
    %c12_375 = arith.constant 12 : index
    %849 = memref.load %arg2[%c13_374, %c12_375] : memref<20x21xf32, #tpu.memory_space<smem>>
    %850 = vector.broadcast %849 : f32 to vector<8x8xf32>
    %851 = arith.mulf %850, %681 : vector<8x8xf32>
    %852 = arith.addf %848, %851 : vector<8x8xf32>
    %c13_376 = arith.constant 13 : index
    %c13_377 = arith.constant 13 : index
    %853 = memref.load %arg2[%c13_376, %c13_377] : memref<20x21xf32, #tpu.memory_space<smem>>
    %854 = vector.broadcast %853 : f32 to vector<8x8xf32>
    %855 = arith.mulf %854, %682 : vector<8x8xf32>
    %856 = arith.addf %852, %855 : vector<8x8xf32>
    %c13_378 = arith.constant 13 : index
    %c14_379 = arith.constant 14 : index
    %857 = memref.load %arg2[%c13_378, %c14_379] : memref<20x21xf32, #tpu.memory_space<smem>>
    %858 = vector.broadcast %857 : f32 to vector<8x8xf32>
    %859 = arith.mulf %858, %683 : vector<8x8xf32>
    %860 = arith.addf %856, %859 : vector<8x8xf32>
    %c14_380 = arith.constant 14 : index
    %c0_381 = arith.constant 0 : index
    %861 = memref.load %arg2[%c14_380, %c0_381] : memref<20x21xf32, #tpu.memory_space<smem>>
    %862 = vector.broadcast %861 : f32 to vector<8x8xf32>
    %863 = arith.mulf %862, %669 : vector<8x8xf32>
    %c14_382 = arith.constant 14 : index
    %c1_383 = arith.constant 1 : index
    %864 = memref.load %arg2[%c14_382, %c1_383] : memref<20x21xf32, #tpu.memory_space<smem>>
    %865 = vector.broadcast %864 : f32 to vector<8x8xf32>
    %866 = arith.mulf %865, %670 : vector<8x8xf32>
    %867 = arith.addf %863, %866 : vector<8x8xf32>
    %c14_384 = arith.constant 14 : index
    %c2_385 = arith.constant 2 : index
    %868 = memref.load %arg2[%c14_384, %c2_385] : memref<20x21xf32, #tpu.memory_space<smem>>
    %869 = vector.broadcast %868 : f32 to vector<8x8xf32>
    %870 = arith.mulf %869, %671 : vector<8x8xf32>
    %871 = arith.addf %867, %870 : vector<8x8xf32>
    %c14_386 = arith.constant 14 : index
    %c3_387 = arith.constant 3 : index
    %872 = memref.load %arg2[%c14_386, %c3_387] : memref<20x21xf32, #tpu.memory_space<smem>>
    %873 = vector.broadcast %872 : f32 to vector<8x8xf32>
    %874 = arith.mulf %873, %672 : vector<8x8xf32>
    %875 = arith.addf %871, %874 : vector<8x8xf32>
    %c14_388 = arith.constant 14 : index
    %c4_389 = arith.constant 4 : index
    %876 = memref.load %arg2[%c14_388, %c4_389] : memref<20x21xf32, #tpu.memory_space<smem>>
    %877 = vector.broadcast %876 : f32 to vector<8x8xf32>
    %878 = arith.mulf %877, %673 : vector<8x8xf32>
    %879 = arith.addf %875, %878 : vector<8x8xf32>
    %c14_390 = arith.constant 14 : index
    %c5_391 = arith.constant 5 : index
    %880 = memref.load %arg2[%c14_390, %c5_391] : memref<20x21xf32, #tpu.memory_space<smem>>
    %881 = vector.broadcast %880 : f32 to vector<8x8xf32>
    %882 = arith.mulf %881, %674 : vector<8x8xf32>
    %883 = arith.addf %879, %882 : vector<8x8xf32>
    %c14_392 = arith.constant 14 : index
    %c6_393 = arith.constant 6 : index
    %884 = memref.load %arg2[%c14_392, %c6_393] : memref<20x21xf32, #tpu.memory_space<smem>>
    %885 = vector.broadcast %884 : f32 to vector<8x8xf32>
    %886 = arith.mulf %885, %675 : vector<8x8xf32>
    %887 = arith.addf %883, %886 : vector<8x8xf32>
    %c14_394 = arith.constant 14 : index
    %c7_395 = arith.constant 7 : index
    %888 = memref.load %arg2[%c14_394, %c7_395] : memref<20x21xf32, #tpu.memory_space<smem>>
    %889 = vector.broadcast %888 : f32 to vector<8x8xf32>
    %890 = arith.mulf %889, %676 : vector<8x8xf32>
    %891 = arith.addf %887, %890 : vector<8x8xf32>
    %c14_396 = arith.constant 14 : index
    %c8_397 = arith.constant 8 : index
    %892 = memref.load %arg2[%c14_396, %c8_397] : memref<20x21xf32, #tpu.memory_space<smem>>
    %893 = vector.broadcast %892 : f32 to vector<8x8xf32>
    %894 = arith.mulf %893, %677 : vector<8x8xf32>
    %895 = arith.addf %891, %894 : vector<8x8xf32>
    %c14_398 = arith.constant 14 : index
    %c9_399 = arith.constant 9 : index
    %896 = memref.load %arg2[%c14_398, %c9_399] : memref<20x21xf32, #tpu.memory_space<smem>>
    %897 = vector.broadcast %896 : f32 to vector<8x8xf32>
    %898 = arith.mulf %897, %678 : vector<8x8xf32>
    %899 = arith.addf %895, %898 : vector<8x8xf32>
    %c14_400 = arith.constant 14 : index
    %c10_401 = arith.constant 10 : index
    %900 = memref.load %arg2[%c14_400, %c10_401] : memref<20x21xf32, #tpu.memory_space<smem>>
    %901 = vector.broadcast %900 : f32 to vector<8x8xf32>
    %902 = arith.mulf %901, %679 : vector<8x8xf32>
    %903 = arith.addf %899, %902 : vector<8x8xf32>
    %c14_402 = arith.constant 14 : index
    %c11_403 = arith.constant 11 : index
    %904 = memref.load %arg2[%c14_402, %c11_403] : memref<20x21xf32, #tpu.memory_space<smem>>
    %905 = vector.broadcast %904 : f32 to vector<8x8xf32>
    %906 = arith.mulf %905, %680 : vector<8x8xf32>
    %907 = arith.addf %903, %906 : vector<8x8xf32>
    %c14_404 = arith.constant 14 : index
    %c12_405 = arith.constant 12 : index
    %908 = memref.load %arg2[%c14_404, %c12_405] : memref<20x21xf32, #tpu.memory_space<smem>>
    %909 = vector.broadcast %908 : f32 to vector<8x8xf32>
    %910 = arith.mulf %909, %681 : vector<8x8xf32>
    %911 = arith.addf %907, %910 : vector<8x8xf32>
    %c14_406 = arith.constant 14 : index
    %c13_407 = arith.constant 13 : index
    %912 = memref.load %arg2[%c14_406, %c13_407] : memref<20x21xf32, #tpu.memory_space<smem>>
    %913 = vector.broadcast %912 : f32 to vector<8x8xf32>
    %914 = arith.mulf %913, %682 : vector<8x8xf32>
    %915 = arith.addf %911, %914 : vector<8x8xf32>
    %c14_408 = arith.constant 14 : index
    %c14_409 = arith.constant 14 : index
    %916 = memref.load %arg2[%c14_408, %c14_409] : memref<20x21xf32, #tpu.memory_space<smem>>
    %917 = vector.broadcast %916 : f32 to vector<8x8xf32>
    %918 = arith.mulf %917, %683 : vector<8x8xf32>
    %919 = arith.addf %915, %918 : vector<8x8xf32>
    %c15_410 = arith.constant 15 : index
    %c0_411 = arith.constant 0 : index
    %920 = memref.load %arg2[%c15_410, %c0_411] : memref<20x21xf32, #tpu.memory_space<smem>>
    %921 = vector.broadcast %920 : f32 to vector<8x8xf32>
    %922 = arith.mulf %921, %669 : vector<8x8xf32>
    %c15_412 = arith.constant 15 : index
    %c1_413 = arith.constant 1 : index
    %923 = memref.load %arg2[%c15_412, %c1_413] : memref<20x21xf32, #tpu.memory_space<smem>>
    %924 = vector.broadcast %923 : f32 to vector<8x8xf32>
    %925 = arith.mulf %924, %670 : vector<8x8xf32>
    %926 = arith.addf %922, %925 : vector<8x8xf32>
    %c15_414 = arith.constant 15 : index
    %c2_415 = arith.constant 2 : index
    %927 = memref.load %arg2[%c15_414, %c2_415] : memref<20x21xf32, #tpu.memory_space<smem>>
    %928 = vector.broadcast %927 : f32 to vector<8x8xf32>
    %929 = arith.mulf %928, %671 : vector<8x8xf32>
    %930 = arith.addf %926, %929 : vector<8x8xf32>
    %c15_416 = arith.constant 15 : index
    %c3_417 = arith.constant 3 : index
    %931 = memref.load %arg2[%c15_416, %c3_417] : memref<20x21xf32, #tpu.memory_space<smem>>
    %932 = vector.broadcast %931 : f32 to vector<8x8xf32>
    %933 = arith.mulf %932, %672 : vector<8x8xf32>
    %934 = arith.addf %930, %933 : vector<8x8xf32>
    %c15_418 = arith.constant 15 : index
    %c4_419 = arith.constant 4 : index
    %935 = memref.load %arg2[%c15_418, %c4_419] : memref<20x21xf32, #tpu.memory_space<smem>>
    %936 = vector.broadcast %935 : f32 to vector<8x8xf32>
    %937 = arith.mulf %936, %673 : vector<8x8xf32>
    %938 = arith.addf %934, %937 : vector<8x8xf32>
    %c15_420 = arith.constant 15 : index
    %c5_421 = arith.constant 5 : index
    %939 = memref.load %arg2[%c15_420, %c5_421] : memref<20x21xf32, #tpu.memory_space<smem>>
    %940 = vector.broadcast %939 : f32 to vector<8x8xf32>
    %941 = arith.mulf %940, %674 : vector<8x8xf32>
    %942 = arith.addf %938, %941 : vector<8x8xf32>
    %c15_422 = arith.constant 15 : index
    %c6_423 = arith.constant 6 : index
    %943 = memref.load %arg2[%c15_422, %c6_423] : memref<20x21xf32, #tpu.memory_space<smem>>
    %944 = vector.broadcast %943 : f32 to vector<8x8xf32>
    %945 = arith.mulf %944, %675 : vector<8x8xf32>
    %946 = arith.addf %942, %945 : vector<8x8xf32>
    %c15_424 = arith.constant 15 : index
    %c7_425 = arith.constant 7 : index
    %947 = memref.load %arg2[%c15_424, %c7_425] : memref<20x21xf32, #tpu.memory_space<smem>>
    %948 = vector.broadcast %947 : f32 to vector<8x8xf32>
    %949 = arith.mulf %948, %676 : vector<8x8xf32>
    %950 = arith.addf %946, %949 : vector<8x8xf32>
    %c15_426 = arith.constant 15 : index
    %c8_427 = arith.constant 8 : index
    %951 = memref.load %arg2[%c15_426, %c8_427] : memref<20x21xf32, #tpu.memory_space<smem>>
    %952 = vector.broadcast %951 : f32 to vector<8x8xf32>
    %953 = arith.mulf %952, %677 : vector<8x8xf32>
    %954 = arith.addf %950, %953 : vector<8x8xf32>
    %c15_428 = arith.constant 15 : index
    %c9_429 = arith.constant 9 : index
    %955 = memref.load %arg2[%c15_428, %c9_429] : memref<20x21xf32, #tpu.memory_space<smem>>
    %956 = vector.broadcast %955 : f32 to vector<8x8xf32>
    %957 = arith.mulf %956, %678 : vector<8x8xf32>
    %958 = arith.addf %954, %957 : vector<8x8xf32>
    %c15_430 = arith.constant 15 : index
    %c10_431 = arith.constant 10 : index
    %959 = memref.load %arg2[%c15_430, %c10_431] : memref<20x21xf32, #tpu.memory_space<smem>>
    %960 = vector.broadcast %959 : f32 to vector<8x8xf32>
    %961 = arith.mulf %960, %679 : vector<8x8xf32>
    %962 = arith.addf %958, %961 : vector<8x8xf32>
    %c15_432 = arith.constant 15 : index
    %c11_433 = arith.constant 11 : index
    %963 = memref.load %arg2[%c15_432, %c11_433] : memref<20x21xf32, #tpu.memory_space<smem>>
    %964 = vector.broadcast %963 : f32 to vector<8x8xf32>
    %965 = arith.mulf %964, %680 : vector<8x8xf32>
    %966 = arith.addf %962, %965 : vector<8x8xf32>
    %c15_434 = arith.constant 15 : index
    %c12_435 = arith.constant 12 : index
    %967 = memref.load %arg2[%c15_434, %c12_435] : memref<20x21xf32, #tpu.memory_space<smem>>
    %968 = vector.broadcast %967 : f32 to vector<8x8xf32>
    %969 = arith.mulf %968, %681 : vector<8x8xf32>
    %970 = arith.addf %966, %969 : vector<8x8xf32>
    %c15_436 = arith.constant 15 : index
    %c13_437 = arith.constant 13 : index
    %971 = memref.load %arg2[%c15_436, %c13_437] : memref<20x21xf32, #tpu.memory_space<smem>>
    %972 = vector.broadcast %971 : f32 to vector<8x8xf32>
    %973 = arith.mulf %972, %682 : vector<8x8xf32>
    %974 = arith.addf %970, %973 : vector<8x8xf32>
    %c15_438 = arith.constant 15 : index
    %c14_439 = arith.constant 14 : index
    %975 = memref.load %arg2[%c15_438, %c14_439] : memref<20x21xf32, #tpu.memory_space<smem>>
    %976 = vector.broadcast %975 : f32 to vector<8x8xf32>
    %977 = arith.mulf %976, %683 : vector<8x8xf32>
    %978 = arith.addf %974, %977 : vector<8x8xf32>
    %c16_440 = arith.constant 16 : index
    %c0_441 = arith.constant 0 : index
    %979 = memref.load %arg2[%c16_440, %c0_441] : memref<20x21xf32, #tpu.memory_space<smem>>
    %980 = vector.broadcast %979 : f32 to vector<8x8xf32>
    %981 = arith.mulf %980, %669 : vector<8x8xf32>
    %c16_442 = arith.constant 16 : index
    %c1_443 = arith.constant 1 : index
    %982 = memref.load %arg2[%c16_442, %c1_443] : memref<20x21xf32, #tpu.memory_space<smem>>
    %983 = vector.broadcast %982 : f32 to vector<8x8xf32>
    %984 = arith.mulf %983, %670 : vector<8x8xf32>
    %985 = arith.addf %981, %984 : vector<8x8xf32>
    %c16_444 = arith.constant 16 : index
    %c2_445 = arith.constant 2 : index
    %986 = memref.load %arg2[%c16_444, %c2_445] : memref<20x21xf32, #tpu.memory_space<smem>>
    %987 = vector.broadcast %986 : f32 to vector<8x8xf32>
    %988 = arith.mulf %987, %671 : vector<8x8xf32>
    %989 = arith.addf %985, %988 : vector<8x8xf32>
    %c16_446 = arith.constant 16 : index
    %c3_447 = arith.constant 3 : index
    %990 = memref.load %arg2[%c16_446, %c3_447] : memref<20x21xf32, #tpu.memory_space<smem>>
    %991 = vector.broadcast %990 : f32 to vector<8x8xf32>
    %992 = arith.mulf %991, %672 : vector<8x8xf32>
    %993 = arith.addf %989, %992 : vector<8x8xf32>
    %c16_448 = arith.constant 16 : index
    %c4_449 = arith.constant 4 : index
    %994 = memref.load %arg2[%c16_448, %c4_449] : memref<20x21xf32, #tpu.memory_space<smem>>
    %995 = vector.broadcast %994 : f32 to vector<8x8xf32>
    %996 = arith.mulf %995, %673 : vector<8x8xf32>
    %997 = arith.addf %993, %996 : vector<8x8xf32>
    %c16_450 = arith.constant 16 : index
    %c5_451 = arith.constant 5 : index
    %998 = memref.load %arg2[%c16_450, %c5_451] : memref<20x21xf32, #tpu.memory_space<smem>>
    %999 = vector.broadcast %998 : f32 to vector<8x8xf32>
    %1000 = arith.mulf %999, %674 : vector<8x8xf32>
    %1001 = arith.addf %997, %1000 : vector<8x8xf32>
    %c16_452 = arith.constant 16 : index
    %c6_453 = arith.constant 6 : index
    %1002 = memref.load %arg2[%c16_452, %c6_453] : memref<20x21xf32, #tpu.memory_space<smem>>
    %1003 = vector.broadcast %1002 : f32 to vector<8x8xf32>
    %1004 = arith.mulf %1003, %675 : vector<8x8xf32>
    %1005 = arith.addf %1001, %1004 : vector<8x8xf32>
    %c16_454 = arith.constant 16 : index
    %c7_455 = arith.constant 7 : index
    %1006 = memref.load %arg2[%c16_454, %c7_455] : memref<20x21xf32, #tpu.memory_space<smem>>
    %1007 = vector.broadcast %1006 : f32 to vector<8x8xf32>
    %1008 = arith.mulf %1007, %676 : vector<8x8xf32>
    %1009 = arith.addf %1005, %1008 : vector<8x8xf32>
    %c16_456 = arith.constant 16 : index
    %c8_457 = arith.constant 8 : index
    %1010 = memref.load %arg2[%c16_456, %c8_457] : memref<20x21xf32, #tpu.memory_space<smem>>
    %1011 = vector.broadcast %1010 : f32 to vector<8x8xf32>
    %1012 = arith.mulf %1011, %677 : vector<8x8xf32>
    %1013 = arith.addf %1009, %1012 : vector<8x8xf32>
    %c16_458 = arith.constant 16 : index
    %c9_459 = arith.constant 9 : index
    %1014 = memref.load %arg2[%c16_458, %c9_459] : memref<20x21xf32, #tpu.memory_space<smem>>
    %1015 = vector.broadcast %1014 : f32 to vector<8x8xf32>
    %1016 = arith.mulf %1015, %678 : vector<8x8xf32>
    %1017 = arith.addf %1013, %1016 : vector<8x8xf32>
    %c16_460 = arith.constant 16 : index
    %c10_461 = arith.constant 10 : index
    %1018 = memref.load %arg2[%c16_460, %c10_461] : memref<20x21xf32, #tpu.memory_space<smem>>
    %1019 = vector.broadcast %1018 : f32 to vector<8x8xf32>
    %1020 = arith.mulf %1019, %679 : vector<8x8xf32>
    %1021 = arith.addf %1017, %1020 : vector<8x8xf32>
    %c16_462 = arith.constant 16 : index
    %c11_463 = arith.constant 11 : index
    %1022 = memref.load %arg2[%c16_462, %c11_463] : memref<20x21xf32, #tpu.memory_space<smem>>
    %1023 = vector.broadcast %1022 : f32 to vector<8x8xf32>
    %1024 = arith.mulf %1023, %680 : vector<8x8xf32>
    %1025 = arith.addf %1021, %1024 : vector<8x8xf32>
    %c16_464 = arith.constant 16 : index
    %c12_465 = arith.constant 12 : index
    %1026 = memref.load %arg2[%c16_464, %c12_465] : memref<20x21xf32, #tpu.memory_space<smem>>
    %1027 = vector.broadcast %1026 : f32 to vector<8x8xf32>
    %1028 = arith.mulf %1027, %681 : vector<8x8xf32>
    %1029 = arith.addf %1025, %1028 : vector<8x8xf32>
    %c16_466 = arith.constant 16 : index
    %c13_467 = arith.constant 13 : index
    %1030 = memref.load %arg2[%c16_466, %c13_467] : memref<20x21xf32, #tpu.memory_space<smem>>
    %1031 = vector.broadcast %1030 : f32 to vector<8x8xf32>
    %1032 = arith.mulf %1031, %682 : vector<8x8xf32>
    %1033 = arith.addf %1029, %1032 : vector<8x8xf32>
    %c16_468 = arith.constant 16 : index
    %c14_469 = arith.constant 14 : index
    %1034 = memref.load %arg2[%c16_468, %c14_469] : memref<20x21xf32, #tpu.memory_space<smem>>
    %1035 = vector.broadcast %1034 : f32 to vector<8x8xf32>
    %1036 = arith.mulf %1035, %683 : vector<8x8xf32>
    %1037 = arith.addf %1033, %1036 : vector<8x8xf32>
    %c17_470 = arith.constant 17 : index
    %c0_471 = arith.constant 0 : index
    %1038 = memref.load %arg2[%c17_470, %c0_471] : memref<20x21xf32, #tpu.memory_space<smem>>
    %1039 = vector.broadcast %1038 : f32 to vector<8x8xf32>
    %1040 = arith.mulf %1039, %669 : vector<8x8xf32>
    %c17_472 = arith.constant 17 : index
    %c1_473 = arith.constant 1 : index
    %1041 = memref.load %arg2[%c17_472, %c1_473] : memref<20x21xf32, #tpu.memory_space<smem>>
    %1042 = vector.broadcast %1041 : f32 to vector<8x8xf32>
    %1043 = arith.mulf %1042, %670 : vector<8x8xf32>
    %1044 = arith.addf %1040, %1043 : vector<8x8xf32>
    %c17_474 = arith.constant 17 : index
    %c2_475 = arith.constant 2 : index
    %1045 = memref.load %arg2[%c17_474, %c2_475] : memref<20x21xf32, #tpu.memory_space<smem>>
    %1046 = vector.broadcast %1045 : f32 to vector<8x8xf32>
    %1047 = arith.mulf %1046, %671 : vector<8x8xf32>
    %1048 = arith.addf %1044, %1047 : vector<8x8xf32>
    %c17_476 = arith.constant 17 : index
    %c3_477 = arith.constant 3 : index
    %1049 = memref.load %arg2[%c17_476, %c3_477] : memref<20x21xf32, #tpu.memory_space<smem>>
    %1050 = vector.broadcast %1049 : f32 to vector<8x8xf32>
    %1051 = arith.mulf %1050, %672 : vector<8x8xf32>
    %1052 = arith.addf %1048, %1051 : vector<8x8xf32>
    %c17_478 = arith.constant 17 : index
    %c4_479 = arith.constant 4 : index
    %1053 = memref.load %arg2[%c17_478, %c4_479] : memref<20x21xf32, #tpu.memory_space<smem>>
    %1054 = vector.broadcast %1053 : f32 to vector<8x8xf32>
    %1055 = arith.mulf %1054, %673 : vector<8x8xf32>
    %1056 = arith.addf %1052, %1055 : vector<8x8xf32>
    %c17_480 = arith.constant 17 : index
    %c5_481 = arith.constant 5 : index
    %1057 = memref.load %arg2[%c17_480, %c5_481] : memref<20x21xf32, #tpu.memory_space<smem>>
    %1058 = vector.broadcast %1057 : f32 to vector<8x8xf32>
    %1059 = arith.mulf %1058, %674 : vector<8x8xf32>
    %1060 = arith.addf %1056, %1059 : vector<8x8xf32>
    %c17_482 = arith.constant 17 : index
    %c6_483 = arith.constant 6 : index
    %1061 = memref.load %arg2[%c17_482, %c6_483] : memref<20x21xf32, #tpu.memory_space<smem>>
    %1062 = vector.broadcast %1061 : f32 to vector<8x8xf32>
    %1063 = arith.mulf %1062, %675 : vector<8x8xf32>
    %1064 = arith.addf %1060, %1063 : vector<8x8xf32>
    %c17_484 = arith.constant 17 : index
    %c7_485 = arith.constant 7 : index
    %1065 = memref.load %arg2[%c17_484, %c7_485] : memref<20x21xf32, #tpu.memory_space<smem>>
    %1066 = vector.broadcast %1065 : f32 to vector<8x8xf32>
    %1067 = arith.mulf %1066, %676 : vector<8x8xf32>
    %1068 = arith.addf %1064, %1067 : vector<8x8xf32>
    %c17_486 = arith.constant 17 : index
    %c8_487 = arith.constant 8 : index
    %1069 = memref.load %arg2[%c17_486, %c8_487] : memref<20x21xf32, #tpu.memory_space<smem>>
    %1070 = vector.broadcast %1069 : f32 to vector<8x8xf32>
    %1071 = arith.mulf %1070, %677 : vector<8x8xf32>
    %1072 = arith.addf %1068, %1071 : vector<8x8xf32>
    %c17_488 = arith.constant 17 : index
    %c9_489 = arith.constant 9 : index
    %1073 = memref.load %arg2[%c17_488, %c9_489] : memref<20x21xf32, #tpu.memory_space<smem>>
    %1074 = vector.broadcast %1073 : f32 to vector<8x8xf32>
    %1075 = arith.mulf %1074, %678 : vector<8x8xf32>
    %1076 = arith.addf %1072, %1075 : vector<8x8xf32>
    %c17_490 = arith.constant 17 : index
    %c10_491 = arith.constant 10 : index
    %1077 = memref.load %arg2[%c17_490, %c10_491] : memref<20x21xf32, #tpu.memory_space<smem>>
    %1078 = vector.broadcast %1077 : f32 to vector<8x8xf32>
    %1079 = arith.mulf %1078, %679 : vector<8x8xf32>
    %1080 = arith.addf %1076, %1079 : vector<8x8xf32>
    %c17_492 = arith.constant 17 : index
    %c11_493 = arith.constant 11 : index
    %1081 = memref.load %arg2[%c17_492, %c11_493] : memref<20x21xf32, #tpu.memory_space<smem>>
    %1082 = vector.broadcast %1081 : f32 to vector<8x8xf32>
    %1083 = arith.mulf %1082, %680 : vector<8x8xf32>
    %1084 = arith.addf %1080, %1083 : vector<8x8xf32>
    %c17_494 = arith.constant 17 : index
    %c12_495 = arith.constant 12 : index
    %1085 = memref.load %arg2[%c17_494, %c12_495] : memref<20x21xf32, #tpu.memory_space<smem>>
    %1086 = vector.broadcast %1085 : f32 to vector<8x8xf32>
    %1087 = arith.mulf %1086, %681 : vector<8x8xf32>
    %1088 = arith.addf %1084, %1087 : vector<8x8xf32>
    %c17_496 = arith.constant 17 : index
    %c13_497 = arith.constant 13 : index
    %1089 = memref.load %arg2[%c17_496, %c13_497] : memref<20x21xf32, #tpu.memory_space<smem>>
    %1090 = vector.broadcast %1089 : f32 to vector<8x8xf32>
    %1091 = arith.mulf %1090, %682 : vector<8x8xf32>
    %1092 = arith.addf %1088, %1091 : vector<8x8xf32>
    %c17_498 = arith.constant 17 : index
    %c14_499 = arith.constant 14 : index
    %1093 = memref.load %arg2[%c17_498, %c14_499] : memref<20x21xf32, #tpu.memory_space<smem>>
    %1094 = vector.broadcast %1093 : f32 to vector<8x8xf32>
    %1095 = arith.mulf %1094, %683 : vector<8x8xf32>
    %1096 = arith.addf %1092, %1095 : vector<8x8xf32>
    %c18_500 = arith.constant 18 : index
    %c0_501 = arith.constant 0 : index
    %1097 = memref.load %arg2[%c18_500, %c0_501] : memref<20x21xf32, #tpu.memory_space<smem>>
    %1098 = vector.broadcast %1097 : f32 to vector<8x8xf32>
    %1099 = arith.mulf %1098, %669 : vector<8x8xf32>
    %c18_502 = arith.constant 18 : index
    %c1_503 = arith.constant 1 : index
    %1100 = memref.load %arg2[%c18_502, %c1_503] : memref<20x21xf32, #tpu.memory_space<smem>>
    %1101 = vector.broadcast %1100 : f32 to vector<8x8xf32>
    %1102 = arith.mulf %1101, %670 : vector<8x8xf32>
    %1103 = arith.addf %1099, %1102 : vector<8x8xf32>
    %c18_504 = arith.constant 18 : index
    %c2_505 = arith.constant 2 : index
    %1104 = memref.load %arg2[%c18_504, %c2_505] : memref<20x21xf32, #tpu.memory_space<smem>>
    %1105 = vector.broadcast %1104 : f32 to vector<8x8xf32>
    %1106 = arith.mulf %1105, %671 : vector<8x8xf32>
    %1107 = arith.addf %1103, %1106 : vector<8x8xf32>
    %c18_506 = arith.constant 18 : index
    %c3_507 = arith.constant 3 : index
    %1108 = memref.load %arg2[%c18_506, %c3_507] : memref<20x21xf32, #tpu.memory_space<smem>>
    %1109 = vector.broadcast %1108 : f32 to vector<8x8xf32>
    %1110 = arith.mulf %1109, %672 : vector<8x8xf32>
    %1111 = arith.addf %1107, %1110 : vector<8x8xf32>
    %c18_508 = arith.constant 18 : index
    %c4_509 = arith.constant 4 : index
    %1112 = memref.load %arg2[%c18_508, %c4_509] : memref<20x21xf32, #tpu.memory_space<smem>>
    %1113 = vector.broadcast %1112 : f32 to vector<8x8xf32>
    %1114 = arith.mulf %1113, %673 : vector<8x8xf32>
    %1115 = arith.addf %1111, %1114 : vector<8x8xf32>
    %c18_510 = arith.constant 18 : index
    %c5_511 = arith.constant 5 : index
    %1116 = memref.load %arg2[%c18_510, %c5_511] : memref<20x21xf32, #tpu.memory_space<smem>>
    %1117 = vector.broadcast %1116 : f32 to vector<8x8xf32>
    %1118 = arith.mulf %1117, %674 : vector<8x8xf32>
    %1119 = arith.addf %1115, %1118 : vector<8x8xf32>
    %c18_512 = arith.constant 18 : index
    %c6_513 = arith.constant 6 : index
    %1120 = memref.load %arg2[%c18_512, %c6_513] : memref<20x21xf32, #tpu.memory_space<smem>>
    %1121 = vector.broadcast %1120 : f32 to vector<8x8xf32>
    %1122 = arith.mulf %1121, %675 : vector<8x8xf32>
    %1123 = arith.addf %1119, %1122 : vector<8x8xf32>
    %c18_514 = arith.constant 18 : index
    %c7_515 = arith.constant 7 : index
    %1124 = memref.load %arg2[%c18_514, %c7_515] : memref<20x21xf32, #tpu.memory_space<smem>>
    %1125 = vector.broadcast %1124 : f32 to vector<8x8xf32>
    %1126 = arith.mulf %1125, %676 : vector<8x8xf32>
    %1127 = arith.addf %1123, %1126 : vector<8x8xf32>
    %c18_516 = arith.constant 18 : index
    %c8_517 = arith.constant 8 : index
    %1128 = memref.load %arg2[%c18_516, %c8_517] : memref<20x21xf32, #tpu.memory_space<smem>>
    %1129 = vector.broadcast %1128 : f32 to vector<8x8xf32>
    %1130 = arith.mulf %1129, %677 : vector<8x8xf32>
    %1131 = arith.addf %1127, %1130 : vector<8x8xf32>
    %c18_518 = arith.constant 18 : index
    %c9_519 = arith.constant 9 : index
    %1132 = memref.load %arg2[%c18_518, %c9_519] : memref<20x21xf32, #tpu.memory_space<smem>>
    %1133 = vector.broadcast %1132 : f32 to vector<8x8xf32>
    %1134 = arith.mulf %1133, %678 : vector<8x8xf32>
    %1135 = arith.addf %1131, %1134 : vector<8x8xf32>
    %c18_520 = arith.constant 18 : index
    %c10_521 = arith.constant 10 : index
    %1136 = memref.load %arg2[%c18_520, %c10_521] : memref<20x21xf32, #tpu.memory_space<smem>>
    %1137 = vector.broadcast %1136 : f32 to vector<8x8xf32>
    %1138 = arith.mulf %1137, %679 : vector<8x8xf32>
    %1139 = arith.addf %1135, %1138 : vector<8x8xf32>
    %c18_522 = arith.constant 18 : index
    %c11_523 = arith.constant 11 : index
    %1140 = memref.load %arg2[%c18_522, %c11_523] : memref<20x21xf32, #tpu.memory_space<smem>>
    %1141 = vector.broadcast %1140 : f32 to vector<8x8xf32>
    %1142 = arith.mulf %1141, %680 : vector<8x8xf32>
    %1143 = arith.addf %1139, %1142 : vector<8x8xf32>
    %c18_524 = arith.constant 18 : index
    %c12_525 = arith.constant 12 : index
    %1144 = memref.load %arg2[%c18_524, %c12_525] : memref<20x21xf32, #tpu.memory_space<smem>>
    %1145 = vector.broadcast %1144 : f32 to vector<8x8xf32>
    %1146 = arith.mulf %1145, %681 : vector<8x8xf32>
    %1147 = arith.addf %1143, %1146 : vector<8x8xf32>
    %c18_526 = arith.constant 18 : index
    %c13_527 = arith.constant 13 : index
    %1148 = memref.load %arg2[%c18_526, %c13_527] : memref<20x21xf32, #tpu.memory_space<smem>>
    %1149 = vector.broadcast %1148 : f32 to vector<8x8xf32>
    %1150 = arith.mulf %1149, %682 : vector<8x8xf32>
    %1151 = arith.addf %1147, %1150 : vector<8x8xf32>
    %c18_528 = arith.constant 18 : index
    %c14_529 = arith.constant 14 : index
    %1152 = memref.load %arg2[%c18_528, %c14_529] : memref<20x21xf32, #tpu.memory_space<smem>>
    %1153 = vector.broadcast %1152 : f32 to vector<8x8xf32>
    %1154 = arith.mulf %1153, %683 : vector<8x8xf32>
    %1155 = arith.addf %1151, %1154 : vector<8x8xf32>
    %c11_530 = arith.constant 11 : index
    %c15_531 = arith.constant 15 : index
    %1156 = memref.load %arg2[%c11_530, %c15_531] : memref<20x21xf32, #tpu.memory_space<smem>>
    %1157 = vector.broadcast %1156 : f32 to vector<8x8xf32>
    %1158 = arith.addf %742, %1157 : vector<8x8xf32>
    %c12_532 = arith.constant 12 : index
    %c15_533 = arith.constant 15 : index
    %1159 = memref.load %arg2[%c12_532, %c15_533] : memref<20x21xf32, #tpu.memory_space<smem>>
    %1160 = vector.broadcast %1159 : f32 to vector<8x8xf32>
    %1161 = arith.addf %801, %1160 : vector<8x8xf32>
    %c13_534 = arith.constant 13 : index
    %c15_535 = arith.constant 15 : index
    %1162 = memref.load %arg2[%c13_534, %c15_535] : memref<20x21xf32, #tpu.memory_space<smem>>
    %1163 = vector.broadcast %1162 : f32 to vector<8x8xf32>
    %1164 = arith.addf %860, %1163 : vector<8x8xf32>
    %c14_536 = arith.constant 14 : index
    %c15_537 = arith.constant 15 : index
    %1165 = memref.load %arg2[%c14_536, %c15_537] : memref<20x21xf32, #tpu.memory_space<smem>>
    %1166 = vector.broadcast %1165 : f32 to vector<8x8xf32>
    %1167 = arith.addf %919, %1166 : vector<8x8xf32>
    %c15_538 = arith.constant 15 : index
    %c15_539 = arith.constant 15 : index
    %1168 = memref.load %arg2[%c15_538, %c15_539] : memref<20x21xf32, #tpu.memory_space<smem>>
    %1169 = vector.broadcast %1168 : f32 to vector<8x8xf32>
    %1170 = arith.addf %978, %1169 : vector<8x8xf32>
    %c16_540 = arith.constant 16 : index
    %c15_541 = arith.constant 15 : index
    %1171 = memref.load %arg2[%c16_540, %c15_541] : memref<20x21xf32, #tpu.memory_space<smem>>
    %1172 = vector.broadcast %1171 : f32 to vector<8x8xf32>
    %1173 = arith.addf %1037, %1172 : vector<8x8xf32>
    %c17_542 = arith.constant 17 : index
    %c15_543 = arith.constant 15 : index
    %1174 = memref.load %arg2[%c17_542, %c15_543] : memref<20x21xf32, #tpu.memory_space<smem>>
    %1175 = vector.broadcast %1174 : f32 to vector<8x8xf32>
    %1176 = arith.addf %1096, %1175 : vector<8x8xf32>
    %c18_544 = arith.constant 18 : index
    %c15_545 = arith.constant 15 : index
    %1177 = memref.load %arg2[%c18_544, %c15_545] : memref<20x21xf32, #tpu.memory_space<smem>>
    %1178 = vector.broadcast %1177 : f32 to vector<8x8xf32>
    %1179 = arith.addf %1155, %1178 : vector<8x8xf32>
    %1180 = tpu.concatenate %1158, %1161, %1164, %1167, %1170, %1173, %1176, %1179 in 0 : vector<8x8xf32>, vector<8x8xf32>, vector<8x8xf32>, vector<8x8xf32>, vector<8x8xf32>, vector<8x8xf32>, vector<8x8xf32>, vector<8x8xf32> -> vector<64x8xf32>
    %c0_546 = arith.constant 0 : index
    %c0_547 = arith.constant 0 : index
    %1181 = vector.load %arg9[%c0_546, %c0_547] : memref<4x96xf32, #tpu.memory_space<vmem>>, vector<1x96xf32>
    %c1_548 = arith.constant 1 : index
    %c0_549 = arith.constant 0 : index
    %1182 = vector.load %arg9[%c1_548, %c0_549] : memref<4x96xf32, #tpu.memory_space<vmem>>, vector<1x96xf32>
    %c2_550 = arith.constant 2 : index
    %c0_551 = arith.constant 0 : index
    %1183 = vector.load %arg9[%c2_550, %c0_551] : memref<4x96xf32, #tpu.memory_space<vmem>>, vector<1x96xf32>
    %c3_552 = arith.constant 3 : index
    %c0_553 = arith.constant 0 : index
    %1184 = vector.load %arg9[%c3_552, %c0_553] : memref<4x96xf32, #tpu.memory_space<vmem>>, vector<1x96xf32>
    %c0_554 = arith.constant 0 : index
    %c0_555 = arith.constant 0 : index
    %1185 = vector.load %arg5[%c0_554, %c0_555] : memref<8x96xf32, #tpu.memory_space<vmem>>, vector<8x96xf32>
    %cst_556 = arith.constant dense<0.000000e+00> : vector<64x96xf32>
    %1186 = tpu.matmul %1180, %1185, %cst_556 {dimension_numbers = #tpu.dot_dimension_numbers<[1], [0], [0], [1], [0, 0, 1, 1], [], []>} : vector<64x8xf32>, vector<8x96xf32>, vector<64x96xf32> -> vector<64x96xf32>
    %1187 = vector.broadcast %1181 : vector<1x96xf32> to vector<64x96xf32>
    %1188 = arith.addf %1186, %1187 : vector<64x96xf32>
    %c0_557 = arith.constant 0 : index
    %c0_558 = arith.constant 0 : index
    %1189 = vector.load %arg6[%c0_557, %c0_558] : memref<8x96xf32, #tpu.memory_space<vmem>>, vector<8x96xf32>
    %cst_559 = arith.constant dense<0.000000e+00> : vector<64x96xf32>
    %1190 = tpu.matmul %1180, %1189, %cst_559 {dimension_numbers = #tpu.dot_dimension_numbers<[1], [0], [0], [1], [0, 0, 1, 1], [], []>} : vector<64x8xf32>, vector<8x96xf32>, vector<64x96xf32> -> vector<64x96xf32>
    %1191 = vector.broadcast %1183 : vector<1x96xf32> to vector<64x96xf32>
    %1192 = arith.addf %1190, %1191 : vector<64x96xf32>
    %1193 = vector.extract_strided_slice %1188 {offsets = [0, 0], sizes = [64, 32], strides = [1, 1]} : vector<64x96xf32> to vector<64x32xf32>
    %1194 = vector.extract_strided_slice %1188 {offsets = [0, 32], sizes = [64, 32], strides = [1, 1]} : vector<64x96xf32> to vector<64x32xf32>
    %1195 = vector.extract_strided_slice %1188 {offsets = [0, 64], sizes = [64, 32], strides = [1, 1]} : vector<64x96xf32> to vector<64x32xf32>
    %1196 = vector.extract_strided_slice %1192 {offsets = [0, 0], sizes = [64, 32], strides = [1, 1]} : vector<64x96xf32> to vector<64x32xf32>
    %1197 = vector.extract_strided_slice %1192 {offsets = [0, 32], sizes = [64, 32], strides = [1, 1]} : vector<64x96xf32> to vector<64x32xf32>
    %1198 = vector.extract_strided_slice %1192 {offsets = [0, 64], sizes = [64, 32], strides = [1, 1]} : vector<64x96xf32> to vector<64x32xf32>
    %c0_560 = arith.constant 0 : index
    %c0_561 = arith.constant 0 : index
    %1199 = vector.load %arg7[%c0_560, %c0_561] : memref<32x96xf32, #tpu.memory_space<vmem>>, vector<32x96xf32>
    %c0_562 = arith.constant 0 : index
    %c0_563 = arith.constant 0 : index
    %1200 = vector.load %arg8[%c0_562, %c0_563] : memref<32x96xf32, #tpu.memory_space<vmem>>, vector<32x96xf32>
    %cst_564 = arith.constant 0.000000e+00 : f32
    %1201 = vector.broadcast %cst_564 : f32 to vector<8x32xf32>
    %cst_565 = arith.constant 0.000000e+00 : f32
    %1202 = vector.broadcast %cst_565 : f32 to vector<8x32xf32>
    %cst_566 = arith.constant dense<0.000000e+00> : vector<8x96xf32>
    %1203 = tpu.matmul %1201, %1199, %cst_566 {dimension_numbers = #tpu.dot_dimension_numbers<[1], [0], [0], [1], [0, 0, 1, 1], [], []>} : vector<8x32xf32>, vector<32x96xf32>, vector<8x96xf32> -> vector<8x96xf32>
    %1204 = vector.broadcast %1182 : vector<1x96xf32> to vector<8x96xf32>
    %1205 = arith.addf %1203, %1204 : vector<8x96xf32>
    %1206 = vector.extract_strided_slice %1193 {offsets = [0, 0], sizes = [8, 32], strides = [1, 1]} : vector<64x32xf32> to vector<8x32xf32>
    %1207 = vector.extract_strided_slice %1205 {offsets = [0, 0], sizes = [8, 32], strides = [1, 1]} : vector<8x96xf32> to vector<8x32xf32>
    %1208 = arith.addf %1206, %1207 : vector<8x32xf32>
    %1209 = arith.negf %1208 : vector<8x32xf32>
    %1210 = math.exp %1209 : vector<8x32xf32>
    %cst_567 = arith.constant 1.000000e+00 : f32
    %1211 = vector.broadcast %cst_567 : f32 to vector<8x32xf32>
    %1212 = arith.addf %1211, %1210 : vector<8x32xf32>
    %1213 = arith.divf %1211, %1212 : vector<8x32xf32>
    %1214 = vector.extract_strided_slice %1194 {offsets = [0, 0], sizes = [8, 32], strides = [1, 1]} : vector<64x32xf32> to vector<8x32xf32>
    %1215 = vector.extract_strided_slice %1205 {offsets = [0, 32], sizes = [8, 32], strides = [1, 1]} : vector<8x96xf32> to vector<8x32xf32>
    %1216 = arith.addf %1214, %1215 : vector<8x32xf32>
    %1217 = arith.negf %1216 : vector<8x32xf32>
    %1218 = math.exp %1217 : vector<8x32xf32>
    %cst_568 = arith.constant 1.000000e+00 : f32
    %1219 = vector.broadcast %cst_568 : f32 to vector<8x32xf32>
    %1220 = arith.addf %1219, %1218 : vector<8x32xf32>
    %1221 = arith.divf %1219, %1220 : vector<8x32xf32>
    %1222 = vector.extract_strided_slice %1195 {offsets = [0, 0], sizes = [8, 32], strides = [1, 1]} : vector<64x32xf32> to vector<8x32xf32>
    %1223 = vector.extract_strided_slice %1205 {offsets = [0, 64], sizes = [8, 32], strides = [1, 1]} : vector<8x96xf32> to vector<8x32xf32>
    %1224 = arith.mulf %1213, %1223 : vector<8x32xf32>
    %1225 = arith.addf %1222, %1224 : vector<8x32xf32>
    %1226 = math.tanh %1225 : vector<8x32xf32>
    %cst_569 = arith.constant 1.000000e+00 : f32
    %1227 = vector.broadcast %cst_569 : f32 to vector<8x32xf32>
    %1228 = arith.subf %1227, %1221 : vector<8x32xf32>
    %1229 = arith.mulf %1228, %1226 : vector<8x32xf32>
    %1230 = arith.mulf %1221, %1201 : vector<8x32xf32>
    %1231 = arith.addf %1229, %1230 : vector<8x32xf32>
    %cst_570 = arith.constant dense<0.000000e+00> : vector<8x96xf32>
    %1232 = tpu.matmul %1202, %1200, %cst_570 {dimension_numbers = #tpu.dot_dimension_numbers<[1], [0], [0], [1], [0, 0, 1, 1], [], []>} : vector<8x32xf32>, vector<32x96xf32>, vector<8x96xf32> -> vector<8x96xf32>
    %1233 = vector.broadcast %1184 : vector<1x96xf32> to vector<8x96xf32>
    %1234 = arith.addf %1232, %1233 : vector<8x96xf32>
    %1235 = vector.extract_strided_slice %1196 {offsets = [56, 0], sizes = [8, 32], strides = [1, 1]} : vector<64x32xf32> to vector<8x32xf32>
    %1236 = vector.extract_strided_slice %1234 {offsets = [0, 0], sizes = [8, 32], strides = [1, 1]} : vector<8x96xf32> to vector<8x32xf32>
    %1237 = arith.addf %1235, %1236 : vector<8x32xf32>
    %1238 = arith.negf %1237 : vector<8x32xf32>
    %1239 = math.exp %1238 : vector<8x32xf32>
    %cst_571 = arith.constant 1.000000e+00 : f32
    %1240 = vector.broadcast %cst_571 : f32 to vector<8x32xf32>
    %1241 = arith.addf %1240, %1239 : vector<8x32xf32>
    %1242 = arith.divf %1240, %1241 : vector<8x32xf32>
    %1243 = vector.extract_strided_slice %1197 {offsets = [56, 0], sizes = [8, 32], strides = [1, 1]} : vector<64x32xf32> to vector<8x32xf32>
    %1244 = vector.extract_strided_slice %1234 {offsets = [0, 32], sizes = [8, 32], strides = [1, 1]} : vector<8x96xf32> to vector<8x32xf32>
    %1245 = arith.addf %1243, %1244 : vector<8x32xf32>
    %1246 = arith.negf %1245 : vector<8x32xf32>
    %1247 = math.exp %1246 : vector<8x32xf32>
    %cst_572 = arith.constant 1.000000e+00 : f32
    %1248 = vector.broadcast %cst_572 : f32 to vector<8x32xf32>
    %1249 = arith.addf %1248, %1247 : vector<8x32xf32>
    %1250 = arith.divf %1248, %1249 : vector<8x32xf32>
    %1251 = vector.extract_strided_slice %1198 {offsets = [56, 0], sizes = [8, 32], strides = [1, 1]} : vector<64x32xf32> to vector<8x32xf32>
    %1252 = vector.extract_strided_slice %1234 {offsets = [0, 64], sizes = [8, 32], strides = [1, 1]} : vector<8x96xf32> to vector<8x32xf32>
    %1253 = arith.mulf %1242, %1252 : vector<8x32xf32>
    %1254 = arith.addf %1251, %1253 : vector<8x32xf32>
    %1255 = math.tanh %1254 : vector<8x32xf32>
    %cst_573 = arith.constant 1.000000e+00 : f32
    %1256 = vector.broadcast %cst_573 : f32 to vector<8x32xf32>
    %1257 = arith.subf %1256, %1250 : vector<8x32xf32>
    %1258 = arith.mulf %1257, %1255 : vector<8x32xf32>
    %1259 = arith.mulf %1250, %1202 : vector<8x32xf32>
    %1260 = arith.addf %1258, %1259 : vector<8x32xf32>
    %c0_574 = arith.constant 0 : index
    %c0_575 = arith.constant 0 : index
    %c0_576 = arith.constant 0 : index
    %1261 = vector.load %arg17[%c0_574, %c0_575, %c0_576] : memref<2x64x32xf32, #tpu.memory_space<vmem>>, vector<1x8x32xf32>
    %1262 = vector.shape_cast %1261 : vector<1x8x32xf32> to vector<8x32xf32>
    %1263 = vector.shape_cast %1231 : vector<8x32xf32> to vector<1x8x32xf32>
    tpu.vector_store %arg17[%c0_574, %c0_575, %c0_576], %1263 {strides = array<i32>} : memref<2x64x32xf32, #tpu.memory_space<vmem>>, vector<1x8x32xf32>,
    %c1_577 = arith.constant 1 : index
    %c56 = arith.constant 56 : index
    %c0_578 = arith.constant 0 : index
    %1264 = vector.load %arg17[%c1_577, %c56, %c0_578] : memref<2x64x32xf32, #tpu.memory_space<vmem>>, vector<1x8x32xf32>
    %1265 = vector.shape_cast %1264 : vector<1x8x32xf32> to vector<8x32xf32>
    %1266 = vector.shape_cast %1260 : vector<8x32xf32> to vector<1x8x32xf32>
    tpu.vector_store %arg17[%c1_577, %c56, %c0_578], %1266 {strides = array<i32>} : memref<2x64x32xf32, #tpu.memory_space<vmem>>, vector<1x8x32xf32>,
    %cst_579 = arith.constant dense<0.000000e+00> : vector<8x96xf32>
    %1267 = tpu.matmul %1231, %1199, %cst_579 {dimension_numbers = #tpu.dot_dimension_numbers<[1], [0], [0], [1], [0, 0, 1, 1], [], []>} : vector<8x32xf32>, vector<32x96xf32>, vector<8x96xf32> -> vector<8x96xf32>
    %1268 = vector.broadcast %1182 : vector<1x96xf32> to vector<8x96xf32>
    %1269 = arith.addf %1267, %1268 : vector<8x96xf32>
    %1270 = vector.extract_strided_slice %1193 {offsets = [8, 0], sizes = [8, 32], strides = [1, 1]} : vector<64x32xf32> to vector<8x32xf32>
    %1271 = vector.extract_strided_slice %1269 {offsets = [0, 0], sizes = [8, 32], strides = [1, 1]} : vector<8x96xf32> to vector<8x32xf32>
    %1272 = arith.addf %1270, %1271 : vector<8x32xf32>
    %1273 = arith.negf %1272 : vector<8x32xf32>
    %1274 = math.exp %1273 : vector<8x32xf32>
    %cst_580 = arith.constant 1.000000e+00 : f32
    %1275 = vector.broadcast %cst_580 : f32 to vector<8x32xf32>
    %1276 = arith.addf %1275, %1274 : vector<8x32xf32>
    %1277 = arith.divf %1275, %1276 : vector<8x32xf32>
    %1278 = vector.extract_strided_slice %1194 {offsets = [8, 0], sizes = [8, 32], strides = [1, 1]} : vector<64x32xf32> to vector<8x32xf32>
    %1279 = vector.extract_strided_slice %1269 {offsets = [0, 32], sizes = [8, 32], strides = [1, 1]} : vector<8x96xf32> to vector<8x32xf32>
    %1280 = arith.addf %1278, %1279 : vector<8x32xf32>
    %1281 = arith.negf %1280 : vector<8x32xf32>
    %1282 = math.exp %1281 : vector<8x32xf32>
    %cst_581 = arith.constant 1.000000e+00 : f32
    %1283 = vector.broadcast %cst_581 : f32 to vector<8x32xf32>
    %1284 = arith.addf %1283, %1282 : vector<8x32xf32>
    %1285 = arith.divf %1283, %1284 : vector<8x32xf32>
    %1286 = vector.extract_strided_slice %1195 {offsets = [8, 0], sizes = [8, 32], strides = [1, 1]} : vector<64x32xf32> to vector<8x32xf32>
    %1287 = vector.extract_strided_slice %1269 {offsets = [0, 64], sizes = [8, 32], strides = [1, 1]} : vector<8x96xf32> to vector<8x32xf32>
    %1288 = arith.mulf %1277, %1287 : vector<8x32xf32>
    %1289 = arith.addf %1286, %1288 : vector<8x32xf32>
    %1290 = math.tanh %1289 : vector<8x32xf32>
    %cst_582 = arith.constant 1.000000e+00 : f32
    %1291 = vector.broadcast %cst_582 : f32 to vector<8x32xf32>
    %1292 = arith.subf %1291, %1285 : vector<8x32xf32>
    %1293 = arith.mulf %1292, %1290 : vector<8x32xf32>
    %1294 = arith.mulf %1285, %1231 : vector<8x32xf32>
    %1295 = arith.addf %1293, %1294 : vector<8x32xf32>
    %cst_583 = arith.constant dense<0.000000e+00> : vector<8x96xf32>
    %1296 = tpu.matmul %1260, %1200, %cst_583 {dimension_numbers = #tpu.dot_dimension_numbers<[1], [0], [0], [1], [0, 0, 1, 1], [], []>} : vector<8x32xf32>, vector<32x96xf32>, vector<8x96xf32> -> vector<8x96xf32>
    %1297 = vector.broadcast %1184 : vector<1x96xf32> to vector<8x96xf32>
    %1298 = arith.addf %1296, %1297 : vector<8x96xf32>
    %1299 = vector.extract_strided_slice %1196 {offsets = [48, 0], sizes = [8, 32], strides = [1, 1]} : vector<64x32xf32> to vector<8x32xf32>
    %1300 = vector.extract_strided_slice %1298 {offsets = [0, 0], sizes = [8, 32], strides = [1, 1]} : vector<8x96xf32> to vector<8x32xf32>
    %1301 = arith.addf %1299, %1300 : vector<8x32xf32>
    %1302 = arith.negf %1301 : vector<8x32xf32>
    %1303 = math.exp %1302 : vector<8x32xf32>
    %cst_584 = arith.constant 1.000000e+00 : f32
    %1304 = vector.broadcast %cst_584 : f32 to vector<8x32xf32>
    %1305 = arith.addf %1304, %1303 : vector<8x32xf32>
    %1306 = arith.divf %1304, %1305 : vector<8x32xf32>
    %1307 = vector.extract_strided_slice %1197 {offsets = [48, 0], sizes = [8, 32], strides = [1, 1]} : vector<64x32xf32> to vector<8x32xf32>
    %1308 = vector.extract_strided_slice %1298 {offsets = [0, 32], sizes = [8, 32], strides = [1, 1]} : vector<8x96xf32> to vector<8x32xf32>
    %1309 = arith.addf %1307, %1308 : vector<8x32xf32>
    %1310 = arith.negf %1309 : vector<8x32xf32>
    %1311 = math.exp %1310 : vector<8x32xf32>
    %cst_585 = arith.constant 1.000000e+00 : f32
    %1312 = vector.broadcast %cst_585 : f32 to vector<8x32xf32>
    %1313 = arith.addf %1312, %1311 : vector<8x32xf32>
    %1314 = arith.divf %1312, %1313 : vector<8x32xf32>
    %1315 = vector.extract_strided_slice %1198 {offsets = [48, 0], sizes = [8, 32], strides = [1, 1]} : vector<64x32xf32> to vector<8x32xf32>
    %1316 = vector.extract_strided_slice %1298 {offsets = [0, 64], sizes = [8, 32], strides = [1, 1]} : vector<8x96xf32> to vector<8x32xf32>
    %1317 = arith.mulf %1306, %1316 : vector<8x32xf32>
    %1318 = arith.addf %1315, %1317 : vector<8x32xf32>
    %1319 = math.tanh %1318 : vector<8x32xf32>
    %cst_586 = arith.constant 1.000000e+00 : f32
    %1320 = vector.broadcast %cst_586 : f32 to vector<8x32xf32>
    %1321 = arith.subf %1320, %1314 : vector<8x32xf32>
    %1322 = arith.mulf %1321, %1319 : vector<8x32xf32>
    %1323 = arith.mulf %1314, %1260 : vector<8x32xf32>
    %1324 = arith.addf %1322, %1323 : vector<8x32xf32>
    %c0_587 = arith.constant 0 : index
    %c8_588 = arith.constant 8 : index
    %c0_589 = arith.constant 0 : index
    %1325 = vector.load %arg17[%c0_587, %c8_588, %c0_589] : memref<2x64x32xf32, #tpu.memory_space<vmem>>, vector<1x8x32xf32>
    %1326 = vector.shape_cast %1325 : vector<1x8x32xf32> to vector<8x32xf32>
    %1327 = vector.shape_cast %1295 : vector<8x32xf32> to vector<1x8x32xf32>
    tpu.vector_store %arg17[%c0_587, %c8_588, %c0_589], %1327 {strides = array<i32>} : memref<2x64x32xf32, #tpu.memory_space<vmem>>, vector<1x8x32xf32>,
    %c1_590 = arith.constant 1 : index
    %c48 = arith.constant 48 : index
    %c0_591 = arith.constant 0 : index
    %1328 = vector.load %arg17[%c1_590, %c48, %c0_591] : memref<2x64x32xf32, #tpu.memory_space<vmem>>, vector<1x8x32xf32>
    %1329 = vector.shape_cast %1328 : vector<1x8x32xf32> to vector<8x32xf32>
    %1330 = vector.shape_cast %1324 : vector<8x32xf32> to vector<1x8x32xf32>
    tpu.vector_store %arg17[%c1_590, %c48, %c0_591], %1330 {strides = array<i32>} : memref<2x64x32xf32, #tpu.memory_space<vmem>>, vector<1x8x32xf32>,
    %cst_592 = arith.constant dense<0.000000e+00> : vector<8x96xf32>
    %1331 = tpu.matmul %1295, %1199, %cst_592 {dimension_numbers = #tpu.dot_dimension_numbers<[1], [0], [0], [1], [0, 0, 1, 1], [], []>} : vector<8x32xf32>, vector<32x96xf32>, vector<8x96xf32> -> vector<8x96xf32>
    %1332 = vector.broadcast %1182 : vector<1x96xf32> to vector<8x96xf32>
    %1333 = arith.addf %1331, %1332 : vector<8x96xf32>
    %1334 = vector.extract_strided_slice %1193 {offsets = [16, 0], sizes = [8, 32], strides = [1, 1]} : vector<64x32xf32> to vector<8x32xf32>
    %1335 = vector.extract_strided_slice %1333 {offsets = [0, 0], sizes = [8, 32], strides = [1, 1]} : vector<8x96xf32> to vector<8x32xf32>
    %1336 = arith.addf %1334, %1335 : vector<8x32xf32>
    %1337 = arith.negf %1336 : vector<8x32xf32>
    %1338 = math.exp %1337 : vector<8x32xf32>
    %cst_593 = arith.constant 1.000000e+00 : f32
    %1339 = vector.broadcast %cst_593 : f32 to vector<8x32xf32>
    %1340 = arith.addf %1339, %1338 : vector<8x32xf32>
    %1341 = arith.divf %1339, %1340 : vector<8x32xf32>
    %1342 = vector.extract_strided_slice %1194 {offsets = [16, 0], sizes = [8, 32], strides = [1, 1]} : vector<64x32xf32> to vector<8x32xf32>
    %1343 = vector.extract_strided_slice %1333 {offsets = [0, 32], sizes = [8, 32], strides = [1, 1]} : vector<8x96xf32> to vector<8x32xf32>
    %1344 = arith.addf %1342, %1343 : vector<8x32xf32>
    %1345 = arith.negf %1344 : vector<8x32xf32>
    %1346 = math.exp %1345 : vector<8x32xf32>
    %cst_594 = arith.constant 1.000000e+00 : f32
    %1347 = vector.broadcast %cst_594 : f32 to vector<8x32xf32>
    %1348 = arith.addf %1347, %1346 : vector<8x32xf32>
    %1349 = arith.divf %1347, %1348 : vector<8x32xf32>
    %1350 = vector.extract_strided_slice %1195 {offsets = [16, 0], sizes = [8, 32], strides = [1, 1]} : vector<64x32xf32> to vector<8x32xf32>
    %1351 = vector.extract_strided_slice %1333 {offsets = [0, 64], sizes = [8, 32], strides = [1, 1]} : vector<8x96xf32> to vector<8x32xf32>
    %1352 = arith.mulf %1341, %1351 : vector<8x32xf32>
    %1353 = arith.addf %1350, %1352 : vector<8x32xf32>
    %1354 = math.tanh %1353 : vector<8x32xf32>
    %cst_595 = arith.constant 1.000000e+00 : f32
    %1355 = vector.broadcast %cst_595 : f32 to vector<8x32xf32>
    %1356 = arith.subf %1355, %1349 : vector<8x32xf32>
    %1357 = arith.mulf %1356, %1354 : vector<8x32xf32>
    %1358 = arith.mulf %1349, %1295 : vector<8x32xf32>
    %1359 = arith.addf %1357, %1358 : vector<8x32xf32>
    %cst_596 = arith.constant dense<0.000000e+00> : vector<8x96xf32>
    %1360 = tpu.matmul %1324, %1200, %cst_596 {dimension_numbers = #tpu.dot_dimension_numbers<[1], [0], [0], [1], [0, 0, 1, 1], [], []>} : vector<8x32xf32>, vector<32x96xf32>, vector<8x96xf32> -> vector<8x96xf32>
    %1361 = vector.broadcast %1184 : vector<1x96xf32> to vector<8x96xf32>
    %1362 = arith.addf %1360, %1361 : vector<8x96xf32>
    %1363 = vector.extract_strided_slice %1196 {offsets = [40, 0], sizes = [8, 32], strides = [1, 1]} : vector<64x32xf32> to vector<8x32xf32>
    %1364 = vector.extract_strided_slice %1362 {offsets = [0, 0], sizes = [8, 32], strides = [1, 1]} : vector<8x96xf32> to vector<8x32xf32>
    %1365 = arith.addf %1363, %1364 : vector<8x32xf32>
    %1366 = arith.negf %1365 : vector<8x32xf32>
    %1367 = math.exp %1366 : vector<8x32xf32>
    %cst_597 = arith.constant 1.000000e+00 : f32
    %1368 = vector.broadcast %cst_597 : f32 to vector<8x32xf32>
    %1369 = arith.addf %1368, %1367 : vector<8x32xf32>
    %1370 = arith.divf %1368, %1369 : vector<8x32xf32>
    %1371 = vector.extract_strided_slice %1197 {offsets = [40, 0], sizes = [8, 32], strides = [1, 1]} : vector<64x32xf32> to vector<8x32xf32>
    %1372 = vector.extract_strided_slice %1362 {offsets = [0, 32], sizes = [8, 32], strides = [1, 1]} : vector<8x96xf32> to vector<8x32xf32>
    %1373 = arith.addf %1371, %1372 : vector<8x32xf32>
    %1374 = arith.negf %1373 : vector<8x32xf32>
    %1375 = math.exp %1374 : vector<8x32xf32>
    %cst_598 = arith.constant 1.000000e+00 : f32
    %1376 = vector.broadcast %cst_598 : f32 to vector<8x32xf32>
    %1377 = arith.addf %1376, %1375 : vector<8x32xf32>
    %1378 = arith.divf %1376, %1377 : vector<8x32xf32>
    %1379 = vector.extract_strided_slice %1198 {offsets = [40, 0], sizes = [8, 32], strides = [1, 1]} : vector<64x32xf32> to vector<8x32xf32>
    %1380 = vector.extract_strided_slice %1362 {offsets = [0, 64], sizes = [8, 32], strides = [1, 1]} : vector<8x96xf32> to vector<8x32xf32>
    %1381 = arith.mulf %1370, %1380 : vector<8x32xf32>
    %1382 = arith.addf %1379, %1381 : vector<8x32xf32>
    %1383 = math.tanh %1382 : vector<8x32xf32>
    %cst_599 = arith.constant 1.000000e+00 : f32
    %1384 = vector.broadcast %cst_599 : f32 to vector<8x32xf32>
    %1385 = arith.subf %1384, %1378 : vector<8x32xf32>
    %1386 = arith.mulf %1385, %1383 : vector<8x32xf32>
    %1387 = arith.mulf %1378, %1324 : vector<8x32xf32>
    %1388 = arith.addf %1386, %1387 : vector<8x32xf32>
    %c0_600 = arith.constant 0 : index
    %c16_601 = arith.constant 16 : index
    %c0_602 = arith.constant 0 : index
    %1389 = vector.load %arg17[%c0_600, %c16_601, %c0_602] : memref<2x64x32xf32, #tpu.memory_space<vmem>>, vector<1x8x32xf32>
    %1390 = vector.shape_cast %1389 : vector<1x8x32xf32> to vector<8x32xf32>
    %1391 = vector.shape_cast %1359 : vector<8x32xf32> to vector<1x8x32xf32>
    tpu.vector_store %arg17[%c0_600, %c16_601, %c0_602], %1391 {strides = array<i32>} : memref<2x64x32xf32, #tpu.memory_space<vmem>>, vector<1x8x32xf32>,
    %c1_603 = arith.constant 1 : index
    %c40 = arith.constant 40 : index
    %c0_604 = arith.constant 0 : index
    %1392 = vector.load %arg17[%c1_603, %c40, %c0_604] : memref<2x64x32xf32, #tpu.memory_space<vmem>>, vector<1x8x32xf32>
    %1393 = vector.shape_cast %1392 : vector<1x8x32xf32> to vector<8x32xf32>
    %1394 = vector.shape_cast %1388 : vector<8x32xf32> to vector<1x8x32xf32>
    tpu.vector_store %arg17[%c1_603, %c40, %c0_604], %1394 {strides = array<i32>} : memref<2x64x32xf32, #tpu.memory_space<vmem>>, vector<1x8x32xf32>,
    %cst_605 = arith.constant dense<0.000000e+00> : vector<8x96xf32>
    %1395 = tpu.matmul %1359, %1199, %cst_605 {dimension_numbers = #tpu.dot_dimension_numbers<[1], [0], [0], [1], [0, 0, 1, 1], [], []>} : vector<8x32xf32>, vector<32x96xf32>, vector<8x96xf32> -> vector<8x96xf32>
    %1396 = vector.broadcast %1182 : vector<1x96xf32> to vector<8x96xf32>
    %1397 = arith.addf %1395, %1396 : vector<8x96xf32>
    %1398 = vector.extract_strided_slice %1193 {offsets = [24, 0], sizes = [8, 32], strides = [1, 1]} : vector<64x32xf32> to vector<8x32xf32>
    %1399 = vector.extract_strided_slice %1397 {offsets = [0, 0], sizes = [8, 32], strides = [1, 1]} : vector<8x96xf32> to vector<8x32xf32>
    %1400 = arith.addf %1398, %1399 : vector<8x32xf32>
    %1401 = arith.negf %1400 : vector<8x32xf32>
    %1402 = math.exp %1401 : vector<8x32xf32>
    %cst_606 = arith.constant 1.000000e+00 : f32
    %1403 = vector.broadcast %cst_606 : f32 to vector<8x32xf32>
    %1404 = arith.addf %1403, %1402 : vector<8x32xf32>
    %1405 = arith.divf %1403, %1404 : vector<8x32xf32>
    %1406 = vector.extract_strided_slice %1194 {offsets = [24, 0], sizes = [8, 32], strides = [1, 1]} : vector<64x32xf32> to vector<8x32xf32>
    %1407 = vector.extract_strided_slice %1397 {offsets = [0, 32], sizes = [8, 32], strides = [1, 1]} : vector<8x96xf32> to vector<8x32xf32>
    %1408 = arith.addf %1406, %1407 : vector<8x32xf32>
    %1409 = arith.negf %1408 : vector<8x32xf32>
    %1410 = math.exp %1409 : vector<8x32xf32>
    %cst_607 = arith.constant 1.000000e+00 : f32
    %1411 = vector.broadcast %cst_607 : f32 to vector<8x32xf32>
    %1412 = arith.addf %1411, %1410 : vector<8x32xf32>
    %1413 = arith.divf %1411, %1412 : vector<8x32xf32>
    %1414 = vector.extract_strided_slice %1195 {offsets = [24, 0], sizes = [8, 32], strides = [1, 1]} : vector<64x32xf32> to vector<8x32xf32>
    %1415 = vector.extract_strided_slice %1397 {offsets = [0, 64], sizes = [8, 32], strides = [1, 1]} : vector<8x96xf32> to vector<8x32xf32>
    %1416 = arith.mulf %1405, %1415 : vector<8x32xf32>
    %1417 = arith.addf %1414, %1416 : vector<8x32xf32>
    %1418 = math.tanh %1417 : vector<8x32xf32>
    %cst_608 = arith.constant 1.000000e+00 : f32
    %1419 = vector.broadcast %cst_608 : f32 to vector<8x32xf32>
    %1420 = arith.subf %1419, %1413 : vector<8x32xf32>
    %1421 = arith.mulf %1420, %1418 : vector<8x32xf32>
    %1422 = arith.mulf %1413, %1359 : vector<8x32xf32>
    %1423 = arith.addf %1421, %1422 : vector<8x32xf32>
    %cst_609 = arith.constant dense<0.000000e+00> : vector<8x96xf32>
    %1424 = tpu.matmul %1388, %1200, %cst_609 {dimension_numbers = #tpu.dot_dimension_numbers<[1], [0], [0], [1], [0, 0, 1, 1], [], []>} : vector<8x32xf32>, vector<32x96xf32>, vector<8x96xf32> -> vector<8x96xf32>
    %1425 = vector.broadcast %1184 : vector<1x96xf32> to vector<8x96xf32>
    %1426 = arith.addf %1424, %1425 : vector<8x96xf32>
    %1427 = vector.extract_strided_slice %1196 {offsets = [32, 0], sizes = [8, 32], strides = [1, 1]} : vector<64x32xf32> to vector<8x32xf32>
    %1428 = vector.extract_strided_slice %1426 {offsets = [0, 0], sizes = [8, 32], strides = [1, 1]} : vector<8x96xf32> to vector<8x32xf32>
    %1429 = arith.addf %1427, %1428 : vector<8x32xf32>
    %1430 = arith.negf %1429 : vector<8x32xf32>
    %1431 = math.exp %1430 : vector<8x32xf32>
    %cst_610 = arith.constant 1.000000e+00 : f32
    %1432 = vector.broadcast %cst_610 : f32 to vector<8x32xf32>
    %1433 = arith.addf %1432, %1431 : vector<8x32xf32>
    %1434 = arith.divf %1432, %1433 : vector<8x32xf32>
    %1435 = vector.extract_strided_slice %1197 {offsets = [32, 0], sizes = [8, 32], strides = [1, 1]} : vector<64x32xf32> to vector<8x32xf32>
    %1436 = vector.extract_strided_slice %1426 {offsets = [0, 32], sizes = [8, 32], strides = [1, 1]} : vector<8x96xf32> to vector<8x32xf32>
    %1437 = arith.addf %1435, %1436 : vector<8x32xf32>
    %1438 = arith.negf %1437 : vector<8x32xf32>
    %1439 = math.exp %1438 : vector<8x32xf32>
    %cst_611 = arith.constant 1.000000e+00 : f32
    %1440 = vector.broadcast %cst_611 : f32 to vector<8x32xf32>
    %1441 = arith.addf %1440, %1439 : vector<8x32xf32>
    %1442 = arith.divf %1440, %1441 : vector<8x32xf32>
    %1443 = vector.extract_strided_slice %1198 {offsets = [32, 0], sizes = [8, 32], strides = [1, 1]} : vector<64x32xf32> to vector<8x32xf32>
    %1444 = vector.extract_strided_slice %1426 {offsets = [0, 64], sizes = [8, 32], strides = [1, 1]} : vector<8x96xf32> to vector<8x32xf32>
    %1445 = arith.mulf %1434, %1444 : vector<8x32xf32>
    %1446 = arith.addf %1443, %1445 : vector<8x32xf32>
    %1447 = math.tanh %1446 : vector<8x32xf32>
    %cst_612 = arith.constant 1.000000e+00 : f32
    %1448 = vector.broadcast %cst_612 : f32 to vector<8x32xf32>
    %1449 = arith.subf %1448, %1442 : vector<8x32xf32>
    %1450 = arith.mulf %1449, %1447 : vector<8x32xf32>
    %1451 = arith.mulf %1442, %1388 : vector<8x32xf32>
    %1452 = arith.addf %1450, %1451 : vector<8x32xf32>
    %c0_613 = arith.constant 0 : index
    %c24 = arith.constant 24 : index
    %c0_614 = arith.constant 0 : index
    %1453 = vector.load %arg17[%c0_613, %c24, %c0_614] : memref<2x64x32xf32, #tpu.memory_space<vmem>>, vector<1x8x32xf32>
    %1454 = vector.shape_cast %1453 : vector<1x8x32xf32> to vector<8x32xf32>
    %1455 = vector.shape_cast %1423 : vector<8x32xf32> to vector<1x8x32xf32>
    tpu.vector_store %arg17[%c0_613, %c24, %c0_614], %1455 {strides = array<i32>} : memref<2x64x32xf32, #tpu.memory_space<vmem>>, vector<1x8x32xf32>,
    %c1_615 = arith.constant 1 : index
    %c32 = arith.constant 32 : index
    %c0_616 = arith.constant 0 : index
    %1456 = vector.load %arg17[%c1_615, %c32, %c0_616] : memref<2x64x32xf32, #tpu.memory_space<vmem>>, vector<1x8x32xf32>
    %1457 = vector.shape_cast %1456 : vector<1x8x32xf32> to vector<8x32xf32>
    %1458 = vector.shape_cast %1452 : vector<8x32xf32> to vector<1x8x32xf32>
    tpu.vector_store %arg17[%c1_615, %c32, %c0_616], %1458 {strides = array<i32>} : memref<2x64x32xf32, #tpu.memory_space<vmem>>, vector<1x8x32xf32>,
    %cst_617 = arith.constant dense<0.000000e+00> : vector<8x96xf32>
    %1459 = tpu.matmul %1423, %1199, %cst_617 {dimension_numbers = #tpu.dot_dimension_numbers<[1], [0], [0], [1], [0, 0, 1, 1], [], []>} : vector<8x32xf32>, vector<32x96xf32>, vector<8x96xf32> -> vector<8x96xf32>
    %1460 = vector.broadcast %1182 : vector<1x96xf32> to vector<8x96xf32>
    %1461 = arith.addf %1459, %1460 : vector<8x96xf32>
    %1462 = vector.extract_strided_slice %1193 {offsets = [32, 0], sizes = [8, 32], strides = [1, 1]} : vector<64x32xf32> to vector<8x32xf32>
    %1463 = vector.extract_strided_slice %1461 {offsets = [0, 0], sizes = [8, 32], strides = [1, 1]} : vector<8x96xf32> to vector<8x32xf32>
    %1464 = arith.addf %1462, %1463 : vector<8x32xf32>
    %1465 = arith.negf %1464 : vector<8x32xf32>
    %1466 = math.exp %1465 : vector<8x32xf32>
    %cst_618 = arith.constant 1.000000e+00 : f32
    %1467 = vector.broadcast %cst_618 : f32 to vector<8x32xf32>
    %1468 = arith.addf %1467, %1466 : vector<8x32xf32>
    %1469 = arith.divf %1467, %1468 : vector<8x32xf32>
    %1470 = vector.extract_strided_slice %1194 {offsets = [32, 0], sizes = [8, 32], strides = [1, 1]} : vector<64x32xf32> to vector<8x32xf32>
    %1471 = vector.extract_strided_slice %1461 {offsets = [0, 32], sizes = [8, 32], strides = [1, 1]} : vector<8x96xf32> to vector<8x32xf32>
    %1472 = arith.addf %1470, %1471 : vector<8x32xf32>
    %1473 = arith.negf %1472 : vector<8x32xf32>
    %1474 = math.exp %1473 : vector<8x32xf32>
    %cst_619 = arith.constant 1.000000e+00 : f32
    %1475 = vector.broadcast %cst_619 : f32 to vector<8x32xf32>
    %1476 = arith.addf %1475, %1474 : vector<8x32xf32>
    %1477 = arith.divf %1475, %1476 : vector<8x32xf32>
    %1478 = vector.extract_strided_slice %1195 {offsets = [32, 0], sizes = [8, 32], strides = [1, 1]} : vector<64x32xf32> to vector<8x32xf32>
    %1479 = vector.extract_strided_slice %1461 {offsets = [0, 64], sizes = [8, 32], strides = [1, 1]} : vector<8x96xf32> to vector<8x32xf32>
    %1480 = arith.mulf %1469, %1479 : vector<8x32xf32>
    %1481 = arith.addf %1478, %1480 : vector<8x32xf32>
    %1482 = math.tanh %1481 : vector<8x32xf32>
    %cst_620 = arith.constant 1.000000e+00 : f32
    %1483 = vector.broadcast %cst_620 : f32 to vector<8x32xf32>
    %1484 = arith.subf %1483, %1477 : vector<8x32xf32>
    %1485 = arith.mulf %1484, %1482 : vector<8x32xf32>
    %1486 = arith.mulf %1477, %1423 : vector<8x32xf32>
    %1487 = arith.addf %1485, %1486 : vector<8x32xf32>
    %cst_621 = arith.constant dense<0.000000e+00> : vector<8x96xf32>
    %1488 = tpu.matmul %1452, %1200, %cst_621 {dimension_numbers = #tpu.dot_dimension_numbers<[1], [0], [0], [1], [0, 0, 1, 1], [], []>} : vector<8x32xf32>, vector<32x96xf32>, vector<8x96xf32> -> vector<8x96xf32>
    %1489 = vector.broadcast %1184 : vector<1x96xf32> to vector<8x96xf32>
    %1490 = arith.addf %1488, %1489 : vector<8x96xf32>
    %1491 = vector.extract_strided_slice %1196 {offsets = [24, 0], sizes = [8, 32], strides = [1, 1]} : vector<64x32xf32> to vector<8x32xf32>
    %1492 = vector.extract_strided_slice %1490 {offsets = [0, 0], sizes = [8, 32], strides = [1, 1]} : vector<8x96xf32> to vector<8x32xf32>
    %1493 = arith.addf %1491, %1492 : vector<8x32xf32>
    %1494 = arith.negf %1493 : vector<8x32xf32>
    %1495 = math.exp %1494 : vector<8x32xf32>
    %cst_622 = arith.constant 1.000000e+00 : f32
    %1496 = vector.broadcast %cst_622 : f32 to vector<8x32xf32>
    %1497 = arith.addf %1496, %1495 : vector<8x32xf32>
    %1498 = arith.divf %1496, %1497 : vector<8x32xf32>
    %1499 = vector.extract_strided_slice %1197 {offsets = [24, 0], sizes = [8, 32], strides = [1, 1]} : vector<64x32xf32> to vector<8x32xf32>
    %1500 = vector.extract_strided_slice %1490 {offsets = [0, 32], sizes = [8, 32], strides = [1, 1]} : vector<8x96xf32> to vector<8x32xf32>
    %1501 = arith.addf %1499, %1500 : vector<8x32xf32>
    %1502 = arith.negf %1501 : vector<8x32xf32>
    %1503 = math.exp %1502 : vector<8x32xf32>
    %cst_623 = arith.constant 1.000000e+00 : f32
    %1504 = vector.broadcast %cst_623 : f32 to vector<8x32xf32>
    %1505 = arith.addf %1504, %1503 : vector<8x32xf32>
    %1506 = arith.divf %1504, %1505 : vector<8x32xf32>
    %1507 = vector.extract_strided_slice %1198 {offsets = [24, 0], sizes = [8, 32], strides = [1, 1]} : vector<64x32xf32> to vector<8x32xf32>
    %1508 = vector.extract_strided_slice %1490 {offsets = [0, 64], sizes = [8, 32], strides = [1, 1]} : vector<8x96xf32> to vector<8x32xf32>
    %1509 = arith.mulf %1498, %1508 : vector<8x32xf32>
    %1510 = arith.addf %1507, %1509 : vector<8x32xf32>
    %1511 = math.tanh %1510 : vector<8x32xf32>
    %cst_624 = arith.constant 1.000000e+00 : f32
    %1512 = vector.broadcast %cst_624 : f32 to vector<8x32xf32>
    %1513 = arith.subf %1512, %1506 : vector<8x32xf32>
    %1514 = arith.mulf %1513, %1511 : vector<8x32xf32>
    %1515 = arith.mulf %1506, %1452 : vector<8x32xf32>
    %1516 = arith.addf %1514, %1515 : vector<8x32xf32>
    %c0_625 = arith.constant 0 : index
    %c32_626 = arith.constant 32 : index
    %c0_627 = arith.constant 0 : index
    %1517 = vector.load %arg17[%c0_625, %c32_626, %c0_627] : memref<2x64x32xf32, #tpu.memory_space<vmem>>, vector<1x8x32xf32>
    %1518 = vector.shape_cast %1517 : vector<1x8x32xf32> to vector<8x32xf32>
    %1519 = vector.shape_cast %1487 : vector<8x32xf32> to vector<1x8x32xf32>
    tpu.vector_store %arg17[%c0_625, %c32_626, %c0_627], %1519 {strides = array<i32>} : memref<2x64x32xf32, #tpu.memory_space<vmem>>, vector<1x8x32xf32>,
    %c1_628 = arith.constant 1 : index
    %c24_629 = arith.constant 24 : index
    %c0_630 = arith.constant 0 : index
    %1520 = vector.load %arg17[%c1_628, %c24_629, %c0_630] : memref<2x64x32xf32, #tpu.memory_space<vmem>>, vector<1x8x32xf32>
    %1521 = vector.shape_cast %1520 : vector<1x8x32xf32> to vector<8x32xf32>
    %1522 = vector.shape_cast %1516 : vector<8x32xf32> to vector<1x8x32xf32>
    tpu.vector_store %arg17[%c1_628, %c24_629, %c0_630], %1522 {strides = array<i32>} : memref<2x64x32xf32, #tpu.memory_space<vmem>>, vector<1x8x32xf32>,
    %cst_631 = arith.constant dense<0.000000e+00> : vector<8x96xf32>
    %1523 = tpu.matmul %1487, %1199, %cst_631 {dimension_numbers = #tpu.dot_dimension_numbers<[1], [0], [0], [1], [0, 0, 1, 1], [], []>} : vector<8x32xf32>, vector<32x96xf32>, vector<8x96xf32> -> vector<8x96xf32>
    %1524 = vector.broadcast %1182 : vector<1x96xf32> to vector<8x96xf32>
    %1525 = arith.addf %1523, %1524 : vector<8x96xf32>
    %1526 = vector.extract_strided_slice %1193 {offsets = [40, 0], sizes = [8, 32], strides = [1, 1]} : vector<64x32xf32> to vector<8x32xf32>
    %1527 = vector.extract_strided_slice %1525 {offsets = [0, 0], sizes = [8, 32], strides = [1, 1]} : vector<8x96xf32> to vector<8x32xf32>
    %1528 = arith.addf %1526, %1527 : vector<8x32xf32>
    %1529 = arith.negf %1528 : vector<8x32xf32>
    %1530 = math.exp %1529 : vector<8x32xf32>
    %cst_632 = arith.constant 1.000000e+00 : f32
    %1531 = vector.broadcast %cst_632 : f32 to vector<8x32xf32>
    %1532 = arith.addf %1531, %1530 : vector<8x32xf32>
    %1533 = arith.divf %1531, %1532 : vector<8x32xf32>
    %1534 = vector.extract_strided_slice %1194 {offsets = [40, 0], sizes = [8, 32], strides = [1, 1]} : vector<64x32xf32> to vector<8x32xf32>
    %1535 = vector.extract_strided_slice %1525 {offsets = [0, 32], sizes = [8, 32], strides = [1, 1]} : vector<8x96xf32> to vector<8x32xf32>
    %1536 = arith.addf %1534, %1535 : vector<8x32xf32>
    %1537 = arith.negf %1536 : vector<8x32xf32>
    %1538 = math.exp %1537 : vector<8x32xf32>
    %cst_633 = arith.constant 1.000000e+00 : f32
    %1539 = vector.broadcast %cst_633 : f32 to vector<8x32xf32>
    %1540 = arith.addf %1539, %1538 : vector<8x32xf32>
    %1541 = arith.divf %1539, %1540 : vector<8x32xf32>
    %1542 = vector.extract_strided_slice %1195 {offsets = [40, 0], sizes = [8, 32], strides = [1, 1]} : vector<64x32xf32> to vector<8x32xf32>
    %1543 = vector.extract_strided_slice %1525 {offsets = [0, 64], sizes = [8, 32], strides = [1, 1]} : vector<8x96xf32> to vector<8x32xf32>
    %1544 = arith.mulf %1533, %1543 : vector<8x32xf32>
    %1545 = arith.addf %1542, %1544 : vector<8x32xf32>
    %1546 = math.tanh %1545 : vector<8x32xf32>
    %cst_634 = arith.constant 1.000000e+00 : f32
    %1547 = vector.broadcast %cst_634 : f32 to vector<8x32xf32>
    %1548 = arith.subf %1547, %1541 : vector<8x32xf32>
    %1549 = arith.mulf %1548, %1546 : vector<8x32xf32>
    %1550 = arith.mulf %1541, %1487 : vector<8x32xf32>
    %1551 = arith.addf %1549, %1550 : vector<8x32xf32>
    %cst_635 = arith.constant dense<0.000000e+00> : vector<8x96xf32>
    %1552 = tpu.matmul %1516, %1200, %cst_635 {dimension_numbers = #tpu.dot_dimension_numbers<[1], [0], [0], [1], [0, 0, 1, 1], [], []>} : vector<8x32xf32>, vector<32x96xf32>, vector<8x96xf32> -> vector<8x96xf32>
    %1553 = vector.broadcast %1184 : vector<1x96xf32> to vector<8x96xf32>
    %1554 = arith.addf %1552, %1553 : vector<8x96xf32>
    %1555 = vector.extract_strided_slice %1196 {offsets = [16, 0], sizes = [8, 32], strides = [1, 1]} : vector<64x32xf32> to vector<8x32xf32>
    %1556 = vector.extract_strided_slice %1554 {offsets = [0, 0], sizes = [8, 32], strides = [1, 1]} : vector<8x96xf32> to vector<8x32xf32>
    %1557 = arith.addf %1555, %1556 : vector<8x32xf32>
    %1558 = arith.negf %1557 : vector<8x32xf32>
    %1559 = math.exp %1558 : vector<8x32xf32>
    %cst_636 = arith.constant 1.000000e+00 : f32
    %1560 = vector.broadcast %cst_636 : f32 to vector<8x32xf32>
    %1561 = arith.addf %1560, %1559 : vector<8x32xf32>
    %1562 = arith.divf %1560, %1561 : vector<8x32xf32>
    %1563 = vector.extract_strided_slice %1197 {offsets = [16, 0], sizes = [8, 32], strides = [1, 1]} : vector<64x32xf32> to vector<8x32xf32>
    %1564 = vector.extract_strided_slice %1554 {offsets = [0, 32], sizes = [8, 32], strides = [1, 1]} : vector<8x96xf32> to vector<8x32xf32>
    %1565 = arith.addf %1563, %1564 : vector<8x32xf32>
    %1566 = arith.negf %1565 : vector<8x32xf32>
    %1567 = math.exp %1566 : vector<8x32xf32>
    %cst_637 = arith.constant 1.000000e+00 : f32
    %1568 = vector.broadcast %cst_637 : f32 to vector<8x32xf32>
    %1569 = arith.addf %1568, %1567 : vector<8x32xf32>
    %1570 = arith.divf %1568, %1569 : vector<8x32xf32>
    %1571 = vector.extract_strided_slice %1198 {offsets = [16, 0], sizes = [8, 32], strides = [1, 1]} : vector<64x32xf32> to vector<8x32xf32>
    %1572 = vector.extract_strided_slice %1554 {offsets = [0, 64], sizes = [8, 32], strides = [1, 1]} : vector<8x96xf32> to vector<8x32xf32>
    %1573 = arith.mulf %1562, %1572 : vector<8x32xf32>
    %1574 = arith.addf %1571, %1573 : vector<8x32xf32>
    %1575 = math.tanh %1574 : vector<8x32xf32>
    %cst_638 = arith.constant 1.000000e+00 : f32
    %1576 = vector.broadcast %cst_638 : f32 to vector<8x32xf32>
    %1577 = arith.subf %1576, %1570 : vector<8x32xf32>
    %1578 = arith.mulf %1577, %1575 : vector<8x32xf32>
    %1579 = arith.mulf %1570, %1516 : vector<8x32xf32>
    %1580 = arith.addf %1578, %1579 : vector<8x32xf32>
    %c0_639 = arith.constant 0 : index
    %c40_640 = arith.constant 40 : index
    %c0_641 = arith.constant 0 : index
    %1581 = vector.load %arg17[%c0_639, %c40_640, %c0_641] : memref<2x64x32xf32, #tpu.memory_space<vmem>>, vector<1x8x32xf32>
    %1582 = vector.shape_cast %1581 : vector<1x8x32xf32> to vector<8x32xf32>
    %1583 = vector.shape_cast %1551 : vector<8x32xf32> to vector<1x8x32xf32>
    tpu.vector_store %arg17[%c0_639, %c40_640, %c0_641], %1583 {strides = array<i32>} : memref<2x64x32xf32, #tpu.memory_space<vmem>>, vector<1x8x32xf32>,
    %c1_642 = arith.constant 1 : index
    %c16_643 = arith.constant 16 : index
    %c0_644 = arith.constant 0 : index
    %1584 = vector.load %arg17[%c1_642, %c16_643, %c0_644] : memref<2x64x32xf32, #tpu.memory_space<vmem>>, vector<1x8x32xf32>
    %1585 = vector.shape_cast %1584 : vector<1x8x32xf32> to vector<8x32xf32>
    %1586 = vector.shape_cast %1580 : vector<8x32xf32> to vector<1x8x32xf32>
    tpu.vector_store %arg17[%c1_642, %c16_643, %c0_644], %1586 {strides = array<i32>} : memref<2x64x32xf32, #tpu.memory_space<vmem>>, vector<1x8x32xf32>,
    %cst_645 = arith.constant dense<0.000000e+00> : vector<8x96xf32>
    %1587 = tpu.matmul %1551, %1199, %cst_645 {dimension_numbers = #tpu.dot_dimension_numbers<[1], [0], [0], [1], [0, 0, 1, 1], [], []>} : vector<8x32xf32>, vector<32x96xf32>, vector<8x96xf32> -> vector<8x96xf32>
    %1588 = vector.broadcast %1182 : vector<1x96xf32> to vector<8x96xf32>
    %1589 = arith.addf %1587, %1588 : vector<8x96xf32>
    %1590 = vector.extract_strided_slice %1193 {offsets = [48, 0], sizes = [8, 32], strides = [1, 1]} : vector<64x32xf32> to vector<8x32xf32>
    %1591 = vector.extract_strided_slice %1589 {offsets = [0, 0], sizes = [8, 32], strides = [1, 1]} : vector<8x96xf32> to vector<8x32xf32>
    %1592 = arith.addf %1590, %1591 : vector<8x32xf32>
    %1593 = arith.negf %1592 : vector<8x32xf32>
    %1594 = math.exp %1593 : vector<8x32xf32>
    %cst_646 = arith.constant 1.000000e+00 : f32
    %1595 = vector.broadcast %cst_646 : f32 to vector<8x32xf32>
    %1596 = arith.addf %1595, %1594 : vector<8x32xf32>
    %1597 = arith.divf %1595, %1596 : vector<8x32xf32>
    %1598 = vector.extract_strided_slice %1194 {offsets = [48, 0], sizes = [8, 32], strides = [1, 1]} : vector<64x32xf32> to vector<8x32xf32>
    %1599 = vector.extract_strided_slice %1589 {offsets = [0, 32], sizes = [8, 32], strides = [1, 1]} : vector<8x96xf32> to vector<8x32xf32>
    %1600 = arith.addf %1598, %1599 : vector<8x32xf32>
    %1601 = arith.negf %1600 : vector<8x32xf32>
    %1602 = math.exp %1601 : vector<8x32xf32>
    %cst_647 = arith.constant 1.000000e+00 : f32
    %1603 = vector.broadcast %cst_647 : f32 to vector<8x32xf32>
    %1604 = arith.addf %1603, %1602 : vector<8x32xf32>
    %1605 = arith.divf %1603, %1604 : vector<8x32xf32>
    %1606 = vector.extract_strided_slice %1195 {offsets = [48, 0], sizes = [8, 32], strides = [1, 1]} : vector<64x32xf32> to vector<8x32xf32>
    %1607 = vector.extract_strided_slice %1589 {offsets = [0, 64], sizes = [8, 32], strides = [1, 1]} : vector<8x96xf32> to vector<8x32xf32>
    %1608 = arith.mulf %1597, %1607 : vector<8x32xf32>
    %1609 = arith.addf %1606, %1608 : vector<8x32xf32>
    %1610 = math.tanh %1609 : vector<8x32xf32>
    %cst_648 = arith.constant 1.000000e+00 : f32
    %1611 = vector.broadcast %cst_648 : f32 to vector<8x32xf32>
    %1612 = arith.subf %1611, %1605 : vector<8x32xf32>
    %1613 = arith.mulf %1612, %1610 : vector<8x32xf32>
    %1614 = arith.mulf %1605, %1551 : vector<8x32xf32>
    %1615 = arith.addf %1613, %1614 : vector<8x32xf32>
    %cst_649 = arith.constant dense<0.000000e+00> : vector<8x96xf32>
    %1616 = tpu.matmul %1580, %1200, %cst_649 {dimension_numbers = #tpu.dot_dimension_numbers<[1], [0], [0], [1], [0, 0, 1, 1], [], []>} : vector<8x32xf32>, vector<32x96xf32>, vector<8x96xf32> -> vector<8x96xf32>
    %1617 = vector.broadcast %1184 : vector<1x96xf32> to vector<8x96xf32>
    %1618 = arith.addf %1616, %1617 : vector<8x96xf32>
    %1619 = vector.extract_strided_slice %1196 {offsets = [8, 0], sizes = [8, 32], strides = [1, 1]} : vector<64x32xf32> to vector<8x32xf32>
    %1620 = vector.extract_strided_slice %1618 {offsets = [0, 0], sizes = [8, 32], strides = [1, 1]} : vector<8x96xf32> to vector<8x32xf32>
    %1621 = arith.addf %1619, %1620 : vector<8x32xf32>
    %1622 = arith.negf %1621 : vector<8x32xf32>
    %1623 = math.exp %1622 : vector<8x32xf32>
    %cst_650 = arith.constant 1.000000e+00 : f32
    %1624 = vector.broadcast %cst_650 : f32 to vector<8x32xf32>
    %1625 = arith.addf %1624, %1623 : vector<8x32xf32>
    %1626 = arith.divf %1624, %1625 : vector<8x32xf32>
    %1627 = vector.extract_strided_slice %1197 {offsets = [8, 0], sizes = [8, 32], strides = [1, 1]} : vector<64x32xf32> to vector<8x32xf32>
    %1628 = vector.extract_strided_slice %1618 {offsets = [0, 32], sizes = [8, 32], strides = [1, 1]} : vector<8x96xf32> to vector<8x32xf32>
    %1629 = arith.addf %1627, %1628 : vector<8x32xf32>
    %1630 = arith.negf %1629 : vector<8x32xf32>
    %1631 = math.exp %1630 : vector<8x32xf32>
    %cst_651 = arith.constant 1.000000e+00 : f32
    %1632 = vector.broadcast %cst_651 : f32 to vector<8x32xf32>
    %1633 = arith.addf %1632, %1631 : vector<8x32xf32>
    %1634 = arith.divf %1632, %1633 : vector<8x32xf32>
    %1635 = vector.extract_strided_slice %1198 {offsets = [8, 0], sizes = [8, 32], strides = [1, 1]} : vector<64x32xf32> to vector<8x32xf32>
    %1636 = vector.extract_strided_slice %1618 {offsets = [0, 64], sizes = [8, 32], strides = [1, 1]} : vector<8x96xf32> to vector<8x32xf32>
    %1637 = arith.mulf %1626, %1636 : vector<8x32xf32>
    %1638 = arith.addf %1635, %1637 : vector<8x32xf32>
    %1639 = math.tanh %1638 : vector<8x32xf32>
    %cst_652 = arith.constant 1.000000e+00 : f32
    %1640 = vector.broadcast %cst_652 : f32 to vector<8x32xf32>
    %1641 = arith.subf %1640, %1634 : vector<8x32xf32>
    %1642 = arith.mulf %1641, %1639 : vector<8x32xf32>
    %1643 = arith.mulf %1634, %1580 : vector<8x32xf32>
    %1644 = arith.addf %1642, %1643 : vector<8x32xf32>
    %c0_653 = arith.constant 0 : index
    %c48_654 = arith.constant 48 : index
    %c0_655 = arith.constant 0 : index
    %1645 = vector.load %arg17[%c0_653, %c48_654, %c0_655] : memref<2x64x32xf32, #tpu.memory_space<vmem>>, vector<1x8x32xf32>
    %1646 = vector.shape_cast %1645 : vector<1x8x32xf32> to vector<8x32xf32>
    %1647 = vector.shape_cast %1615 : vector<8x32xf32> to vector<1x8x32xf32>
    tpu.vector_store %arg17[%c0_653, %c48_654, %c0_655], %1647 {strides = array<i32>} : memref<2x64x32xf32, #tpu.memory_space<vmem>>, vector<1x8x32xf32>,
    %c1_656 = arith.constant 1 : index
    %c8_657 = arith.constant 8 : index
    %c0_658 = arith.constant 0 : index
    %1648 = vector.load %arg17[%c1_656, %c8_657, %c0_658] : memref<2x64x32xf32, #tpu.memory_space<vmem>>, vector<1x8x32xf32>
    %1649 = vector.shape_cast %1648 : vector<1x8x32xf32> to vector<8x32xf32>
    %1650 = vector.shape_cast %1644 : vector<8x32xf32> to vector<1x8x32xf32>
    tpu.vector_store %arg17[%c1_656, %c8_657, %c0_658], %1650 {strides = array<i32>} : memref<2x64x32xf32, #tpu.memory_space<vmem>>, vector<1x8x32xf32>,
    %cst_659 = arith.constant dense<0.000000e+00> : vector<8x96xf32>
    %1651 = tpu.matmul %1615, %1199, %cst_659 {dimension_numbers = #tpu.dot_dimension_numbers<[1], [0], [0], [1], [0, 0, 1, 1], [], []>} : vector<8x32xf32>, vector<32x96xf32>, vector<8x96xf32> -> vector<8x96xf32>
    %1652 = vector.broadcast %1182 : vector<1x96xf32> to vector<8x96xf32>
    %1653 = arith.addf %1651, %1652 : vector<8x96xf32>
    %1654 = vector.extract_strided_slice %1193 {offsets = [56, 0], sizes = [8, 32], strides = [1, 1]} : vector<64x32xf32> to vector<8x32xf32>
    %1655 = vector.extract_strided_slice %1653 {offsets = [0, 0], sizes = [8, 32], strides = [1, 1]} : vector<8x96xf32> to vector<8x32xf32>
    %1656 = arith.addf %1654, %1655 : vector<8x32xf32>
    %1657 = arith.negf %1656 : vector<8x32xf32>
    %1658 = math.exp %1657 : vector<8x32xf32>
    %cst_660 = arith.constant 1.000000e+00 : f32
    %1659 = vector.broadcast %cst_660 : f32 to vector<8x32xf32>
    %1660 = arith.addf %1659, %1658 : vector<8x32xf32>
    %1661 = arith.divf %1659, %1660 : vector<8x32xf32>
    %1662 = vector.extract_strided_slice %1194 {offsets = [56, 0], sizes = [8, 32], strides = [1, 1]} : vector<64x32xf32> to vector<8x32xf32>
    %1663 = vector.extract_strided_slice %1653 {offsets = [0, 32], sizes = [8, 32], strides = [1, 1]} : vector<8x96xf32> to vector<8x32xf32>
    %1664 = arith.addf %1662, %1663 : vector<8x32xf32>
    %1665 = arith.negf %1664 : vector<8x32xf32>
    %1666 = math.exp %1665 : vector<8x32xf32>
    %cst_661 = arith.constant 1.000000e+00 : f32
    %1667 = vector.broadcast %cst_661 : f32 to vector<8x32xf32>
    %1668 = arith.addf %1667, %1666 : vector<8x32xf32>
    %1669 = arith.divf %1667, %1668 : vector<8x32xf32>
    %1670 = vector.extract_strided_slice %1195 {offsets = [56, 0], sizes = [8, 32], strides = [1, 1]} : vector<64x32xf32> to vector<8x32xf32>
    %1671 = vector.extract_strided_slice %1653 {offsets = [0, 64], sizes = [8, 32], strides = [1, 1]} : vector<8x96xf32> to vector<8x32xf32>
    %1672 = arith.mulf %1661, %1671 : vector<8x32xf32>
    %1673 = arith.addf %1670, %1672 : vector<8x32xf32>
    %1674 = math.tanh %1673 : vector<8x32xf32>
    %cst_662 = arith.constant 1.000000e+00 : f32
    %1675 = vector.broadcast %cst_662 : f32 to vector<8x32xf32>
    %1676 = arith.subf %1675, %1669 : vector<8x32xf32>
    %1677 = arith.mulf %1676, %1674 : vector<8x32xf32>
    %1678 = arith.mulf %1669, %1615 : vector<8x32xf32>
    %1679 = arith.addf %1677, %1678 : vector<8x32xf32>
    %cst_663 = arith.constant dense<0.000000e+00> : vector<8x96xf32>
    %1680 = tpu.matmul %1644, %1200, %cst_663 {dimension_numbers = #tpu.dot_dimension_numbers<[1], [0], [0], [1], [0, 0, 1, 1], [], []>} : vector<8x32xf32>, vector<32x96xf32>, vector<8x96xf32> -> vector<8x96xf32>
    %1681 = vector.broadcast %1184 : vector<1x96xf32> to vector<8x96xf32>
    %1682 = arith.addf %1680, %1681 : vector<8x96xf32>
    %1683 = vector.extract_strided_slice %1196 {offsets = [0, 0], sizes = [8, 32], strides = [1, 1]} : vector<64x32xf32> to vector<8x32xf32>
    %1684 = vector.extract_strided_slice %1682 {offsets = [0, 0], sizes = [8, 32], strides = [1, 1]} : vector<8x96xf32> to vector<8x32xf32>
    %1685 = arith.addf %1683, %1684 : vector<8x32xf32>
    %1686 = arith.negf %1685 : vector<8x32xf32>
    %1687 = math.exp %1686 : vector<8x32xf32>
    %cst_664 = arith.constant 1.000000e+00 : f32
    %1688 = vector.broadcast %cst_664 : f32 to vector<8x32xf32>
    %1689 = arith.addf %1688, %1687 : vector<8x32xf32>
    %1690 = arith.divf %1688, %1689 : vector<8x32xf32>
    %1691 = vector.extract_strided_slice %1197 {offsets = [0, 0], sizes = [8, 32], strides = [1, 1]} : vector<64x32xf32> to vector<8x32xf32>
    %1692 = vector.extract_strided_slice %1682 {offsets = [0, 32], sizes = [8, 32], strides = [1, 1]} : vector<8x96xf32> to vector<8x32xf32>
    %1693 = arith.addf %1691, %1692 : vector<8x32xf32>
    %1694 = arith.negf %1693 : vector<8x32xf32>
    %1695 = math.exp %1694 : vector<8x32xf32>
    %cst_665 = arith.constant 1.000000e+00 : f32
    %1696 = vector.broadcast %cst_665 : f32 to vector<8x32xf32>
    %1697 = arith.addf %1696, %1695 : vector<8x32xf32>
    %1698 = arith.divf %1696, %1697 : vector<8x32xf32>
    %1699 = vector.extract_strided_slice %1198 {offsets = [0, 0], sizes = [8, 32], strides = [1, 1]} : vector<64x32xf32> to vector<8x32xf32>
    %1700 = vector.extract_strided_slice %1682 {offsets = [0, 64], sizes = [8, 32], strides = [1, 1]} : vector<8x96xf32> to vector<8x32xf32>
    %1701 = arith.mulf %1690, %1700 : vector<8x32xf32>
    %1702 = arith.addf %1699, %1701 : vector<8x32xf32>
    %1703 = math.tanh %1702 : vector<8x32xf32>
    %cst_666 = arith.constant 1.000000e+00 : f32
    %1704 = vector.broadcast %cst_666 : f32 to vector<8x32xf32>
    %1705 = arith.subf %1704, %1698 : vector<8x32xf32>
    %1706 = arith.mulf %1705, %1703 : vector<8x32xf32>
    %1707 = arith.mulf %1698, %1644 : vector<8x32xf32>
    %1708 = arith.addf %1706, %1707 : vector<8x32xf32>
    %c0_667 = arith.constant 0 : index
    %c56_668 = arith.constant 56 : index
    %c0_669 = arith.constant 0 : index
    %1709 = vector.load %arg17[%c0_667, %c56_668, %c0_669] : memref<2x64x32xf32, #tpu.memory_space<vmem>>, vector<1x8x32xf32>
    %1710 = vector.shape_cast %1709 : vector<1x8x32xf32> to vector<8x32xf32>
    %1711 = vector.shape_cast %1679 : vector<8x32xf32> to vector<1x8x32xf32>
    tpu.vector_store %arg17[%c0_667, %c56_668, %c0_669], %1711 {strides = array<i32>} : memref<2x64x32xf32, #tpu.memory_space<vmem>>, vector<1x8x32xf32>,
    %c1_670 = arith.constant 1 : index
    %c0_671 = arith.constant 0 : index
    %c0_672 = arith.constant 0 : index
    %1712 = vector.load %arg17[%c1_670, %c0_671, %c0_672] : memref<2x64x32xf32, #tpu.memory_space<vmem>>, vector<1x8x32xf32>
    %1713 = vector.shape_cast %1712 : vector<1x8x32xf32> to vector<8x32xf32>
    %1714 = vector.shape_cast %1708 : vector<8x32xf32> to vector<1x8x32xf32>
    tpu.vector_store %arg17[%c1_670, %c0_671, %c0_672], %1714 {strides = array<i32>} : memref<2x64x32xf32, #tpu.memory_space<vmem>>, vector<1x8x32xf32>,
    %c0_673 = arith.constant 0 : index
    %c0_674 = arith.constant 0 : index
    %c0_675 = arith.constant 0 : index
    %1715 = vector.load %arg17[%c0_673, %c0_674, %c0_675] : memref<2x64x32xf32, #tpu.memory_space<vmem>>, vector<1x64x32xf32>
    %1716 = vector.shape_cast %1715 : vector<1x64x32xf32> to vector<64x32xf32>
    %c1_676 = arith.constant 1 : index
    %c0_677 = arith.constant 0 : index
    %c0_678 = arith.constant 0 : index
    %1717 = vector.load %arg17[%c1_676, %c0_677, %c0_678] : memref<2x64x32xf32, #tpu.memory_space<vmem>>, vector<1x64x32xf32>
    %1718 = vector.shape_cast %1717 : vector<1x64x32xf32> to vector<64x32xf32>
    %1719 = tpu.concatenate %1716, %1718 in 1 : vector<64x32xf32>, vector<64x32xf32> -> vector<64x64xf32>
    %c0_679 = arith.constant 0 : index
    %c0_680 = arith.constant 0 : index
    %1720 = vector.load %arg14[%c0_679, %c0_680] : memref<4x96xf32, #tpu.memory_space<vmem>>, vector<1x96xf32>
    %c1_681 = arith.constant 1 : index
    %c0_682 = arith.constant 0 : index
    %1721 = vector.load %arg14[%c1_681, %c0_682] : memref<4x96xf32, #tpu.memory_space<vmem>>, vector<1x96xf32>
    %c2_683 = arith.constant 2 : index
    %c0_684 = arith.constant 0 : index
    %1722 = vector.load %arg14[%c2_683, %c0_684] : memref<4x96xf32, #tpu.memory_space<vmem>>, vector<1x96xf32>
    %c3_685 = arith.constant 3 : index
    %c0_686 = arith.constant 0 : index
    %1723 = vector.load %arg14[%c3_685, %c0_686] : memref<4x96xf32, #tpu.memory_space<vmem>>, vector<1x96xf32>
    %c0_687 = arith.constant 0 : index
    %c0_688 = arith.constant 0 : index
    %1724 = vector.load %arg10[%c0_687, %c0_688] : memref<64x96xf32, #tpu.memory_space<vmem>>, vector<64x96xf32>
    %cst_689 = arith.constant dense<0.000000e+00> : vector<64x96xf32>
    %1725 = tpu.matmul %1719, %1724, %cst_689 {dimension_numbers = #tpu.dot_dimension_numbers<[1], [0], [0], [1], [0, 0, 1, 1], [], []>} : vector<64x64xf32>, vector<64x96xf32>, vector<64x96xf32> -> vector<64x96xf32>
    %1726 = vector.broadcast %1720 : vector<1x96xf32> to vector<64x96xf32>
    %1727 = arith.addf %1725, %1726 : vector<64x96xf32>
    %c0_690 = arith.constant 0 : index
    %c0_691 = arith.constant 0 : index
    %1728 = vector.load %arg11[%c0_690, %c0_691] : memref<64x96xf32, #tpu.memory_space<vmem>>, vector<64x96xf32>
    %cst_692 = arith.constant dense<0.000000e+00> : vector<64x96xf32>
    %1729 = tpu.matmul %1719, %1728, %cst_692 {dimension_numbers = #tpu.dot_dimension_numbers<[1], [0], [0], [1], [0, 0, 1, 1], [], []>} : vector<64x64xf32>, vector<64x96xf32>, vector<64x96xf32> -> vector<64x96xf32>
    %1730 = vector.broadcast %1722 : vector<1x96xf32> to vector<64x96xf32>
    %1731 = arith.addf %1729, %1730 : vector<64x96xf32>
    %1732 = vector.extract_strided_slice %1727 {offsets = [0, 0], sizes = [64, 32], strides = [1, 1]} : vector<64x96xf32> to vector<64x32xf32>
    %1733 = vector.extract_strided_slice %1727 {offsets = [0, 32], sizes = [64, 32], strides = [1, 1]} : vector<64x96xf32> to vector<64x32xf32>
    %1734 = vector.extract_strided_slice %1727 {offsets = [0, 64], sizes = [64, 32], strides = [1, 1]} : vector<64x96xf32> to vector<64x32xf32>
    %1735 = vector.extract_strided_slice %1731 {offsets = [0, 0], sizes = [64, 32], strides = [1, 1]} : vector<64x96xf32> to vector<64x32xf32>
    %1736 = vector.extract_strided_slice %1731 {offsets = [0, 32], sizes = [64, 32], strides = [1, 1]} : vector<64x96xf32> to vector<64x32xf32>
    %1737 = vector.extract_strided_slice %1731 {offsets = [0, 64], sizes = [64, 32], strides = [1, 1]} : vector<64x96xf32> to vector<64x32xf32>
    %c0_693 = arith.constant 0 : index
    %c0_694 = arith.constant 0 : index
    %1738 = vector.load %arg12[%c0_693, %c0_694] : memref<32x96xf32, #tpu.memory_space<vmem>>, vector<32x96xf32>
    %c0_695 = arith.constant 0 : index
    %c0_696 = arith.constant 0 : index
    %1739 = vector.load %arg13[%c0_695, %c0_696] : memref<32x96xf32, #tpu.memory_space<vmem>>, vector<32x96xf32>
    %cst_697 = arith.constant 0.000000e+00 : f32
    %1740 = vector.broadcast %cst_697 : f32 to vector<8x32xf32>
    %cst_698 = arith.constant 0.000000e+00 : f32
    %1741 = vector.broadcast %cst_698 : f32 to vector<8x32xf32>
    %cst_699 = arith.constant dense<0.000000e+00> : vector<8x96xf32>
    %1742 = tpu.matmul %1740, %1738, %cst_699 {dimension_numbers = #tpu.dot_dimension_numbers<[1], [0], [0], [1], [0, 0, 1, 1], [], []>} : vector<8x32xf32>, vector<32x96xf32>, vector<8x96xf32> -> vector<8x96xf32>
    %1743 = vector.broadcast %1721 : vector<1x96xf32> to vector<8x96xf32>
    %1744 = arith.addf %1742, %1743 : vector<8x96xf32>
    %1745 = vector.extract_strided_slice %1732 {offsets = [0, 0], sizes = [8, 32], strides = [1, 1]} : vector<64x32xf32> to vector<8x32xf32>
    %1746 = vector.extract_strided_slice %1744 {offsets = [0, 0], sizes = [8, 32], strides = [1, 1]} : vector<8x96xf32> to vector<8x32xf32>
    %1747 = arith.addf %1745, %1746 : vector<8x32xf32>
    %1748 = arith.negf %1747 : vector<8x32xf32>
    %1749 = math.exp %1748 : vector<8x32xf32>
    %cst_700 = arith.constant 1.000000e+00 : f32
    %1750 = vector.broadcast %cst_700 : f32 to vector<8x32xf32>
    %1751 = arith.addf %1750, %1749 : vector<8x32xf32>
    %1752 = arith.divf %1750, %1751 : vector<8x32xf32>
    %1753 = vector.extract_strided_slice %1733 {offsets = [0, 0], sizes = [8, 32], strides = [1, 1]} : vector<64x32xf32> to vector<8x32xf32>
    %1754 = vector.extract_strided_slice %1744 {offsets = [0, 32], sizes = [8, 32], strides = [1, 1]} : vector<8x96xf32> to vector<8x32xf32>
    %1755 = arith.addf %1753, %1754 : vector<8x32xf32>
    %1756 = arith.negf %1755 : vector<8x32xf32>
    %1757 = math.exp %1756 : vector<8x32xf32>
    %cst_701 = arith.constant 1.000000e+00 : f32
    %1758 = vector.broadcast %cst_701 : f32 to vector<8x32xf32>
    %1759 = arith.addf %1758, %1757 : vector<8x32xf32>
    %1760 = arith.divf %1758, %1759 : vector<8x32xf32>
    %1761 = vector.extract_strided_slice %1734 {offsets = [0, 0], sizes = [8, 32], strides = [1, 1]} : vector<64x32xf32> to vector<8x32xf32>
    %1762 = vector.extract_strided_slice %1744 {offsets = [0, 64], sizes = [8, 32], strides = [1, 1]} : vector<8x96xf32> to vector<8x32xf32>
    %1763 = arith.mulf %1752, %1762 : vector<8x32xf32>
    %1764 = arith.addf %1761, %1763 : vector<8x32xf32>
    %1765 = math.tanh %1764 : vector<8x32xf32>
    %cst_702 = arith.constant 1.000000e+00 : f32
    %1766 = vector.broadcast %cst_702 : f32 to vector<8x32xf32>
    %1767 = arith.subf %1766, %1760 : vector<8x32xf32>
    %1768 = arith.mulf %1767, %1765 : vector<8x32xf32>
    %1769 = arith.mulf %1760, %1740 : vector<8x32xf32>
    %1770 = arith.addf %1768, %1769 : vector<8x32xf32>
    %cst_703 = arith.constant dense<0.000000e+00> : vector<8x96xf32>
    %1771 = tpu.matmul %1741, %1739, %cst_703 {dimension_numbers = #tpu.dot_dimension_numbers<[1], [0], [0], [1], [0, 0, 1, 1], [], []>} : vector<8x32xf32>, vector<32x96xf32>, vector<8x96xf32> -> vector<8x96xf32>
    %1772 = vector.broadcast %1723 : vector<1x96xf32> to vector<8x96xf32>
    %1773 = arith.addf %1771, %1772 : vector<8x96xf32>
    %1774 = vector.extract_strided_slice %1735 {offsets = [56, 0], sizes = [8, 32], strides = [1, 1]} : vector<64x32xf32> to vector<8x32xf32>
    %1775 = vector.extract_strided_slice %1773 {offsets = [0, 0], sizes = [8, 32], strides = [1, 1]} : vector<8x96xf32> to vector<8x32xf32>
    %1776 = arith.addf %1774, %1775 : vector<8x32xf32>
    %1777 = arith.negf %1776 : vector<8x32xf32>
    %1778 = math.exp %1777 : vector<8x32xf32>
    %cst_704 = arith.constant 1.000000e+00 : f32
    %1779 = vector.broadcast %cst_704 : f32 to vector<8x32xf32>
    %1780 = arith.addf %1779, %1778 : vector<8x32xf32>
    %1781 = arith.divf %1779, %1780 : vector<8x32xf32>
    %1782 = vector.extract_strided_slice %1736 {offsets = [56, 0], sizes = [8, 32], strides = [1, 1]} : vector<64x32xf32> to vector<8x32xf32>
    %1783 = vector.extract_strided_slice %1773 {offsets = [0, 32], sizes = [8, 32], strides = [1, 1]} : vector<8x96xf32> to vector<8x32xf32>
    %1784 = arith.addf %1782, %1783 : vector<8x32xf32>
    %1785 = arith.negf %1784 : vector<8x32xf32>
    %1786 = math.exp %1785 : vector<8x32xf32>
    %cst_705 = arith.constant 1.000000e+00 : f32
    %1787 = vector.broadcast %cst_705 : f32 to vector<8x32xf32>
    %1788 = arith.addf %1787, %1786 : vector<8x32xf32>
    %1789 = arith.divf %1787, %1788 : vector<8x32xf32>
    %1790 = vector.extract_strided_slice %1737 {offsets = [56, 0], sizes = [8, 32], strides = [1, 1]} : vector<64x32xf32> to vector<8x32xf32>
    %1791 = vector.extract_strided_slice %1773 {offsets = [0, 64], sizes = [8, 32], strides = [1, 1]} : vector<8x96xf32> to vector<8x32xf32>
    %1792 = arith.mulf %1781, %1791 : vector<8x32xf32>
    %1793 = arith.addf %1790, %1792 : vector<8x32xf32>
    %1794 = math.tanh %1793 : vector<8x32xf32>
    %cst_706 = arith.constant 1.000000e+00 : f32
    %1795 = vector.broadcast %cst_706 : f32 to vector<8x32xf32>
    %1796 = arith.subf %1795, %1789 : vector<8x32xf32>
    %1797 = arith.mulf %1796, %1794 : vector<8x32xf32>
    %1798 = arith.mulf %1789, %1741 : vector<8x32xf32>
    %1799 = arith.addf %1797, %1798 : vector<8x32xf32>
    %cst_707 = arith.constant dense<0.000000e+00> : vector<8x96xf32>
    %1800 = tpu.matmul %1770, %1738, %cst_707 {dimension_numbers = #tpu.dot_dimension_numbers<[1], [0], [0], [1], [0, 0, 1, 1], [], []>} : vector<8x32xf32>, vector<32x96xf32>, vector<8x96xf32> -> vector<8x96xf32>
    %1801 = vector.broadcast %1721 : vector<1x96xf32> to vector<8x96xf32>
    %1802 = arith.addf %1800, %1801 : vector<8x96xf32>
    %1803 = vector.extract_strided_slice %1732 {offsets = [8, 0], sizes = [8, 32], strides = [1, 1]} : vector<64x32xf32> to vector<8x32xf32>
    %1804 = vector.extract_strided_slice %1802 {offsets = [0, 0], sizes = [8, 32], strides = [1, 1]} : vector<8x96xf32> to vector<8x32xf32>
    %1805 = arith.addf %1803, %1804 : vector<8x32xf32>
    %1806 = arith.negf %1805 : vector<8x32xf32>
    %1807 = math.exp %1806 : vector<8x32xf32>
    %cst_708 = arith.constant 1.000000e+00 : f32
    %1808 = vector.broadcast %cst_708 : f32 to vector<8x32xf32>
    %1809 = arith.addf %1808, %1807 : vector<8x32xf32>
    %1810 = arith.divf %1808, %1809 : vector<8x32xf32>
    %1811 = vector.extract_strided_slice %1733 {offsets = [8, 0], sizes = [8, 32], strides = [1, 1]} : vector<64x32xf32> to vector<8x32xf32>
    %1812 = vector.extract_strided_slice %1802 {offsets = [0, 32], sizes = [8, 32], strides = [1, 1]} : vector<8x96xf32> to vector<8x32xf32>
    %1813 = arith.addf %1811, %1812 : vector<8x32xf32>
    %1814 = arith.negf %1813 : vector<8x32xf32>
    %1815 = math.exp %1814 : vector<8x32xf32>
    %cst_709 = arith.constant 1.000000e+00 : f32
    %1816 = vector.broadcast %cst_709 : f32 to vector<8x32xf32>
    %1817 = arith.addf %1816, %1815 : vector<8x32xf32>
    %1818 = arith.divf %1816, %1817 : vector<8x32xf32>
    %1819 = vector.extract_strided_slice %1734 {offsets = [8, 0], sizes = [8, 32], strides = [1, 1]} : vector<64x32xf32> to vector<8x32xf32>
    %1820 = vector.extract_strided_slice %1802 {offsets = [0, 64], sizes = [8, 32], strides = [1, 1]} : vector<8x96xf32> to vector<8x32xf32>
    %1821 = arith.mulf %1810, %1820 : vector<8x32xf32>
    %1822 = arith.addf %1819, %1821 : vector<8x32xf32>
    %1823 = math.tanh %1822 : vector<8x32xf32>
    %cst_710 = arith.constant 1.000000e+00 : f32
    %1824 = vector.broadcast %cst_710 : f32 to vector<8x32xf32>
    %1825 = arith.subf %1824, %1818 : vector<8x32xf32>
    %1826 = arith.mulf %1825, %1823 : vector<8x32xf32>
    %1827 = arith.mulf %1818, %1770 : vector<8x32xf32>
    %1828 = arith.addf %1826, %1827 : vector<8x32xf32>
    %cst_711 = arith.constant dense<0.000000e+00> : vector<8x96xf32>
    %1829 = tpu.matmul %1799, %1739, %cst_711 {dimension_numbers = #tpu.dot_dimension_numbers<[1], [0], [0], [1], [0, 0, 1, 1], [], []>} : vector<8x32xf32>, vector<32x96xf32>, vector<8x96xf32> -> vector<8x96xf32>
    %1830 = vector.broadcast %1723 : vector<1x96xf32> to vector<8x96xf32>
    %1831 = arith.addf %1829, %1830 : vector<8x96xf32>
    %1832 = vector.extract_strided_slice %1735 {offsets = [48, 0], sizes = [8, 32], strides = [1, 1]} : vector<64x32xf32> to vector<8x32xf32>
    %1833 = vector.extract_strided_slice %1831 {offsets = [0, 0], sizes = [8, 32], strides = [1, 1]} : vector<8x96xf32> to vector<8x32xf32>
    %1834 = arith.addf %1832, %1833 : vector<8x32xf32>
    %1835 = arith.negf %1834 : vector<8x32xf32>
    %1836 = math.exp %1835 : vector<8x32xf32>
    %cst_712 = arith.constant 1.000000e+00 : f32
    %1837 = vector.broadcast %cst_712 : f32 to vector<8x32xf32>
    %1838 = arith.addf %1837, %1836 : vector<8x32xf32>
    %1839 = arith.divf %1837, %1838 : vector<8x32xf32>
    %1840 = vector.extract_strided_slice %1736 {offsets = [48, 0], sizes = [8, 32], strides = [1, 1]} : vector<64x32xf32> to vector<8x32xf32>
    %1841 = vector.extract_strided_slice %1831 {offsets = [0, 32], sizes = [8, 32], strides = [1, 1]} : vector<8x96xf32> to vector<8x32xf32>
    %1842 = arith.addf %1840, %1841 : vector<8x32xf32>
    %1843 = arith.negf %1842 : vector<8x32xf32>
    %1844 = math.exp %1843 : vector<8x32xf32>
    %cst_713 = arith.constant 1.000000e+00 : f32
    %1845 = vector.broadcast %cst_713 : f32 to vector<8x32xf32>
    %1846 = arith.addf %1845, %1844 : vector<8x32xf32>
    %1847 = arith.divf %1845, %1846 : vector<8x32xf32>
    %1848 = vector.extract_strided_slice %1737 {offsets = [48, 0], sizes = [8, 32], strides = [1, 1]} : vector<64x32xf32> to vector<8x32xf32>
    %1849 = vector.extract_strided_slice %1831 {offsets = [0, 64], sizes = [8, 32], strides = [1, 1]} : vector<8x96xf32> to vector<8x32xf32>
    %1850 = arith.mulf %1839, %1849 : vector<8x32xf32>
    %1851 = arith.addf %1848, %1850 : vector<8x32xf32>
    %1852 = math.tanh %1851 : vector<8x32xf32>
    %cst_714 = arith.constant 1.000000e+00 : f32
    %1853 = vector.broadcast %cst_714 : f32 to vector<8x32xf32>
    %1854 = arith.subf %1853, %1847 : vector<8x32xf32>
    %1855 = arith.mulf %1854, %1852 : vector<8x32xf32>
    %1856 = arith.mulf %1847, %1799 : vector<8x32xf32>
    %1857 = arith.addf %1855, %1856 : vector<8x32xf32>
    %cst_715 = arith.constant dense<0.000000e+00> : vector<8x96xf32>
    %1858 = tpu.matmul %1828, %1738, %cst_715 {dimension_numbers = #tpu.dot_dimension_numbers<[1], [0], [0], [1], [0, 0, 1, 1], [], []>} : vector<8x32xf32>, vector<32x96xf32>, vector<8x96xf32> -> vector<8x96xf32>
    %1859 = vector.broadcast %1721 : vector<1x96xf32> to vector<8x96xf32>
    %1860 = arith.addf %1858, %1859 : vector<8x96xf32>
    %1861 = vector.extract_strided_slice %1732 {offsets = [16, 0], sizes = [8, 32], strides = [1, 1]} : vector<64x32xf32> to vector<8x32xf32>
    %1862 = vector.extract_strided_slice %1860 {offsets = [0, 0], sizes = [8, 32], strides = [1, 1]} : vector<8x96xf32> to vector<8x32xf32>
    %1863 = arith.addf %1861, %1862 : vector<8x32xf32>
    %1864 = arith.negf %1863 : vector<8x32xf32>
    %1865 = math.exp %1864 : vector<8x32xf32>
    %cst_716 = arith.constant 1.000000e+00 : f32
    %1866 = vector.broadcast %cst_716 : f32 to vector<8x32xf32>
    %1867 = arith.addf %1866, %1865 : vector<8x32xf32>
    %1868 = arith.divf %1866, %1867 : vector<8x32xf32>
    %1869 = vector.extract_strided_slice %1733 {offsets = [16, 0], sizes = [8, 32], strides = [1, 1]} : vector<64x32xf32> to vector<8x32xf32>
    %1870 = vector.extract_strided_slice %1860 {offsets = [0, 32], sizes = [8, 32], strides = [1, 1]} : vector<8x96xf32> to vector<8x32xf32>
    %1871 = arith.addf %1869, %1870 : vector<8x32xf32>
    %1872 = arith.negf %1871 : vector<8x32xf32>
    %1873 = math.exp %1872 : vector<8x32xf32>
    %cst_717 = arith.constant 1.000000e+00 : f32
    %1874 = vector.broadcast %cst_717 : f32 to vector<8x32xf32>
    %1875 = arith.addf %1874, %1873 : vector<8x32xf32>
    %1876 = arith.divf %1874, %1875 : vector<8x32xf32>
    %1877 = vector.extract_strided_slice %1734 {offsets = [16, 0], sizes = [8, 32], strides = [1, 1]} : vector<64x32xf32> to vector<8x32xf32>
    %1878 = vector.extract_strided_slice %1860 {offsets = [0, 64], sizes = [8, 32], strides = [1, 1]} : vector<8x96xf32> to vector<8x32xf32>
    %1879 = arith.mulf %1868, %1878 : vector<8x32xf32>
    %1880 = arith.addf %1877, %1879 : vector<8x32xf32>
    %1881 = math.tanh %1880 : vector<8x32xf32>
    %cst_718 = arith.constant 1.000000e+00 : f32
    %1882 = vector.broadcast %cst_718 : f32 to vector<8x32xf32>
    %1883 = arith.subf %1882, %1876 : vector<8x32xf32>
    %1884 = arith.mulf %1883, %1881 : vector<8x32xf32>
    %1885 = arith.mulf %1876, %1828 : vector<8x32xf32>
    %1886 = arith.addf %1884, %1885 : vector<8x32xf32>
    %cst_719 = arith.constant dense<0.000000e+00> : vector<8x96xf32>
    %1887 = tpu.matmul %1857, %1739, %cst_719 {dimension_numbers = #tpu.dot_dimension_numbers<[1], [0], [0], [1], [0, 0, 1, 1], [], []>} : vector<8x32xf32>, vector<32x96xf32>, vector<8x96xf32> -> vector<8x96xf32>
    %1888 = vector.broadcast %1723 : vector<1x96xf32> to vector<8x96xf32>
    %1889 = arith.addf %1887, %1888 : vector<8x96xf32>
    %1890 = vector.extract_strided_slice %1735 {offsets = [40, 0], sizes = [8, 32], strides = [1, 1]} : vector<64x32xf32> to vector<8x32xf32>
    %1891 = vector.extract_strided_slice %1889 {offsets = [0, 0], sizes = [8, 32], strides = [1, 1]} : vector<8x96xf32> to vector<8x32xf32>
    %1892 = arith.addf %1890, %1891 : vector<8x32xf32>
    %1893 = arith.negf %1892 : vector<8x32xf32>
    %1894 = math.exp %1893 : vector<8x32xf32>
    %cst_720 = arith.constant 1.000000e+00 : f32
    %1895 = vector.broadcast %cst_720 : f32 to vector<8x32xf32>
    %1896 = arith.addf %1895, %1894 : vector<8x32xf32>
    %1897 = arith.divf %1895, %1896 : vector<8x32xf32>
    %1898 = vector.extract_strided_slice %1736 {offsets = [40, 0], sizes = [8, 32], strides = [1, 1]} : vector<64x32xf32> to vector<8x32xf32>
    %1899 = vector.extract_strided_slice %1889 {offsets = [0, 32], sizes = [8, 32], strides = [1, 1]} : vector<8x96xf32> to vector<8x32xf32>
    %1900 = arith.addf %1898, %1899 : vector<8x32xf32>
    %1901 = arith.negf %1900 : vector<8x32xf32>
    %1902 = math.exp %1901 : vector<8x32xf32>
    %cst_721 = arith.constant 1.000000e+00 : f32
    %1903 = vector.broadcast %cst_721 : f32 to vector<8x32xf32>
    %1904 = arith.addf %1903, %1902 : vector<8x32xf32>
    %1905 = arith.divf %1903, %1904 : vector<8x32xf32>
    %1906 = vector.extract_strided_slice %1737 {offsets = [40, 0], sizes = [8, 32], strides = [1, 1]} : vector<64x32xf32> to vector<8x32xf32>
    %1907 = vector.extract_strided_slice %1889 {offsets = [0, 64], sizes = [8, 32], strides = [1, 1]} : vector<8x96xf32> to vector<8x32xf32>
    %1908 = arith.mulf %1897, %1907 : vector<8x32xf32>
    %1909 = arith.addf %1906, %1908 : vector<8x32xf32>
    %1910 = math.tanh %1909 : vector<8x32xf32>
    %cst_722 = arith.constant 1.000000e+00 : f32
    %1911 = vector.broadcast %cst_722 : f32 to vector<8x32xf32>
    %1912 = arith.subf %1911, %1905 : vector<8x32xf32>
    %1913 = arith.mulf %1912, %1910 : vector<8x32xf32>
    %1914 = arith.mulf %1905, %1857 : vector<8x32xf32>
    %1915 = arith.addf %1913, %1914 : vector<8x32xf32>
    %cst_723 = arith.constant dense<0.000000e+00> : vector<8x96xf32>
    %1916 = tpu.matmul %1886, %1738, %cst_723 {dimension_numbers = #tpu.dot_dimension_numbers<[1], [0], [0], [1], [0, 0, 1, 1], [], []>} : vector<8x32xf32>, vector<32x96xf32>, vector<8x96xf32> -> vector<8x96xf32>
    %1917 = vector.broadcast %1721 : vector<1x96xf32> to vector<8x96xf32>
    %1918 = arith.addf %1916, %1917 : vector<8x96xf32>
    %1919 = vector.extract_strided_slice %1732 {offsets = [24, 0], sizes = [8, 32], strides = [1, 1]} : vector<64x32xf32> to vector<8x32xf32>
    %1920 = vector.extract_strided_slice %1918 {offsets = [0, 0], sizes = [8, 32], strides = [1, 1]} : vector<8x96xf32> to vector<8x32xf32>
    %1921 = arith.addf %1919, %1920 : vector<8x32xf32>
    %1922 = arith.negf %1921 : vector<8x32xf32>
    %1923 = math.exp %1922 : vector<8x32xf32>
    %cst_724 = arith.constant 1.000000e+00 : f32
    %1924 = vector.broadcast %cst_724 : f32 to vector<8x32xf32>
    %1925 = arith.addf %1924, %1923 : vector<8x32xf32>
    %1926 = arith.divf %1924, %1925 : vector<8x32xf32>
    %1927 = vector.extract_strided_slice %1733 {offsets = [24, 0], sizes = [8, 32], strides = [1, 1]} : vector<64x32xf32> to vector<8x32xf32>
    %1928 = vector.extract_strided_slice %1918 {offsets = [0, 32], sizes = [8, 32], strides = [1, 1]} : vector<8x96xf32> to vector<8x32xf32>
    %1929 = arith.addf %1927, %1928 : vector<8x32xf32>
    %1930 = arith.negf %1929 : vector<8x32xf32>
    %1931 = math.exp %1930 : vector<8x32xf32>
    %cst_725 = arith.constant 1.000000e+00 : f32
    %1932 = vector.broadcast %cst_725 : f32 to vector<8x32xf32>
    %1933 = arith.addf %1932, %1931 : vector<8x32xf32>
    %1934 = arith.divf %1932, %1933 : vector<8x32xf32>
    %1935 = vector.extract_strided_slice %1734 {offsets = [24, 0], sizes = [8, 32], strides = [1, 1]} : vector<64x32xf32> to vector<8x32xf32>
    %1936 = vector.extract_strided_slice %1918 {offsets = [0, 64], sizes = [8, 32], strides = [1, 1]} : vector<8x96xf32> to vector<8x32xf32>
    %1937 = arith.mulf %1926, %1936 : vector<8x32xf32>
    %1938 = arith.addf %1935, %1937 : vector<8x32xf32>
    %1939 = math.tanh %1938 : vector<8x32xf32>
    %cst_726 = arith.constant 1.000000e+00 : f32
    %1940 = vector.broadcast %cst_726 : f32 to vector<8x32xf32>
    %1941 = arith.subf %1940, %1934 : vector<8x32xf32>
    %1942 = arith.mulf %1941, %1939 : vector<8x32xf32>
    %1943 = arith.mulf %1934, %1886 : vector<8x32xf32>
    %1944 = arith.addf %1942, %1943 : vector<8x32xf32>
    %cst_727 = arith.constant dense<0.000000e+00> : vector<8x96xf32>
    %1945 = tpu.matmul %1915, %1739, %cst_727 {dimension_numbers = #tpu.dot_dimension_numbers<[1], [0], [0], [1], [0, 0, 1, 1], [], []>} : vector<8x32xf32>, vector<32x96xf32>, vector<8x96xf32> -> vector<8x96xf32>
    %1946 = vector.broadcast %1723 : vector<1x96xf32> to vector<8x96xf32>
    %1947 = arith.addf %1945, %1946 : vector<8x96xf32>
    %1948 = vector.extract_strided_slice %1735 {offsets = [32, 0], sizes = [8, 32], strides = [1, 1]} : vector<64x32xf32> to vector<8x32xf32>
    %1949 = vector.extract_strided_slice %1947 {offsets = [0, 0], sizes = [8, 32], strides = [1, 1]} : vector<8x96xf32> to vector<8x32xf32>
    %1950 = arith.addf %1948, %1949 : vector<8x32xf32>
    %1951 = arith.negf %1950 : vector<8x32xf32>
    %1952 = math.exp %1951 : vector<8x32xf32>
    %cst_728 = arith.constant 1.000000e+00 : f32
    %1953 = vector.broadcast %cst_728 : f32 to vector<8x32xf32>
    %1954 = arith.addf %1953, %1952 : vector<8x32xf32>
    %1955 = arith.divf %1953, %1954 : vector<8x32xf32>
    %1956 = vector.extract_strided_slice %1736 {offsets = [32, 0], sizes = [8, 32], strides = [1, 1]} : vector<64x32xf32> to vector<8x32xf32>
    %1957 = vector.extract_strided_slice %1947 {offsets = [0, 32], sizes = [8, 32], strides = [1, 1]} : vector<8x96xf32> to vector<8x32xf32>
    %1958 = arith.addf %1956, %1957 : vector<8x32xf32>
    %1959 = arith.negf %1958 : vector<8x32xf32>
    %1960 = math.exp %1959 : vector<8x32xf32>
    %cst_729 = arith.constant 1.000000e+00 : f32
    %1961 = vector.broadcast %cst_729 : f32 to vector<8x32xf32>
    %1962 = arith.addf %1961, %1960 : vector<8x32xf32>
    %1963 = arith.divf %1961, %1962 : vector<8x32xf32>
    %1964 = vector.extract_strided_slice %1737 {offsets = [32, 0], sizes = [8, 32], strides = [1, 1]} : vector<64x32xf32> to vector<8x32xf32>
    %1965 = vector.extract_strided_slice %1947 {offsets = [0, 64], sizes = [8, 32], strides = [1, 1]} : vector<8x96xf32> to vector<8x32xf32>
    %1966 = arith.mulf %1955, %1965 : vector<8x32xf32>
    %1967 = arith.addf %1964, %1966 : vector<8x32xf32>
    %1968 = math.tanh %1967 : vector<8x32xf32>
    %cst_730 = arith.constant 1.000000e+00 : f32
    %1969 = vector.broadcast %cst_730 : f32 to vector<8x32xf32>
    %1970 = arith.subf %1969, %1963 : vector<8x32xf32>
    %1971 = arith.mulf %1970, %1968 : vector<8x32xf32>
    %1972 = arith.mulf %1963, %1915 : vector<8x32xf32>
    %1973 = arith.addf %1971, %1972 : vector<8x32xf32>
    %cst_731 = arith.constant dense<0.000000e+00> : vector<8x96xf32>
    %1974 = tpu.matmul %1944, %1738, %cst_731 {dimension_numbers = #tpu.dot_dimension_numbers<[1], [0], [0], [1], [0, 0, 1, 1], [], []>} : vector<8x32xf32>, vector<32x96xf32>, vector<8x96xf32> -> vector<8x96xf32>
    %1975 = vector.broadcast %1721 : vector<1x96xf32> to vector<8x96xf32>
    %1976 = arith.addf %1974, %1975 : vector<8x96xf32>
    %1977 = vector.extract_strided_slice %1732 {offsets = [32, 0], sizes = [8, 32], strides = [1, 1]} : vector<64x32xf32> to vector<8x32xf32>
    %1978 = vector.extract_strided_slice %1976 {offsets = [0, 0], sizes = [8, 32], strides = [1, 1]} : vector<8x96xf32> to vector<8x32xf32>
    %1979 = arith.addf %1977, %1978 : vector<8x32xf32>
    %1980 = arith.negf %1979 : vector<8x32xf32>
    %1981 = math.exp %1980 : vector<8x32xf32>
    %cst_732 = arith.constant 1.000000e+00 : f32
    %1982 = vector.broadcast %cst_732 : f32 to vector<8x32xf32>
    %1983 = arith.addf %1982, %1981 : vector<8x32xf32>
    %1984 = arith.divf %1982, %1983 : vector<8x32xf32>
    %1985 = vector.extract_strided_slice %1733 {offsets = [32, 0], sizes = [8, 32], strides = [1, 1]} : vector<64x32xf32> to vector<8x32xf32>
    %1986 = vector.extract_strided_slice %1976 {offsets = [0, 32], sizes = [8, 32], strides = [1, 1]} : vector<8x96xf32> to vector<8x32xf32>
    %1987 = arith.addf %1985, %1986 : vector<8x32xf32>
    %1988 = arith.negf %1987 : vector<8x32xf32>
    %1989 = math.exp %1988 : vector<8x32xf32>
    %cst_733 = arith.constant 1.000000e+00 : f32
    %1990 = vector.broadcast %cst_733 : f32 to vector<8x32xf32>
    %1991 = arith.addf %1990, %1989 : vector<8x32xf32>
    %1992 = arith.divf %1990, %1991 : vector<8x32xf32>
    %1993 = vector.extract_strided_slice %1734 {offsets = [32, 0], sizes = [8, 32], strides = [1, 1]} : vector<64x32xf32> to vector<8x32xf32>
    %1994 = vector.extract_strided_slice %1976 {offsets = [0, 64], sizes = [8, 32], strides = [1, 1]} : vector<8x96xf32> to vector<8x32xf32>
    %1995 = arith.mulf %1984, %1994 : vector<8x32xf32>
    %1996 = arith.addf %1993, %1995 : vector<8x32xf32>
    %1997 = math.tanh %1996 : vector<8x32xf32>
    %cst_734 = arith.constant 1.000000e+00 : f32
    %1998 = vector.broadcast %cst_734 : f32 to vector<8x32xf32>
    %1999 = arith.subf %1998, %1992 : vector<8x32xf32>
    %2000 = arith.mulf %1999, %1997 : vector<8x32xf32>
    %2001 = arith.mulf %1992, %1944 : vector<8x32xf32>
    %2002 = arith.addf %2000, %2001 : vector<8x32xf32>
    %cst_735 = arith.constant dense<0.000000e+00> : vector<8x96xf32>
    %2003 = tpu.matmul %1973, %1739, %cst_735 {dimension_numbers = #tpu.dot_dimension_numbers<[1], [0], [0], [1], [0, 0, 1, 1], [], []>} : vector<8x32xf32>, vector<32x96xf32>, vector<8x96xf32> -> vector<8x96xf32>
    %2004 = vector.broadcast %1723 : vector<1x96xf32> to vector<8x96xf32>
    %2005 = arith.addf %2003, %2004 : vector<8x96xf32>
    %2006 = vector.extract_strided_slice %1735 {offsets = [24, 0], sizes = [8, 32], strides = [1, 1]} : vector<64x32xf32> to vector<8x32xf32>
    %2007 = vector.extract_strided_slice %2005 {offsets = [0, 0], sizes = [8, 32], strides = [1, 1]} : vector<8x96xf32> to vector<8x32xf32>
    %2008 = arith.addf %2006, %2007 : vector<8x32xf32>
    %2009 = arith.negf %2008 : vector<8x32xf32>
    %2010 = math.exp %2009 : vector<8x32xf32>
    %cst_736 = arith.constant 1.000000e+00 : f32
    %2011 = vector.broadcast %cst_736 : f32 to vector<8x32xf32>
    %2012 = arith.addf %2011, %2010 : vector<8x32xf32>
    %2013 = arith.divf %2011, %2012 : vector<8x32xf32>
    %2014 = vector.extract_strided_slice %1736 {offsets = [24, 0], sizes = [8, 32], strides = [1, 1]} : vector<64x32xf32> to vector<8x32xf32>
    %2015 = vector.extract_strided_slice %2005 {offsets = [0, 32], sizes = [8, 32], strides = [1, 1]} : vector<8x96xf32> to vector<8x32xf32>
    %2016 = arith.addf %2014, %2015 : vector<8x32xf32>
    %2017 = arith.negf %2016 : vector<8x32xf32>
    %2018 = math.exp %2017 : vector<8x32xf32>
    %cst_737 = arith.constant 1.000000e+00 : f32
    %2019 = vector.broadcast %cst_737 : f32 to vector<8x32xf32>
    %2020 = arith.addf %2019, %2018 : vector<8x32xf32>
    %2021 = arith.divf %2019, %2020 : vector<8x32xf32>
    %2022 = vector.extract_strided_slice %1737 {offsets = [24, 0], sizes = [8, 32], strides = [1, 1]} : vector<64x32xf32> to vector<8x32xf32>
    %2023 = vector.extract_strided_slice %2005 {offsets = [0, 64], sizes = [8, 32], strides = [1, 1]} : vector<8x96xf32> to vector<8x32xf32>
    %2024 = arith.mulf %2013, %2023 : vector<8x32xf32>
    %2025 = arith.addf %2022, %2024 : vector<8x32xf32>
    %2026 = math.tanh %2025 : vector<8x32xf32>
    %cst_738 = arith.constant 1.000000e+00 : f32
    %2027 = vector.broadcast %cst_738 : f32 to vector<8x32xf32>
    %2028 = arith.subf %2027, %2021 : vector<8x32xf32>
    %2029 = arith.mulf %2028, %2026 : vector<8x32xf32>
    %2030 = arith.mulf %2021, %1973 : vector<8x32xf32>
    %2031 = arith.addf %2029, %2030 : vector<8x32xf32>
    %cst_739 = arith.constant dense<0.000000e+00> : vector<8x96xf32>
    %2032 = tpu.matmul %2002, %1738, %cst_739 {dimension_numbers = #tpu.dot_dimension_numbers<[1], [0], [0], [1], [0, 0, 1, 1], [], []>} : vector<8x32xf32>, vector<32x96xf32>, vector<8x96xf32> -> vector<8x96xf32>
    %2033 = vector.broadcast %1721 : vector<1x96xf32> to vector<8x96xf32>
    %2034 = arith.addf %2032, %2033 : vector<8x96xf32>
    %2035 = vector.extract_strided_slice %1732 {offsets = [40, 0], sizes = [8, 32], strides = [1, 1]} : vector<64x32xf32> to vector<8x32xf32>
    %2036 = vector.extract_strided_slice %2034 {offsets = [0, 0], sizes = [8, 32], strides = [1, 1]} : vector<8x96xf32> to vector<8x32xf32>
    %2037 = arith.addf %2035, %2036 : vector<8x32xf32>
    %2038 = arith.negf %2037 : vector<8x32xf32>
    %2039 = math.exp %2038 : vector<8x32xf32>
    %cst_740 = arith.constant 1.000000e+00 : f32
    %2040 = vector.broadcast %cst_740 : f32 to vector<8x32xf32>
    %2041 = arith.addf %2040, %2039 : vector<8x32xf32>
    %2042 = arith.divf %2040, %2041 : vector<8x32xf32>
    %2043 = vector.extract_strided_slice %1733 {offsets = [40, 0], sizes = [8, 32], strides = [1, 1]} : vector<64x32xf32> to vector<8x32xf32>
    %2044 = vector.extract_strided_slice %2034 {offsets = [0, 32], sizes = [8, 32], strides = [1, 1]} : vector<8x96xf32> to vector<8x32xf32>
    %2045 = arith.addf %2043, %2044 : vector<8x32xf32>
    %2046 = arith.negf %2045 : vector<8x32xf32>
    %2047 = math.exp %2046 : vector<8x32xf32>
    %cst_741 = arith.constant 1.000000e+00 : f32
    %2048 = vector.broadcast %cst_741 : f32 to vector<8x32xf32>
    %2049 = arith.addf %2048, %2047 : vector<8x32xf32>
    %2050 = arith.divf %2048, %2049 : vector<8x32xf32>
    %2051 = vector.extract_strided_slice %1734 {offsets = [40, 0], sizes = [8, 32], strides = [1, 1]} : vector<64x32xf32> to vector<8x32xf32>
    %2052 = vector.extract_strided_slice %2034 {offsets = [0, 64], sizes = [8, 32], strides = [1, 1]} : vector<8x96xf32> to vector<8x32xf32>
    %2053 = arith.mulf %2042, %2052 : vector<8x32xf32>
    %2054 = arith.addf %2051, %2053 : vector<8x32xf32>
    %2055 = math.tanh %2054 : vector<8x32xf32>
    %cst_742 = arith.constant 1.000000e+00 : f32
    %2056 = vector.broadcast %cst_742 : f32 to vector<8x32xf32>
    %2057 = arith.subf %2056, %2050 : vector<8x32xf32>
    %2058 = arith.mulf %2057, %2055 : vector<8x32xf32>
    %2059 = arith.mulf %2050, %2002 : vector<8x32xf32>
    %2060 = arith.addf %2058, %2059 : vector<8x32xf32>
    %cst_743 = arith.constant dense<0.000000e+00> : vector<8x96xf32>
    %2061 = tpu.matmul %2031, %1739, %cst_743 {dimension_numbers = #tpu.dot_dimension_numbers<[1], [0], [0], [1], [0, 0, 1, 1], [], []>} : vector<8x32xf32>, vector<32x96xf32>, vector<8x96xf32> -> vector<8x96xf32>
    %2062 = vector.broadcast %1723 : vector<1x96xf32> to vector<8x96xf32>
    %2063 = arith.addf %2061, %2062 : vector<8x96xf32>
    %2064 = vector.extract_strided_slice %1735 {offsets = [16, 0], sizes = [8, 32], strides = [1, 1]} : vector<64x32xf32> to vector<8x32xf32>
    %2065 = vector.extract_strided_slice %2063 {offsets = [0, 0], sizes = [8, 32], strides = [1, 1]} : vector<8x96xf32> to vector<8x32xf32>
    %2066 = arith.addf %2064, %2065 : vector<8x32xf32>
    %2067 = arith.negf %2066 : vector<8x32xf32>
    %2068 = math.exp %2067 : vector<8x32xf32>
    %cst_744 = arith.constant 1.000000e+00 : f32
    %2069 = vector.broadcast %cst_744 : f32 to vector<8x32xf32>
    %2070 = arith.addf %2069, %2068 : vector<8x32xf32>
    %2071 = arith.divf %2069, %2070 : vector<8x32xf32>
    %2072 = vector.extract_strided_slice %1736 {offsets = [16, 0], sizes = [8, 32], strides = [1, 1]} : vector<64x32xf32> to vector<8x32xf32>
    %2073 = vector.extract_strided_slice %2063 {offsets = [0, 32], sizes = [8, 32], strides = [1, 1]} : vector<8x96xf32> to vector<8x32xf32>
    %2074 = arith.addf %2072, %2073 : vector<8x32xf32>
    %2075 = arith.negf %2074 : vector<8x32xf32>
    %2076 = math.exp %2075 : vector<8x32xf32>
    %cst_745 = arith.constant 1.000000e+00 : f32
    %2077 = vector.broadcast %cst_745 : f32 to vector<8x32xf32>
    %2078 = arith.addf %2077, %2076 : vector<8x32xf32>
    %2079 = arith.divf %2077, %2078 : vector<8x32xf32>
    %2080 = vector.extract_strided_slice %1737 {offsets = [16, 0], sizes = [8, 32], strides = [1, 1]} : vector<64x32xf32> to vector<8x32xf32>
    %2081 = vector.extract_strided_slice %2063 {offsets = [0, 64], sizes = [8, 32], strides = [1, 1]} : vector<8x96xf32> to vector<8x32xf32>
    %2082 = arith.mulf %2071, %2081 : vector<8x32xf32>
    %2083 = arith.addf %2080, %2082 : vector<8x32xf32>
    %2084 = math.tanh %2083 : vector<8x32xf32>
    %cst_746 = arith.constant 1.000000e+00 : f32
    %2085 = vector.broadcast %cst_746 : f32 to vector<8x32xf32>
    %2086 = arith.subf %2085, %2079 : vector<8x32xf32>
    %2087 = arith.mulf %2086, %2084 : vector<8x32xf32>
    %2088 = arith.mulf %2079, %2031 : vector<8x32xf32>
    %2089 = arith.addf %2087, %2088 : vector<8x32xf32>
    %cst_747 = arith.constant dense<0.000000e+00> : vector<8x96xf32>
    %2090 = tpu.matmul %2060, %1738, %cst_747 {dimension_numbers = #tpu.dot_dimension_numbers<[1], [0], [0], [1], [0, 0, 1, 1], [], []>} : vector<8x32xf32>, vector<32x96xf32>, vector<8x96xf32> -> vector<8x96xf32>
    %2091 = vector.broadcast %1721 : vector<1x96xf32> to vector<8x96xf32>
    %2092 = arith.addf %2090, %2091 : vector<8x96xf32>
    %2093 = vector.extract_strided_slice %1732 {offsets = [48, 0], sizes = [8, 32], strides = [1, 1]} : vector<64x32xf32> to vector<8x32xf32>
    %2094 = vector.extract_strided_slice %2092 {offsets = [0, 0], sizes = [8, 32], strides = [1, 1]} : vector<8x96xf32> to vector<8x32xf32>
    %2095 = arith.addf %2093, %2094 : vector<8x32xf32>
    %2096 = arith.negf %2095 : vector<8x32xf32>
    %2097 = math.exp %2096 : vector<8x32xf32>
    %cst_748 = arith.constant 1.000000e+00 : f32
    %2098 = vector.broadcast %cst_748 : f32 to vector<8x32xf32>
    %2099 = arith.addf %2098, %2097 : vector<8x32xf32>
    %2100 = arith.divf %2098, %2099 : vector<8x32xf32>
    %2101 = vector.extract_strided_slice %1733 {offsets = [48, 0], sizes = [8, 32], strides = [1, 1]} : vector<64x32xf32> to vector<8x32xf32>
    %2102 = vector.extract_strided_slice %2092 {offsets = [0, 32], sizes = [8, 32], strides = [1, 1]} : vector<8x96xf32> to vector<8x32xf32>
    %2103 = arith.addf %2101, %2102 : vector<8x32xf32>
    %2104 = arith.negf %2103 : vector<8x32xf32>
    %2105 = math.exp %2104 : vector<8x32xf32>
    %cst_749 = arith.constant 1.000000e+00 : f32
    %2106 = vector.broadcast %cst_749 : f32 to vector<8x32xf32>
    %2107 = arith.addf %2106, %2105 : vector<8x32xf32>
    %2108 = arith.divf %2106, %2107 : vector<8x32xf32>
    %2109 = vector.extract_strided_slice %1734 {offsets = [48, 0], sizes = [8, 32], strides = [1, 1]} : vector<64x32xf32> to vector<8x32xf32>
    %2110 = vector.extract_strided_slice %2092 {offsets = [0, 64], sizes = [8, 32], strides = [1, 1]} : vector<8x96xf32> to vector<8x32xf32>
    %2111 = arith.mulf %2100, %2110 : vector<8x32xf32>
    %2112 = arith.addf %2109, %2111 : vector<8x32xf32>
    %2113 = math.tanh %2112 : vector<8x32xf32>
    %cst_750 = arith.constant 1.000000e+00 : f32
    %2114 = vector.broadcast %cst_750 : f32 to vector<8x32xf32>
    %2115 = arith.subf %2114, %2108 : vector<8x32xf32>
    %2116 = arith.mulf %2115, %2113 : vector<8x32xf32>
    %2117 = arith.mulf %2108, %2060 : vector<8x32xf32>
    %2118 = arith.addf %2116, %2117 : vector<8x32xf32>
    %cst_751 = arith.constant dense<0.000000e+00> : vector<8x96xf32>
    %2119 = tpu.matmul %2089, %1739, %cst_751 {dimension_numbers = #tpu.dot_dimension_numbers<[1], [0], [0], [1], [0, 0, 1, 1], [], []>} : vector<8x32xf32>, vector<32x96xf32>, vector<8x96xf32> -> vector<8x96xf32>
    %2120 = vector.broadcast %1723 : vector<1x96xf32> to vector<8x96xf32>
    %2121 = arith.addf %2119, %2120 : vector<8x96xf32>
    %2122 = vector.extract_strided_slice %1735 {offsets = [8, 0], sizes = [8, 32], strides = [1, 1]} : vector<64x32xf32> to vector<8x32xf32>
    %2123 = vector.extract_strided_slice %2121 {offsets = [0, 0], sizes = [8, 32], strides = [1, 1]} : vector<8x96xf32> to vector<8x32xf32>
    %2124 = arith.addf %2122, %2123 : vector<8x32xf32>
    %2125 = arith.negf %2124 : vector<8x32xf32>
    %2126 = math.exp %2125 : vector<8x32xf32>
    %cst_752 = arith.constant 1.000000e+00 : f32
    %2127 = vector.broadcast %cst_752 : f32 to vector<8x32xf32>
    %2128 = arith.addf %2127, %2126 : vector<8x32xf32>
    %2129 = arith.divf %2127, %2128 : vector<8x32xf32>
    %2130 = vector.extract_strided_slice %1736 {offsets = [8, 0], sizes = [8, 32], strides = [1, 1]} : vector<64x32xf32> to vector<8x32xf32>
    %2131 = vector.extract_strided_slice %2121 {offsets = [0, 32], sizes = [8, 32], strides = [1, 1]} : vector<8x96xf32> to vector<8x32xf32>
    %2132 = arith.addf %2130, %2131 : vector<8x32xf32>
    %2133 = arith.negf %2132 : vector<8x32xf32>
    %2134 = math.exp %2133 : vector<8x32xf32>
    %cst_753 = arith.constant 1.000000e+00 : f32
    %2135 = vector.broadcast %cst_753 : f32 to vector<8x32xf32>
    %2136 = arith.addf %2135, %2134 : vector<8x32xf32>
    %2137 = arith.divf %2135, %2136 : vector<8x32xf32>
    %2138 = vector.extract_strided_slice %1737 {offsets = [8, 0], sizes = [8, 32], strides = [1, 1]} : vector<64x32xf32> to vector<8x32xf32>
    %2139 = vector.extract_strided_slice %2121 {offsets = [0, 64], sizes = [8, 32], strides = [1, 1]} : vector<8x96xf32> to vector<8x32xf32>
    %2140 = arith.mulf %2129, %2139 : vector<8x32xf32>
    %2141 = arith.addf %2138, %2140 : vector<8x32xf32>
    %2142 = math.tanh %2141 : vector<8x32xf32>
    %cst_754 = arith.constant 1.000000e+00 : f32
    %2143 = vector.broadcast %cst_754 : f32 to vector<8x32xf32>
    %2144 = arith.subf %2143, %2137 : vector<8x32xf32>
    %2145 = arith.mulf %2144, %2142 : vector<8x32xf32>
    %2146 = arith.mulf %2137, %2089 : vector<8x32xf32>
    %2147 = arith.addf %2145, %2146 : vector<8x32xf32>
    %cst_755 = arith.constant dense<0.000000e+00> : vector<8x96xf32>
    %2148 = tpu.matmul %2118, %1738, %cst_755 {dimension_numbers = #tpu.dot_dimension_numbers<[1], [0], [0], [1], [0, 0, 1, 1], [], []>} : vector<8x32xf32>, vector<32x96xf32>, vector<8x96xf32> -> vector<8x96xf32>
    %2149 = vector.broadcast %1721 : vector<1x96xf32> to vector<8x96xf32>
    %2150 = arith.addf %2148, %2149 : vector<8x96xf32>
    %2151 = vector.extract_strided_slice %1732 {offsets = [56, 0], sizes = [8, 32], strides = [1, 1]} : vector<64x32xf32> to vector<8x32xf32>
    %2152 = vector.extract_strided_slice %2150 {offsets = [0, 0], sizes = [8, 32], strides = [1, 1]} : vector<8x96xf32> to vector<8x32xf32>
    %2153 = arith.addf %2151, %2152 : vector<8x32xf32>
    %2154 = arith.negf %2153 : vector<8x32xf32>
    %2155 = math.exp %2154 : vector<8x32xf32>
    %cst_756 = arith.constant 1.000000e+00 : f32
    %2156 = vector.broadcast %cst_756 : f32 to vector<8x32xf32>
    %2157 = arith.addf %2156, %2155 : vector<8x32xf32>
    %2158 = arith.divf %2156, %2157 : vector<8x32xf32>
    %2159 = vector.extract_strided_slice %1733 {offsets = [56, 0], sizes = [8, 32], strides = [1, 1]} : vector<64x32xf32> to vector<8x32xf32>
    %2160 = vector.extract_strided_slice %2150 {offsets = [0, 32], sizes = [8, 32], strides = [1, 1]} : vector<8x96xf32> to vector<8x32xf32>
    %2161 = arith.addf %2159, %2160 : vector<8x32xf32>
    %2162 = arith.negf %2161 : vector<8x32xf32>
    %2163 = math.exp %2162 : vector<8x32xf32>
    %cst_757 = arith.constant 1.000000e+00 : f32
    %2164 = vector.broadcast %cst_757 : f32 to vector<8x32xf32>
    %2165 = arith.addf %2164, %2163 : vector<8x32xf32>
    %2166 = arith.divf %2164, %2165 : vector<8x32xf32>
    %2167 = vector.extract_strided_slice %1734 {offsets = [56, 0], sizes = [8, 32], strides = [1, 1]} : vector<64x32xf32> to vector<8x32xf32>
    %2168 = vector.extract_strided_slice %2150 {offsets = [0, 64], sizes = [8, 32], strides = [1, 1]} : vector<8x96xf32> to vector<8x32xf32>
    %2169 = arith.mulf %2158, %2168 : vector<8x32xf32>
    %2170 = arith.addf %2167, %2169 : vector<8x32xf32>
    %2171 = math.tanh %2170 : vector<8x32xf32>
    %cst_758 = arith.constant 1.000000e+00 : f32
    %2172 = vector.broadcast %cst_758 : f32 to vector<8x32xf32>
    %2173 = arith.subf %2172, %2166 : vector<8x32xf32>
    %2174 = arith.mulf %2173, %2171 : vector<8x32xf32>
    %2175 = arith.mulf %2166, %2118 : vector<8x32xf32>
    %2176 = arith.addf %2174, %2175 : vector<8x32xf32>
    %cst_759 = arith.constant dense<0.000000e+00> : vector<8x96xf32>
    %2177 = tpu.matmul %2147, %1739, %cst_759 {dimension_numbers = #tpu.dot_dimension_numbers<[1], [0], [0], [1], [0, 0, 1, 1], [], []>} : vector<8x32xf32>, vector<32x96xf32>, vector<8x96xf32> -> vector<8x96xf32>
    %2178 = vector.broadcast %1723 : vector<1x96xf32> to vector<8x96xf32>
    %2179 = arith.addf %2177, %2178 : vector<8x96xf32>
    %2180 = vector.extract_strided_slice %1735 {offsets = [0, 0], sizes = [8, 32], strides = [1, 1]} : vector<64x32xf32> to vector<8x32xf32>
    %2181 = vector.extract_strided_slice %2179 {offsets = [0, 0], sizes = [8, 32], strides = [1, 1]} : vector<8x96xf32> to vector<8x32xf32>
    %2182 = arith.addf %2180, %2181 : vector<8x32xf32>
    %2183 = arith.negf %2182 : vector<8x32xf32>
    %2184 = math.exp %2183 : vector<8x32xf32>
    %cst_760 = arith.constant 1.000000e+00 : f32
    %2185 = vector.broadcast %cst_760 : f32 to vector<8x32xf32>
    %2186 = arith.addf %2185, %2184 : vector<8x32xf32>
    %2187 = arith.divf %2185, %2186 : vector<8x32xf32>
    %2188 = vector.extract_strided_slice %1736 {offsets = [0, 0], sizes = [8, 32], strides = [1, 1]} : vector<64x32xf32> to vector<8x32xf32>
    %2189 = vector.extract_strided_slice %2179 {offsets = [0, 32], sizes = [8, 32], strides = [1, 1]} : vector<8x96xf32> to vector<8x32xf32>
    %2190 = arith.addf %2188, %2189 : vector<8x32xf32>
    %2191 = arith.negf %2190 : vector<8x32xf32>
    %2192 = math.exp %2191 : vector<8x32xf32>
    %cst_761 = arith.constant 1.000000e+00 : f32
    %2193 = vector.broadcast %cst_761 : f32 to vector<8x32xf32>
    %2194 = arith.addf %2193, %2192 : vector<8x32xf32>
    %2195 = arith.divf %2193, %2194 : vector<8x32xf32>
    %2196 = vector.extract_strided_slice %1737 {offsets = [0, 0], sizes = [8, 32], strides = [1, 1]} : vector<64x32xf32> to vector<8x32xf32>
    %2197 = vector.extract_strided_slice %2179 {offsets = [0, 64], sizes = [8, 32], strides = [1, 1]} : vector<8x96xf32> to vector<8x32xf32>
    %2198 = arith.mulf %2187, %2197 : vector<8x32xf32>
    %2199 = arith.addf %2196, %2198 : vector<8x32xf32>
    %2200 = math.tanh %2199 : vector<8x32xf32>
    %cst_762 = arith.constant 1.000000e+00 : f32
    %2201 = vector.broadcast %cst_762 : f32 to vector<8x32xf32>
    %2202 = arith.subf %2201, %2195 : vector<8x32xf32>
    %2203 = arith.mulf %2202, %2200 : vector<8x32xf32>
    %2204 = arith.mulf %2195, %2147 : vector<8x32xf32>
    %2205 = arith.addf %2203, %2204 : vector<8x32xf32>
    %2206 = tpu.concatenate %2176, %2205 in 1 : vector<8x32xf32>, vector<8x32xf32> -> vector<8x64xf32>
    %cst_763 = arith.constant 0.000000e+00 : f32
    %2207 = vector.broadcast %cst_763 : f32 to vector<8x64xf32>
    %2208 = arith.cmpf ogt, %2206, %2207 : vector<8x64xf32>
    %cst_764 = arith.constant 1.000000e-01 : f32
    %2209 = vector.broadcast %cst_764 : f32 to vector<8x64xf32>
    %2210 = arith.mulf %2209, %2206 : vector<8x64xf32>
    %2211 = arith.select %2208, %2206, %2210 : vector<8x64xi1>, vector<8x64xf32>
    %c0_765 = arith.constant 0 : index
    %c0_766 = arith.constant 0 : index
    %2212 = vector.load %arg15[%c0_765, %c0_766] : memref<3x64xf32, #tpu.memory_space<vmem>>, vector<1x64xf32>
    %2213 = vector.broadcast %2212 : vector<1x64xf32> to vector<8x64xf32>
    %2214 = arith.mulf %2211, %2213 : vector<8x64xf32>
    %c1_767 = arith.constant 1 : index
    %c0_768 = arith.constant 0 : index
    %2215 = vector.load %arg15[%c1_767, %c0_768] : memref<3x64xf32, #tpu.memory_space<vmem>>, vector<1x64xf32>
    %2216 = vector.broadcast %2215 : vector<1x64xf32> to vector<8x64xf32>
    %2217 = arith.addf %2214, %2216 : vector<8x64xf32>
    %c2_769 = arith.constant 2 : index
    %c0_770 = arith.constant 0 : index
    %2218 = vector.load %arg15[%c2_769, %c0_770] : memref<3x64xf32, #tpu.memory_space<vmem>>, vector<1x64xf32>
    %cst_771 = arith.constant dense<0.000000e+00> : vector<1x8xf32>
    %2219 = tpu.matmul %2218, %2217, %cst_771 {dimension_numbers = #tpu.dot_dimension_numbers<[1], [1], [0], [0], [0, 0, 1, 0], [], []>} : vector<1x64xf32>, vector<8x64xf32>, vector<1x8xf32> -> vector<1x8xf32>
    %c19_772 = arith.constant 19 : index
    %c0_773 = arith.constant 0 : index
    %2220 = memref.load %arg2[%c19_772, %c0_773] : memref<20x21xf32, #tpu.memory_space<smem>>
    %2221 = vector.broadcast %2220 : f32 to vector<1x8xf32>
    %2222 = arith.addf %2219, %2221 : vector<1x8xf32>
    %2223 = arith.negf %2222 : vector<1x8xf32>
    %2224 = math.exp %2223 : vector<1x8xf32>
    %cst_774 = arith.constant 1.000000e+00 : f32
    %2225 = vector.broadcast %cst_774 : f32 to vector<1x8xf32>
    %2226 = arith.addf %2225, %2224 : vector<1x8xf32>
    %2227 = arith.divf %2225, %2226 : vector<1x8xf32>
    %c0_775 = arith.constant 0 : index
    %c0_776 = arith.constant 0 : index
    %c0_777 = arith.constant 0 : index
    %2228 = vector.load %arg16[%c0_775, %c0_776, %c0_777] : memref<1x1x8xf32, #tpu.memory_space<vmem>>, vector<1x1x8xf32>
    %2229 = vector.shape_cast %2228 : vector<1x1x8xf32> to vector<1x8xf32>
    %2230 = vector.shape_cast %2227 : vector<1x8xf32> to vector<1x1x8xf32>
    tpu.vector_store %arg16[%c0_775, %c0_776, %c0_777], %2230 {strides = array<i32>} : memref<1x1x8xf32, #tpu.memory_space<vmem>>, vector<1x1x8xf32>,
    return
  }
  func.func @transform_0(%arg0: i32) -> (i32, i32) {
    %c0_i32 = arith.constant 0 : i32
    %c0_i32_0 = arith.constant 0 : i32
    return %arg0, %c0_i32 : i32, i32
  }
  func.func @transform_1(%arg0: i32) -> (i32, i32) {
    %c0_i32 = arith.constant 0 : i32
    %c0_i32_0 = arith.constant 0 : i32
    %c0_i32_1 = arith.constant 0 : i32
    return %c0_i32, %c0_i32_0 : i32, i32
  }
  func.func @transform_2(%arg0: i32) -> (i32, i32) {
    %c0_i32 = arith.constant 0 : i32
    %c0_i32_0 = arith.constant 0 : i32
    %c0_i32_1 = arith.constant 0 : i32
    return %c0_i32, %c0_i32_0 : i32, i32
  }
  func.func @transform_3(%arg0: i32) -> (i32, i32) {
    %c0_i32 = arith.constant 0 : i32
    %c0_i32_0 = arith.constant 0 : i32
    %c0_i32_1 = arith.constant 0 : i32
    return %c0_i32, %c0_i32_0 : i32, i32
  }
  func.func @transform_4(%arg0: i32) -> (i32, i32) {
    %c0_i32 = arith.constant 0 : i32
    %c0_i32_0 = arith.constant 0 : i32
    %c0_i32_1 = arith.constant 0 : i32
    return %c0_i32, %c0_i32_0 : i32, i32
  }
  func.func @transform_5(%arg0: i32) -> (i32, i32) {
    %c0_i32 = arith.constant 0 : i32
    %c0_i32_0 = arith.constant 0 : i32
    %c0_i32_1 = arith.constant 0 : i32
    return %c0_i32, %c0_i32_0 : i32, i32
  }
  func.func @transform_6(%arg0: i32) -> (i32, i32) {
    %c0_i32 = arith.constant 0 : i32
    %c0_i32_0 = arith.constant 0 : i32
    %c0_i32_1 = arith.constant 0 : i32
    return %c0_i32, %c0_i32_0 : i32, i32
  }
  func.func @transform_7(%arg0: i32) -> (i32, i32) {
    %c0_i32 = arith.constant 0 : i32
    %c0_i32_0 = arith.constant 0 : i32
    %c0_i32_1 = arith.constant 0 : i32
    return %c0_i32, %c0_i32_0 : i32, i32
  }
  func.func @transform_8(%arg0: i32) -> (i32, i32) {
    %c0_i32 = arith.constant 0 : i32
    %c0_i32_0 = arith.constant 0 : i32
    %c0_i32_1 = arith.constant 0 : i32
    return %c0_i32, %c0_i32_0 : i32, i32
  }
  func.func @transform_9(%arg0: i32) -> (i32, i32) {
    %c0_i32 = arith.constant 0 : i32
    %c0_i32_0 = arith.constant 0 : i32
    %c0_i32_1 = arith.constant 0 : i32
    return %c0_i32, %c0_i32_0 : i32, i32
  }
  func.func @transform_10(%arg0: i32) -> (i32, i32) {
    %c0_i32 = arith.constant 0 : i32
    %c0_i32_0 = arith.constant 0 : i32
    %c0_i32_1 = arith.constant 0 : i32
    return %c0_i32, %c0_i32_0 : i32, i32
  }
  func.func @transform_11(%arg0: i32) -> (i32, i32) {
    %c0_i32 = arith.constant 0 : i32
    %c0_i32_0 = arith.constant 0 : i32
    %c0_i32_1 = arith.constant 0 : i32
    return %c0_i32, %c0_i32_0 : i32, i32
  }
  func.func @transform_12(%arg0: i32) -> (i32, i32) {
    %c0_i32 = arith.constant 0 : i32
    %c0_i32_0 = arith.constant 0 : i32
    %c0_i32_1 = arith.constant 0 : i32
    return %c0_i32, %c0_i32_0 : i32, i32
  }
  func.func @transform_13(%arg0: i32) -> (i32, i32) {
    %c0_i32 = arith.constant 0 : i32
    %c0_i32_0 = arith.constant 0 : i32
    %c0_i32_1 = arith.constant 0 : i32
    return %c0_i32, %c0_i32_0 : i32, i32
  }
  func.func @transform_14(%arg0: i32) -> (i32, i32) {
    %c0_i32 = arith.constant 0 : i32
    %c0_i32_0 = arith.constant 0 : i32
    %c0_i32_1 = arith.constant 0 : i32
    return %c0_i32, %c0_i32_0 : i32, i32
  }
  func.func @transform_15(%arg0: i32) -> (i32, i32, i32) {
    %c0_i32 = arith.constant 0 : i32
    %c0_i32_0 = arith.constant 0 : i32
    %c0_i32_1 = arith.constant 0 : i32
    return %arg0, %c0_i32, %c0_i32_0 : i32, i32, i32
  }
}

</mosaic_0001>

<bundles_post_ra>
// kernel: node_rnn_forward.1
= control target key start
LH: loop header
LB: loop body
LE: loop exit
PB: predicated region body
PF: predicated region fallthrough
CT: control target
= control target key end

     0   :  { %s9907_s0 = inlined_call_operand.vmem [shape: f32[16,98], index: 0, kind: input, shape index: {}]   ;;  %s9908_s1 = inlined_call_operand.vmem [shape: f32[20,21], index: 1, kind: input, shape index: {}]   ;;  %s9909_s2 = inlined_call_operand.vmem [shape: f32[94,32], index: 2, kind: input, shape index: {}]   ;;  %s9910_s3 = inlined_call_operand.vmem [shape: f32[28,10], index: 3, kind: input, shape index: {}]   ;;  %s9911_s4 = inlined_call_operand.vmem [shape: f32[8,96], index: 4, kind: input, shape index: {}]   ;;  %s9912_s5 = inlined_call_operand.vmem [shape: f32[8,96], index: 5, kind: input, shape index: {}]   ;;  %s9913_s6 = inlined_call_operand.vmem [shape: f32[32,96], index: 6, kind: input, shape index: {}]   ;;  %s9914_s7 = inlined_call_operand.vmem [shape: f32[32,96], index: 7, kind: input, shape index: {}]   ;;  %s9915_s8 = inlined_call_operand.vmem [shape: f32[4,96], index: 8, kind: input, shape index: {}]   ;;  %s9916_s9 = inlined_call_operand.vmem [shape: f32[64,96], index: 9, kind: input, shape index: {}]   ;;  %s9917_s10 = inlined_call_operand.vmem [shape: f32[64,96], index: 10, kind: input, shape index: {}]   ;;  %s9918_s11 = inlined_call_operand.vmem [shape: f32[32,96], index: 11, kind: input, shape index: {}]   ;;  %s9919_s12 = inlined_call_operand.vmem [shape: f32[32,96], index: 12, kind: input, shape index: {}]   ;;  %s9920_s13 = inlined_call_operand.vmem [shape: f32[4,96], index: 13, kind: input, shape index: {}]   ;;  %s9921_s14 = inlined_call_operand.vmem [shape: f32[3,64], index: 14, kind: input, shape index: {}]   ;;  %s9922_s15 = inlined_call_operand.vmem [shape: f32[2,1,8], index: 15, kind: output, shape index: {}]  }
   0x1   :  { %9925 = sst [smem:[#allocation6_spill]] %s9907_s0 }
   0x2   :  { %9926 = sst [smem:[#allocation7_spill]] %s9908_s1 }
   0x3   :  { %9927 = sst [smem:[#allocation8_spill]] %s9909_s2 }
   0x4   :  { %20 = vsyncpa [#allocation4], 0  ;;  %s8014_s18 = smov 0  }
   0x5 LB: > { %s8020_s19 = sadd.s32 4294967295, %s7922_s18   ;;  %p6528_p0 = scmp.ge.s32.totalorder %s7922_s18, 1  ;;  %s7922_s18 = sphi %s8014_s18, %s26_s18  }
   0x6   : > { %p377_p1 = scmp.lt.s32.totalorder %s7922_s18, 3  ;;  %s9928_s1 = sld [smem:[#allocation7_spill]] }
   0x7   : > { %p7667_p3 = scmp.eq.s32.totalorder %s8020_s19, 0 }
   0x8   : > { %p8027_p2 = pnand %p6528_p0, %p377_p1 }
   0xa   : > { %p7663_p4 = pneg %p8027_p2 }
   0xc   : > { %s389_s22 = sshll.u32 %s9928_s1, 4  ;;  %p8036_p5 = pnand %p7667_p3, %p7663_p4  ;;  %s390_s22 = int_to_ptr.vmem [resolvable:$true] %s389_s22 }
   0xd   : > { %s7897_s25 = scalar_lea.vmem %s390_s22, 384  ;;  %p7905_p10 = scmp.lt.s32.totalorder %s390_s22, %s390_s22 }
   0xe   : > { %p7898_p6 = scmp.ne.s32.totalorder %s390_s22, %s7897_s25  ;;  %p7899_p7 = pneg %p8036_p5 }
   0xf   : > { %p7906_p11 = scmp.lt.s32.totalorder %s7897_s25, %s7897_s25 }
  0x10   : > { %p7900_p8 = pnand %p7899_p7, %p7898_p6 }
  0x11   : > { %p7907_p12 = por %p7906_p11, %p7905_p10 }
  0x12   : > { %p7901_p9 = pneg %p7900_p8 }
  0x14   : > { %p7908_p13 = pnand %p7907_p12, %p7901_p9 }
  0x16   : > { %7911 = shalt.err (!%p7908_p13)
}
  0x17   : > { %s7924_s26 = smov [#allocation3]   ;;  %s7925_s27 = smov 128  }
  0x18   : > { %s7926_s28 = smov 8   ;;  %451 = sbr.rel (%p8027_p2) target bundleno = 12522 (0x30ea), region = 80 }
  0x19   : > { %7666 = dma.vmem_to_smem (!%p8036_p5), %s390_s22, 384, %s7924_s26, [#allocation4], %s7925_s27, %s7925_s27, %s7926_s28  }
  0x1d   : > { %7917 = dma.done.wait (%p7667_p3), [#allocation4], 384  }
  0x1e   : > { %7919 = vsyncadd (%p7667_p3), [#allocation4], 4294966912 }
  0x1f   : > { %457 = sfence }
  0x20   : > { %p497_p0 = scmp.lt.s32.totalorder %s8020_s19, 1  ;;  %s6534_s29 = sld [smem:[#allocation3 + $0x1]]  ;;  %vm704_vm0 = vcmask 1045504   ;;  %vm685_vm1 = vcmask 769024   ;;  %vm1535_vm8 = vcmask 1043456   ;;  %vm7930_vm9 = vmmov 0  }
  0x21   : > { %s6535_s30 = sld [smem:[#allocation3 + $0x2]]  ;;  %s7927_s28 = smov 127   ;;  %vm1519_vm10 = vcmask 228352  }
  0x22   : > { %s9935_s19 = smov (!%p497_p0, %s8020_s19), 1  ;;  %s6537_s16 = sld [smem:[#allocation3 + $0x81]] }
  0x23   : > { %s6533_s17 = sshll.u32 %s9935_s19, 3  ;;  %s6538_s20 = sld [smem:[#allocation3 + $0x82]] }
  0x24   : > { %s9931_s0 = sld [smem:[#allocation6_spill]]  ;;  %s9923_s1 = smov 126  }
  0x25   : > { %s6540_s24 = sld [smem:[#allocation3 + $0x101]] }
  0x26   : > { %v509_v1 = vstv %s6534_s29  ;;  %s6543_s25 = sld [smem:[#allocation3 + $0x181]] }
  0x27   : > { %v517_v3 = vstv %s6535_s30  ;;  %s6541_s26 = sld [smem:[#allocation3 + $0x102]] }
  0x28   : > { %s6544_s27 = sld [smem:[#allocation3 + $0x182]]  ;;  %v528_v5 = vstv %s6537_s16 }
  0x29   : > { %v536_v7 = vstv %s6538_s20  ;;  %s6549_s29 = sld [smem:[#allocation3 + $0x281]] }
  0x2a   : > { %s500_s23 = scalar_lea.vmem %s9931_s0, %s6533_s17  ;;  %s6546_s17 = sld [smem:[#allocation3 + $0x201]] }
  0x2b   : > { %v8058_v0 = vld [vmem:[%s500_s23] sm:$0xff]  ;;  %v547_v9 = vstv %s6540_s24  ;;  %s6547_s30 = sld [smem:[#allocation3 + $0x202]] }
  0x2c   : > { %v510_v2 = vmul.f32 %v509_v1, %v8058_v0  ;;  %v518_v4 = vmul.f32 %v517_v3, %v8058_v0  ;;  %v529_v6 = vmul.f32 %v528_v5, %v8058_v0  ;;  %v537_v8 = vmul.f32 %v536_v7, %v8058_v0  ;;  %s6550_s16 = sld [smem:[#allocation3 + $0x282]] }
  0x2d   : > { %v566_v10 = vstv %s6543_s25  ;;  %v548_v11 = vmul.f32 %v547_v9, %v8058_v0  ;;  %v555_v13 = vstv %s6541_s26  ;;  %s9932_s2 = sld [smem:[#allocation8_spill]] }
  0x2e   : > { %512 = vrot.lane.b32.xlu0 %v510_v2, %s7927_s28  ;;  %520 = vrot.lane.b32.xlu1 %v518_v4, %s9923_s1  ;;  %v567_v12 = vmul.f32 %v566_v10, %v8058_v0  ;;  %v574_v14 = vstv %s6544_s27  ;;  %v556_v15 = vmul.f32 %v555_v13, %v8058_v0  ;;  %s505_s22 = sld [smem:[#allocation3]] }
  0x2f   : > { %v575_v16 = vmul.f32 %v574_v14, %v8058_v0  ;;  %v604_v18 = vstv %s6549_s29  ;;  %s6536_s23 = sld [smem:[#allocation3 + $0x80]] }
  0x30   : > { %v585_v17 = vstv %s6546_s17  ;;  %v605_v20 = vmul.f32 %v604_v18, %v8058_v0  ;;  %s6539_s17 = sld [smem:[#allocation3 + $0x100]] }
  0x31   : > { %v586_v19 = vmul.f32 %v585_v17, %v8058_v0  ;;  %v593_v21 = vstv %s6547_s30  ;;  %s6542_s29 = sld [smem:[#allocation3 + $0x180]] }
  0x32   : > { %531 = vrot.lane.b32.xlu0 %v529_v6, %s7927_s28  ;;  %539 = vrot.lane.b32.xlu1 %v537_v8, %s9923_s1  ;;  %v612_v22 = vstv %s6550_s16  ;;  %v594_v25 = vmul.f32 %v593_v21, %v8058_v0  ;;  %s6545_s25 = sld [smem:[#allocation3 + $0x200]] }
  0x33   : > { %v684_v23 = vld [vmem:[%s9932_s2 + $0x58] sm:$0x3f]  ;;  %v683_v24 = vld [vmem:[%s9932_s2 + $0x50] sm:$0xff]  ;;  %v613_v26 = vmul.f32 %v612_v22, %v8058_v0  ;;  %v682_v27 = vld [vmem:[%s9932_s2 + $0x48] sm:$0xff]  ;;  %s6548_s26 = sld [smem:[#allocation3 + $0x280]] }
  0x34   : > { %7162 = vmatprep.subr.msk.mxu0 %vm704_vm0, %v684_v23  ;;  %v681_v28 = vld [vmem:[%s9932_s2 + $0x40] sm:$0xff]  ;;  %v680_v29 = vld [vmem:[%s9932_s2 + $0x38] sm:$0xff]  ;;  %v679_v30 = vld [vmem:[%s9932_s2 + $0x30] sm:$0xff]  ;;  %v506_v34 = vstv %s505_s22  ;;  %s6558_s27 = sld [smem:[#allocation3 + $0x3]] }
  0x35   : > { %7163 = vmatpush3.msk.msra.mxu0 %vm704_vm0, %v684_v23  ;;  %v678_v31 = vld [vmem:[%s9932_s2 + $0x28] sm:$0xff]  ;;  %v677_v32 = vld [vmem:[%s9932_s2 + $0x20] sm:$0xff]  ;;  %v676_v33 = vld [vmem:[%s9932_s2 + $0x18] sm:$0xff]  ;;  %v507_v37 = vmul.f32 %v506_v34, %v8058_v0  ;;  %v525_v38 = vstv %s6536_s23  ;;  %s6561_s23 = sld [smem:[#allocation3 + $0x83]]  ;;  %vm2514_vm0 = vcmask 64512  }
  0x36   : > { %550 = vrot.lane.b32.xlu0 %v548_v11, %s7927_s28  ;;  %569 = vrot.lane.b32.xlu1 %v567_v12, %s7927_s28  ;;  %v675_v35 = vld [vmem:[%s9932_s2 + $0x10] sm:$0xff]  ;;  %v674_v36 = vld [vmem:[%s9932_s2 + $0x8] sm:$0xff]  ;;  %v526_v43 = vmul.f32 %v525_v38, %v8058_v0  ;;  %s6598_s30 = sld [smem:[#allocation3 + $0x384]] }
  0x37   : > { %7164 = vmatprep.subr.mxu0 %v683_v24  ;;  %v673_v39 = vld [vmem:[%s9932_s2] sm:$0xff]  ;;  %v544_v44 = vstv %s6539_s17  ;;  %v563_v46 = vstv %s6542_s29  ;;  %s6562_s17 = sld [smem:[#allocation3 + $0x84]] }
  0x38   : > { %7165 = vmatpush3.msra.mxu0 %v683_v24  ;;  %v545_v50 = vmul.f32 %v544_v44, %v8058_v0  ;;  %v564_v51 = vmul.f32 %v563_v46, %v8058_v0  ;;  %v582_v57 = vstv %s6545_s25  ;;  %s6563_s29 = sld [smem:[#allocation3 + $0x85]] }
  0x39   : > { %7166 = vmatprep.subr.mxu0 %v682_v27  ;;  %v601_v58 = vstv %s6548_s26  ;;  %v583_v62 = vmul.f32 %v582_v57, %v8058_v0  ;;  %s6580_s16 = sld [smem:[#allocation3 + $0x304]] }
  0x3a   : > { %558 = vrot.lane.b32.xlu0 %v556_v15, %s9923_s1  ;;  %577 = vrot.lane.b32.xlu1 %v575_v16, %s9923_s1  ;;  %v602_v1 = vmul.f32 %v601_v58, %v8058_v0  ;;  %s6559_s20 = sld [smem:[#allocation3 + $0x4]] }
  0x3b   : > { %7167 = vmatpush3.msra.mxu0 %v682_v27  ;;  %s6634_s21 = sld [smem:[#allocation3 + $0x484]] }
  0x3c   : > { %7168 = vmatprep.subr.mxu0 %v681_v28  ;;  %s6581_s22 = sld [smem:[#allocation3 + $0x305]] }
  0x3d   : > { %7169 = vmatpush3.msra.mxu0 %v681_v28  ;;  %s6560_s24 = sld [smem:[#allocation3 + $0x5]] }
  0x3e   : > { %588 = vrot.lane.b32.xlu0 %v586_v19, %s7927_s28  ;;  %607 = vrot.lane.b32.xlu1 %v605_v20, %s7927_s28  ;;  %s6653_s25 = sld [smem:[#allocation3 + $0x505]] }
  0x3f   : > { %7170 = vmatprep.subr.mxu0 %v680_v29  ;;  %v899_v46 = vstv %s6580_s16  ;;  %s6599_s26 = sld [smem:[#allocation3 + $0x385]] }
  0x40   : > { %7171 = vmatpush3.msra.mxu0 %v680_v29  ;;  %s6596_s16 = sld [smem:[#allocation3 + $0x382]] }
  0x41   : > { %7172 = vmatprep.subr.mxu0 %v679_v30  ;;  %s8705_s0 = sld [smem:[#allocation3 + $0x88b]] }
  0x42   : > { %596 = vrot.lane.b32.xlu0 %v594_v25, %s9923_s1  ;;  %615 = vrot.lane.b32.xlu1 %v613_v26, %s9923_s1  ;;  %s8762_s2 = sld [smem:[#allocation3 + $0x60e]] }
  0x43   : > { %7173 = vmatpush3.msra.mxu0 %v679_v30  ;;  %v813_v57 = vstv %s6560_s24  ;;  %s8166_s24 = sld [smem:[#allocation3 + $0x481]] }
  0x44   : > { %7174 = vmatprep.subr.mxu0 %v678_v31  ;;  %v1383_v58 = vstv %s6653_s25  ;;  %s8168_s25 = sld [smem:[#allocation3 + $0x301]] }
  0x45   : > { %7175 = vmatpush3.msra.mxu0 %v678_v31 }
  0x46   : > { %7176 = vmatprep.subr.mxu0 %v677_v32 }
  0x47   : > { %7177 = vmatpush3.msra.mxu0 %v677_v32 }
  0x48   : > { %7178 = vmatprep.subr.mxu0 %v676_v33 }
  0x49   : > { %7179 = vmatpush3.msra.mxu0 %v676_v33  ;;  %v816_v33 = vstv %s6561_s23  ;;  %s6616_s23 = sld [smem:[#allocation3 + $0x404]] }
  0x4a   : > { %7180 = vmatprep.subr.mxu0 %v675_v35 }
  0x4b   : > { %7181 = vmatpush3.msra.mxu0 %v675_v35  ;;  %v804_v35 = vstv %s6558_s27  ;;  %s6578_s27 = sld [smem:[#allocation3 + $0x302]] }
  0x4c   : > { %7182 = vmatprep.subr.mxu0 %v674_v36 }
  0x4d   : > { %7183 = vmatpush3.msra.mxu0 %v674_v36 }
  0x4e   : > { %7184 = vmatprep.subr.mxu0 %v673_v39 }
  0x4f   : > { %7185 = vmatpush3.msra.mxu0 %v673_v39  ;;  %v822_v39 = vstv %s6562_s17  ;;  %s6617_s17 = sld [smem:[#allocation3 + $0x405]] }
  0xa0   : > { %v513_v40 = vpop.permute.xlu0 %512  ;;  %v521_v42 = vpop.permute.xlu1 %520 }
  0xa1   : > { %v515_v41 = vadd.f32 %v513_v40, %v507_v37 }
  0xa3   : > { %v523_v45 = vadd.f32 %v521_v42, %v515_v41  ;;  %v825_v42 = vstv %s6563_s29  ;;  %s6595_s29 = sld [smem:[#allocation3 + $0x381]] }
  0xa4   : > { %v532_v47 = vpop.permute.xlu0 %531  ;;  %v540_v49 = vpop.permute.xlu1 %539 }
  0xa5   : > { %v534_v48 = vadd.f32 %v532_v47, %v526_v43  ;;  %620 = vrot.lane.b32.xlu0 %v523_v45, %s7927_s28 }
  0xa7   : > { %v542_v52 = vadd.f32 %v540_v49, %v534_v48 }
  0xa8   : > { %v551_v53 = vpop.permute.xlu0 %550  ;;  %v570_v55 = vpop.permute.xlu1 %569 }
  0xa9   : > { %v553_v54 = vadd.f32 %v551_v53, %v545_v50  ;;  %629 = vrot.lane.b32.xlu1 %v542_v52, %s7927_s28  ;;  %624 = vrot.lane.b32.xlu0 %v523_v45, %s9923_s1  ;;  %v572_v56 = vadd.f32 %v570_v55, %v564_v51  ;;  %v810_v51 = vstv %s6559_s20  ;;  %v907_v53 = vstv %s6581_s22  ;;  %s6567_s20 = sld [smem:[#allocation3 + $0x183]] }
  0xaa   : > { %s6614_s22 = sld [smem:[#allocation3 + $0x402]] }
  0xac   : > { %v559_v59 = vpop.permute.xlu0 %558  ;;  %v578_v61 = vpop.permute.xlu1 %577 }
  0xad   : > { %v561_v60 = vadd.f32 %v559_v59, %v553_v54  ;;  %633 = vrot.lane.b32.xlu1 %v542_v52, %s9923_s1  ;;  %v580_v63 = vadd.f32 %v578_v61, %v572_v56  ;;  %v1026_v59 = vstv %s6599_s26  ;;  %s8170_s26 = sld [smem:[#allocation3 + $0x103]] }
  0xaf   : > { %638 = vrot.lane.b32.xlu0 %v561_v60, %s7927_s28 }
  0xb0   : > { %v589_v2 = vpop.permute.xlu0 %588  ;;  %v608_v4 = vpop.permute.xlu1 %607 }
  0xb1   : > { %v591_v3 = vadd.f32 %v589_v2, %v583_v62  ;;  %647 = vrot.lane.b32.xlu1 %v580_v63, %s7927_s28  ;;  %v610_v5 = vadd.f32 %v608_v4, %v602_v1  ;;  %v887_v1 = vstv %s6578_s27  ;;  %v1145_v4 = vstv %s6617_s17  ;;  %s8178_s27 = sld [smem:[#allocation3 + $0x482]] }
  0xb2   : > { %s8180_s17 = sld [smem:[#allocation3 + $0x401]] }
  0xb3   : > { %642 = vrot.lane.b32.xlu0 %v561_v60, %s9923_s1 }
  0xb4   : > { %v597_v6 = vpop.permute.xlu0 %596  ;;  %v616_v8 = vpop.permute.xlu1 %615 }
  0xb5   : > { %v599_v7 = vadd.f32 %v597_v6, %v591_v3  ;;  %651 = vrot.lane.b32.xlu1 %v580_v63, %s9923_s1  ;;  %v618_v9 = vadd.f32 %v616_v8, %v610_v5  ;;  %v998_v5 = vstv %s6595_s29  ;;  %s8184_s29 = sld [smem:[#allocation3 + $0x185]] }
  0xb7   : > { %656 = vrot.lane.b32.xlu0 %v599_v7, %s7927_s28 }
  0xb9   : > { %665 = vrot.lane.b32.xlu1 %v618_v9, %s7927_s28 }
  0xbb   : > { %660 = vrot.lane.b32.xlu0 %v599_v7, %s9923_s1 }
  0xbd   : > { %669 = vrot.lane.b32.xlu1 %v618_v9, %s9923_s1 }
 0x117   : > { %v621_v0 = vpop.permute.xlu0 %620 }
 0x118   : > { %v623_v10 = vmax.f32 %v523_v45, %v621_v0  ;;  %v1018_v45 = vstv %s6598_s30  ;;  %s6635_s30 = sld [smem:[#allocation3 + $0x485]] }
 0x11b   : > { %v630_v11 = vpop.permute.xlu1 %629  ;;  %v625_v12 = vpop.permute.xlu0 %624 }
 0x11c   : > { %v627_v13 = vmax.f32 %v623_v10, %v625_v12  ;;  %v632_v14 = vmax.f32 %v542_v52, %v630_v11  ;;  %v1256_v52 = vstv %s6634_s21  ;;  %s6652_s21 = sld [smem:[#allocation3 + $0x504]]  ;;  %v840_v10 = vstv %s6567_s20 }
 0x11d   : > { %s8197_s20 = sld [smem:[#allocation3 + $0x104]] }
 0x11e   : > { %7186 = vmatprep.mubr.msk.f32.mxu0 %vm685_vm1, %v627_v13  ;;  %v1264_v8 = vstv %s6635_s30  ;;  %s8188_s30 = sld [smem:[#allocation3 + $0x502]] }
 0x11f   : > { %v634_v15 = vpop.permute.xlu1 %633 }
 0x120   : > { %v636_v16 = vmax.f32 %v632_v14, %v634_v15  ;;  %v1125_v15 = vstv %s6614_s22  ;;  %s6586_s22 = sld [smem:[#allocation3 + $0x30a]] }
 0x121   : > { %v639_v17 = vpop.permute.xlu0 %638 }
 0x122   : > { %7187 = vmatmul.mubr.msk.f32.vlgmr.msra.gmra.mxu0 %vm685_vm1, %v636_v16  ;;  %v641_v19 = vmax.f32 %v561_v60, %v639_v17  ;;  %v1375_v14 = vstv %s6652_s21  ;;  %s8202_s21 = sld [smem:[#allocation3 + $0x38a]] }
 0x123   : > { %v648_v18 = vpop.permute.xlu1 %647 }
 0x124   : > { %v650_v21 = vmax.f32 %v580_v63, %v648_v18  ;;  %v1137_v63 = vstv %s6616_s23  ;;  %s8174_s23 = sld [smem:[#allocation3 + $0x184]] }
 0x125   : > { %v643_v20 = vpop.permute.xlu0 %642 }
 0x126   : > { %v645_v22 = vmax.f32 %v641_v19, %v643_v20  ;;  %v1236_v19 = vstv %s8166_s24  ;;  %v879_v20 = vstv %s8168_s25  ;;  %s8208_s24 = sld [smem:[#allocation3 + $0x105]] }
 0x127   : > { %v652_v23 = vpop.permute.xlu1 %651  ;;  %s8212_s25 = sld [smem:[#allocation3 + $0x40b]] }
 0x128   : > { %v654_v24 = vmax.f32 %v650_v21, %v652_v23  ;;  %7189 = vmatprep.mubr.msk.f32.mxu0 %vm685_vm1, %v645_v22  ;;  %v828_v22 = vstv %s8170_s26  ;;  %s6587_s26 = sld [smem:[#allocation3 + $0x30b]] }
 0x129   : > { %v657_v25 = vpop.permute.xlu0 %656 }
 0x12a   : > { %7190 = vmatmul.mubr.msk.f32.gmra.mxu0 %vm685_vm1, %v654_v24  ;;  %v659_v27 = vmax.f32 %v599_v7, %v657_v25  ;;  %v846_v23 = vstv %s8174_s23  ;;  %s6605_s23 = sld [smem:[#allocation3 + $0x38b]] }
 0x12b   : > { %v666_v26 = vpop.permute.xlu1 %665 }
 0x12c   : > { %v668_v29 = vmax.f32 %v618_v9, %v666_v26  ;;  %v1006_v9 = vstv %s6596_s16  ;;  %s8192_s16 = sld [smem:[#allocation3 + $0x501]] }
 0x12d   : > { %v661_v28 = vpop.permute.xlu0 %660 }
 0x12e   : > { %v663_v30 = vmax.f32 %v659_v27, %v661_v28  ;;  %v1244_v28 = vstv %s8178_s27  ;;  %s6584_s27 = sld [smem:[#allocation3 + $0x308]] }
 0x12f   : > { %v670_v31 = vpop.permute.xlu1 %669 }
 0x130   : > { %v672_v32 = vmax.f32 %v668_v29, %v670_v31  ;;  %7192 = vmatprep.mubr.msk.f32.mxu0 %vm685_vm1, %v663_v30  ;;  %v1117_v29 = vstv %s8180_s17  ;;  %s6622_s17 = sld [smem:[#allocation3 + $0x40a]] }
 0x132   : > { %7193 = vmatmul.mubr.msk.f32.gmra.mxu0 %vm685_vm1, %v672_v32  ;;  %vm2766_vm1 = vcmask 261120  }
 0x1e2   : > { %v7188_v34 = vpop.f32.mrf.mxu0 }
 0x1e3   : > { %v817_v36 = vadd.f32 %v7188_v34, %v816_v33  ;;  %v849_v33 = vstv %s8184_s29  ;;  %s6601_s29 = sld [smem:[#allocation3 + $0x387]] }
 0x1e4   : > { %v774_v37 = vpop.f32.mrf.mxu0 }
 0x1e5   : > { %vm818_vm2 = vcmp.gt.f32.partialorder %v817_v36, 0.0  ;;  %v819_v38 = vmul.f32 0.1, %v817_v36  ;;  %v805_v40 = vadd.f32 %v804_v35, %v774_v37  ;;  %v1363_v35 = vstv %s8188_s30  ;;  %s6573_s30 = sld [smem:[#allocation3 + $0x283]] }
 0x1e7   : > { %v820_v41 = vsel %vm818_vm2, %v817_v36, %v819_v38  ;;  %v807_v44 = vmul.f32 0.1, %v805_v40  ;;  %vm806_vm3 = vcmp.gt.f32.partialorder %v805_v40, 0.0  ;;  %v1355_v36 = vstv %s8192_s16  ;;  %s6640_s16 = sld [smem:[#allocation3 + $0x48a]] }
 0x1e8   : > { %v823_v43 = vmul.f32 %v822_v39, %v820_v41  ;;  %v834_v41 = vstv %s8197_s20  ;;  %s6602_s20 = sld [smem:[#allocation3 + $0x388]]  ;;  %vm4491_vm2 = vcmask 523264  }
 0x1e9   : > { %v808_v50 = vsel %vm806_vm3, %v805_v40, %v807_v44 }
 0x1ea   : > { %v8144_v47 = vadd.f32 %v825_v42, %v823_v43  ;;  %v811_v54 = vmul.f32 %v810_v51, %v808_v50  ;;  %v7191_v0 = vpop.f32.mrf.mxu0  ;;  %v1058_v42 = vstv %s8202_s21  ;;  %v939_v43 = vstv %s6586_s22  ;;  %s8241_s21 = sld [smem:[#allocation3 + $0x408]] }
 0x1eb   : > { %v841_v13 = vadd.f32 %v7191_v0, %v840_v10  ;;  %v947_v50 = vstv %s6587_s26  ;;  %s8243_s22 = sld [smem:[#allocation3 + $0x307]] }
 0x1ec   : > { %v1019_v48 = vmul.f32 %v1018_v45, %v8144_v47  ;;  %v900_v49 = vmul.f32 %v899_v46, %v8144_v47  ;;  %v1257_v55 = vmul.f32 %v1256_v52, %v8144_v47  ;;  %v908_v56 = vmul.f32 %v907_v53, %v8144_v47  ;;  %v784_v21 = vpop.f32.mrf.mxu0  ;;  %s8253_s26 = sld [smem:[#allocation3 + $0x487]] }
 0x1ed   : > { %v8154_v60 = vadd.f32 %v813_v57, %v811_v54  ;;  %v1384_v61 = vmul.f32 %v1383_v58, %v8144_v47  ;;  %v1027_v62 = vmul.f32 %v1026_v59, %v8144_v47  ;;  %v1138_v2 = vmul.f32 %v1137_v63, %v8144_v47 }
 0x1ee   : > { %1021 = vrot.lane.b32.xlu1 %v1019_v48, %s7927_s28  ;;  %902 = vrot.lane.b32.xlu0 %v900_v49, %s7927_s28  ;;  %v1146_v6 = vmul.f32 %v1145_v4, %v8144_v47  ;;  %v1265_v11 = vmul.f32 %v1264_v8, %v8144_v47  ;;  %v1376_v16 = vmul.f32 %v1375_v14, %v8144_v47  ;;  %v843_v18 = vmul.f32 0.1, %v841_v13 }
 0x1ef   : > { %v888_v3 = vmul.f32 %v887_v1, %v8154_v60  ;;  %v999_v7 = vmul.f32 %v998_v5, %v8154_v60  ;;  %v1007_v12 = vmul.f32 %v1006_v9, %v8154_v60  ;;  %v1126_v17 = vmul.f32 %v1125_v15, %v8154_v60 }
 0x1f0   : > { %vm842_vm4 = vcmp.gt.f32.partialorder %v841_v13, 0.0  ;;  %v1237_v24 = vmul.f32 %v1236_v19, %v8154_v60  ;;  %v880_v25 = vmul.f32 %v879_v20, %v8154_v60  ;;  %v829_v27 = vadd.f32 %v828_v22, %v784_v21 }
 0x1f1   : > { %v844_v26 = vsel %vm842_vm4, %v841_v13, %v843_v18  ;;  %v1245_v31 = vmul.f32 %v1244_v28, %v8154_v60  ;;  %v1118_v32 = vmul.f32 %v1117_v29, %v8154_v60  ;;  %v1364_v38 = vmul.f32 %v1363_v35, %v8154_v60 }
 0x1f2   : > { %1259 = vrot.lane.b32.xlu1 %v1257_v55, %s7927_s28  ;;  %910 = vrot.lane.b32.xlu0 %v908_v56, %s9923_s1  ;;  %v847_v30 = vmul.f32 %v846_v23, %v844_v26  ;;  %v831_v34 = vmul.f32 0.1, %v829_v27  ;;  %vm830_vm5 = vcmp.gt.f32.partialorder %v829_v27, 0.0  ;;  %v1356_v39 = vmul.f32 %v1355_v36, %v8154_v60 }
 0x1f3   : > { %v837_v48 = vstv %s8208_s24  ;;  %v1185_v49 = vstv %s8212_s25  ;;  %v1066_v54 = vstv %s6605_s23  ;;  %v927_v55 = vstv %s6584_s27  ;;  %s8245_s24 = sld [smem:[#allocation3 + $0x203]] }
 0x1f4   : > { %v8219_v37 = vadd.f32 %v849_v33, %v847_v30  ;;  %v832_v40 = vsel %vm830_vm5, %v829_v27, %v831_v34  ;;  %v1177_v58 = vstv %s6622_s17  ;;  %v1038_v59 = vstv %s6601_s29  ;;  %s8249_s25 = sld [smem:[#allocation3 + $0x284]] }
 0x1f5   : > { %v835_v44 = vmul.f32 %v834_v41, %v832_v40  ;;  %v1046_v4 = vstv %s6602_s20  ;;  %s8255_s23 = sld [smem:[#allocation3 + $0x407]]  ;;  %v1165_v8 = vstv %s8241_s21  ;;  %v919_v9 = vstv %s8243_s22 }
 0x1f6   : > { %1386 = vrot.lane.b32.xlu1 %v1384_v61, %s9923_s1  ;;  %1029 = vrot.lane.b32.xlu0 %v1027_v62, %s9923_s1  ;;  %v1059_v45 = vmul.f32 %v1058_v42, %v8219_v37  ;;  %v940_v46 = vmul.f32 %v939_v43, %v8219_v37  ;;  %v1186_v52 = vmul.f32 %v1185_v49, %v8219_v37  ;;  %v7194_v61 = vpop.f32.mrf.mxu0  ;;  %v864_v62 = vstv %s6573_s30  ;;  %s8259_s27 = sld [smem:[#allocation3 + $0x285]] }
 0x1f7   : > { %v8233_v51 = vadd.f32 %v837_v48, %v835_v44  ;;  %v948_v53 = vmul.f32 %v947_v50, %v8219_v37  ;;  %v1067_v56 = vmul.f32 %v1066_v54, %v8219_v37  ;;  %v1178_v63 = vmul.f32 %v1177_v58, %v8219_v37  ;;  %s8263_s17 = sld [smem:[#allocation3 + $0x507]] }
 0x1f8   : > { %s8267_s29 = sld [smem:[#allocation3 + $0x488]]  ;;  %v794_v0 = vpop.f32.mrf.mxu0  ;;  %vm6465_vm4 = vcmask 57344  }
 0x1f9   : > { %v928_v57 = vmul.f32 %v927_v55, %v8233_v51  ;;  %v1039_v1 = vmul.f32 %v1038_v59, %v8233_v51  ;;  %v852_v10 = vstv %s8245_s24  ;;  %s8272_s30 = sld [smem:[#allocation3 + $0x204]]  ;;  %v920_v13 = vmul.f32 %v919_v9, %v8233_v51 }
 0x1fa   : > { %1140 = vrot.lane.b32.xlu0 %v1138_v2, %s7927_s28  ;;  %890 = vrot.lane.b32.xlu1 %v888_v3, %s9923_s1  ;;  %v865_v2 = vadd.f32 %v7194_v61, %v864_v62  ;;  %v1296_v3 = vstv %s6640_s16  ;;  %s8277_s16 = sld [smem:[#allocation3 + $0x311]]  ;;  %v853_v15 = vadd.f32 %v852_v10, %v794_v0 }
 0x1fb   : > { %v1297_v5 = vmul.f32 %v1296_v3, %v8219_v37  ;;  %s6592_s20 = sld [smem:[#allocation3 + $0x310]] }
 0x1fc   : > { %vm866_vm6 = vcmp.gt.f32.partialorder %v865_v2, 0.0  ;;  %s8283_s21 = sld [smem:[#allocation3 + $0x205]]  ;;  %v873_v21 = vstv %s8259_s27  ;;  %v855_v22 = vmul.f32 0.1, %v853_v15  ;;  %vm854_vm7 = vcmp.gt.f32.partialorder %v853_v15, 0.0 }
 0x1fd   : > { %s8287_s22 = sld [smem:[#allocation3 + $0x508]]  ;;  %v1395_v23 = vstv %s8263_s17 }
 0x1fe   : > { %1148 = vrot.lane.b32.xlu0 %v1146_v6, %s9923_s1  ;;  %1001 = vrot.lane.b32.xlu1 %v999_v7, %s7927_s28  ;;  %v1047_v6 = vmul.f32 %v1046_v4, %v8233_v51  ;;  %v867_v7 = vmul.f32 0.1, %v865_v2  ;;  %s6610_s24 = sld [smem:[#allocation3 + $0x390]]  ;;  %v1396_v26 = vmul.f32 %v1395_v23, %v8233_v51  ;;  %v856_v28 = vsel %vm854_vm7, %v853_v15, %v855_v22  ;;  %v1518_v15 = vld [vmem:[%s9910_s3 + $0x18] sm:$0xf] }
 0x1ff   : > { %v858_v29 = vstv %s8272_s30  ;;  %s6589_s27 = sld [smem:[#allocation3 + $0x30d]] }
 0x200   : > { %v868_v14 = vsel %vm866_vm6, %v865_v2, %v867_v7  ;;  %v987_v30 = vstv %s8277_s16  ;;  %s6629_s17 = sld [smem:[#allocation3 + $0x411]] }
 0x201   : > { %s6659_s30 = sld [smem:[#allocation3 + $0x50b]] }
 0x202   : > { %1267 = vrot.lane.b32.xlu0 %v1265_v11, %s9923_s1  ;;  %1009 = vrot.lane.b32.xlu1 %v1007_v12, %s9923_s1  ;;  %v870_v11 = vstv %s8249_s25  ;;  %v1166_v12 = vmul.f32 %v1165_v8, %v8233_v51  ;;  %s6611_s25 = sld [smem:[#allocation3 + $0x391]]  ;;  %v861_v35 = vstv %s8283_s21 }
 0x203   : > { %v871_v18 = vmul.f32 %v870_v11, %v868_v14  ;;  %v1403_v36 = vstv %s8287_s22  ;;  %s6608_s16 = sld [smem:[#allocation3 + $0x38e]] }
 0x204   : > { %v1404_v40 = vmul.f32 %v1403_v36, %v8233_v51  ;;  %s6628_s21 = sld [smem:[#allocation3 + $0x410]] }
 0x205   : > { %v959_v48 = vstv %s6589_s27  ;;  %s6626_s22 = sld [smem:[#allocation3 + $0x40e]] }
 0x206   : > { %1378 = vrot.lane.b32.xlu0 %v1376_v16, %s7927_s28  ;;  %1128 = vrot.lane.b32.xlu1 %v1126_v17, %s9923_s1  ;;  %v1276_v16 = vstv %s8253_s26  ;;  %v1157_v17 = vstv %s8255_s23  ;;  %s6590_s26 = sld [smem:[#allocation3 + $0x30e]] }
 0x207   : > { %v1277_v19 = vmul.f32 %v1276_v16, %v8233_v51  ;;  %v1158_v20 = vmul.f32 %v1157_v17, %v8233_v51  ;;  %s6607_s23 = sld [smem:[#allocation3 + $0x38d]]  ;;  %v7929_v16 = vmov 0.0  }
 0x208   : > { %v1106_v42 = vstv %s6611_s25  ;;  %s6643_s25 = sld [smem:[#allocation3 + $0x48d]]  ;;  %7195 = vmatprep.subr.mxu1 %v7929_v16  ;;  %7203 = vmatprep.mubr.msk.f32.mxu1 %vm7930_vm9, %v7929_v16 }
 0x209   : > { %s6646_s27 = sld [smem:[#allocation3 + $0x490]]  ;;  %7196 = vmatpush3.msk.msra.mxu1 %vm1535_vm8, %v1518_v15 }
 0x20a   : > { %1239 = vrot.lane.b32.xlu1 %v1237_v24, %s7927_s28  ;;  %882 = vrot.lane.b32.xlu0 %v880_v25, %s7927_s28  ;;  %v1284_v24 = vstv %s8267_s29  ;;  %v8294_v25 = vadd.f32 %v873_v21, %v871_v18  ;;  %s6641_s29 = sld [smem:[#allocation3 + $0x48b]]  ;;  %v1217_v62 = vstv %s6628_s21 }
 0x20b   : > { %v1285_v27 = vmul.f32 %v1284_v24, %v8233_v51  ;;  %v1205_v2 = vstv %s6626_s22  ;;  %7197 = vmatprep.subr.mxu1 %v7929_v16  ;;  %s8385_s21 = sld [smem:[#allocation3 + $0x500]] }
 0x20c   : > { %v988_v33 = vmul.f32 %v987_v30, %v8294_v25  ;;  %v967_v43 = vstv %s6590_s26  ;;  %v1107_v44 = vmul.f32 %v1106_v42, %v8294_v25  ;;  %s6644_s26 = sld [smem:[#allocation3 + $0x48e]] }
 0x20d   : > { %s8389_s22 = sld [smem:[#allocation3 + $0x306]] }
 0x20e   : > { %1247 = vrot.lane.b32.xlu1 %v1245_v31, %s9923_s1  ;;  %1120 = vrot.lane.b32.xlu0 %v1118_v32, %s7927_s28  ;;  %v979_v31 = vstv %s6592_s20  ;;  %v859_v32 = vmul.f32 %v858_v29, %v856_v28  ;;  %s6625_s20 = sld [smem:[#allocation3 + $0x40d]] }
 0x20f   : > { %v980_v34 = vmul.f32 %v979_v31, %v8294_v25  ;;  %v1336_v10 = vstv %s6646_s27  ;;  %s6600_s27 = sld [smem:[#allocation3 + $0x386]] }
 0x212   : > { %1366 = vrot.lane.b32.xlu1 %v1364_v38, %s9923_s1  ;;  %1358 = vrot.lane.b32.xlu0 %v1356_v39, %s7927_s28  ;;  %v1098_v38 = vstv %s6610_s24  ;;  %v8308_v39 = vadd.f32 %v861_v35, %v859_v32  ;;  %s6658_s24 = sld [smem:[#allocation3 + $0x50a]]  ;;  %v1324_v7 = vstv %s6644_s26 }
 0x213   : > { %v1099_v41 = vmul.f32 %v1098_v38, %v8294_v25  ;;  %s6597_s26 = sld [smem:[#allocation3 + $0x383]] }
 0x214   : > { %v960_v50 = vmul.f32 %v959_v48, %v8308_v39  ;;  %v1197_v61 = vstv %s6625_s20  ;;  %v1206_v4 = vmul.f32 %v1205_v2, %v8308_v39  ;;  %v1325_v9 = vmul.f32 %v1324_v7, %v8308_v39  ;;  %s8383_s20 = sld [smem:[#allocation3 + $0x403]] }
 0x216   : > { %1061 = vrot.lane.b32.xlu1 %v1059_v45, %s7927_s28  ;;  %942 = vrot.lane.b32.xlu0 %v940_v46, %s7927_s28  ;;  %v968_v45 = vmul.f32 %v967_v43, %v8308_v39  ;;  %v1078_v46 = vstv %s6607_s23  ;;  %s6661_s23 = sld [smem:[#allocation3 + $0x50d]] }
 0x217   : > { %v1079_v49 = vmul.f32 %v1078_v46, %v8308_v39 }
 0x218   : > { %v1415_v3 = vstv %s6658_s24  ;;  %s8391_s24 = sld [smem:[#allocation3 + $0x503]] }
 0x219   : > { %v1014_v38 = vstv %s6597_s26  ;;  %s8402_s26 = sld [smem:[#allocation3 + $0x406]] }
 0x21a   : > { %1188 = vrot.lane.b32.xlu1 %v1186_v52, %s9923_s1  ;;  %950 = vrot.lane.b32.xlu0 %v948_v53, %s9923_s1  ;;  %v1225_v52 = vstv %s6629_s17  ;;  %v1304_v53 = vstv %s6641_s29  ;;  %s6662_s17 = sld [smem:[#allocation3 + $0x50e]]  ;;  %v1015_v43 = vmul.f32 %v1014_v38, %v8144_v47 }
 0x21b   : > { %v1226_v54 = vmul.f32 %v1225_v52, %v8294_v25  ;;  %v1305_v55 = vmul.f32 %v1304_v53, %v8219_v37  ;;  %s6647_s29 = sld [smem:[#allocation3 + $0x491]] }
 0x21c   : > { %v1435_v0 = vstv %s6661_s23  ;;  %s6576_s23 = sld [smem:[#allocation3 + $0x300]] }
 0x21d   : > { %v1436_v11 = vmul.f32 %v1435_v0, %v8308_v39  ;;  %v1352_v0 = vstv %s8385_s21  ;;  %s8431_s21 = sld [smem:[#allocation3 + $0x40c]] }
 0x21e   : > { %1069 = vrot.lane.b32.xlu0 %v1067_v56, %s9923_s1  ;;  %930 = vrot.lane.b32.xlu1 %v928_v57, %s9923_s1  ;;  %v1423_v56 = vstv %s6659_s30  ;;  %v1086_v57 = vstv %s6608_s16  ;;  %s6665_s30 = sld [smem:[#allocation3 + $0x511]] }
 0x21f   : > { %v1424_v58 = vmul.f32 %v1423_v56, %v8219_v37  ;;  %v1087_v59 = vmul.f32 %v1086_v57, %v8308_v39  ;;  %s6664_s16 = sld [smem:[#allocation3 + $0x510]] }
 0x221   : > { %v1344_v14 = vstv %s6647_s29  ;;  %s8376_s29 = sld [smem:[#allocation3 + $0x303]] }
 0x222   : > { %1180 = vrot.lane.b32.xlu0 %v1178_v63, %s7927_s28  ;;  %1041 = vrot.lane.b32.xlu1 %v1039_v1, %s7927_s28  ;;  %v1198_v63 = vmul.f32 %v1197_v61, %v8308_v39  ;;  %v1218_v1 = vmul.f32 %v1217_v62, %v8294_v25  ;;  %v1345_v18 = vmul.f32 %v1344_v14, %v8294_v25 }
 0x225   : > { %v1455_v21 = vstv %s6664_s16  ;;  %s8381_s16 = sld [smem:[#allocation3 + $0x483]] }
 0x226   : > { %1299 = vrot.lane.b32.xlu0 %v1297_v5, %s7927_s28  ;;  %1049 = vrot.lane.b32.xlu1 %v1047_v6, %s9923_s1  ;;  %v1416_v5 = vmul.f32 %v1415_v3, %v8219_v37  ;;  %v1316_v6 = vstv %s6643_s25  ;;  %s6594_s25 = sld [smem:[#allocation3 + $0x380]]  ;;  %v1133_v3 = vstv %s8383_s20 }
 0x227   : > { %v1317_v8 = vmul.f32 %v1316_v6, %v8308_v39  ;;  %v1134_v15 = vmul.f32 %v1133_v3, %v8144_v47  ;;  %s8429_s20 = sld [smem:[#allocation3 + $0x30c]] }
 0x22a   : > { %1168 = vrot.lane.b32.xlu1 %v1166_v12, %s9923_s1  ;;  %922 = vrot.lane.b32.xlu0 %v920_v13, %s7927_s28  ;;  %v1337_v12 = vmul.f32 %v1336_v10, %v8294_v25  ;;  %v1443_v13 = vstv %s6662_s17  ;;  %s6630_s17 = sld [smem:[#allocation3 + $0x480]]  ;;  %v915_v10 = vstv %s8389_s22 }
 0x22b   : > { %v1444_v17 = vmul.f32 %v1443_v13, %v8308_v39  ;;  %v1252_v2 = vstv %s8381_s16  ;;  %s6639_s16 = sld [smem:[#allocation3 + $0x489]] }
 0x22c   : > { %s6657_s22 = sld [smem:[#allocation3 + $0x509]] }
 0x22e   : > { %1279 = vrot.lane.b32.xlu1 %v1277_v19, %s7927_s28  ;;  %1160 = vrot.lane.b32.xlu0 %v1158_v20, %s7927_s28  ;;  %v1517_v19 = vld [vmem:[%s9910_s3 + $0x10] sm:$0xff]  ;;  %v1463_v20 = vstv %s6665_s30  ;;  %s8378_s30 = sld [smem:[#allocation3 + $0x400]] }
 0x22f   : > { %7198 = vmatpush3.msra.mxu1 %v1517_v19  ;;  %v1464_v24 = vmul.f32 %v1463_v20, %v8294_v25 }
 0x230   : > { %7199 = vmatprep.subr.mxu1 %v7929_v16  ;;  %v1233_v53 = vstv %s6630_s17  ;;  %s6585_s17 = sld [smem:[#allocation3 + $0x309]] }
 0x231   : > { %v1234_v62 = vmul.f32 %v1233_v53, %v8154_v60 }
 0x232   : > { %1398 = vrot.lane.b32.xlu1 %v1396_v26, %s7927_s28  ;;  %1287 = vrot.lane.b32.xlu0 %v1285_v27, %s9923_s1  ;;  %v1456_v26 = vmul.f32 %v1455_v21, %v8294_v25  ;;  %v1353_v21 = vmul.f32 %v1352_v0, %v8154_v60 }
 0x234   : > { %v1114_v61 = vstv %s8378_s30  ;;  %s6621_s30 = sld [smem:[#allocation3 + $0x409]] }
 0x235   : > { %v1115_v7 = vmul.f32 %v1114_v61, %v8154_v60 }
 0x236   : > { %990 = vrot.lane.b32.xlu1 %v988_v33, %s9923_s1  ;;  %982 = vrot.lane.b32.xlu0 %v980_v34, %s7927_s28  ;;  %v995_v33 = vstv %s6594_s25  ;;  %s8393_s25 = sld [smem:[#allocation3 + $0x486]] }
 0x237   : > { %v996_v36 = vmul.f32 %v995_v33, %v8154_v60 }
 0x23a   : > { %1406 = vrot.lane.b32.xlu1 %v1404_v40, %s9923_s1  ;;  %1101 = vrot.lane.b32.xlu0 %v1099_v41, %s7927_s28 }
 0x23e   : > { %1109 = vrot.lane.b32.xlu0 %v1107_v44, %s9923_s1  ;;  %970 = vrot.lane.b32.xlu1 %v968_v45, %s9923_s1 }
 0x242   : > { %1081 = vrot.lane.b32.xlu1 %v1079_v49, %s7927_s28  ;;  %962 = vrot.lane.b32.xlu0 %v960_v50, %s7927_s28  ;;  %v876_v49 = vstv %s6576_s23  ;;  %v1034_v50 = vstv %s6600_s27  ;;  %s6654_s23 = sld [smem:[#allocation3 + $0x506]] }
 0x243   : > { %s6603_s27 = sld [smem:[#allocation3 + $0x389]] }
 0x246   : > { %1228 = vrot.lane.b32.xlu1 %v1226_v54, %s9923_s1  ;;  %1307 = vrot.lane.b32.xlu0 %v1305_v55, %s9923_s1  ;;  %v877_v54 = vmul.f32 %v876_v49, %v8154_v60  ;;  %v1035_v55 = vmul.f32 %v1034_v50, %v8233_v51 }
 0x248   : > { %v1391_v53 = vstv %s6654_s23  ;;  %s6688_s23 = sld [smem:[#allocation3 + $0x581]] }
 0x24a   : > { %1426 = vrot.lane.b32.xlu1 %v1424_v58, %s9923_s1  ;;  %1089 = vrot.lane.b32.xlu0 %v1087_v59, %s9923_s1  ;;  %v895_v58 = vstv %s8376_s29  ;;  %s6606_s29 = sld [smem:[#allocation3 + $0x38c]] }
 0x24e   : > { %1200 = vrot.lane.b32.xlu1 %v1198_v63, %s7927_s28  ;;  %1220 = vrot.lane.b32.xlu0 %v1218_v1, %s7927_s28 }
 0x252   : > { %1208 = vrot.lane.b32.xlu1 %v1206_v4, %s9923_s1  ;;  %1418 = vrot.lane.b32.xlu0 %v1416_v5, %s7927_s28  ;;  %v896_v5 = vmul.f32 %v895_v58, %v8144_v47 }
 0x256   : > { %1319 = vrot.lane.b32.xlu1 %v1317_v8, %s7927_s28  ;;  %1327 = vrot.lane.b32.xlu0 %v1325_v9, %s9923_s1 }
 0x25a   : > { %1438 = vrot.lane.b32.xlu1 %v1436_v11, %s7927_s28  ;;  %1339 = vrot.lane.b32.xlu0 %v1337_v12, %s7927_s28  ;;  %v1253_v12 = vmul.f32 %v1252_v2, %v8144_v47 }
 0x25e   : > { %1446 = vrot.lane.b32.xlu1 %v1444_v17, %s9923_s1  ;;  %1347 = vrot.lane.b32.xlu0 %v1345_v18, %s9923_s1  ;;  %v1371_v17 = vstv %s8391_s24  ;;  %v1272_v18 = vstv %s8393_s25  ;;  %s6591_s24 = sld [smem:[#allocation3 + $0x30f]] }
 0x25f   : > { %v1372_v38 = vmul.f32 %v1371_v17, %v8144_v47  ;;  %v1292_v17 = vstv %s6639_s16  ;;  %s6642_s25 = sld [smem:[#allocation3 + $0x48c]] }
 0x260   : > { %v1022_v22 = vpop.permute.xlu1 %1021  ;;  %v8358_v23 = vpop.permute.xlu0 %902  ;;  %s6660_s16 = sld [smem:[#allocation3 + $0x50c]] }
 0x262   : > { %1466 = vrot.lane.b32.xlu1 %v1464_v24, %s9923_s1  ;;  %1458 = vrot.lane.b32.xlu0 %v1456_v26, %s7927_s28 }
 0x264   : > { %v8365_v27 = vpop.permute.xlu1 %1259  ;;  %v8367_v28 = vpop.permute.xlu0 %910 }
 0x268   : > { %v8369_v29 = vpop.permute.xlu1 %1386  ;;  %v1030_v30 = vpop.permute.xlu0 %1029 }
 0x26c   : > { %v891_v31 = vpop.permute.xlu1 %890  ;;  %v8371_v32 = vpop.permute.xlu0 %1140 }
 0x270   : > { %v1002_v34 = vpop.permute.xlu1 %1001  ;;  %v8373_v35 = vpop.permute.xlu0 %1148 }
 0x271   : > { %v1004_v40 = vadd.f32 %v1002_v34, %v996_v36 }
 0x274   : > { %v1010_v41 = vpop.permute.xlu1 %1009  ;;  %v1268_v42 = vpop.permute.xlu0 %1267 }
 0x275   : > { %v1012_v44 = vadd.f32 %v1010_v41, %v1004_v40  ;;  %v1273_v40 = vmul.f32 %v1272_v18, %v8233_v51  ;;  %v1153_v41 = vstv %s8402_s26  ;;  %s6609_s26 = sld [smem:[#allocation3 + $0x38f]] }
 0x277   : > { %v1016_v45 = vadd.f32 %v1015_v43, %v1012_v44 }
 0x278   : > { %v1129_v46 = vpop.permute.xlu1 %1128  ;;  %v8387_v48 = vpop.permute.xlu0 %1378 }
 0x279   : > { %v1024_v52 = vadd.f32 %v1022_v22, %v1016_v45 }
 0x27b   : > { %v1032_v56 = vadd.f32 %v1030_v30, %v1024_v52  ;;  %v916_v30 = vmul.f32 %v915_v10, %v8233_v51  ;;  %v1154_v52 = vmul.f32 %v1153_v41, %v8233_v51 }
 0x27c   : > { %v1240_v57 = vpop.permute.xlu1 %1239  ;;  %v883_v59 = vpop.permute.xlu0 %882 }
 0x27d   : > { %v885_v63 = vadd.f32 %v883_v59, %v877_v54  ;;  %v1036_v1 = vadd.f32 %v1035_v55, %v1032_v56  ;;  %v1242_v4 = vadd.f32 %v1240_v57, %v1234_v62  ;;  %v1392_v56 = vmul.f32 %v1391_v53, %v8233_v51 }
 0x27f   : > { %v893_v6 = vadd.f32 %v891_v31, %v885_v63 }
 0x280   : > { %v1248_v8 = vpop.permute.xlu1 %1247  ;;  %v1121_v9 = vpop.permute.xlu0 %1120 }
 0x281   : > { %v897_v11 = vadd.f32 %v896_v5, %v893_v6  ;;  %v1250_v13 = vadd.f32 %v1248_v8, %v1242_v4  ;;  %v1123_v14 = vadd.f32 %v1121_v9, %v1115_v7  ;;  %v935_v4 = vstv %s6585_s17  ;;  %s6704_s17 = sld [smem:[#allocation3 + $0x602]] }
 0x282   : > { %v1074_v6 = vstv %s6606_s29  ;;  %s6689_s29 = sld [smem:[#allocation3 + $0x582]] }
 0x283   : > { %v1254_v19 = vadd.f32 %v1253_v12, %v1250_v13  ;;  %v1131_v20 = vadd.f32 %v1129_v46, %v1123_v14  ;;  %v905_v22 = vadd.f32 %v8358_v23, %v897_v11  ;;  %v1075_v0 = vmul.f32 %v1074_v6, %v8308_v39 }
 0x284   : > { %v1367_v24 = vpop.permute.xlu1 %1366  ;;  %v1359_v26 = vpop.permute.xlu0 %1358  ;;  %v1173_v12 = vstv %s6621_s30  ;;  %s6627_s30 = sld [smem:[#allocation3 + $0x40f]] }
 0x285   : > { %v1262_v31 = vadd.f32 %v8365_v27, %v1254_v19  ;;  %v1135_v33 = vadd.f32 %v1134_v15, %v1131_v20  ;;  %v1361_v34 = vadd.f32 %v1359_v26, %v1353_v21  ;;  %v913_v36 = vadd.f32 %v8367_v28, %v905_v22 }
 0x286   : > { %v955_v19 = vstv %s8429_s20  ;;  %v1174_v21 = vmul.f32 %v1173_v12, %v8219_v37  ;;  %s6645_s20 = sld [smem:[#allocation3 + $0x48f]] }
 0x287   : > { %v1369_v43 = vadd.f32 %v1367_v24, %v1361_v34  ;;  %v917_v44 = vadd.f32 %v916_v30, %v913_v36  ;;  %v1270_v60 = vadd.f32 %v1268_v42, %v1262_v31  ;;  %v1143_v23 = vadd.f32 %v8371_v32, %v1135_v33 }
 0x288   : > { %v1062_v45 = vpop.permute.xlu1 %1061  ;;  %v943_v46 = vpop.permute.xlu0 %942  ;;  %v1293_v30 = vmul.f32 %v1292_v17, %v8219_v37 }
 0x289   : > { %v1373_v49 = vadd.f32 %v1372_v38, %v1369_v43  ;;  %v1274_v50 = vadd.f32 %v1273_v40, %v1270_v60  ;;  %v1151_v27 = vadd.f32 %v8373_v35, %v1143_v23  ;;  %v1054_v35 = vstv %s6603_s27  ;;  %s6675_s27 = sld [smem:[#allocation3 + $0x392]] }
 0x28a   : > { %v956_v38 = vmul.f32 %v955_v19, %v8308_v39  ;;  %v1193_v40 = vstv %s8431_s21  ;;  %s6663_s21 = sld [smem:[#allocation3 + $0x50f]] }
 0x28b   : > { %v1155_v28 = vadd.f32 %v1154_v52, %v1151_v27  ;;  %v1381_v47 = vadd.f32 %v8387_v48, %v1373_v49  ;;  %v1055_v48 = vmul.f32 %v1054_v35, %v8219_v37 }
 0x28c   : > { %v1189_v54 = vpop.permute.xlu1 %1188  ;;  %v951_v55 = vpop.permute.xlu0 %950 }
 0x28d   : > { %v1389_v42 = vadd.f32 %v8369_v29, %v1381_v47 }
 0x28f   : > { %v1393_v32 = vadd.f32 %v1392_v56, %v1389_v42 }
 0x290   : > { %v931_v57 = vpop.permute.xlu1 %930  ;;  %v1070_v58 = vpop.permute.xlu0 %1069 }
 0x294   : > { %v1042_v59 = vpop.permute.xlu1 %1041  ;;  %v1181_v61 = vpop.permute.xlu0 %1180 }
 0x295   : > { %v1044_v62 = vadd.f32 %v1042_v59, %v1036_v1  ;;  %v936_v1 = vmul.f32 %v935_v4, %v8219_v37 }
 0x298   : > { %v1050_v63 = vpop.permute.xlu1 %1049  ;;  %v8426_v2 = vpop.permute.xlu0 %1299 }
 0x299   : > { %v1052_v3 = vadd.f32 %v1050_v63, %v1044_v62 }
 0x29b   : > { %v1056_v51 = vadd.f32 %v1055_v48, %v1052_v3 }
 0x29c   : > { %v1169_v29 = vpop.permute.xlu1 %1168  ;;  %v923_v5 = vpop.permute.xlu0 %922 }
 0x29d   : > { %v1064_v7 = vadd.f32 %v1062_v45, %v1056_v51  ;;  %v925_v8 = vadd.f32 %v923_v5, %v917_v44  ;;  %v1194_v45 = vmul.f32 %v1193_v40, %v8308_v39  ;;  %v1094_v5 = vstv %s6609_s26  ;;  %s6703_s26 = sld [smem:[#allocation3 + $0x601]] }
 0x29f   : > { %v933_v9 = vadd.f32 %v931_v57, %v925_v8  ;;  %v1072_v10 = vadd.f32 %v1070_v58, %v1064_v7  ;;  %v975_v58 = vstv %s6591_s24  ;;  %s6673_s24 = sld [smem:[#allocation3 + $0x313]] }
 0x2a0   : > { %v1280_v11 = vpop.permute.xlu1 %1279  ;;  %v1161_v13 = vpop.permute.xlu0 %1160  ;;  %v976_v35 = vmul.f32 %v975_v58, %v8294_v25 }
 0x2a1   : > { %v937_v14 = vadd.f32 %v936_v1, %v933_v9  ;;  %v1163_v15 = vadd.f32 %v1161_v13, %v1155_v28  ;;  %v1076_v18 = vadd.f32 %v1075_v0, %v1072_v10  ;;  %v1282_v20 = vadd.f32 %v1280_v11, %v1274_v50 }
 0x2a2   : > { %v1411_v50 = vstv %s6657_s22  ;;  %v1095_v0 = vmul.f32 %v1094_v5, %v8294_v25  ;;  %s6672_s22 = sld [smem:[#allocation3 + $0x312]] }
 0x2a3   : > { %v1171_v22 = vadd.f32 %v1169_v29, %v1163_v15  ;;  %v945_v24 = vadd.f32 %v943_v46, %v937_v14  ;;  %v1412_v47 = vmul.f32 %v1411_v50, %v8219_v37  ;;  %v1312_v37 = vstv %s6642_s25  ;;  %s6674_s25 = sld [smem:[#allocation3 + $0x314]] }
 0x2a4   : > { %v1399_v26 = vpop.permute.xlu1 %1398  ;;  %v1288_v31 = vpop.permute.xlu0 %1287  ;;  %v1313_v4 = vmul.f32 %v1312_v37, %v8308_v39  ;;  %v1213_v15 = vstv %s6627_s30  ;;  %s6733_s30 = sld [smem:[#allocation3 + $0x701]] }
 0x2a5   : > { %v1175_v33 = vadd.f32 %v1174_v21, %v1171_v22  ;;  %v1290_v34 = vadd.f32 %v1288_v31, %v1282_v20  ;;  %v953_v36 = vadd.f32 %v951_v55, %v945_v24  ;;  %v1401_v46 = vadd.f32 %v1399_v26, %v1393_v32  ;;  %v1515_v32 = vld [vmem:[%s9910_s3] sm:$0xff] }
 0x2a6   : > { %v1431_v21 = vstv %s6660_s16  ;;  %v1214_v22 = vmul.f32 %v1213_v15, %v8294_v25  ;;  %s6718_s16 = sld [smem:[#allocation3 + $0x681]] }
 0x2a7   : > { %v1294_v41 = vadd.f32 %v1293_v30, %v1290_v34  ;;  %v957_v43 = vadd.f32 %v956_v38, %v953_v36  ;;  %v1183_v44 = vadd.f32 %v1181_v61, %v1175_v33  ;;  %v1432_v33 = vmul.f32 %v1431_v21, %v8308_v39 }
 0x2a8   : > { %v991_v60 = vpop.permute.xlu1 %990  ;;  %v983_v23 = vpop.permute.xlu0 %982  ;;  %v1332_v38 = vstv %s6645_s20  ;;  %v1693_v21 = vstv %s6688_s23  ;;  %s8484_s20 = sld [smem:[#allocation3 + $0x393]] }
 0x2a9   : > { %v1191_v49 = vadd.f32 %v1189_v54, %v1183_v44  ;;  %v1516_v54 = vld [vmem:[%s9910_s3 + $0x8] sm:$0xff]  ;;  %v1302_v63 = vadd.f32 %v8426_v2, %v1294_v41  ;;  %s8504_s23 = sld [smem:[#allocation3 + $0x781]] }
 0x2aa   : > { %7200 = vmatpush3.msra.mxu1 %v1516_v54 }
 0x2ab   : > { %v1195_v27 = vadd.f32 %v1194_v45, %v1191_v49  ;;  %7201 = vmatprep.subr.mxu1 %v7929_v16 }
 0x2ac   : > { %v1407_v52 = vpop.permute.xlu1 %1406  ;;  %v1102_v53 = vpop.permute.xlu0 %1101  ;;  %7202 = vmatpush3.msra.mxu1 %v1515_v32 }
 0x2ad   : > { %v1409_v28 = vadd.f32 %v1407_v52, %v1401_v46  ;;  %v1451_v46 = vstv %s6663_s21  ;;  %s8488_s21 = sld [smem:[#allocation3 + $0x682]] }
 0x2af   : > { %v1413_v55 = vadd.f32 %v1412_v47, %v1409_v28 }
 0x2b0   : > { %v971_v56 = vpop.permute.xlu1 %970  ;;  %v1110_v42 = vpop.permute.xlu0 %1109 }
 0x2b4   : > { %v1082_v57 = vpop.permute.xlu1 %1081  ;;  %v963_v59 = vpop.permute.xlu0 %962 }
 0x2b5   : > { %v965_v61 = vadd.f32 %v963_v59, %v957_v43  ;;  %v1084_v6 = vadd.f32 %v1082_v57, %v1076_v18 }
 0x2b7   : > { %v973_v62 = vadd.f32 %v971_v56, %v965_v61 }
 0x2b8   : > { %v1229_v48 = vpop.permute.xlu1 %1228  ;;  %v1308_v3 = vpop.permute.xlu0 %1307 }
 0x2b9   : > { %v977_v51 = vadd.f32 %v976_v35, %v973_v62  ;;  %v1310_v29 = vadd.f32 %v1308_v3, %v1302_v63 }
 0x2bb   : > { %v985_v7 = vadd.f32 %v983_v23, %v977_v51  ;;  %v1314_v8 = vadd.f32 %v1313_v4, %v1310_v29 }
 0x2bc   : > { %v1427_v1 = vpop.permute.xlu1 %1426  ;;  %v1090_v9 = vpop.permute.xlu0 %1089 }
 0x2bd   : > { %v1092_v10 = vadd.f32 %v1090_v9, %v1084_v6  ;;  %v993_v11 = vadd.f32 %v991_v60, %v985_v7  ;;  %v1333_v60 = vmul.f32 %v1332_v38, %v8294_v25 }
 0x2bf   : > { %v1096_v2 = vadd.f32 %v1095_v0, %v1092_v10  ;;  %1475 = vrot.lane.b32.xlu1 %v993_v11, %s9923_s1  ;;  %1471 = vrot.lane.b32.xlu0 %v993_v11, %s7927_s28  ;;  %v1630_v10 = vstv %s6672_s22  ;;  %s6778_s22 = sld [smem:[#allocation3 + $0x881]] }
 0x2c0   : > { %v1201_v12 = vpop.permute.xlu1 %1200  ;;  %v1221_v13 = vpop.permute.xlu0 %1220 }
 0x2c1   : > { %v1104_v14 = vadd.f32 %v1102_v53, %v1096_v2  ;;  %v1203_v17 = vadd.f32 %v1201_v12, %v1195_v27 }
 0x2c3   : > { %v1112_v18 = vadd.f32 %v1110_v42, %v1104_v14  ;;  %v1636_v14 = vstv %s6673_s24  ;;  %s8492_s24 = sld [smem:[#allocation3 + $0x394]] }
 0x2c4   : > { %v1209_v19 = vpop.permute.xlu1 %1208  ;;  %v1419_v20 = vpop.permute.xlu0 %1418 }
 0x2c5   : > { %v1211_v24 = vadd.f32 %v1209_v19, %v1203_v17  ;;  %v1421_v26 = vadd.f32 %v1419_v20, %v1413_v55  ;;  %1484 = vrot.lane.b32.xlu1 %v1112_v18, %s9923_s1  ;;  %1480 = vrot.lane.b32.xlu0 %v1112_v18, %s7927_s28  ;;  %v1452_v55 = vmul.f32 %v1451_v46, %v8294_v25  ;;  %v1639_v17 = vstv %s6674_s25  ;;  %s8498_s25 = sld [smem:[#allocation3 + $0x702]] }
 0x2c6   : > { %v1792_v20 = vstv %s6703_s26  ;;  %s6779_s26 = sld [smem:[#allocation3 + $0x882]]  ;;  %v1648_v46 = vstv %s8484_s20 }
 0x2c7   : > { %v1215_v30 = vadd.f32 %v1214_v22, %v1211_v24  ;;  %v1429_v31 = vadd.f32 %v1427_v1, %v1421_v26  ;;  %v1642_v24 = vstv %s6675_s27  ;;  %s6691_s27 = sld [smem:[#allocation3 + $0x584]] }
 0x2c8   : > { %v1320_v34 = vpop.permute.xlu1 %1319  ;;  %v1328_v36 = vpop.permute.xlu0 %1327  ;;  %s6764_s20 = sld [smem:[#allocation3 + $0x802]] }
 0x2c9   : > { %v1223_v40 = vadd.f32 %v1221_v13, %v1215_v30  ;;  %v1322_v41 = vadd.f32 %v1320_v34, %v1314_v8  ;;  %v1433_v43 = vadd.f32 %v1432_v33, %v1429_v31  ;;  %v1800_v34 = vstv %s6704_s17  ;;  %s6763_s17 = sld [smem:[#allocation3 + $0x801]] }
 0x2cb   : > { %v1330_v44 = vadd.f32 %v1328_v36, %v1322_v41  ;;  %v1231_v23 = vadd.f32 %v1229_v48, %v1223_v40  ;;  %v1701_v36 = vstv %s6689_s29  ;;  %s6706_s29 = sld [smem:[#allocation3 + $0x604]] }
 0x2cc   : > { %v1439_v45 = vpop.permute.xlu1 %1438  ;;  %v1340_v49 = vpop.permute.xlu0 %1339 }
 0x2cd   : > { %v1334_v50 = vadd.f32 %v1333_v60, %v1330_v44  ;;  %1493 = vrot.lane.b32.xlu1 %v1231_v23, %s9923_s1  ;;  %1489 = vrot.lane.b32.xlu0 %v1231_v23, %s7927_s28  ;;  %v1441_v27 = vadd.f32 %v1439_v45, %v1433_v43  ;;  %v1990_v44 = vstv %s6733_s30  ;;  %v1891_v60 = vstv %s6718_s16  ;;  %s6749_s30 = sld [smem:[#allocation3 + $0x782]] }
 0x2ce   : > { %s6692_s16 = sld [smem:[#allocation3 + $0x585]] }
 0x2cf   : > { %v1342_v39 = vadd.f32 %v1340_v49, %v1334_v50 }
 0x2d0   : > { %v1447_v52 = vpop.permute.xlu1 %1446  ;;  %v1348_v53 = vpop.permute.xlu0 %1347 }
 0x2d1   : > { %v1449_v28 = vadd.f32 %v1447_v52, %v1441_v27  ;;  %v1350_v47 = vadd.f32 %v1348_v53, %v1342_v39  ;;  %v1899_v27 = vstv %s8488_s21  ;;  %v2287_v39 = vstv %s6778_s22  ;;  %s6707_s21 = sld [smem:[#allocation3 + $0x605]] }
 0x2d2   : > { %s6793_s22 = sld [smem:[#allocation3 + $0x901]] }
 0x2d3   : > { %1502 = vrot.lane.b32.xlu1 %v1350_v47, %s9923_s1  ;;  %1498 = vrot.lane.b32.xlu0 %v1350_v47, %s7927_s28  ;;  %v1453_v56 = vadd.f32 %v1452_v55, %v1449_v28 }
 0x2d4   : > { %v1459_v42 = vpop.permute.xlu0 %1458  ;;  %v1467_v58 = vpop.permute.xlu1 %1466 }
 0x2d5   : > { %v1461_v57 = vadd.f32 %v1459_v42, %v1453_v56  ;;  %v1651_v56 = vstv %s8492_s24  ;;  %v1998_v42 = vstv %s8498_s25  ;;  %s6721_s24 = sld [smem:[#allocation3 + $0x684]] }
 0x2d6   : > { %s6794_s25 = sld [smem:[#allocation3 + $0x902]] }
 0x2d7   : > { %v1469_v59 = vadd.f32 %v1467_v58, %v1461_v57  ;;  %v2295_v57 = vstv %s6779_s26  ;;  %s6736_s26 = sld [smem:[#allocation3 + $0x704]] }
 0x2d9   : > { %1511 = vrot.lane.b32.xlu1 %v1469_v59, %s9923_s1  ;;  %1507 = vrot.lane.b32.xlu0 %v1469_v59, %s7927_s28 }
 0x331   : > { %v1472_v54 = vpop.permute.xlu0 %1471  ;;  %v1476_v61 = vpop.permute.xlu1 %1475 }
 0x332   : > { %v1474_v32 = vmax.f32 %v993_v11, %v1472_v54 }
 0x334   : > { %v1478_v37 = vmax.f32 %v1474_v32, %v1476_v61  ;;  %v2089_v61 = vstv %s8504_s23  ;;  %s6678_s23 = sld [smem:[#allocation3 + $0x412]] }
 0x336   : > { %7204 = vmatmul.mubr.msk.f32.vlgmr.msra.gmra.mxu1 %vm1519_vm10, %v1478_v37  ;;  %v1713_v37 = vstv %s6691_s27  ;;  %s6722_s27 = sld [smem:[#allocation3 + $0x685]] }
 0x337   : > { %v1481_v25 = vpop.permute.xlu0 %1480  ;;  %7206 = vmatprep.mubr.msk.f32.mxu1 %vm7930_vm9, %v7929_v16  ;;  %v1485_v62 = vpop.permute.xlu1 %1484 }
 0x338   : > { %v1483_v35 = vmax.f32 %v1112_v18, %v1481_v25 }
 0x33a   : > { %v1487_v63 = vmax.f32 %v1483_v35, %v1485_v62 }
 0x33c   : > { %7207 = vmatmul.mubr.msk.f32.gmra.mxu1 %vm1519_vm10, %v1487_v63  ;;  %v2188_v63 = vstv %s6763_s17  ;;  %s6737_s17 = sld [smem:[#allocation3 + $0x705]] }
 0x33d   : > { %7209 = vmatprep.mubr.msk.f32.mxu1 %vm7930_vm9, %v7929_v16 }
 0x33f   : > { %v1490_v48 = vpop.permute.xlu0 %1489  ;;  %v1494_v51 = vpop.permute.xlu1 %1493 }
 0x340   : > { %v1492_v3 = vmax.f32 %v1231_v23, %v1490_v48  ;;  %v1812_v48 = vstv %s6706_s29  ;;  %s6751_s29 = sld [smem:[#allocation3 + $0x784]] }
 0x342   : > { %v1496_v29 = vmax.f32 %v1492_v3, %v1494_v51 }
 0x344   : > { %7210 = vmatmul.mubr.msk.f32.gmra.mxu1 %vm1519_vm10, %v1496_v29  ;;  %v2097_v29 = vstv %s6749_s30  ;;  %s6766_s30 = sld [smem:[#allocation3 + $0x804]] }
 0x345   : > { %v1499_v4 = vpop.permute.xlu0 %1498  ;;  %7212 = vmatprep.mubr.msk.f32.mxu1 %vm7930_vm9, %v7929_v16  ;;  %v1503_v6 = vpop.permute.xlu1 %1502 }
 0x346   : > { %v1501_v5 = vmax.f32 %v1350_v47, %v1499_v4  ;;  %v1721_v4 = vstv %s6692_s16  ;;  %s8547_s16 = sld [smem:[#allocation3 + $0x413]] }
 0x348   : > { %v1505_v7 = vmax.f32 %v1501_v5, %v1503_v6 }
 0x34a   : > { %7213 = vmatmul.mubr.msk.f32.gmra.mxu1 %vm1519_vm10, %v1505_v7  ;;  %v2196_v7 = vstv %s6764_s20  ;;  %s6752_s20 = sld [smem:[#allocation3 + $0x785]] }
 0x34b   : > { %v1508_v8 = vpop.permute.xlu0 %1507  ;;  %7215 = vmatprep.mubr.msk.f32.mxu1 %vm7930_vm9, %v7929_v16  ;;  %v1512_v9 = vpop.permute.xlu1 %1511 }
 0x34c   : > { %v1510_v1 = vmax.f32 %v1469_v59, %v1508_v8  ;;  %v1820_v8 = vstv %s6707_s21  ;;  %s6781_s21 = sld [smem:[#allocation3 + $0x884]] }
 0x34e   : > { %v1514_v0 = vmax.f32 %v1510_v1, %v1512_v9 }
 0x350   : > { %7216 = vmatmul.mubr.msk.f32.gmra.mxu1 %vm1519_vm10, %v1514_v0  ;;  %v2386_v0 = vstv %s6793_s22  ;;  %s8554_s22 = sld [smem:[#allocation3 + $0x414]] }
 0x3f6   : > { %v1605_v11 = vpop.f32.mrf.mxu1 }
 0x3f7   : > { %v1631_v2 = vadd.f32 %v1630_v10, %v1605_v11  ;;  %v1911_v10 = vstv %s6721_s24  ;;  %s6767_s24 = sld [smem:[#allocation3 + $0x805]] }
 0x3f8   : > { %v7205_v12 = vpop.f32.mrf.mxu1 }
 0x3f9   : > { %vm1632_vm11 = vcmp.gt.f32.partialorder %v1631_v2, 0.0  ;;  %v1633_v13 = vmul.f32 0.1, %v1631_v2  ;;  %v2394_v12 = vstv %s6794_s25  ;;  %s6782_s25 = sld [smem:[#allocation3 + $0x885]] }
 0x3fb   : > { %v1634_v15 = vsel %vm1632_vm11, %v1631_v2, %v1633_v13  ;;  %v2010_v13 = vstv %s6736_s26  ;;  %s6796_s26 = sld [smem:[#allocation3 + $0x904]] }
 0x3fc   : > { %v1637_v18 = vmul.f32 %v1636_v14, %v1634_v15  ;;  %v1610_v19 = vpop.f32.mrf.mxu1  ;;  %v1654_v14 = vstv %s6678_s23  ;;  %s6694_s23 = sld [smem:[#allocation3 + $0x587]] }
 0x3fd   : > { %v1643_v33 = vadd.f32 %v1642_v24, %v1610_v19  ;;  %v1919_v19 = vstv %s6722_s27  ;;  %s6797_s27 = sld [smem:[#allocation3 + $0x905]] }
 0x3fe   : > { %v8482_v22 = vadd.f32 %v1639_v17, %v1637_v18  ;;  %v7208_v26 = vpop.f32.mrf.mxu1 }
 0x3ff   : > { %v1645_v43 = vmul.f32 0.1, %v1643_v33  ;;  %vm1644_vm12 = vcmp.gt.f32.partialorder %v1643_v33, 0.0 }
 0x400   : > { %v1793_v30 = vmul.f32 %v1792_v20, %v8482_v22  ;;  %v1694_v31 = vmul.f32 %v1693_v21, %v8482_v22  ;;  %v1801_v40 = vmul.f32 %v1800_v34, %v8482_v22  ;;  %v1702_v41 = vmul.f32 %v1701_v36, %v8482_v22 }
 0x401   : > { %v1991_v45 = vmul.f32 %v1990_v44, %v8482_v22  ;;  %v1892_v49 = vmul.f32 %v1891_v60, %v8482_v22  ;;  %v1646_v50 = vsel %vm1644_vm12, %v1643_v33, %v1645_v43  ;;  %v1900_v47 = vmul.f32 %v1899_v27, %v8482_v22 }
 0x402   : > { %1795 = vrot.lane.b32.xlu1 %v1793_v30, %s7927_s28  ;;  %1696 = vrot.lane.b32.xlu0 %v1694_v31, %s7927_s28  ;;  %v1649_v53 = vmul.f32 %v1648_v46, %v1646_v50  ;;  %v2288_v55 = vmul.f32 %v2287_v39, %v8482_v22  ;;  %v1999_v54 = vmul.f32 %v1998_v42, %v8482_v22  ;;  %v2018_v20 = vstv %s6737_s17  ;;  %s6695_s17 = sld [smem:[#allocation3 + $0x588]] }
 0x403   : > { %v2296_v32 = vmul.f32 %v2295_v57, %v8482_v22  ;;  %v2090_v35 = vmul.f32 %v2089_v61, %v8482_v22  ;;  %v2189_v3 = vmul.f32 %v2188_v63, %v8482_v22  ;;  %v2098_v5 = vmul.f32 %v2097_v29, %v8482_v22 }
 0x404   : > { %v8494_v38 = vpop.f32.mrf.mxu1  ;;  %v8518_v58 = vadd.f32 %v1651_v56, %v1649_v53  ;;  %v2197_v1 = vmul.f32 %v2196_v7, %v8482_v22  ;;  %v2387_v11 = vmul.f32 %v2386_v0, %v8482_v22  ;;  %v2395_v15 = vmul.f32 %v2394_v12, %v8482_v22 }
 0x405   : > { %v1655_v18 = vadd.f32 %v1654_v14, %v8494_v38  ;;  %v2109_v30 = vstv %s6751_s29  ;;  %v2208_v31 = vstv %s6766_s30  ;;  %v1660_v38 = vstv %s8547_s16  ;;  %s6709_s29 = sld [smem:[#allocation3 + $0x607]] }
 0x406   : > { %1803 = vrot.lane.b32.xlu1 %v1801_v40, %s9923_s1  ;;  %1704 = vrot.lane.b32.xlu0 %v1702_v41, %s9923_s1  ;;  %v7211_v23 = vpop.f32.mrf.mxu1  ;;  %v1714_v62 = vmul.f32 %v1713_v37, %v8518_v58  ;;  %v1813_v51 = vmul.f32 %v1812_v48, %v8518_v58  ;;  %v1722_v6 = vmul.f32 %v1721_v4, %v8518_v58  ;;  %v2117_v40 = vstv %s6752_s20  ;;  %s6724_s30 = sld [smem:[#allocation3 + $0x687]] }
 0x407   : > { %v1821_v9 = vmul.f32 %v1820_v8, %v8518_v58  ;;  %v1912_v2 = vmul.f32 %v1911_v10, %v8518_v58  ;;  %v2011_v17 = vmul.f32 %v2010_v13, %v8518_v58  ;;  %v1920_v21 = vmul.f32 %v1919_v19, %v8518_v58  ;;  %s6710_s16 = sld [smem:[#allocation3 + $0x608]] }
 0x408   : > { %v2019_v24 = vmul.f32 %v2018_v20, %v8518_v58  ;;  %v1657_v26 = vmul.f32 0.1, %v1655_v18  ;;  %vm1656_vm13 = vcmp.gt.f32.partialorder %v1655_v18, 0.0  ;;  %v2110_v33 = vmul.f32 %v2109_v30, %v8518_v58  ;;  %s6739_s20 = sld [smem:[#allocation3 + $0x707]] }
 0x409   : > { %v2209_v34 = vmul.f32 %v2208_v31, %v8518_v58  ;;  %v2307_v41 = vstv %s6781_s21  ;;  %v2118_v44 = vmul.f32 %v2117_v40, %v8518_v58  ;;  %v1663_v23 = vstv %s8554_s22  ;;  %s6681_s21 = sld [smem:[#allocation3 + $0x492]] }
 0x40a   : > { %1993 = vrot.lane.b32.xlu1 %v1991_v45, %s7927_s28  ;;  %1894 = vrot.lane.b32.xlu0 %v1892_v49, %s7927_s28  ;;  %v8510_v52 = vpop.f32.mrf.mxu1  ;;  %v1658_v36 = vsel %vm1656_vm13, %v1655_v18, %v1657_v26  ;;  %v2308_v60 = vmul.f32 %v2307_v41, %v8518_v58  ;;  %v2216_v45 = vstv %s6767_s24  ;;  %v2315_v49 = vstv %s6782_s25  ;;  %s6725_s22 = sld [smem:[#allocation3 + $0x688]] }
 0x40b   : > { %v1661_v43 = vmul.f32 %v1660_v38, %v1658_v36  ;;  %v2217_v46 = vmul.f32 %v2216_v45, %v8518_v58  ;;  %v2316_v27 = vmul.f32 %v2315_v49, %v8518_v58  ;;  %v2406_v39 = vstv %s6796_s26  ;;  %s6740_s24 = sld [smem:[#allocation3 + $0x708]] }
 0x40c   : > { %v7214_v28 = vpop.f32.mrf.mxu1  ;;  %v1733_v53 = vstv %s6694_s23  ;;  %v1741_v56 = vstv %s6695_s17  ;;  %s6754_s25 = sld [smem:[#allocation3 + $0x787]] }
 0x40d   : > { %v8570_v50 = vadd.f32 %v1663_v23, %v1661_v43  ;;  %v2407_v28 = vmul.f32 %v2406_v39, %v8518_v58  ;;  %s6769_s26 = sld [smem:[#allocation3 + $0x807]] }
 0x40e   : > { %1902 = vrot.lane.b32.xlu1 %v1900_v47, %s9923_s1  ;;  %2290 = vrot.lane.b32.xlu0 %v2288_v55, %s7927_s28  ;;  %v2414_v55 = vstv %s6797_s27  ;;  %s8588_s23 = sld [smem:[#allocation3 + $0x493]] }
 0x40f   : > { %v1734_v47 = vmul.f32 %v1733_v53, %v8570_v50  ;;  %v2415_v42 = vmul.f32 %v2414_v55, %v8518_v58  ;;  %v1742_v57 = vmul.f32 %v1741_v56, %v8570_v50  ;;  %s6755_s27 = sld [smem:[#allocation3 + $0x788]] }
 0x410   : > { %v8520_v59 = vpop.f32.mrf.mxu1  ;;  %s6784_s17 = sld [smem:[#allocation3 + $0x887]] }
 0x411   : > { %v2038_v29 = vstv %s6740_s24  ;;  %s6698_s24 = sld [smem:[#allocation3 + $0x58b]] }
 0x412   : > { %2001 = vrot.lane.b32.xlu1 %v1999_v54, %s9923_s1  ;;  %2298 = vrot.lane.b32.xlu0 %v2296_v32, %s9923_s1  ;;  %v7217_v25 = vpop.f32.mrf.mxu1  ;;  %v1832_v54 = vstv %s6709_s29  ;;  %v1931_v32 = vstv %s6724_s30  ;;  %s8595_s29 = sld [smem:[#allocation3 + $0x494]] }
 0x413   : > { %v1833_v61 = vmul.f32 %v1832_v54, %v8570_v50  ;;  %v1932_v37 = vmul.f32 %v1931_v32, %v8570_v50  ;;  %v1840_v25 = vstv %s6710_s16  ;;  %s6770_s30 = sld [smem:[#allocation3 + $0x808]]  ;;  %v2129_v7 = vstv %s6754_s25 }
 0x414   : > { %v1841_v63 = vmul.f32 %v1840_v25, %v8570_v50  ;;  %v2228_v8 = vstv %s6769_s26  ;;  %s6785_s16 = sld [smem:[#allocation3 + $0x888]]  ;;  %v1672_v0 = vstv %s8588_s23 }
 0x415   : > { %v2137_v10 = vstv %s6755_s27  ;;  %s6684_s25 = sld [smem:[#allocation3 + $0x512]] }
 0x416   : > { %2092 = vrot.lane.b32.xlu1 %v2090_v35, %s7927_s28  ;;  %1716 = vrot.lane.b32.xlu0 %v1714_v62, %s7927_s28  ;;  %v2030_v35 = vstv %s6739_s20  ;;  %v1666_v62 = vstv %s6681_s21  ;;  %s6799_s20 = sld [smem:[#allocation3 + $0x907]]  ;;  %v2138_v12 = vmul.f32 %v2137_v10, %v8570_v50 }
 0x417   : > { %v2031_v48 = vmul.f32 %v2030_v35, %v8570_v50  ;;  %s6697_s21 = sld [smem:[#allocation3 + $0x58a]] }
 0x418   : > { %v1675_v14 = vstv %s8595_s29  ;;  %s6712_s26 = sld [smem:[#allocation3 + $0x60a]] }
 0x419   : > { %s6727_s23 = sld [smem:[#allocation3 + $0x68a]] }
 0x41a   : > { %2191 = vrot.lane.b32.xlu1 %v2189_v3, %s7927_s28  ;;  %1815 = vrot.lane.b32.xlu0 %v1813_v51, %s7927_s28  ;;  %v1667_v3 = vadd.f32 %v1666_v62, %v8510_v52  ;;  %v1939_v51 = vstv %s6725_s22  ;;  %v2130_v52 = vmul.f32 %v2129_v7, %v8570_v50  ;;  %s6800_s22 = sld [smem:[#allocation3 + $0x908]] }
 0x41b   : > { %v1940_v4 = vmul.f32 %v1939_v51, %v8570_v50  ;;  %s6713_s27 = sld [smem:[#allocation3 + $0x60b]] }
 0x41c   : > { %vm1668_vm14 = vcmp.gt.f32.partialorder %v1667_v3, 0.0  ;;  %s8621_s29 = sld [smem:[#allocation3 + $0x513]] }
 0x41e   : > { %2100 = vrot.lane.b32.xlu1 %v2098_v5, %s9923_s1  ;;  %1724 = vrot.lane.b32.xlu0 %v1722_v6, %s9923_s1  ;;  %v2039_v5 = vmul.f32 %v2038_v29, %v8570_v50  ;;  %v1669_v6 = vmul.f32 0.1, %v1667_v3  ;;  %v1852_v41 = vstv %s6712_s26  ;;  %s8648_s26 = sld [smem:[#allocation3 + $0x58d]] }
 0x41f   : > { %v1951_v43 = vstv %s6727_s23  ;;  %s8652_s23 = sld [smem:[#allocation3 + $0x580]] }
 0x420   : > { %v2434_v31 = vstv %s6800_s22  ;;  %s8636_s22 = sld [smem:[#allocation3 + $0x80a]] }
 0x421   : > { %v2435_v36 = vmul.f32 %v2434_v31, %v8570_v50  ;;  %v1860_v45 = vstv %s6713_s27  ;;  %s8654_s27 = sld [smem:[#allocation3 + $0x80b]] }
 0x422   : > { %2199 = vrot.lane.b32.xlu1 %v2197_v1, %s9923_s1  ;;  %1823 = vrot.lane.b32.xlu0 %v1821_v9, %s9923_s1  ;;  %v2229_v1 = vmul.f32 %v2228_v8, %v8570_v50  ;;  %v1670_v9 = vsel %vm1668_vm14, %v1667_v3, %v1669_v6  ;;  %v1684_v39 = vstv %s8621_s29  ;;  %s8663_s29 = sld [smem:[#allocation3 + $0x583]] }
 0x424   : > { %v1773_v35 = vstv %s8648_s26  ;;  %s9933_s26 = smov 126  }
 0x426   : > { %2389 = vrot.lane.b32.xlu1 %v2387_v11, %s7927_s28  ;;  %1914 = vrot.lane.b32.xlu0 %v1912_v2, %s7927_s28  ;;  %v2327_v11 = vstv %s6784_s17  ;;  %v1673_v2 = vmul.f32 %v1672_v0, %v1670_v9  ;;  %s6742_s17 = sld [smem:[#allocation3 + $0x70a]]  ;;  %v2248_v54 = vstv %s8636_s22 }
 0x427   : > { %v2328_v13 = vmul.f32 %v2327_v11, %v8570_v50  ;;  %s8685_s22 = sld [smem:[#allocation3 + $0x680]]  ;;  %v2256_v6 = vstv %s8654_s27 }
 0x428   : > { %v8611_v18 = vadd.f32 %v1675_v14, %v1673_v2  ;;  %v1709_v8 = vstv %s8663_s29  ;;  %s8711_s27 = sld [smem:[#allocation3 + $0x68e]] }
 0x429   : > { %s8720_s29 = sld [smem:[#allocation3 + $0x883]] }
 0x42a   : > { %2397 = vrot.lane.b32.xlu1 %v2395_v15, %s9923_s1  ;;  %2013 = vrot.lane.b32.xlu0 %v2011_v17, %s7927_s28  ;;  %v2236_v15 = vstv %s6770_s30  ;;  %v2335_v17 = vstv %s6785_s16  ;;  %s8625_s30 = sld [smem:[#allocation3 + $0x68b]]  ;;  %v1861_v49 = vmul.f32 %v1860_v45, %v8611_v18  ;;  %v2257_v11 = vmul.f32 %v2256_v6, %v8611_v18 }
 0x42b   : > { %v2237_v19 = vmul.f32 %v2236_v15, %v8570_v50  ;;  %v2336_v20 = vmul.f32 %v2335_v17, %v8570_v50  ;;  %s6743_s16 = sld [smem:[#allocation3 + $0x70b]]  ;;  %v1710_v17 = vmul.f32 %v1709_v8, %v8518_v58  ;;  %v2509_v6 = vld [vmem:[%s9911_s4] sm:$0xff] }
 0x42c   : > { %7218 = vmatprep.subr.mxu1 %v2509_v6 }
 0x42d   : > { %7219 = vmatpush3.msra.mxu1 %v2509_v6 }
 0x42e   : > { %1922 = vrot.lane.b32.xlu1 %v1920_v21, %s9923_s1  ;;  %2021 = vrot.lane.b32.xlu0 %v2019_v24, %s9923_s1  ;;  %v2426_v21 = vstv %s6799_s20  ;;  %v1753_v24 = vstv %s6697_s21  ;;  %s8630_s20 = sld [smem:[#allocation3 + $0x514]] }
 0x42f   : > { %v2427_v26 = vmul.f32 %v2426_v21, %v8570_v50  ;;  %v1754_v30 = vmul.f32 %v1753_v24, %v8611_v18  ;;  %s8634_s21 = sld [smem:[#allocation3 + $0x78a]]  ;;  %7246 = vmatprep.subr.mxu1 %v7929_v16 }
 0x430   : > { %v1959_v53 = vstv %s8625_s30  ;;  %s8667_s30 = sld [smem:[#allocation3 + $0x603]] }
 0x431   : > { %v1960_v55 = vmul.f32 %v1959_v53, %v8611_v18 }
 0x432   : > { %2112 = vrot.lane.b32.xlu1 %v2110_v33, %s7927_s28  ;;  %2211 = vrot.lane.b32.xlu0 %v2209_v34, %s7927_s28  ;;  %v1761_v33 = vstv %s6698_s24  ;;  %v1678_v34 = vstv %s6684_s25  ;;  %s8640_s24 = sld [smem:[#allocation3 + $0x600]] }
 0x433   : > { %v1762_v38 = vmul.f32 %v1761_v33, %v8611_v18  ;;  %v1679_v40 = vadd.f32 %v1678_v34, %v8520_v59  ;;  %v2050_v59 = vstv %s6742_s17  ;;  %s8644_s25 = sld [smem:[#allocation3 + $0x78b]] }
 0x434   : > { %s8658_s17 = sld [smem:[#allocation3 + $0x58e]] }
 0x435   : > { %v1681_v23 = vmul.f32 0.1, %v1679_v40  ;;  %vm1680_vm15 = vcmp.gt.f32.partialorder %v1679_v40, 0.0 }
 0x436   : > { %2120 = vrot.lane.b32.xlu1 %v2118_v44, %s9923_s1  ;;  %2310 = vrot.lane.b32.xlu0 %v2308_v60, %s7927_s28  ;;  %v1853_v44 = vmul.f32 %v1852_v41, %v8611_v18  ;;  %v1952_v60 = vmul.f32 %v1951_v43, %v8611_v18 }
 0x438   : > { %v1789_v62 = vstv %s8640_s24  ;;  %s8697_s24 = sld [smem:[#allocation3 + $0x70d]] }
 0x439   : > { %v2157_v25 = vstv %s8644_s25  ;;  %s8691_s25 = sld [smem:[#allocation3 + $0x90a]] }
 0x43a   : > { %2219 = vrot.lane.b32.xlu1 %v2217_v46, %s9923_s1  ;;  %2318 = vrot.lane.b32.xlu0 %v2316_v27, %s9923_s1  ;;  %v2051_v46 = vmul.f32 %v2050_v59, %v8611_v18  ;;  %v1682_v27 = vsel %vm1680_vm15, %v1679_v40, %v1681_v23  ;;  %v2158_v51 = vmul.f32 %v2157_v25, %v8611_v18  ;;  %v1781_v7 = vstv %s8658_s17  ;;  %s8715_s17 = sld [smem:[#allocation3 + $0x703]] }
 0x43e   : > { %2409 = vrot.lane.b32.xlu1 %v2407_v28, %s7927_s28  ;;  %1736 = vrot.lane.b32.xlu0 %v1734_v47, %s7927_s28  ;;  %v2058_v28 = vstv %s6743_s16  ;;  %v1685_v47 = vmul.f32 %v1684_v39, %v1682_v27  ;;  %s8669_s16 = sld [smem:[#allocation3 + $0x88a]]  ;;  %v2070_v40 = vstv %s8697_s24 }
 0x43f   : > { %v2059_v56 = vmul.f32 %v2058_v28, %v8611_v18  ;;  %v1979_v27 = vstv %s8711_s27  ;;  %s8774_s24 = sld [smem:[#allocation3 + $0x783]] }
 0x440   : > { %s8781_s27 = sld [smem:[#allocation3 + $0x80e]] }
 0x442   : > { %2417 = vrot.lane.b32.xlu1 %v2415_v42, %s9923_s1  ;;  %1744 = vrot.lane.b32.xlu0 %v1742_v57, %s9923_s1  ;;  %v1687_v42 = vstv %s8630_s20  ;;  %v2149_v57 = vstv %s8634_s21  ;;  %s8675_s20 = sld [smem:[#allocation3 + $0x68d]] }
 0x443   : > { %v8671_v32 = vadd.f32 %v1687_v42, %v1685_v47  ;;  %s8679_s21 = sld [smem:[#allocation3 + $0x700]] }
 0x445   : > { %v1774_v29 = vmul.f32 %v1773_v35, %v8671_v32  ;;  %v1782_v2 = vmul.f32 %v1781_v7, %v8671_v32  ;;  %v1980_v35 = vmul.f32 %v1979_v27, %v8671_v32 }
 0x446   : > { %1835 = vrot.lane.b32.xlu1 %v1833_v61, %s7927_s28  ;;  %1934 = vrot.lane.b32.xlu0 %v1932_v37, %s7927_s28  ;;  %v2150_v61 = vmul.f32 %v2149_v57, %v8611_v18  ;;  %v2249_v37 = vmul.f32 %v2248_v54, %v8611_v18 }
 0x449   : > { %v1987_v34 = vstv %s8679_s21  ;;  %s8749_s21 = sld [smem:[#allocation3 + $0x60d]] }
 0x44a   : > { %1843 = vrot.lane.b32.xlu1 %v1841_v63, %s9923_s1  ;;  %2033 = vrot.lane.b32.xlu0 %v2031_v48, %s7927_s28  ;;  %v1690_v63 = vstv %s8652_s23  ;;  %s8703_s23 = sld [smem:[#allocation3 + $0x683]]  ;;  %v1988_v39 = vmul.f32 %v1987_v34, %v8482_v22 }
 0x44e   : > { %1942 = vrot.lane.b32.xlu1 %v1940_v4, %s9923_s1  ;;  %2041 = vrot.lane.b32.xlu0 %v2039_v5, %s9923_s1  ;;  %v1790_v4 = vmul.f32 %v1789_v62, %v8482_v22  ;;  %v1691_v5 = vmul.f32 %v1690_v63, %v8482_v22 }
 0x450   : > { %v1907_v43 = vstv %s8703_s23  ;;  %s8779_s23 = sld [smem:[#allocation3 + $0x586]] }
 0x451   : > { %v1908_v47 = vmul.f32 %v1907_v43, %v8518_v58 }
 0x452   : > { %2132 = vrot.lane.b32.xlu1 %v2130_v52, %s7927_s28  ;;  %2231 = vrot.lane.b32.xlu0 %v2229_v1, %s7927_s28  ;;  %v1808_v52 = vstv %s8667_s30  ;;  %s8724_s30 = sld [smem:[#allocation3 + $0x90b]] }
 0x456   : > { %2140 = vrot.lane.b32.xlu1 %v2138_v12, %s9923_s1  ;;  %2330 = vrot.lane.b32.xlu0 %v2328_v13, %s7927_s28  ;;  %v2347_v12 = vstv %s8669_s16  ;;  %v1971_v13 = vstv %s8675_s20  ;;  %s8730_s16 = sld [smem:[#allocation3 + $0x70e]] }
 0x457   : > { %v2348_v31 = vmul.f32 %v2347_v12, %v8611_v18  ;;  %v1972_v33 = vmul.f32 %v1971_v13, %v8671_v32  ;;  %s8740_s20 = sld [smem:[#allocation3 + $0x780]] }
 0x458   : > { %v2454_v62 = vstv %s8724_s30  ;;  %s8792_s30 = sld [smem:[#allocation3 + $0x78e]] }
 0x45a   : > { %2239 = vrot.lane.b32.xlu1 %v2237_v19, %s9923_s1  ;;  %2338 = vrot.lane.b32.xlu0 %v2336_v20, %s9923_s1  ;;  %v1809_v19 = vmul.f32 %v1808_v52, %v8518_v58  ;;  %v1888_v20 = vstv %s8685_s22  ;;  %v2455_v52 = vmul.f32 %v2454_v62, %v8611_v18  ;;  %s8801_s22 = sld [smem:[#allocation3 + $0x606]] }
 0x45c   : > { %v2078_v63 = vstv %s8730_s16  ;;  %s8796_s16 = sld [smem:[#allocation3 + $0x803]] }
 0x45e   : > { %2429 = vrot.lane.b32.xlu1 %v2427_v26, %s7927_s28  ;;  %1756 = vrot.lane.b32.xlu0 %v1754_v30, %s7927_s28  ;;  %v2177_v43 = vstv %s8792_s30  ;;  %s6711_s30 = sld [smem:[#allocation3 + $0x609]] }
 0x462   : > { %2437 = vrot.lane.b32.xlu1 %v2435_v36, %s9923_s1  ;;  %1764 = vrot.lane.b32.xlu0 %v1762_v38, %s9923_s1  ;;  %v1889_v36 = vmul.f32 %v1888_v20, %v8482_v22  ;;  %v2446_v38 = vstv %s8691_s25  ;;  %s8771_s25 = sld [smem:[#allocation3 + $0x80d]]  ;;  %v2105_v20 = vstv %s8774_s24 }
 0x463   : > { %v2447_v59 = vmul.f32 %v2446_v38, %v8611_v18  ;;  %s8852_s24 = sld [smem:[#allocation3 + $0x706]] }
 0x466   : > { %1855 = vrot.lane.b32.xlu1 %v1853_v44, %s7927_s28  ;;  %1954 = vrot.lane.b32.xlu0 %v1952_v60, %s7927_s28  ;;  %v2644_v60 = vld [vmem:[%s9912_s5] sm:$0xff] }
 0x467   : > { %7232 = vmatprep.subr.mxu0 %v2644_v60 }
 0x468   : > { %7233 = vmatpush3.msra.mxu0 %v2644_v60 }
 0x469   : > { %7257 = vmatprep.subr.mxu0 %v7929_v16 }
 0x46a   : > { %1863 = vrot.lane.b32.xlu1 %v1861_v49, %s9923_s1  ;;  %2053 = vrot.lane.b32.xlu0 %v2051_v46, %s7927_s28  ;;  %v2071_v49 = vmul.f32 %v2070_v40, %v8671_v32  ;;  %v2355_v46 = vstv %s8705_s0  ;;  %s8758_s0 = sld [smem:[#allocation3 + $0x800]] }
 0x46b   : > { %v2356_v25 = vmul.f32 %v2355_v46, %v8611_v18 }
 0x46e   : > { %1962 = vrot.lane.b32.xlu1 %v1960_v55, %s9923_s1  ;;  %2061 = vrot.lane.b32.xlu0 %v2059_v56, %s9923_s1  ;;  %s8687_s1 = sld [smem:[#allocation3 + $0x880]]  ;;  %v2006_v55 = vstv %s8715_s17  ;;  %v2303_v56 = vstv %s8720_s29 }
 0x46f   : > { %s8803_s17 = sld [smem:[#allocation3 + $0x90d]] }
 0x470   : > { %s6696_s29 = sld [smem:[#allocation3 + $0x589]] }
 0x472   : > { %2152 = vrot.lane.b32.xlu1 %v2150_v61, %s7927_s28  ;;  %2251 = vrot.lane.b32.xlu0 %v2249_v37, %s7927_s28 }
 0x474   : > { %v1796_v48 = vpop.permute.xlu1 %1795  ;;  %v1697_v3 = vpop.permute.xlu0 %1696  ;;  %v2284_v41 = vstv %s8687_s1  ;;  %s8753_s1 = sld [smem:[#allocation3 + $0x78d]] }
 0x475   : > { %v1798_v1 = vadd.f32 %v1796_v48, %v1790_v4  ;;  %v1699_v9 = vadd.f32 %v1697_v3, %v1691_v5  ;;  %v2285_v28 = vmul.f32 %v2284_v41, %v8482_v22 }
 0x476   : > { %2160 = vrot.lane.b32.xlu1 %v2158_v51, %s9933_s26  ;;  %1776 = vrot.lane.b32.xlu0 %v1774_v29, %s7927_s28  ;;  %v2007_v51 = vmul.f32 %v2006_v55, %v8518_v58  ;;  %v2304_v29 = vmul.f32 %v2303_v56, %v8518_v58  ;;  %v2178_v55 = vmul.f32 %v2177_v43, %v8671_v32  ;;  %v2466_v56 = vstv %s8803_s17  ;;  %s6756_s17 = sld [smem:[#allocation3 + $0x789]] }
 0x478   : > { %v1804_v0 = vpop.permute.xlu1 %1803  ;;  %v1705_v10 = vpop.permute.xlu0 %1704 }
 0x479   : > { %v1806_v14 = vadd.f32 %v1804_v0, %v1798_v1  ;;  %v1707_v15 = vadd.f32 %v1705_v10, %v1699_v9  ;;  %v2079_v1 = vmul.f32 %v2078_v63, %v8671_v32  ;;  %v1872_v9 = vstv %s8749_s21  ;;  %s8816_s21 = sld [smem:[#allocation3 + $0x900]] }
 0x47a   : > { %2259 = vrot.lane.b32.xlu1 %v2257_v11, %s9933_s26  ;;  %1784 = vrot.lane.b32.xlu0 %v1782_v2, %s9933_s26  ;;  %v2169_v0 = vstv %s8753_s1  ;;  %v2086_v10 = vstv %s8740_s20  ;;  %v1873_v12 = vmul.f32 %v1872_v9, %v8671_v32  ;;  %s8808_s20 = sld [smem:[#allocation3 + $0x88d]] }
 0x47b   : > { %v8722_v21 = vadd.f32 %v1710_v17, %v1707_v15  ;;  %v8726_v24 = vadd.f32 %v1809_v19, %v1806_v14  ;;  %v2170_v13 = vmul.f32 %v2169_v0, %v8671_v32  ;;  %v2087_v14 = vmul.f32 %v2086_v10, %v8482_v22  ;;  %s8826_s1 = sld [smem:[#allocation3 + $0x90e]] }
 0x47c   : > { %v1994_v26 = vpop.permute.xlu1 %1993  ;;  %v1895_v30 = vpop.permute.xlu0 %1894  ;;  %v2185_v15 = vstv %s8758_s0  ;;  %v1880_v17 = vstv %s8762_s2  ;;  %v2268_v19 = vstv %s8771_s25  ;;  %s8828_s0 = sld [smem:[#allocation3 + $0x88e]] }
 0x47d   : > { %v1897_v44 = vadd.f32 %v1895_v30, %v1889_v36  ;;  %v1996_v42 = vadd.f32 %v1994_v26, %v1988_v39  ;;  %v1729_v26 = vstv %s8779_s23  ;;  %v2186_v34 = vmul.f32 %v2185_v15, %v8482_v22  ;;  %s8835_s2 = sld [smem:[#allocation3 + $0x903]] }
 0x47e   : > { %2350 = vrot.lane.b32.xlu1 %v2348_v31, %s7927_s28  ;;  %1974 = vrot.lane.b32.xlu0 %v1972_v33, %s7927_s28  ;;  %v2276_v33 = vstv %s8781_s27  ;;  %v1881_v40 = vmul.f32 %v1880_v17, %v8671_v32  ;;  %v2269_v41 = vmul.f32 %v2268_v19, %v8671_v32  ;;  %s8847_s25 = sld [smem:[#allocation3 + $0x686]] }
 0x47f   : > { %s6753_s23 = sld [smem:[#allocation3 + $0x786]] }
 0x480   : > { %v1903_v23 = vpop.permute.xlu1 %1902  ;;  %v2291_v45 = vpop.permute.xlu0 %2290  ;;  %s6783_s27 = sld [smem:[#allocation3 + $0x886]] }
 0x481   : > { %v1905_v53 = vadd.f32 %v1903_v23, %v1897_v44  ;;  %v2293_v57 = vadd.f32 %v2291_v45, %v2285_v28  ;;  %v1730_v23 = vmul.f32 %v1729_v26, %v8570_v50  ;;  %v2204_v45 = vstv %s8796_s16  ;;  %s6726_s16 = sld [smem:[#allocation3 + $0x689]] }
 0x482   : > { %2449 = vrot.lane.b32.xlu1 %v2447_v59, %s7927_s28  ;;  %2073 = vrot.lane.b32.xlu0 %v2071_v49, %s7927_s28  ;;  %v1828_v59 = vstv %s8801_s22  ;;  %v2474_v6 = vstv %s8826_s1  ;;  %s6741_s22 = sld [smem:[#allocation3 + $0x709]] }
 0x483   : > { %v8764_v54 = vadd.f32 %v1908_v47, %v1905_v53  ;;  %v2277_v47 = vmul.f32 %v2276_v33, %v8671_v32  ;;  %v2475_v0 = vmul.f32 %v2474_v6, %v8671_v32  ;;  %s6699_s1 = sld [smem:[#allocation3 + $0x58c]] }
 0x484   : > { %v2002_v61 = vpop.permute.xlu1 %2001  ;;  %v2299_v37 = vpop.permute.xlu0 %2298 }
 0x485   : > { %v2004_v48 = vadd.f32 %v2002_v61, %v1996_v42  ;;  %v2301_v3 = vadd.f32 %v2299_v37, %v2293_v57  ;;  %v2367_v42 = vstv %s8808_s20  ;;  %v2205_v37 = vmul.f32 %v2204_v45, %v8518_v58  ;;  %s6771_s20 = sld [smem:[#allocation3 + $0x809]] }
 0x486   : > { %2358 = vrot.lane.b32.xlu1 %v2356_v25, %s9933_s26  ;;  %1982 = vrot.lane.b32.xlu0 %v1980_v35, %s9933_s26  ;;  %v2383_v25 = vstv %s8816_s21  ;;  %s6786_s21 = sld [smem:[#allocation3 + $0x889]] }
 0x487   : > { %v8783_v4 = vadd.f32 %v2007_v51, %v2004_v48  ;;  %v8785_v5 = vadd.f32 %v2304_v29, %v2301_v3  ;;  %v2467_v3 = vmul.f32 %v2466_v56, %v8671_v32  ;;  %v2368_v51 = vmul.f32 %v2367_v42, %v8671_v32 }
 0x488   : > { %v2093_v7 = vpop.permute.xlu1 %2092  ;;  %v1717_v8 = vpop.permute.xlu0 %1716  ;;  %v2384_v29 = vmul.f32 %v2383_v25, %v8482_v22  ;;  %v1927_v22 = vstv %s8847_s25  ;;  %s6729_s25 = sld [smem:[#allocation3 + $0x68c]] }
 0x489   : > { %v2095_v30 = vadd.f32 %v2093_v7, %v2087_v14  ;;  %v1719_v31 = vadd.f32 %v1717_v8, %v8722_v21  ;;  %v2106_v21 = vmul.f32 %v2105_v20, %v8518_v58  ;;  %v2375_v7 = vstv %s8828_s0  ;;  %s6801_s0 = sld [smem:[#allocation3 + $0x909]] }
 0x48a   : > { %2457 = vrot.lane.b32.xlu1 %v2455_v52, %s9933_s26  ;;  %2081 = vrot.lane.b32.xlu0 %v2079_v1, %s9933_s26  ;;  %v2402_v8 = vstv %s8835_s2  ;;  %v2376_v10 = vmul.f32 %v2375_v7, %v8671_v32  ;;  %s6714_s2 = sld [smem:[#allocation3 + $0x60c]] }
 0x48c   : > { %v2192_v11 = vpop.permute.xlu1 %2191  ;;  %v1816_v2 = vpop.permute.xlu0 %1815 }
 0x48d   : > { %v2194_v49 = vadd.f32 %v2192_v11, %v2186_v34  ;;  %v1818_v46 = vadd.f32 %v1816_v2, %v8726_v24  ;;  %v1829_v24 = vmul.f32 %v1828_v59, %v8570_v50  ;;  %v2403_v2 = vmul.f32 %v2402_v8, %v8518_v58 }
 0x48e   : > { %1875 = vrot.lane.b32.xlu1 %v1873_v12, %s7927_s28  ;;  %2172 = vrot.lane.b32.xlu0 %v2170_v13, %s7927_s28  ;;  %v2026_v12 = vstv %s8852_s24  ;;  %v1848_v8 = vstv %s6711_s30  ;;  %s6744_s24 = sld [smem:[#allocation3 + $0x70c]] }
 0x48f   : > { %v2027_v58 = vmul.f32 %v2026_v12, %v8570_v50  ;;  %s6808_s30 = sld [smem:[#allocation3 + $0x60f]] }
 0x490   : > { %v2101_v36 = vpop.permute.xlu1 %2100  ;;  %v1725_v38 = vpop.permute.xlu0 %1724 }
 0x491   : > { %v2103_v44 = vadd.f32 %v2101_v36, %v2095_v30  ;;  %v1727_v60 = vadd.f32 %v1725_v38, %v1719_v31  ;;  %v1928_v30 = vmul.f32 %v1927_v22, %v8570_v50  ;;  %v2125_v38 = vstv %s6753_s23  ;;  %s6759_s23 = sld [smem:[#allocation3 + $0x78c]] }
 0x492   : > { %1883 = vrot.lane.b32.xlu1 %v1881_v40, %s9933_s26  ;;  %2271 = vrot.lane.b32.xlu0 %v2269_v41, %s7927_s28  ;;  %v2126_v43 = vmul.f32 %v2125_v38, %v8570_v50 }
 0x493   : > { %v2107_v27 = vadd.f32 %v2106_v21, %v2103_v44  ;;  %v8839_v39 = vadd.f32 %v1730_v23, %v1727_v60  ;;  %v2323_v60 = vstv %s6783_s27  ;;  %s6807_s27 = sld [smem:[#allocation3 + $0x58f]] }
 0x494   : > { %v2200_v53 = vpop.permute.xlu1 %2199  ;;  %v1824_v28 = vpop.permute.xlu0 %1823 }
 0x495   : > { %v2202_v57 = vadd.f32 %v2200_v53, %v2194_v49  ;;  %v1826_v61 = vadd.f32 %v1824_v28, %v1818_v46 }
 0x496   : > { %2279 = vrot.lane.b32.xlu1 %v2277_v47, %s9933_s26  ;;  %2180 = vrot.lane.b32.xlu0 %v2178_v55, %s9933_s26 }
 0x497   : > { %v2206_v35 = vadd.f32 %v2205_v37, %v2202_v57  ;;  %v8854_v62 = vadd.f32 %v1829_v24, %v1826_v61  ;;  %v1749_v61 = vstv %s6696_s29  ;;  %s6804_s29 = sld [smem:[#allocation3 + $0x90c]] }
 0x498   : > { %v2390_v63 = vpop.permute.xlu1 %2389  ;;  %v1915_v48 = vpop.permute.xlu0 %1914 }
 0x499   : > { %v2392_v52 = vadd.f32 %v2390_v63, %v2384_v29  ;;  %v1917_v13 = vadd.f32 %v1915_v48, %v8764_v54 }
 0x49a   : > { %2469 = vrot.lane.b32.xlu1 %v2467_v3, %s7927_s28  ;;  %2370 = vrot.lane.b32.xlu0 %v2368_v51, %s7927_s28  ;;  %s6768_s28 = sld [smem:[#allocation3 + $0x806]]  ;;  %v1750_v3 = vmul.f32 %v1749_v61, %v8611_v18 }
 0x49c   : > { %v2398_v1 = vpop.permute.xlu1 %2397  ;;  %v2014_v9 = vpop.permute.xlu0 %2013 }
 0x49d   : > { %v2400_v11 = vadd.f32 %v2398_v1, %v2392_v52  ;;  %v2016_v14 = vadd.f32 %v2014_v9, %v8783_v4 }
 0x49e   : > { %2477 = vrot.lane.b32.xlu1 %v2475_v0, %s9933_s26  ;;  %2378 = vrot.lane.b32.xlu0 %v2376_v10, %s9933_s26  ;;  %s6798_s26 = sld [smem:[#allocation3 + $0x906]]  ;;  %v1849_v0 = vmul.f32 %v1848_v8, %v8611_v18  ;;  %v1947_v10 = vstv %s6726_s16 }
 0x49f   : > { %v2404_v15 = vadd.f32 %v2403_v2, %v2400_v11  ;;  %v2046_v11 = vstv %s6741_s22  ;;  %s6809_s16 = sld [smem:[#allocation3 + $0x68f]] }
 0x4a0   : > { %v1923_v17 = vpop.permute.xlu1 %1922  ;;  %v2022_v19 = vpop.permute.xlu0 %2021  ;;  %v2224_v44 = vstv %s6768_s28  ;;  %s6774_s28 = sld [smem:[#allocation3 + $0x80c]] }
 0x4a1   : > { %v1925_v20 = vadd.f32 %v1923_v17, %v1917_v13  ;;  %v2024_v26 = vadd.f32 %v2022_v19, %v2016_v14  ;;  %v2225_v28 = vmul.f32 %v2224_v44, %v8570_v50  ;;  %v1948_v17 = vmul.f32 %v1947_v10, %v8611_v18  ;;  %s8903_s22 = sld [smem:[#allocation3 + $0x70f]] }
 0x4a2   : > { %v2047_v19 = vmul.f32 %v2046_v11, %v8611_v18 }
 0x4a3   : > { %v1929_v31 = vadd.f32 %v1928_v30, %v1925_v20  ;;  %v2028_v33 = vadd.f32 %v2027_v58, %v2024_v26  ;;  %v2145_v58 = vstv %s6756_s17  ;;  %s8905_s17 = sld [smem:[#allocation3 + $0x78f]] }
 0x4a4   : > { %v2113_v34 = vpop.permute.xlu1 %2112  ;;  %v2212_v36 = vpop.permute.xlu0 %2211  ;;  %v2422_v57 = vstv %s6798_s26  ;;  %v2146_v38 = vmul.f32 %v2145_v58, %v8611_v18  ;;  %s6789_s26 = sld [smem:[#allocation3 + $0x88c]] }
 0x4a5   : > { %v2115_v40 = vadd.f32 %v2113_v34, %v2107_v27  ;;  %v2214_v21 = vadd.f32 %v2212_v36, %v2206_v35  ;;  %v2324_v27 = vmul.f32 %v2323_v60, %v8570_v50  ;;  %v2423_v48 = vmul.f32 %v2422_v57, %v8570_v50 }
 0x4a6   : > { %v2264_v58 = vstv %s6774_s28 }
 0x4a8   : > { %v2121_v54 = vpop.permute.xlu1 %2120  ;;  %v2311_v41 = vpop.permute.xlu0 %2310 }
 0x4a9   : > { %v2123_v4 = vadd.f32 %v2121_v54, %v2115_v40  ;;  %v2313_v23 = vadd.f32 %v2311_v41, %v8785_v5  ;;  %v2244_v40 = vstv %s6771_s20  ;;  %v2343_v54 = vstv %s6786_s21  ;;  %s8907_s20 = sld [smem:[#allocation3 + $0x80f]] }
 0x4aa   : > { %s8909_s21 = sld [smem:[#allocation3 + $0x90f]] }
 0x4ab   : > { %v2127_v45 = vadd.f32 %v2126_v43, %v2123_v4 }
 0x4ac   : > { %v2220_v59 = vpop.permute.xlu1 %2219  ;;  %v2319_v49 = vpop.permute.xlu0 %2318 }
 0x4ad   : > { %v2222_v46 = vadd.f32 %v2220_v59, %v2214_v21  ;;  %v2321_v53 = vadd.f32 %v2319_v49, %v2313_v23  ;;  %v2245_v59 = vmul.f32 %v2244_v40, %v8611_v18 }
 0x4af   : > { %v2226_v47 = vadd.f32 %v2225_v28, %v2222_v46  ;;  %v2325_v55 = vadd.f32 %v2324_v27, %v2321_v53  ;;  %v1769_v27 = vstv %s6699_s1 }
 0x4b0   : > { %v2410_v56 = vpop.permute.xlu1 %2409  ;;  %v1737_v42 = vpop.permute.xlu0 %1736 }
 0x4b1   : > { %v2412_v37 = vadd.f32 %v2410_v56, %v2404_v15  ;;  %v1739_v24 = vadd.f32 %v1737_v42, %v8839_v39  ;;  %v2442_v56 = vstv %s6801_s0 }
 0x4b4   : > { %v2418_v5 = vpop.permute.xlu1 %2417  ;;  %v1745_v25 = vpop.permute.xlu0 %1744 }
 0x4b5   : > { %v2420_v35 = vadd.f32 %v2418_v5, %v2412_v37  ;;  %v1747_v63 = vadd.f32 %v1745_v25, %v1739_v24  ;;  %v1770_v24 = vmul.f32 %v1769_v27, %v8671_v32  ;;  %v2443_v5 = vmul.f32 %v2442_v56, %v8611_v18 }
 0x4b7   : > { %v2424_v51 = vadd.f32 %v2423_v48, %v2420_v35  ;;  %v1751_v29 = vadd.f32 %v1750_v3, %v1747_v63  ;;  %v1868_v3 = vstv %s6714_s2  ;;  %s8918_s2 = sld [smem:[#allocation3 + $0x88f]] }
 0x4b8   : > { %v1836_v6 = vpop.permute.xlu1 %1835  ;;  %v1935_v7 = vpop.permute.xlu0 %1934 }
 0x4b9   : > { %v1838_v52 = vadd.f32 %v1836_v6, %v8854_v62  ;;  %v1937_v50 = vadd.f32 %v1935_v7, %v1929_v31 }
 0x4bc   : > { %v1844_v1 = vpop.permute.xlu1 %1843  ;;  %v2034_v9 = vpop.permute.xlu0 %2033 }
 0x4bd   : > { %v1846_v39 = vadd.f32 %v1844_v1, %v1838_v52  ;;  %v2036_v2 = vadd.f32 %v2034_v9, %v2028_v33  ;;  %v1967_v52 = vstv %s6729_s25  ;;  %v2066_v1 = vstv %s6744_s24 }
 0x4bf   : > { %v1850_v22 = vadd.f32 %v1849_v0, %v1846_v39 }
 0x4c0   : > { %v1943_v12 = vpop.permute.xlu1 %1942  ;;  %v2042_v13 = vpop.permute.xlu0 %2041 }
 0x4c1   : > { %v1945_v14 = vadd.f32 %v1943_v12, %v1937_v50  ;;  %v2044_v15 = vadd.f32 %v2042_v13, %v2036_v2  ;;  %v1968_v2 = vmul.f32 %v1967_v52, %v8671_v32  ;;  %v2067_v12 = vmul.f32 %v2066_v1, %v8671_v32 }
 0x4c3   : > { %v1949_v62 = vadd.f32 %v1948_v17, %v1945_v14  ;;  %v2048_v20 = vadd.f32 %v2047_v19, %v2044_v15  ;;  %v2165_v17 = vstv %s6759_s23  ;;  %s503_s23 = scalar_lea.vmem %s9922_s15, %s9935_s19 }
 0x4c4   : > { %v2133_v26 = vpop.permute.xlu1 %2132  ;;  %v2232_v30 = vpop.permute.xlu0 %2231 }
 0x4c5   : > { %v2135_v34 = vadd.f32 %v2133_v26, %v2127_v45  ;;  %v2234_v41 = vadd.f32 %v2232_v30, %v2226_v47  ;;  %v2344_v45 = vmul.f32 %v2343_v54, %v8611_v18  ;;  %v2166_v30 = vmul.f32 %v2165_v17, %v8671_v32 }
 0x4c8   : > { %v2141_v36 = vpop.permute.xlu1 %2140  ;;  %v2331_v31 = vpop.permute.xlu0 %2330 }
 0x4c9   : > { %v2143_v33 = vadd.f32 %v2141_v36, %v2135_v34  ;;  %v2333_v4 = vadd.f32 %v2331_v31, %v2325_v55 }
 0x4cb   : > { %v2147_v43 = vadd.f32 %v2146_v38, %v2143_v33  ;;  %v2482_v38 = vstv %s6807_s27 }
 0x4cc   : > { %v2240_v44 = vpop.permute.xlu1 %2239  ;;  %v2339_v60 = vpop.permute.xlu0 %2338 }
 0x4cd   : > { %v2242_v21 = vadd.f32 %v2240_v44, %v2234_v41  ;;  %v2341_v23 = vadd.f32 %v2339_v60, %v2333_v4  ;;  %v2265_v4 = vmul.f32 %v2264_v58, %v8671_v32 }
 0x4cf   : > { %v2246_v49 = vadd.f32 %v2245_v59, %v2242_v21  ;;  %v8889_v46 = vadd.f32 %v2344_v45, %v2341_v23  ;;  %v2363_v45 = vstv %s6789_s26 }
 0x4d0   : > { %v2430_v53 = vpop.permute.xlu1 %2429  ;;  %v1757_v28 = vpop.permute.xlu0 %1756  ;;  %v2364_v56 = vmul.f32 %v2363_v45, %v8671_v32 }
 0x4d1   : > { %v2432_v42 = vadd.f32 %v2430_v53, %v2424_v51  ;;  %v1759_v47 = vadd.f32 %v1757_v28, %v1751_v29  ;;  %v1869_v29 = vmul.f32 %v1868_v3, %v8671_v32  ;;  %v2485_v3 = vstv %s6808_s30  ;;  %s7932_s30 = smov 96  }
 0x4d4   : > { %v2438_v55 = vpop.permute.xlu1 %2437  ;;  %v1765_v57 = vpop.permute.xlu0 %1764 }
 0x4d5   : > { %v2440_v61 = vadd.f32 %v2438_v55, %v2432_v42  ;;  %v1767_v37 = vadd.f32 %v1765_v57, %v1759_v47  ;;  %v2462_v42 = vstv %s6804_s29  ;;  %s7931_s29 = smov 64  }
 0x4d7   : > { %v1771_v25 = vadd.f32 %v1770_v24, %v1767_v37  ;;  %v2444_v35 = vadd.f32 %v2443_v5, %v2440_v61  ;;  %v2463_v24 = vmul.f32 %v2462_v42, %v8671_v32 }
 0x4d8   : > { %v1856_v63 = vpop.permute.xlu1 %1855  ;;  %v1955_v48 = vpop.permute.xlu0 %1954 }
 0x4d9   : > { %v1858_v6 = vadd.f32 %v1856_v63, %v1850_v22  ;;  %v1957_v9 = vadd.f32 %v1955_v48, %v1949_v62 }
 0x4dc   : > { %v1864_v7 = vpop.permute.xlu1 %1863  ;;  %v2054_v8 = vpop.permute.xlu0 %2053 }
 0x4dd   : > { %v1866_v51 = vadd.f32 %v1864_v7, %v1858_v6  ;;  %v2056_v39 = vadd.f32 %v2054_v8, %v2048_v20 }
 0x4df   : > { %v1870_v0 = vadd.f32 %v1869_v29, %v1866_v51  ;;  %v2488_v51 = vstv %s6809_s16 }
 0x4e0   : > { %v1963_v10 = vpop.permute.xlu1 %1962  ;;  %v2062_v18 = vpop.permute.xlu0 %2061 }
 0x4e1   : > { %v1965_v11 = vadd.f32 %v1963_v10, %v1957_v9  ;;  %v2064_v50 = vadd.f32 %v2062_v18, %v2056_v39  ;;  %v2491_v39 = vstv %s8903_s22  ;;  %v2494_v18 = vstv %s8905_s17  ;;  %s7933_s17 = smov 32  }
 0x4e3   : > { %v1969_v22 = vadd.f32 %v1968_v2, %v1965_v11  ;;  %v2068_v13 = vadd.f32 %v2067_v12, %v2064_v50  ;;  %v8916_v11 = vld [vmem:[%s9914_s7 + $0x18] sm:$0xff] }
 0x4e4   : > { %v2153_v14 = vpop.permute.xlu1 %2152  ;;  %v2252_v15 = vpop.permute.xlu0 %2251  ;;  %v8923_v50 = vld [vmem:[%s9913_s6 + $0x18] sm:$0xff] }
 0x4e5   : > { %v2155_v19 = vadd.f32 %v2153_v14, %v2147_v43  ;;  %v2254_v34 = vadd.f32 %v2252_v15, %v2246_v49  ;;  %v2497_v15 = vstv %s8907_s20 }
 0x4e8   : > { %v2161_v26 = vpop.permute.xlu1 %2160  ;;  %v1777_v62 = vpop.permute.xlu0 %1776 }
 0x4e9   : > { %v2163_v20 = vadd.f32 %v2161_v26, %v2155_v19  ;;  %v1779_v36 = vadd.f32 %v1777_v62, %v1771_v25  ;;  %v8936_v26 = vld [vmem:[%s9914_s7 + $0x10] sm:$0xff] }
 0x4ea   : > { %v8942_v62 = vld [vmem:[%s9913_s6 + $0x10] sm:$0xff] }
 0x4eb   : > { %v2167_v31 = vadd.f32 %v2166_v30, %v2163_v20 }
 0x4ec   : > { %v2260_v33 = vpop.permute.xlu1 %2259  ;;  %v1785_v40 = vpop.permute.xlu0 %1784 }
 0x4ed   : > { %v2262_v54 = vadd.f32 %v2260_v33, %v2254_v34  ;;  %v1787_v41 = vadd.f32 %v1785_v40, %v1779_v36  ;;  %v8952_v34 = vld [vmem:[%s9914_s7 + $0x8] sm:$0xff] }
 0x4ee   : > { %v8958_v36 = vld [vmem:[%s9913_s6 + $0x8] sm:$0xff] }
 0x4ef   : > { %v2483_v44 = vadd.f32 %v2482_v38, %v1787_v41  ;;  %v2266_v43 = vadd.f32 %v2265_v4, %v2262_v54  ;;  %v2500_v38 = vstv %s8918_s2  ;;  %v8969_v4 = vld [vmem:[%s9914_s7] sm:$0xff]  ;;  %s6917_s2 = sld [smem:[#allocation3 + $0x980]] }
 0x4f0   : > { %v2351_v60 = vpop.permute.xlu1 %2350  ;;  %v1975_v21 = vpop.permute.xlu0 %1974 }
 0x4f1   : > { %7220 = vmatprep.mubr.msk.f32.mxu1 %vm2514_vm0, %v2483_v44  ;;  %7234 = vmatprep.mubr.msk.f32.mxu0 %vm2514_vm0, %v2483_v44  ;;  %v2353_v49 = vadd.f32 %v2351_v60, %v8889_v46  ;;  %v1977_v63 = vadd.f32 %v1975_v21, %v1969_v22  ;;  %v8974_v44 = vld [vmem:[%s9913_s6] sm:$0xff] }
 0x4f2   : > { %v6815_v21 = vld [vmem:[%s9915_s8] ss:$0 sm:$0xff] }
 0x4f4   : > { %v2450_v23 = vpop.permute.xlu1 %2449  ;;  %v2074_v59 = vpop.permute.xlu0 %2073 }
 0x4f5   : > { %v2452_v47 = vadd.f32 %v2450_v23, %v2444_v35  ;;  %v2076_v8 = vadd.f32 %v2074_v59, %v2068_v13  ;;  %v6824_v23 = vld [vmem:[%s9915_s8 + $0x2] ss:$0 sm:$0xff] }
 0x4f8   : > { %v2359_v53 = vpop.permute.xlu1 %2358  ;;  %v1983_v28 = vpop.permute.xlu0 %1982 }
 0x4f9   : > { %v2361_v27 = vadd.f32 %v2359_v53, %v2353_v49  ;;  %v1985_v35 = vadd.f32 %v1983_v28, %v1977_v63 }
 0x4fb   : > { %v2365_v55 = vadd.f32 %v2364_v56, %v2361_v27  ;;  %v2489_v9 = vadd.f32 %v2488_v51, %v1985_v35 }
 0x4fc   : > { %v2458_v57 = vpop.permute.xlu1 %2457  ;;  %v2082_v61 = vpop.permute.xlu0 %2081 }
 0x4fd   : > { %v2460_v37 = vadd.f32 %v2458_v57, %v2452_v47  ;;  %v2084_v29 = vadd.f32 %v2082_v61, %v2076_v8 }
 0x4ff   : > { %v2464_v5 = vadd.f32 %v2463_v24, %v2460_v37  ;;  %v2492_v22 = vadd.f32 %v2491_v39, %v2084_v29 }
 0x500   : > { %v1876_v25 = vpop.permute.xlu1 %1875  ;;  %v2173_v46 = vpop.permute.xlu0 %2172 }
 0x501   : > { %v1878_v48 = vadd.f32 %v1876_v25, %v1870_v0  ;;  %v2175_v52 = vadd.f32 %v2173_v46, %v2167_v31  ;;  %v2503_v31 = vstv %s8909_s21 }
 0x504   : > { %v1884_v6 = vpop.permute.xlu1 %1883  ;;  %v2272_v7 = vpop.permute.xlu0 %2271 }
 0x505   : > { %v1886_v32 = vadd.f32 %v1884_v6, %v1878_v48  ;;  %v2274_v2 = vadd.f32 %v2272_v7, %v2266_v43 }
 0x507   : > { %v2486_v1 = vadd.f32 %v2485_v3, %v1886_v32 }
 0x508   : > { %v2280_v10 = vpop.permute.xlu1 %2279  ;;  %v2181_v0 = vpop.permute.xlu0 %2180 }
 0x509   : > { %v2183_v12 = vadd.f32 %v2181_v0, %v2175_v52  ;;  %7221 = vmatmul.mubr.msk.f32.vlgmr.msra.gmra.mxu1 %vm2514_vm0, %v2486_v1  ;;  %7235 = vmatmul.mubr.msk.f32.vlgmr.msra.gmra.mxu0 %vm2514_vm0, %v2486_v1  ;;  %v2282_v13 = vadd.f32 %v2280_v10, %v2274_v2  ;;  %v9047_v1 = vld [vmem:[%s9915_s8 + $0x3] ss:$0 sm:$0xff]  ;;  %v9057_v2 = vld [vmem:[%s9915_s8 + $0x1] ss:$0 sm:$0xff] }
 0x50a   : > { %7223 = vmatprep.mubr.msk.f32.mxu1 %vm2514_vm0, %v2489_v9  ;;  %7237 = vmatprep.mubr.msk.f32.mxu0 %vm2514_vm0, %v2489_v9 }
 0x50b   : > { %v2495_v14 = vadd.f32 %v2494_v18, %v2183_v12  ;;  %7258 = vmatpush3.msra.mxu0 %v8916_v11  ;;  %7247 = vmatpush3.msra.mxu1 %v8923_v50  ;;  %v2498_v20 = vadd.f32 %v2497_v15, %v2282_v13 }
 0x50c   : > { %v2470_v17 = vpop.permute.xlu1 %2469  ;;  %v2371_v19 = vpop.permute.xlu0 %2370  ;;  %7259 = vmatprep.subr.mxu0 %v7929_v16  ;;  %7248 = vmatprep.subr.mxu1 %v7929_v16 }
 0x50d   : > { %7224 = vmatmul.mubr.msk.f32.gmra.mxu1 %vm2514_vm0, %v2492_v22  ;;  %7238 = vmatmul.mubr.msk.f32.gmra.mxu0 %vm2514_vm0, %v2492_v22  ;;  %v2472_v30 = vadd.f32 %v2470_v17, %v2464_v5  ;;  %v2373_v58 = vadd.f32 %v2371_v19, %v2365_v55 }
 0x50e   : > { %7226 = vmatprep.mubr.msk.f32.mxu1 %vm2514_vm0, %v2495_v14  ;;  %7240 = vmatprep.mubr.msk.f32.mxu0 %vm2514_vm0, %v2495_v14 }
 0x50f   : > { %7260 = vmatpush3.msra.mxu0 %v8936_v26  ;;  %7249 = vmatpush3.msra.mxu1 %v8942_v62 }
 0x510   : > { %v2478_v33 = vpop.permute.xlu1 %2477  ;;  %v2379_v40 = vpop.permute.xlu0 %2378  ;;  %7261 = vmatprep.subr.mxu0 %v7929_v16  ;;  %7250 = vmatprep.subr.mxu1 %v7929_v16 }
 0x511   : > { %v2480_v54 = vadd.f32 %v2478_v33, %v2472_v30  ;;  %v2381_v41 = vadd.f32 %v2379_v40, %v2373_v58  ;;  %7227 = vmatmul.mubr.msk.f32.gmra.mxu1 %vm2514_vm0, %v2498_v20  ;;  %7241 = vmatmul.mubr.msk.f32.gmra.mxu0 %vm2514_vm0, %v2498_v20 }
 0x512   : > { %7262 = vmatpush3.msra.mxu0 %v8952_v34  ;;  %7251 = vmatpush3.msra.mxu1 %v8958_v36 }
 0x513   : > { %v2504_v43 = vadd.f32 %v2503_v31, %v2480_v54  ;;  %v2501_v60 = vadd.f32 %v2500_v38, %v2381_v41  ;;  %7263 = vmatprep.subr.mxu0 %v7929_v16  ;;  %7252 = vmatprep.subr.mxu1 %v7929_v16 }
 0x514   : > { %7264 = vmatpush3.msra.mxu0 %v8969_v4  ;;  %7253 = vmatpush3.msra.mxu1 %v8974_v44 }
 0x515   : > { %7229 = vmatprep.mubr.msk.f32.mxu1 %vm2514_vm0, %v2501_v60  ;;  %7243 = vmatprep.mubr.msk.f32.mxu0 %vm2514_vm0, %v2501_v60 }
 0x516   : > { %7230 = vmatmul.mubr.msk.f32.gmra.mxu1 %vm2514_vm0, %v2504_v43  ;;  %7244 = vmatmul.mubr.msk.f32.gmra.mxu0 %vm2514_vm0, %v2504_v43 }
 0x517   : > { %7254 = vmatprep.mubr.msk.f32.mxu1 %vm7930_vm9, %v7929_v16  ;;  %7265 = vmatprep.mubr.msk.f32.mxu0 %vm7930_vm9, %v7929_v16 }
 0x518   : > { %7279 = vmatprep.subr.mxu0 %v7929_v16  ;;  %7268 = vmatprep.subr.mxu1 %v7929_v16 }
 0x51a   : > { %7255 = vmatmul.mubr.f32.vlgmr.msra.gmra.mxu1 %v7929_v16  ;;  %7266 = vmatmul.mubr.f32.vlgmr.msra.gmra.mxu0 %v7929_v16 }
 0x51b   : > { %7280 = vmatpush3.msra.mxu0 %v8916_v11  ;;  %7269 = vmatpush3.msra.mxu1 %v8923_v50 }
 0x51c   : > { %7281 = vmatprep.subr.mxu0 %v7929_v16  ;;  %7270 = vmatprep.subr.mxu1 %v7929_v16 }
 0x51d   : > { %7282 = vmatpush3.msra.mxu0 %v8936_v26  ;;  %7271 = vmatpush3.msra.mxu1 %v8942_v62 }
 0x51e   : > { %7283 = vmatprep.subr.mxu0 %v7929_v16  ;;  %7287 = vmatprep.mubr.msk.f32.mxu0 %vm7930_vm9, %v7929_v16 }
 0x51f   : > { %7284 = vmatpush3.msra.mxu0 %v8952_v34  ;;  %7272 = vmatprep.subr.mxu1 %v7929_v16 }
 0x520   : > { %7285 = vmatprep.subr.mxu0 %v7929_v16  ;;  %7273 = vmatpush3.msra.mxu1 %v8958_v36 }
 0x521   : > { %7286 = vmatpush3.msra.mxu0 %v8969_v4  ;;  %7274 = vmatprep.subr.mxu1 %v7929_v16 }
 0x522   : > { %7275 = vmatpush3.msra.mxu1 %v8974_v44  ;;  %7276 = vmatprep.mubr.msk.f32.mxu1 %vm7930_vm9, %v7929_v16 }
 0x523   : > { %7301 = vmatprep.subr.mxu0 %v7929_v16  ;;  %7290 = vmatprep.subr.mxu1 %v7929_v16 }
 0x5c9   : > { %v7222_v59 = vpop.f32.mrf.mxu1  ;;  %v7236_v45 = vpop.f32.mrf.mxu0 }
 0x5ca   : > { %v9020_v49 = vadd.f32 %v7222_v59, %v6815_v21  ;;  %v9022_v53 = vadd.f32 %v7236_v45, %v6824_v23 }
 0x5cb   : > { %v2605_v28 = vpop.f32.mrf.mxu1  ;;  %v2715_v27 = vpop.f32.mrf.mxu0 }
 0x5cc   : > { %v9024_v56 = vadd.f32 %v6824_v23, %v2715_v27  ;;  %v2606_v17 = vadd.f32 %v6815_v21, %v2605_v28 }
 0x5cd   : > { %v7225_v42 = vpop.f32.mrf.mxu1  ;;  %v7239_v47 = vpop.f32.mrf.mxu0 }
 0x5ce   : > { %v9026_v55 = vadd.f32 %v7225_v42, %v6815_v21  ;;  %v9028_v57 = vadd.f32 %v7239_v47, %v6824_v23 }
 0x5cf   : > { %v2615_v61 = vpop.f32.mrf.mxu1  ;;  %v2725_v37 = vpop.f32.mrf.mxu0 }
 0x5d0   : > { %v9030_v24 = vadd.f32 %v6815_v21, %v2615_v61  ;;  %v9032_v5 = vadd.f32 %v6824_v23, %v2725_v37 }
 0x5d1   : > { %v7228_v25 = vpop.f32.mrf.mxu1  ;;  %v7242_v46 = vpop.f32.mrf.mxu0 }
 0x5d2   : > { %v9034_v63 = vadd.f32 %v7228_v25, %v6815_v21  ;;  %v9036_v48 = vadd.f32 %v7242_v46, %v6824_v23 }
 0x5d3   : > { %v2625_v35 = vpop.f32.mrf.mxu1  ;;  %v2735_v3 = vpop.f32.mrf.mxu0 }
 0x5d4   : > { %v9038_v6 = vadd.f32 %v6815_v21, %v2625_v35  ;;  %v9040_v7 = vadd.f32 %v6824_v23, %v2735_v3 }
 0x5d6   : > { %v7231_v8 = vpop.f32.mrf.mxu1  ;;  %v7245_v51 = vpop.f32.mrf.mxu0 }
 0x5d7   : > { %v9042_v32 = vadd.f32 %v7231_v8, %v6815_v21  ;;  %v2751_v14 = vadd.f32 %v7245_v51, %v6824_v23 }
 0x5d8   : > { %v2635_v29 = vpop.f32.mrf.mxu1  ;;  %v2745_v52 = vpop.f32.mrf.mxu0 }
 0x5d9   : > { %v9049_v9 = vadd.f32 %v6815_v21, %v2635_v29  ;;  %v9051_v39 = vadd.f32 %v6824_v23, %v2745_v52 }
 0x5da   : > { %v2836_v10 = vpop.f32.mrf.mxu1  ;;  %v2936_v18 = vpop.f32.mrf.mxu0 }
 0x5db   : > { %v2937_v0 = vadd.f32 %v9047_v1, %v2936_v18  ;;  %v2837_v13 = vadd.f32 %v9057_v2, %v2836_v10 }
 0x5dc   : > { %v7267_v12 = vpop.f32.mrf.mxu0  ;;  %v7256_v22 = vpop.f32.mrf.mxu1 }
 0x5dd   : > { %2948 = vrot.lane.b32.xlu0 %v2937_v0, %s7931_s29  ;;  %v2940_v15 = vadd.f32 %v2937_v0, %v2751_v14  ;;  %v2840_v19 = vadd.f32 %v2837_v13, %v2606_v17 }
 0x5df   : > { %v6836_v20 = vmul.f32 -1.442695, %v2940_v15  ;;  %v6834_v30 = vmul.f32 -1.442695, %v2840_v19 }
 0x5e1   : > { %2848 = vrot.lane.b32.xlu0 %v2837_v13, %s7931_s29  ;;  %7687 = vpow2.f32 %v6836_v20 }
 0x5e2   : > { %7689 = vpow2.f32 %v6834_v30 }
 0x5ee   : > { %v7688_v58 = vpop.eup %7687 }
 0x5ef   : > { %v2944_v31 = vadd.f32 1.0, %v7688_v58  ;;  %v7690_v33 = vpop.eup %7689 }
 0x5f0   : > { %v2844_v38 = vadd.f32 1.0, %v7690_v33 }
 0x5f1   : > { %7691 = vrcp.f32 %v2944_v31 }
 0x5f2   : > { %7693 = vrcp.f32 %v2844_v38 }
 0x5fe   : > { %v7692_v40 = vpop.eup %7691 }
 0x5ff   : > { %v7694_v43 = vpop.eup %7693  ;;  %v2958_v47 = vsub.f32 1.0, %v7692_v40  ;;  %v2964_v37 = vmul.f32 0.0, %v7692_v40 }
 0x600   : > { %v2858_v35 = vsub.f32 1.0, %v7694_v43  ;;  %v2864_v8 = vmul.f32 0.0, %v7694_v43 }
 0x64f   : > { %v2949_v54 = vpop.permute.xlu0 %2948 }
 0x650   : > { %v2951_v41 = vmul.f32 %v7692_v40, %v2949_v54 }
 0x652   : > { %2953 = vrot.lane.b32.xlu1 %v2951_v41, %s7931_s29 }
 0x653   : > { %v2849_v60 = vpop.permute.xlu0 %2848 }
 0x654   : > { %v2851_v23 = vmul.f32 %v7694_v43, %v2849_v60 }
 0x656   : > { %2853 = vrot.lane.b32.xlu1 %v2851_v23, %s7931_s29 }
 0x6c4   : > { %v2954_v21 = vpop.permute.xlu1 %2953 }
 0x6c5   : > { %v2956_v59 = vadd.f32 %v2954_v21, %v2751_v14 }
 0x6c7   : > { %7695 = vtanh.f32 %v2956_v59 }
 0x6c8   : > { %v2854_v45 = vpop.permute.xlu1 %2853 }
 0x6c9   : > { %v2856_v28 = vadd.f32 %v2854_v45, %v2606_v17 }
 0x6cb   : > { %7697 = vtanh.f32 %v2856_v28 }
 0x6d4   : > { %v7696_v27 = vpop.eup %7695 }
 0x6d5   : > { %2960 = vrot.lane.b32.xlu0 %v7696_v27, %s7932_s30 }
 0x6d8   : > { %v7698_v42 = vpop.eup %7697 }
 0x6d9   : > { %2860 = vrot.lane.b32.xlu0 %v7698_v42, %s7932_s30 }
 0x747   : > { %v2961_v61 = vpop.permute.xlu0 %2960 }
 0x748   : > { %v2963_v25 = vmul.f32 %v2961_v61, %v2958_v47 }
 0x74a   : > { %v9066_v46 = vadd.f32 %v2964_v37, %v2963_v25 }
 0x74b   : > { %v2861_v3 = vpop.permute.xlu0 %2860 }
 0x74c   : > { %v2863_v51 = vmul.f32 %v2861_v3, %v2858_v35  ;;  %2972 = vrot.lane.b32.xlu1 %v9066_v46, %s7932_s30 }
 0x74e   : > { %v9070_v29 = vadd.f32 %v2864_v8, %v2863_v51 }
 0x750   : > { %2967 = vrot.lane.b32.xlu1 %v9070_v29, %s7932_s30 }
 0x7be   : > { %v2973_v52 = vpop.permute.xlu1 %2972 }
 0x7bf   : > { %2976 = vst.msk [vmem:[#allocation2 + $0x78] sm:$0xff] %vm2766_vm1, %v2973_v52  ;;  %7288 = vmatmul.mubr.msk.f32.vlgmr.msra.gmra.mxu0 %vm2766_vm1, %v2973_v52 }
 0x7c0   : > { %7302 = vmatpush3.msra.mxu0 %v8916_v11  ;;  %7309 = vmatprep.mubr.msk.f32.mxu0 %vm7930_vm9, %v7929_v16 }
 0x7c1   : > { %7303 = vmatprep.subr.mxu0 %v7929_v16 }
 0x7c2   : > { %v2968_v10 = vpop.permute.xlu1 %2967  ;;  %7304 = vmatpush3.msra.mxu0 %v8936_v26 }
 0x7c3   : > { %2970 = vst.msk [vmem:[#allocation2] sm:$0xff] %vm2766_vm1, %v2968_v10  ;;  %7277 = vmatmul.mubr.msk.f32.vlgmr.msra.gmra.mxu1 %vm2766_vm1, %v2968_v10  ;;  %7305 = vmatprep.subr.mxu0 %v7929_v16 }
 0x7c4   : > { %7291 = vmatpush3.msra.mxu1 %v8923_v50  ;;  %7306 = vmatpush3.msra.mxu0 %v8952_v34 }
 0x7c5   : > { %7292 = vmatprep.subr.mxu1 %v7929_v16  ;;  %7307 = vmatprep.subr.mxu0 %v7929_v16 }
 0x7c6   : > { %7293 = vmatpush3.msra.mxu1 %v8942_v62  ;;  %7308 = vmatpush3.msra.mxu0 %v8969_v4 }
 0x7c7   : > { %7294 = vmatprep.subr.mxu1 %v7929_v16  ;;  %7298 = vmatprep.mubr.msk.f32.mxu1 %vm7930_vm9, %v7929_v16 }
 0x7c8   : > { %7295 = vmatpush3.msra.mxu1 %v8958_v36  ;;  %7323 = vmatprep.subr.mxu0 %v7929_v16 }
 0x7c9   : > { %7296 = vmatprep.subr.mxu1 %v7929_v16 }
 0x7ca   : > { %7297 = vmatpush3.msra.mxu1 %v8974_v44 }
 0x7cb   : > { %7312 = vmatprep.subr.mxu1 %v7929_v16 }
 0x87f   : > { %v3143_v18 = vpop.f32.mrf.mxu0 }
 0x880   : > { %v3144_v0 = vadd.f32 %v9047_v1, %v3143_v18 }
 0x881   : > { %v7289_v12 = vpop.f32.mrf.mxu0 }
 0x882   : > { %3155 = vrot.lane.b32.xlu0 %v3144_v0, %s7931_s29  ;;  %v3147_v15 = vadd.f32 %v3144_v0, %v9051_v39 }
 0x883   : > { %v3045_v22 = vpop.f32.mrf.mxu1 }
 0x884   : > { %v3046_v13 = vadd.f32 %v9057_v2, %v3045_v22  ;;  %v6840_v17 = vmul.f32 -1.442695, %v3147_v15 }
 0x885   : > { %v7278_v14 = vpop.f32.mrf.mxu1 }
 0x886   : > { %3057 = vrot.lane.b32.xlu0 %v3046_v13, %s7931_s29  ;;  %v3049_v19 = vadd.f32 %v3046_v13, %v9020_v49  ;;  %7699 = vpow2.f32 %v6840_v17 }
 0x888   : > { %v6838_v20 = vmul.f32 -1.442695, %v3049_v19 }
 0x88a   : > { %7701 = vpow2.f32 %v6838_v20 }
 0x893   : > { %v7700_v30 = vpop.eup %7699 }
 0x894   : > { %v3151_v58 = vadd.f32 1.0, %v7700_v30 }
 0x896   : > { %7703 = vrcp.f32 %v3151_v58 }
 0x897   : > { %v7702_v31 = vpop.eup %7701 }
 0x898   : > { %v3053_v33 = vadd.f32 1.0, %v7702_v31 }
 0x89a   : > { %7705 = vrcp.f32 %v3053_v33 }
 0x8a3   : > { %v7704_v38 = vpop.eup %7703 }
 0x8a4   : > { %v3165_v42 = vsub.f32 1.0, %v7704_v38  ;;  %v3171_v61 = vmul.f32 %v7704_v38, %v9066_v46 }
 0x8a7   : > { %v7706_v41 = vpop.eup %7705 }
 0x8a8   : > { %v3067_v35 = vsub.f32 1.0, %v7706_v41  ;;  %v3073_v3 = vmul.f32 %v7706_v41, %v9070_v29 }
 0x8f4   : > { %v3156_v40 = vpop.permute.xlu0 %3155 }
 0x8f5   : > { %v3158_v54 = vmul.f32 %v7704_v38, %v3156_v40 }
 0x8f7   : > { %3160 = vrot.lane.b32.xlu1 %v3158_v54, %s7931_s29 }
 0x8f8   : > { %v3058_v43 = vpop.permute.xlu0 %3057 }
 0x8f9   : > { %v3060_v60 = vmul.f32 %v7706_v41, %v3058_v43 }
 0x8fb   : > { %3062 = vrot.lane.b32.xlu1 %v3060_v60, %s7931_s29 }
 0x969   : > { %v3161_v23 = vpop.permute.xlu1 %3160 }
 0x96a   : > { %v3163_v21 = vadd.f32 %v3161_v23, %v9051_v39 }
 0x96c   : > { %7707 = vtanh.f32 %v3163_v21 }
 0x96d   : > { %v3063_v59 = vpop.permute.xlu1 %3062 }
 0x96e   : > { %v3065_v45 = vadd.f32 %v3063_v59, %v9020_v49 }
 0x970   : > { %7709 = vtanh.f32 %v3065_v45 }
 0x979   : > { %v7708_v28 = vpop.eup %7707 }
 0x97a   : > { %3167 = vrot.lane.b32.xlu0 %v7708_v28, %s7932_s30 }
 0x97d   : > { %v7710_v27 = vpop.eup %7709 }
 0x97e   : > { %3069 = vrot.lane.b32.xlu0 %v7710_v27, %s7932_s30 }
 0x9ec   : > { %v3168_v47 = vpop.permute.xlu0 %3167 }
 0x9ed   : > { %v3170_v37 = vmul.f32 %v3168_v47, %v3165_v42 }
 0x9ef   : > { %v9111_v25 = vadd.f32 %v3171_v61, %v3170_v37 }
 0x9f0   : > { %v3070_v39 = vpop.permute.xlu0 %3069 }
 0x9f1   : > { %v3072_v8 = vmul.f32 %v3070_v39, %v3067_v35  ;;  %3179 = vrot.lane.b32.xlu1 %v9111_v25, %s7932_s30 }
 0x9f3   : > { %v9116_v49 = vadd.f32 %v3073_v3, %v3072_v8 }
 0x9f5   : > { %3174 = vrot.lane.b32.xlu1 %v9116_v49, %s7932_s30 }
 0xa63   : > { %v3180_v51 = vpop.permute.xlu1 %3179 }
 0xa64   : > { %3182 = vst.msk [vmem:[#allocation2 + $0x70] sm:$0xff] %vm2766_vm1, %v3180_v51  ;;  %7310 = vmatmul.mubr.msk.f32.vlgmr.msra.gmra.mxu0 %vm2766_vm1, %v3180_v51 }
 0xa65   : > { %7324 = vmatpush3.msra.mxu0 %v8916_v11  ;;  %7331 = vmatprep.mubr.msk.f32.mxu0 %vm7930_vm9, %v7929_v16 }
 0xa66   : > { %7325 = vmatprep.subr.mxu0 %v7929_v16 }
 0xa67   : > { %v3175_v46 = vpop.permute.xlu1 %3174  ;;  %7326 = vmatpush3.msra.mxu0 %v8936_v26 }
 0xa68   : > { %3177 = vst.msk [vmem:[#allocation2 + $0x8] sm:$0xff] %vm2766_vm1, %v3175_v46  ;;  %7299 = vmatmul.mubr.msk.f32.vlgmr.msra.gmra.mxu1 %vm2766_vm1, %v3175_v46  ;;  %7327 = vmatprep.subr.mxu0 %v7929_v16 }
 0xa69   : > { %7313 = vmatpush3.msra.mxu1 %v8923_v50  ;;  %7328 = vmatpush3.msra.mxu0 %v8952_v34 }
 0xa6a   : > { %7314 = vmatprep.subr.mxu1 %v7929_v16  ;;  %7329 = vmatprep.subr.mxu0 %v7929_v16 }
 0xa6b   : > { %7315 = vmatpush3.msra.mxu1 %v8942_v62  ;;  %7330 = vmatpush3.msra.mxu0 %v8969_v4 }
 0xa6c   : > { %7316 = vmatprep.subr.mxu1 %v7929_v16  ;;  %7320 = vmatprep.mubr.msk.f32.mxu1 %vm7930_vm9, %v7929_v16 }
 0xa6d   : > { %7317 = vmatpush3.msra.mxu1 %v8958_v36  ;;  %7345 = vmatprep.subr.mxu0 %v7929_v16 }
 0xa6e   : > { %7318 = vmatprep.subr.mxu1 %v7929_v16 }
 0xa6f   : > { %7319 = vmatpush3.msra.mxu1 %v8974_v44 }
 0xa70   : > { %7334 = vmatprep.subr.mxu1 %v7929_v16 }
 0xb24   : > { %v3349_v29 = vpop.f32.mrf.mxu0 }
 0xb25   : > { %v3350_v52 = vadd.f32 %v9047_v1, %v3349_v29 }
 0xb26   : > { %v7311_v10 = vpop.f32.mrf.mxu0 }
 0xb27   : > { %3361 = vrot.lane.b32.xlu0 %v3350_v52, %s7931_s29  ;;  %v3353_v22 = vadd.f32 %v3350_v52, %v9036_v48 }
 0xb28   : > { %v3251_v18 = vpop.f32.mrf.mxu1 }
 0xb29   : > { %v3252_v0 = vadd.f32 %v9057_v2, %v3251_v18  ;;  %v6844_v13 = vmul.f32 -1.442695, %v3353_v22 }
 0xb2a   : > { %v7300_v12 = vpop.f32.mrf.mxu1 }
 0xb2b   : > { %3263 = vrot.lane.b32.xlu0 %v3252_v0, %s7931_s29  ;;  %v3255_v14 = vadd.f32 %v3252_v0, %v9030_v24  ;;  %7711 = vpow2.f32 %v6844_v13 }
 0xb2d   : > { %v6842_v15 = vmul.f32 -1.442695, %v3255_v14 }
 0xb2f   : > { %7713 = vpow2.f32 %v6842_v15 }
 0xb38   : > { %v7712_v17 = vpop.eup %7711 }
 0xb39   : > { %v3357_v19 = vadd.f32 1.0, %v7712_v17 }
 0xb3b   : > { %7715 = vrcp.f32 %v3357_v19 }
 0xb3c   : > { %v7714_v20 = vpop.eup %7713 }
 0xb3d   : > { %v3259_v30 = vadd.f32 1.0, %v7714_v20 }
 0xb3f   : > { %7717 = vrcp.f32 %v3259_v30 }
 0xb48   : > { %v7716_v58 = vpop.eup %7715 }
 0xb49   : > { %v3371_v45 = vsub.f32 1.0, %v7716_v58  ;;  %v3377_v27 = vmul.f32 %v7716_v58, %v9111_v25 }
 0xb4c   : > { %v7718_v38 = vpop.eup %7717 }
 0xb4d   : > { %v3273_v61 = vsub.f32 1.0, %v7718_v38  ;;  %v3279_v37 = vmul.f32 %v7718_v38, %v9116_v49 }
 0xb99   : > { %v3362_v31 = vpop.permute.xlu0 %3361 }
 0xb9a   : > { %v3364_v33 = vmul.f32 %v7716_v58, %v3362_v31 }
 0xb9c   : > { %3366 = vrot.lane.b32.xlu1 %v3364_v33, %s7931_s29 }
 0xb9d   : > { %v3264_v40 = vpop.permute.xlu0 %3263 }
 0xb9e   : > { %v3266_v54 = vmul.f32 %v7718_v38, %v3264_v40 }
 0xba0   : > { %3268 = vrot.lane.b32.xlu1 %v3266_v54, %s7931_s29 }
 0xc0e   : > { %v3367_v41 = vpop.permute.xlu1 %3366 }
 0xc0f   : > { %v3369_v43 = vadd.f32 %v3367_v41, %v9036_v48 }
 0xc11   : > { %7719 = vtanh.f32 %v3369_v43 }
 0xc12   : > { %v3269_v60 = vpop.permute.xlu1 %3268 }
 0xc13   : > { %v3271_v23 = vadd.f32 %v3269_v60, %v9030_v24 }
 0xc15   : > { %7721 = vtanh.f32 %v3271_v23 }
 0xc1e   : > { %v7720_v21 = vpop.eup %7719 }
 0xc1f   : > { %3373 = vrot.lane.b32.xlu0 %v7720_v21, %s7932_s30 }
 0xc22   : > { %v7722_v59 = vpop.eup %7721 }
 0xc23   : > { %3275 = vrot.lane.b32.xlu0 %v7722_v59, %s7932_s30 }
 0xc91   : > { %v3374_v28 = vpop.permute.xlu0 %3373 }
 0xc92   : > { %v3376_v42 = vmul.f32 %v3374_v28, %v3371_v45 }
 0xc94   : > { %v9157_v47 = vadd.f32 %v3377_v27, %v3376_v42 }
 0xc95   : > { %v3276_v48 = vpop.permute.xlu0 %3275 }
 0xc96   : > { %v3278_v35 = vmul.f32 %v3276_v48, %v3273_v61  ;;  %3385 = vrot.lane.b32.xlu1 %v9157_v47, %s7932_s30 }
 0xc98   : > { %v9162_v24 = vadd.f32 %v3279_v37, %v3278_v35 }
 0xc9a   : > { %3380 = vrot.lane.b32.xlu1 %v9162_v24, %s7932_s30 }
 0xd08   : > { %v3386_v39 = vpop.permute.xlu1 %3385 }
 0xd09   : > { %3388 = vst.msk [vmem:[#allocation2 + $0x68] sm:$0xff] %vm2766_vm1, %v3386_v39  ;;  %7332 = vmatmul.mubr.msk.f32.vlgmr.msra.gmra.mxu0 %vm2766_vm1, %v3386_v39 }
 0xd0a   : > { %7346 = vmatpush3.msra.mxu0 %v8916_v11  ;;  %7353 = vmatprep.mubr.msk.f32.mxu0 %vm7930_vm9, %v7929_v16 }
 0xd0b   : > { %7347 = vmatprep.subr.mxu0 %v7929_v16 }
 0xd0c   : > { %v3381_v25 = vpop.permute.xlu1 %3380  ;;  %7348 = vmatpush3.msra.mxu0 %v8936_v26 }
 0xd0d   : > { %3383 = vst.msk [vmem:[#allocation2 + $0x10] sm:$0xff] %vm2766_vm1, %v3381_v25  ;;  %7321 = vmatmul.mubr.msk.f32.vlgmr.msra.gmra.mxu1 %vm2766_vm1, %v3381_v25  ;;  %7349 = vmatprep.subr.mxu0 %v7929_v16 }
 0xd0e   : > { %7335 = vmatpush3.msra.mxu1 %v8923_v50  ;;  %7350 = vmatpush3.msra.mxu0 %v8952_v34 }
 0xd0f   : > { %7336 = vmatprep.subr.mxu1 %v7929_v16  ;;  %7351 = vmatprep.subr.mxu0 %v7929_v16 }
 0xd10   : > { %7337 = vmatpush3.msra.mxu1 %v8942_v62  ;;  %7352 = vmatpush3.msra.mxu0 %v8969_v4 }
 0xd11   : > { %7338 = vmatprep.subr.mxu1 %v7929_v16  ;;  %7342 = vmatprep.mubr.msk.f32.mxu1 %vm7930_vm9, %v7929_v16 }
 0xd12   : > { %7339 = vmatpush3.msra.mxu1 %v8958_v36  ;;  %7367 = vmatprep.subr.mxu0 %v7929_v16 }
 0xd13   : > { %7340 = vmatprep.subr.mxu1 %v7929_v16 }
 0xd14   : > { %7341 = vmatpush3.msra.mxu1 %v8974_v44 }
 0xd15   : > { %7356 = vmatprep.subr.mxu1 %v7929_v16 }
 0xdc9   : > { %v3555_v3 = vpop.f32.mrf.mxu0 }
 0xdca   : > { %v3556_v8 = vadd.f32 %v9047_v1, %v3555_v3 }
 0xdcb   : > { %v7333_v49 = vpop.f32.mrf.mxu0 }
 0xdcc   : > { %3567 = vrot.lane.b32.xlu0 %v3556_v8, %s7931_s29  ;;  %v3559_v52 = vadd.f32 %v3556_v8, %v9040_v7 }
 0xdcd   : > { %v3457_v51 = vpop.f32.mrf.mxu1 }
 0xdce   : > { %v3458_v46 = vadd.f32 %v9057_v2, %v3457_v51  ;;  %v6848_v10 = vmul.f32 -1.442695, %v3559_v52 }
 0xdcf   : > { %v7322_v29 = vpop.f32.mrf.mxu1 }
 0xdd0   : > { %3469 = vrot.lane.b32.xlu0 %v3458_v46, %s7931_s29  ;;  %v3461_v18 = vadd.f32 %v3458_v46, %v9026_v55  ;;  %7723 = vpow2.f32 %v6848_v10 }
 0xdd2   : > { %v6846_v0 = vmul.f32 -1.442695, %v3461_v18 }
 0xdd4   : > { %7725 = vpow2.f32 %v6846_v0 }
 0xddd   : > { %v7724_v12 = vpop.eup %7723 }
 0xdde   : > { %v3563_v22 = vadd.f32 1.0, %v7724_v12 }
 0xde0   : > { %7727 = vrcp.f32 %v3563_v22 }
 0xde1   : > { %v7726_v13 = vpop.eup %7725 }
 0xde2   : > { %v3465_v14 = vadd.f32 1.0, %v7726_v13 }
 0xde4   : > { %7729 = vrcp.f32 %v3465_v14 }
 0xded   : > { %v7728_v15 = vpop.eup %7727 }
 0xdee   : > { %v3577_v43 = vsub.f32 1.0, %v7728_v15  ;;  %v3583_v23 = vmul.f32 %v7728_v15, %v9157_v47 }
 0xdf1   : > { %v7730_v20 = vpop.eup %7729 }
 0xdf2   : > { %v3479_v45 = vsub.f32 1.0, %v7730_v20  ;;  %v3485_v28 = vmul.f32 %v7730_v20, %v9162_v24 }
 0xe3e   : > { %v3568_v17 = vpop.permute.xlu0 %3567 }
 0xe3f   : > { %v3570_v19 = vmul.f32 %v7728_v15, %v3568_v17 }
 0xe41   : > { %3572 = vrot.lane.b32.xlu1 %v3570_v19, %s7931_s29 }
 0xe42   : > { %v3470_v30 = vpop.permute.xlu0 %3469 }
 0xe43   : > { %v3472_v58 = vmul.f32 %v7730_v20, %v3470_v30 }
 0xe45   : > { %3474 = vrot.lane.b32.xlu1 %v3472_v58, %s7931_s29 }
 0xeb3   : > { %v3573_v31 = vpop.permute.xlu1 %3572 }
 0xeb4   : > { %v3575_v33 = vadd.f32 %v3573_v31, %v9040_v7 }
 0xeb6   : > { %7731 = vtanh.f32 %v3575_v33 }
 0xeb7   : > { %v3475_v38 = vpop.permute.xlu1 %3474 }
 0xeb8   : > { %v3477_v40 = vadd.f32 %v3475_v38, %v9026_v55 }
 0xeba   : > { %7733 = vtanh.f32 %v3477_v40 }
 0xec3   : > { %v7732_v54 = vpop.eup %7731 }
 0xec4   : > { %3579 = vrot.lane.b32.xlu0 %v7732_v54, %s7932_s30 }
 0xec7   : > { %v7734_v41 = vpop.eup %7733 }
 0xec8   : > { %3481 = vrot.lane.b32.xlu0 %v7734_v41, %s7932_s30 }
 0xf36   : > { %v3580_v60 = vpop.permute.xlu0 %3579 }
 0xf37   : > { %v3582_v21 = vmul.f32 %v3580_v60, %v3577_v43 }
 0xf39   : > { %v9203_v59 = vadd.f32 %v3583_v23, %v3582_v21 }
 0xf3a   : > { %v3482_v7 = vpop.permute.xlu0 %3481 }
 0xf3b   : > { %v3484_v27 = vmul.f32 %v3482_v7, %v3479_v45  ;;  %3591 = vrot.lane.b32.xlu1 %v9203_v59, %s7932_s30 }
 0xf3d   : > { %v9208_v55 = vadd.f32 %v3485_v28, %v3484_v27 }
 0xf3f   : > { %3586 = vrot.lane.b32.xlu1 %v9208_v55, %s7932_s30 }
 0xfad   : > { %v3592_v42 = vpop.permute.xlu1 %3591 }
 0xfae   : > { %3594 = vst.msk [vmem:[#allocation2 + $0x60] sm:$0xff] %vm2766_vm1, %v3592_v42  ;;  %7354 = vmatmul.mubr.msk.f32.vlgmr.msra.gmra.mxu0 %vm2766_vm1, %v3592_v42 }
 0xfaf   : > { %7368 = vmatpush3.msra.mxu0 %v8916_v11  ;;  %7375 = vmatprep.mubr.msk.f32.mxu0 %vm7930_vm9, %v7929_v16 }
 0xfb0   : > { %7369 = vmatprep.subr.mxu0 %v7929_v16 }
 0xfb1   : > { %v3587_v47 = vpop.permute.xlu1 %3586  ;;  %7370 = vmatpush3.msra.mxu0 %v8936_v26 }
 0xfb2   : > { %3589 = vst.msk [vmem:[#allocation2 + $0x18] sm:$0xff] %vm2766_vm1, %v3587_v47  ;;  %7343 = vmatmul.mubr.msk.f32.vlgmr.msra.gmra.mxu1 %vm2766_vm1, %v3587_v47  ;;  %7371 = vmatprep.subr.mxu0 %v7929_v16 }
 0xfb3   : > { %7357 = vmatpush3.msra.mxu1 %v8923_v50  ;;  %7372 = vmatpush3.msra.mxu0 %v8952_v34 }
 0xfb4   : > { %7358 = vmatprep.subr.mxu1 %v7929_v16  ;;  %7373 = vmatprep.subr.mxu0 %v7929_v16 }
 0xfb5   : > { %7359 = vmatpush3.msra.mxu1 %v8942_v62  ;;  %7374 = vmatpush3.msra.mxu0 %v8969_v4 }
 0xfb6   : > { %7360 = vmatprep.subr.mxu1 %v7929_v16  ;;  %7364 = vmatprep.mubr.msk.f32.mxu1 %vm7930_vm9, %v7929_v16 }
 0xfb7   : > { %7361 = vmatpush3.msra.mxu1 %v8958_v36  ;;  %7389 = vmatprep.subr.mxu0 %v7929_v16 }
 0xfb8   : > { %7362 = vmatprep.subr.mxu1 %v7929_v16 }
 0xfb9   : > { %7363 = vmatpush3.msra.mxu1 %v8974_v44 }
 0xfba   : > { %7378 = vmatprep.subr.mxu1 %v7929_v16 }
0x106e   : > { %v3761_v61 = vpop.f32.mrf.mxu0 }
0x106f   : > { %v3762_v48 = vadd.f32 %v9047_v1, %v3761_v61 }
0x1070   : > { %v7355_v37 = vpop.f32.mrf.mxu0 }
0x1071   : > { %3773 = vrot.lane.b32.xlu0 %v3762_v48, %s7931_s29  ;;  %v3765_v25 = vadd.f32 %v3762_v48, %v9028_v57 }
0x1072   : > { %v3663_v35 = vpop.f32.mrf.mxu1 }
0x1073   : > { %v3664_v24 = vadd.f32 %v9057_v2, %v3663_v35  ;;  %v6852_v3 = vmul.f32 -1.442695, %v3765_v25 }
0x1074   : > { %v7344_v39 = vpop.f32.mrf.mxu1 }
0x1075   : > { %3675 = vrot.lane.b32.xlu0 %v3664_v24, %s7931_s29  ;;  %v3667_v8 = vadd.f32 %v3664_v24, %v9038_v6  ;;  %7735 = vpow2.f32 %v6852_v3 }
0x1077   : > { %v6850_v49 = vmul.f32 -1.442695, %v3667_v8 }
0x1079   : > { %7737 = vpow2.f32 %v6850_v49 }
0x1082   : > { %v7736_v51 = vpop.eup %7735 }
0x1083   : > { %v3769_v46 = vadd.f32 1.0, %v7736_v51 }
0x1085   : > { %7739 = vrcp.f32 %v3769_v46 }
0x1086   : > { %v7738_v29 = vpop.eup %7737 }
0x1087   : > { %v3671_v52 = vadd.f32 1.0, %v7738_v29 }
0x1089   : > { %7741 = vrcp.f32 %v3671_v52 }
0x1092   : > { %v7740_v10 = vpop.eup %7739 }
0x1093   : > { %v3783_v58 = vsub.f32 1.0, %v7740_v10  ;;  %v3789_v33 = vmul.f32 %v7740_v10, %v9203_v59 }
0x1096   : > { %v7742_v12 = vpop.eup %7741 }
0x1097   : > { %v3685_v54 = vsub.f32 1.0, %v7742_v12  ;;  %v3691_v41 = vmul.f32 %v7742_v12, %v9208_v55 }
0x10e3   : > { %v3774_v18 = vpop.permute.xlu0 %3773 }
0x10e4   : > { %v3776_v0 = vmul.f32 %v7740_v10, %v3774_v18 }
0x10e6   : > { %3778 = vrot.lane.b32.xlu1 %v3776_v0, %s7931_s29 }
0x10e7   : > { %v3676_v22 = vpop.permute.xlu0 %3675 }
0x10e8   : > { %v3678_v13 = vmul.f32 %v7742_v12, %v3676_v22  ;;  %v7883_v22 = vld [vmem:[%s9914_s7 + $0x18] sm:$0xff] }
0x10ea   : > { %3680 = vrot.lane.b32.xlu1 %v3678_v13, %s7931_s29 }
0x1158   : > { %v3779_v14 = vpop.permute.xlu1 %3778 }
0x1159   : > { %v3781_v15 = vadd.f32 %v3779_v14, %v9028_v57  ;;  %v7884_v14 = vld [vmem:[%s9914_s7 + $0x10] sm:$0xff] }
0x115b   : > { %7743 = vtanh.f32 %v3781_v15  ;;  %v7885_v15 = vld [vmem:[%s9913_s6 + $0x18] sm:$0xff] }
0x115c   : > { %v3681_v17 = vpop.permute.xlu1 %3680 }
0x115d   : > { %v3683_v19 = vadd.f32 %v3681_v17, %v9038_v6  ;;  %v7886_v17 = vld [vmem:[%s9914_s7 + $0x8] sm:$0xff] }
0x115f   : > { %7745 = vtanh.f32 %v3683_v19  ;;  %v7887_v19 = vld [vmem:[%s9913_s6 + $0x10] sm:$0xff] }
0x1168   : > { %v7744_v20 = vpop.eup %7743 }
0x1169   : > { %3785 = vrot.lane.b32.xlu0 %v7744_v20, %s7932_s30  ;;  %v7888_v20 = vld [vmem:[%s9914_s7] sm:$0xff] }
0x116c   : > { %v7746_v30 = vpop.eup %7745 }
0x116d   : > { %3687 = vrot.lane.b32.xlu0 %v7746_v30, %s7932_s30  ;;  %v7889_v30 = vld [vmem:[%s9913_s6 + $0x8] sm:$0xff] }
0x11db   : > { %v3786_v31 = vpop.permute.xlu0 %3785 }
0x11dc   : > { %v3788_v38 = vmul.f32 %v3786_v31, %v3783_v58  ;;  %v7890_v58 = vld [vmem:[%s9913_s6] sm:$0xff] }
0x11de   : > { %v9249_v40 = vadd.f32 %v3789_v33, %v3788_v38 }
0x11df   : > { %v3688_v57 = vpop.permute.xlu0 %3687 }
0x11e0   : > { %v3690_v43 = vmul.f32 %v3688_v57, %v3685_v54  ;;  %3797 = vrot.lane.b32.xlu1 %v9249_v40, %s7932_s30 }
0x11e2   : > { %v9254_v6 = vadd.f32 %v3691_v41, %v3690_v43 }
0x11e4   : > { %3792 = vrot.lane.b32.xlu1 %v9254_v6, %s7932_s30 }
0x1252   : > { %v3798_v60 = vpop.permute.xlu1 %3797 }
0x1253   : > { %3800 = vst.msk [vmem:[#allocation2 + $0x58] sm:$0xff] %vm2766_vm1, %v3798_v60  ;;  %7376 = vmatmul.mubr.msk.f32.vlgmr.msra.gmra.mxu0 %vm2766_vm1, %v3798_v60 }
0x1254   : > { %7390 = vmatpush3.msra.mxu0 %v8916_v11  ;;  %7397 = vmatprep.mubr.msk.f32.mxu0 %vm7930_vm9, %v7929_v16 }
0x1255   : > { %7391 = vmatprep.subr.mxu0 %v7929_v16 }
0x1256   : > { %v3793_v23 = vpop.permute.xlu1 %3792  ;;  %7392 = vmatpush3.msra.mxu0 %v8936_v26 }
0x1257   : > { %3795 = vst.msk [vmem:[#allocation2 + $0x20] sm:$0xff] %vm2766_vm1, %v3793_v23  ;;  %7365 = vmatmul.mubr.msk.f32.vlgmr.msra.gmra.mxu1 %vm2766_vm1, %v3793_v23  ;;  %7393 = vmatprep.subr.mxu0 %v7929_v16 }
0x1258   : > { %7379 = vmatpush3.msra.mxu1 %v8923_v50  ;;  %7394 = vmatpush3.msra.mxu0 %v8952_v34 }
0x1259   : > { %7380 = vmatprep.subr.mxu1 %v7929_v16  ;;  %7395 = vmatprep.subr.mxu0 %v7929_v16 }
0x125a   : > { %7381 = vmatpush3.msra.mxu1 %v8942_v62  ;;  %7396 = vmatpush3.msra.mxu0 %v8969_v4 }
0x125b   : > { %7382 = vmatprep.subr.mxu1 %v7929_v16  ;;  %7386 = vmatprep.mubr.msk.f32.mxu1 %vm7930_vm9, %v7929_v16 }
0x125c   : > { %7383 = vmatpush3.msra.mxu1 %v8958_v36  ;;  %7411 = vmatprep.subr.mxu0 %v7929_v16 }
0x125d   : > { %7384 = vmatprep.subr.mxu1 %v7929_v16 }
0x125e   : > { %7385 = vmatpush3.msra.mxu1 %v8974_v44 }
0x125f   : > { %7400 = vmatprep.subr.mxu1 %v7929_v16 }
0x1313   : > { %v3967_v11 = vpop.f32.mrf.mxu0 }
0x1314   : > { %v3968_v50 = vadd.f32 %v9047_v1, %v3967_v11 }
0x1315   : > { %v7377_v26 = vpop.f32.mrf.mxu0 }
0x1316   : > { %3979 = vrot.lane.b32.xlu0 %v3968_v50, %s7931_s29  ;;  %v3971_v36 = vadd.f32 %v3968_v50, %v9032_v5 }
0x1317   : > { %v3869_v62 = vpop.f32.mrf.mxu1 }
0x1318   : > { %v3870_v34 = vadd.f32 %v9057_v2, %v3869_v62  ;;  %v6856_v21 = vmul.f32 -1.442695, %v3971_v36 }
0x1319   : > { %v7366_v4 = vpop.f32.mrf.mxu1 }
0x131a   : > { %3881 = vrot.lane.b32.xlu0 %v3870_v34, %s7931_s29  ;;  %v3873_v59 = vadd.f32 %v3870_v34, %v9034_v63  ;;  %7747 = vpow2.f32 %v6856_v21 }
0x131c   : > { %v6854_v44 = vmul.f32 -1.442695, %v3873_v59 }
0x131e   : > { %7749 = vpow2.f32 %v6854_v44 }
0x1327   : > { %v7748_v45 = vpop.eup %7747 }
0x1328   : > { %v3975_v7 = vadd.f32 1.0, %v7748_v45 }
0x132a   : > { %7751 = vrcp.f32 %v3975_v7 }
0x132b   : > { %v7750_v28 = vpop.eup %7749 }
0x132c   : > { %v3877_v27 = vadd.f32 1.0, %v7750_v28 }
0x132e   : > { %7753 = vrcp.f32 %v3877_v27 }
0x1337   : > { %v7752_v55 = vpop.eup %7751 }
0x1338   : > { %v3989_v49 = vsub.f32 1.0, %v7752_v55  ;;  %v3995_v46 = vmul.f32 %v7752_v55, %v9249_v40 }
0x133b   : > { %v7754_v61 = vpop.eup %7753 }
0x133c   : > { %v3891_v10 = vsub.f32 1.0, %v7754_v61  ;;  %v3897_v18 = vmul.f32 %v7754_v61, %v9254_v6 }
0x1388   : > { %v3980_v42 = vpop.permute.xlu0 %3979 }
0x1389   : > { %v3982_v47 = vmul.f32 %v7752_v55, %v3980_v42 }
0x138b   : > { %3984 = vrot.lane.b32.xlu1 %v3982_v47, %s7931_s29 }
0x138c   : > { %v3882_v48 = vpop.permute.xlu0 %3881 }
0x138d   : > { %v3884_v37 = vmul.f32 %v7754_v61, %v3882_v48 }
0x138f   : > { %3886 = vrot.lane.b32.xlu1 %v3884_v37, %s7931_s29 }
0x13fd   : > { %v3985_v35 = vpop.permute.xlu1 %3984 }
0x13fe   : > { %v3987_v24 = vadd.f32 %v3985_v35, %v9032_v5 }
0x1400   : > { %7755 = vtanh.f32 %v3987_v24 }
0x1401   : > { %v3887_v39 = vpop.permute.xlu1 %3886 }
0x1402   : > { %v3889_v25 = vadd.f32 %v3887_v39, %v9034_v63 }
0x1404   : > { %7757 = vtanh.f32 %v3889_v25 }
0x140d   : > { %v7756_v3 = vpop.eup %7755 }
0x140e   : > { %3991 = vrot.lane.b32.xlu0 %v7756_v3, %s7932_s30 }
0x1411   : > { %v7758_v8 = vpop.eup %7757 }
0x1412   : > { %3893 = vrot.lane.b32.xlu0 %v7758_v8, %s7932_s30 }
0x1480   : > { %v3992_v51 = vpop.permute.xlu0 %3991 }
0x1481   : > { %v3994_v29 = vmul.f32 %v3992_v51, %v3989_v49 }
0x1483   : > { %v9295_v52 = vadd.f32 %v3995_v46, %v3994_v29 }
0x1484   : > { %v3894_v5 = vpop.permute.xlu0 %3893 }
0x1485   : > { %v3896_v0 = vmul.f32 %v3894_v5, %v3891_v10  ;;  %4003 = vrot.lane.b32.xlu1 %v9295_v52, %s7932_s30 }
0x1487   : > { %v9300_v63 = vadd.f32 %v3897_v18, %v3896_v0 }
0x1489   : > { %3998 = vrot.lane.b32.xlu1 %v9300_v63, %s7932_s30 }
0x14f7   : > { %v4004_v12 = vpop.permute.xlu1 %4003 }
0x14f8   : > { %4006 = vst.msk [vmem:[#allocation2 + $0x50] sm:$0xff] %vm2766_vm1, %v4004_v12  ;;  %7398 = vmatmul.mubr.msk.f32.vlgmr.msra.gmra.mxu0 %vm2766_vm1, %v4004_v12 }
0x14f9   : > { %7412 = vmatpush3.msra.mxu0 %v7883_v22  ;;  %7419 = vmatprep.mubr.msk.f32.mxu0 %vm7930_vm9, %v7929_v16 }
0x14fa   : > { %7413 = vmatprep.subr.mxu0 %v7929_v16 }
0x14fb   : > { %v3999_v13 = vpop.permute.xlu1 %3998  ;;  %7414 = vmatpush3.msra.mxu0 %v7884_v14 }
0x14fc   : > { %4001 = vst.msk [vmem:[#allocation2 + $0x28] sm:$0xff] %vm2766_vm1, %v3999_v13  ;;  %7387 = vmatmul.mubr.msk.f32.vlgmr.msra.gmra.mxu1 %vm2766_vm1, %v3999_v13  ;;  %7415 = vmatprep.subr.mxu0 %v7929_v16 }
0x14fd   : > { %7401 = vmatpush3.msra.mxu1 %v7885_v15  ;;  %7416 = vmatpush3.msra.mxu0 %v7886_v17 }
0x14fe   : > { %7402 = vmatprep.subr.mxu1 %v7929_v16  ;;  %7417 = vmatprep.subr.mxu0 %v7929_v16 }
0x14ff   : > { %7403 = vmatpush3.msra.mxu1 %v7887_v19  ;;  %7418 = vmatpush3.msra.mxu0 %v7888_v20 }
0x1500   : > { %7404 = vmatprep.subr.mxu1 %v7929_v16  ;;  %7408 = vmatprep.mubr.msk.f32.mxu1 %vm7930_vm9, %v7929_v16 }
0x1501   : > { %7405 = vmatpush3.msra.mxu1 %v7889_v30 }
0x1502   : > { %7406 = vmatprep.subr.mxu1 %v7929_v16 }
0x1503   : > { %7407 = vmatpush3.msra.mxu1 %v7890_v58 }
0x15b8   : > { %v4173_v31 = vpop.f32.mrf.mxu0 }
0x15b9   : > { %v4174_v33 = vadd.f32 %v9047_v1, %v4173_v31 }
0x15ba   : > { %v7399_v38 = vpop.f32.mrf.mxu0 }
0x15bb   : > { %4185 = vrot.lane.b32.xlu0 %v4174_v33, %s7931_s29  ;;  %v4177_v41 = vadd.f32 %v4174_v33, %v9022_v53 }
0x15bc   : > { %v4075_v40 = vpop.f32.mrf.mxu1 }
0x15bd   : > { %v4076_v54 = vadd.f32 %v9057_v2, %v4075_v40  ;;  %v6860_v43 = vmul.f32 -1.442695, %v4177_v41 }
0x15be   : > { %v7388_v57 = vpop.f32.mrf.mxu1 }
0x15bf   : > { %4087 = vrot.lane.b32.xlu0 %v4076_v54, %s7931_s29  ;;  %v4079_v6 = vadd.f32 %v4076_v54, %v9049_v9  ;;  %7759 = vpow2.f32 %v6860_v43 }
0x15c1   : > { %v6858_v60 = vmul.f32 -1.442695, %v4079_v6 }
0x15c3   : > { %7761 = vpow2.f32 %v6858_v60 }
0x15cc   : > { %v7760_v23 = vpop.eup %7759 }
0x15cd   : > { %v4181_v11 = vadd.f32 1.0, %v7760_v23 }
0x15cf   : > { %7763 = vrcp.f32 %v4181_v11 }
0x15d0   : > { %v7762_v50 = vpop.eup %7761 }
0x15d1   : > { %v4083_v26 = vadd.f32 1.0, %v7762_v50  ;;  %v4431_v50 = vld [vmem:[#allocation2 + $0x60] sm:$0xff] }
0x15d3   : > { %7765 = vrcp.f32 %v4083_v26  ;;  %v4433_v26 = vld [vmem:[#allocation2 + $0x70] sm:$0xff] }
0x15dc   : > { %v7764_v62 = vpop.eup %7763 }
0x15dd   : > { %v4195_v42 = vsub.f32 1.0, %v7764_v62  ;;  %v4201_v61 = vmul.f32 %v7764_v62, %v9295_v52 }
0x15e0   : > { %v7766_v36 = vpop.eup %7765 }
0x15e1   : > { %v4097_v35 = vsub.f32 1.0, %v7766_v36 }
0x162d   : > { %v4186_v34 = vpop.permute.xlu0 %4185 }
0x162e   : > { %v4188_v4 = vmul.f32 %v7764_v62, %v4186_v34  ;;  %v4486_v62 = vld [vmem:[%s9916_s9 + $0x38] sm:$0xff] }
0x162f   : > { %v4628_v34 = vld [vmem:[%s9917_s10 + $0x38] sm:$0xff]  ;;  %7422 = vmatprep.subr.mxu1 %v4486_v62 }
0x1630   : > { %4190 = vrot.lane.b32.xlu1 %v4188_v4, %s7931_s29  ;;  %v4485_v4 = vld [vmem:[%s9916_s9 + $0x30] sm:$0xff]  ;;  %7450 = vmatprep.subr.mxu0 %v4628_v34 }
0x1631   : > { %v4088_v21 = vpop.permute.xlu0 %4087 }
0x1632   : > { %v4090_v59 = vmul.f32 %v7766_v36, %v4088_v21  ;;  %v4484_v21 = vld [vmem:[%s9916_s9 + $0x28] sm:$0xff] }
0x1634   : > { %4092 = vrot.lane.b32.xlu1 %v4090_v59, %s7931_s29  ;;  %v4626_v59 = vld [vmem:[%s9917_s10 + $0x28] sm:$0xff] }
0x16a2   : > { %v4191_v44 = vpop.permute.xlu1 %4190 }
0x16a3   : > { %v4193_v45 = vadd.f32 %v4191_v44, %v9022_v53  ;;  %v4103_v53 = vmul.f32 %v7766_v36, %v9300_v63  ;;  %v4627_v36 = vld [vmem:[%s9917_s10 + $0x30] sm:$0xff]  ;;  %v4483_v44 = vld [vmem:[%s9916_s9 + $0x20] sm:$0xff] }
0x16a5   : > { %7767 = vtanh.f32 %v4193_v45  ;;  %v4625_v45 = vld [vmem:[%s9917_s10 + $0x20] sm:$0xff] }
0x16a6   : > { %v4093_v7 = vpop.permute.xlu1 %4092 }
0x16a7   : > { %v4095_v28 = vadd.f32 %v4093_v7, %v9049_v9  ;;  %v4482_v7 = vld [vmem:[%s9916_s9 + $0x18] sm:$0xff] }
0x16a9   : > { %7769 = vtanh.f32 %v4095_v28  ;;  %v4624_v28 = vld [vmem:[%s9917_s10 + $0x18] sm:$0xff] }
0x16b2   : > { %v7768_v27 = vpop.eup %7767 }
0x16b3   : > { %4197 = vrot.lane.b32.xlu0 %v7768_v27, %s7932_s30  ;;  %v4481_v27 = vld [vmem:[%s9916_s9 + $0x10] sm:$0xff] }
0x16b6   : > { %v7770_v55 = vpop.eup %7769 }
0x16b7   : > { %4099 = vrot.lane.b32.xlu0 %v7770_v55, %s7932_s30  ;;  %v4623_v55 = vld [vmem:[%s9917_s10 + $0x10] sm:$0xff] }
0x1725   : > { %v4198_v47 = vpop.permute.xlu0 %4197 }
0x1726   : > { %v4200_v48 = vmul.f32 %v4198_v47, %v4195_v42  ;;  %v4480_v42 = vld [vmem:[%s9916_s9 + $0x8] sm:$0xff] }
0x1727   : > { %v4622_v47 = vld [vmem:[%s9917_s10 + $0x8] sm:$0xff] }
0x1728   : > { %v4202_v37 = vadd.f32 %v4201_v61, %v4200_v48  ;;  %v4479_v61 = vld [vmem:[%s9916_s9] sm:$0xff] }
0x1729   : > { %v4100_v24 = vpop.permute.xlu0 %4099  ;;  %v4621_v48 = vld [vmem:[%s9917_s10] sm:$0xff] }
0x172a   : > { %v4102_v39 = vmul.f32 %v4100_v24, %v4097_v35  ;;  %4209 = vrot.lane.b32.xlu1 %v4202_v37, %s7932_s30 }
0x172c   : > { %v4104_v9 = vadd.f32 %v4103_v53, %v4102_v39  ;;  %v4429_v39 = vld [vmem:[#allocation2 + $0x50] sm:$0xff] }
0x172e   : > { %4204 = vrot.lane.b32.xlu1 %v4104_v9, %s7932_s30 }
0x179c   : > { %v4210_v25 = vpop.permute.xlu1 %4209 }
0x179d   : > { %4212 = vst.msk [vmem:[#allocation2 + $0x48] sm:$0xff] %vm2766_vm1, %v4210_v25  ;;  %7420 = vmatmul.mubr.msk.f32.vlgmr.msra.gmra.mxu0 %vm2766_vm1, %v4210_v25  ;;  %v4432_v25 = vld [vmem:[#allocation2 + $0x68] sm:$0xff] }
0x179e   : > { %7451 = vmatpush3.msra.mxu0 %v4628_v34 }
0x179f   : > { %7452 = vmatprep.subr.mxu0 %v4627_v36 }
0x17a0   : > { %v4205_v3 = vpop.permute.xlu1 %4204  ;;  %7453 = vmatpush3.msra.mxu0 %v4627_v36 }
0x17a1   : > { %4207 = vst.msk [vmem:[#allocation2 + $0x30] sm:$0xff] %vm2766_vm1, %v4205_v3  ;;  %7409 = vmatmul.mubr.msk.f32.vlgmr.msra.gmra.mxu1 %vm2766_vm1, %v4205_v3  ;;  %7454 = vmatprep.subr.mxu0 %v4626_v59  ;;  %v4434_v3 = vld [vmem:[#allocation2 + $0x78] sm:$0xff] }
0x17a2   : > { %7423 = vmatpush3.msra.mxu1 %v4486_v62  ;;  %7455 = vmatpush3.msra.mxu0 %v4626_v59 }
0x17a3   : > { %7424 = vmatprep.subr.mxu1 %v4485_v4  ;;  %7456 = vmatprep.subr.mxu0 %v4625_v45 }
0x17a4   : > { %v4428_v40 = vld [vmem:[#allocation2 + $0x48] sm:$0xff]  ;;  %7425 = vmatpush3.msra.mxu1 %v4485_v4  ;;  %7457 = vmatpush3.msra.mxu0 %v4625_v45 }
0x17a5   : > { %7426 = vmatprep.subr.mxu1 %v4484_v21  ;;  %7458 = vmatprep.subr.mxu0 %v4624_v28 }
0x17a6   : > { %7427 = vmatpush3.msra.mxu1 %v4484_v21  ;;  %7459 = vmatpush3.msra.mxu0 %v4624_v28 }
0x17a7   : > { %7428 = vmatprep.subr.mxu1 %v4483_v44  ;;  %7460 = vmatprep.subr.mxu0 %v4623_v55 }
0x17a8   : > { %7429 = vmatpush3.msra.mxu1 %v4483_v44  ;;  %7461 = vmatpush3.msra.mxu0 %v4623_v55 }
0x17a9   : > { %7430 = vmatprep.subr.mxu1 %v4482_v7  ;;  %7462 = vmatprep.subr.mxu0 %v4622_v47 }
0x17aa   : > { %7431 = vmatpush3.msra.mxu1 %v4482_v7  ;;  %7463 = vmatpush3.msra.mxu0 %v4622_v47 }
0x17ab   : > { %7432 = vmatprep.subr.mxu1 %v4481_v27  ;;  %7464 = vmatprep.subr.mxu0 %v4621_v48 }
0x17ac   : > { %7433 = vmatpush3.msra.mxu1 %v4481_v27  ;;  %7465 = vmatpush3.msra.mxu0 %v4621_v48 }
0x17ad   : > { %7434 = vmatprep.subr.mxu1 %v4480_v42  ;;  %7489 = vmatprep.subr.mxu0 %v7929_v16 }
0x17ae   : > { %7435 = vmatpush3.msra.mxu1 %v4480_v42 }
0x17af   : > { %7436 = vmatprep.subr.mxu1 %v4479_v61 }
0x17b0   : > { %7437 = vmatpush3.msra.mxu1 %v4479_v61 }
0x17b1   : > { %7478 = vmatprep.subr.mxu1 %v7929_v16 }
0x185d   : > { %v4379_v8 = vpop.f32.mrf.mxu0 }
0x185e   : > { %v4380_v49 = vadd.f32 %v9047_v1, %v4379_v8  ;;  %v4419_v8 = vld [vmem:[#allocation2] sm:$0xff] }
0x185f   : > { %v7421_v51 = vpop.f32.mrf.mxu0 }
0x1860   : > { %4391 = vrot.lane.b32.xlu0 %v4380_v49, %s7931_s29  ;;  %v4383_v10 = vadd.f32 %v4380_v49, %v9024_v56  ;;  %v4420_v51 = vld [vmem:[#allocation2 + $0x8] sm:$0xff] }
0x1861   : > { %v4281_v46 = vpop.f32.mrf.mxu1 }
0x1862   : > { %v4282_v29 = vadd.f32 %v9057_v2, %v4281_v46  ;;  %v6864_v5 = vmul.f32 -1.442695, %v4383_v10 }
0x1863   : > { %v7410_v52 = vpop.f32.mrf.mxu1 }
0x1864   : > { %4293 = vrot.lane.b32.xlu0 %v4282_v29, %s7931_s29  ;;  %v4285_v18 = vadd.f32 %v4282_v29, %v9042_v32  ;;  %7771 = vpow2.f32 %v6864_v5  ;;  %v9440_v29 = vld [vmem:[%s9918_s11 + $0x18] sm:$0xff]  ;;  %v4421_v5 = vld [vmem:[#allocation2 + $0x10] sm:$0xff] }
0x1865   : > { %v9445_v52 = vld [vmem:[%s9919_s12 + $0x18] sm:$0xff] }
0x1866   : > { %v6862_v0 = vmul.f32 -1.442695, %v4285_v18 }
0x1868   : > { %7773 = vpow2.f32 %v6862_v0  ;;  %v9456_v0 = vld [vmem:[%s9918_s11 + $0x10] sm:$0xff] }
0x1871   : > { %v7772_v63 = vpop.eup %7771 }
0x1872   : > { %v4387_v12 = vadd.f32 1.0, %v7772_v63  ;;  %v9462_v63 = vld [vmem:[%s9919_s12 + $0x10] sm:$0xff] }
0x1874   : > { %7775 = vrcp.f32 %v4387_v12 }
0x1875   : > { %v7774_v1 = vpop.eup %7773 }
0x1876   : > { %v4289_v22 = vadd.f32 1.0, %v7774_v1 }
0x1878   : > { %7777 = vrcp.f32 %v4289_v22  ;;  %v9472_v22 = vld [vmem:[%s9918_s11 + $0x8] sm:$0xff] }
0x1881   : > { %v7776_v13 = vpop.eup %7775 }
0x1882   : > { %v4401_v54 = vsub.f32 1.0, %v7776_v13  ;;  %v4407_v41 = vmul.f32 %v7776_v13, %v4202_v37 }
0x1885   : > { %v7778_v15 = vpop.eup %7777 }
0x1886   : > { %v4303_v6 = vsub.f32 1.0, %v7778_v15  ;;  %v4309_v23 = vmul.f32 %v7778_v15, %v4104_v9  ;;  %v4430_v9 = vld [vmem:[#allocation2 + $0x58] sm:$0xff] }
0x18d2   : > { %v4392_v14 = vpop.permute.xlu0 %4391 }
0x18d3   : > { %v4394_v2 = vmul.f32 %v7776_v13, %v4392_v14  ;;  %v9477_v13 = vld [vmem:[%s9919_s12 + $0x8] sm:$0xff]  ;;  %v4422_v14 = vld [vmem:[#allocation2 + $0x18] sm:$0xff] }
0x18d5   : > { %4396 = vrot.lane.b32.xlu1 %v4394_v2, %s7931_s29 }
0x18d6   : > { %v4294_v17 = vpop.permute.xlu0 %4293 }
0x18d7   : > { %v4296_v19 = vmul.f32 %v7778_v15, %v4294_v17  ;;  %v4423_v15 = vld [vmem:[#allocation2 + $0x20] sm:$0xff] }
0x18d9   : > { %4298 = vrot.lane.b32.xlu1 %v4296_v19, %s7931_s29 }
0x1947   : > { %v4397_v20 = vpop.permute.xlu1 %4396 }
0x1948   : > { %v4399_v30 = vadd.f32 %v4397_v20, %v9024_v56  ;;  %v9492_v20 = vld [vmem:[%s9918_s11] sm:$0xff] }
0x194a   : > { %7779 = vtanh.f32 %v4399_v30  ;;  %v9497_v30 = vld [vmem:[%s9919_s12] sm:$0xff] }
0x194b   : > { %v4299_v58 = vpop.permute.xlu1 %4298 }
0x194c   : > { %v4301_v31 = vadd.f32 %v4299_v58, %v9042_v32 }
0x194e   : > { %7781 = vtanh.f32 %v4301_v31  ;;  %v4424_v31 = vld [vmem:[#allocation2 + $0x28] sm:$0xff] }
0x1957   : > { %v7780_v33 = vpop.eup %7779 }
0x1958   : > { %4403 = vrot.lane.b32.xlu0 %v7780_v33, %s7932_s30 }
0x195b   : > { %v7782_v38 = vpop.eup %7781 }
0x195c   : > { %4305 = vrot.lane.b32.xlu0 %v7782_v38, %s7932_s30  ;;  %v4425_v38 = vld [vmem:[#allocation2 + $0x30] sm:$0xff] }
0x1960   : > { %4445 = vrot.lane.b32.xlu0 %v4428_v40, %s7933_s17 }
0x19ca   : > { %v4404_v57 = vpop.permute.xlu0 %4403 }
0x19cb   : > { %v4406_v43 = vmul.f32 %v4404_v57, %v4401_v54 }
0x19cd   : > { %v4408_v56 = vadd.f32 %v4407_v41, %v4406_v43 }
0x19ce   : > { %v4306_v60 = vpop.permute.xlu0 %4305 }
0x19cf   : > { %v4308_v32 = vmul.f32 %v4306_v60, %v4303_v6  ;;  %4415 = vrot.lane.b32.xlu1 %v4408_v56, %s7932_s30  ;;  %v6865_v56 = vld [vmem:[%s9920_s13] ss:$0 sm:$0xff]  ;;  %v6874_v6 = vld [vmem:[%s9920_s13 + $0x2] ss:$0 sm:$0xff] }
0x19d1   : > { %v4310_v11 = vadd.f32 %v4309_v23, %v4308_v32 }
0x19d2   : > { %v4446_v37 = vpop.permute.xlu0 %4445 }
0x19d3   : > { %4410 = vrot.lane.b32.xlu0 %v4310_v11, %s7932_s30  ;;  %v4468_v10 = vsel %vm2766_vm1, %v4420_v51, %v4446_v37 }
0x19d7   : > { %4451 = vrot.lane.b32.xlu0 %v4431_v50, %s7933_s17 }
0x19db   : > { %4455 = vrot.lane.b32.xlu0 %v4433_v26, %s7933_s17 }
0x1a41   : > { %v4416_v35 = vpop.permute.xlu1 %4415 }
0x1a42   : > { %4418 = vst.msk [vmem:[#allocation2 + $0x40] sm:$0xff] %vm2766_vm1, %v4416_v35 }
0x1a45   : > { %v4411_v24 = vpop.permute.xlu0 %4410 }
0x1a46   : > { %4413 = vst.msk [vmem:[#allocation2 + $0x38] sm:$0xff] %vm2766_vm1, %v4411_v24 }
0x1a49   : > { %v4427_v53 = vld [vmem:[#allocation2 + $0x40] sm:$0xff]  ;;  %v4452_v12 = vpop.permute.xlu0 %4451 }
0x1a4a   : > { %4443 = vrot.lane.b32.xlu1 %v4427_v53, %s7933_s17  ;;  %v4471_v19 = vsel %vm2766_vm1, %v4423_v15, %v4452_v12 }
0x1a4d   : > { %v4456_v58 = vpop.permute.xlu0 %4455  ;;  %v4426_v57 = vld [vmem:[#allocation2 + $0x38] sm:$0xff] }
0x1a4e   : > { %4447 = vrot.lane.b32.xlu1 %v4429_v39, %s7933_s17  ;;  %v4473_v54 = vsel %vm2766_vm1, %v4425_v38, %v4456_v58 }
0x1a52   : > { %4449 = vrot.lane.b32.xlu1 %v4430_v9, %s7933_s17 }
0x1a56   : > { %4453 = vrot.lane.b32.xlu1 %v4432_v25, %s7933_s17  ;;  %v9575_v25 = vld [vmem:[%s9920_s13 + $0x1] ss:$0 sm:$0xff] }
0x1a5a   : > { %4457 = vrot.lane.b32.xlu1 %v4434_v3, %s7933_s17  ;;  %v9580_v3 = vld [vmem:[%s9920_s13 + $0x3] ss:$0 sm:$0xff] }
0x1abc   : > { %v4444_v49 = vpop.permute.xlu1 %4443 }
0x1abd   : > { %v4467_v46 = vsel %vm2766_vm1, %v4419_v8, %v4444_v49 }
0x1abe   : > { %7438 = vmatprep.mubr.msk.f32.mxu1 %vm4491_vm2, %v4467_v46  ;;  %7466 = vmatprep.mubr.msk.f32.mxu0 %vm4491_vm2, %v4467_v46 }
0x1abf   : > { %7439 = vmatmul.mubr.msk.f32.vlgmr.msra.gmra.mxu1 %vm4491_vm2, %v4468_v10  ;;  %7467 = vmatmul.mubr.msk.f32.vlgmr.msra.gmra.mxu0 %vm4491_vm2, %v4468_v10 }
0x1ac0   : > { %v4448_v18 = vpop.permute.xlu1 %4447  ;;  %7479 = vmatpush3.msra.mxu1 %v9440_v29  ;;  %7490 = vmatpush3.msra.mxu0 %v9445_v52 }
0x1ac1   : > { %v4469_v1 = vsel %vm2766_vm1, %v4421_v5, %v4448_v18  ;;  %7480 = vmatprep.subr.mxu1 %v7929_v16  ;;  %7491 = vmatprep.subr.mxu0 %v7929_v16 }
0x1ac2   : > { %7441 = vmatprep.mubr.msk.f32.mxu1 %vm4491_vm2, %v4469_v1  ;;  %7469 = vmatprep.mubr.msk.f32.mxu0 %vm4491_vm2, %v4469_v1 }
0x1ac3   : > { %7481 = vmatpush3.msra.mxu1 %v9456_v0  ;;  %7492 = vmatpush3.msra.mxu0 %v9462_v63 }
0x1ac4   : > { %v4450_v2 = vpop.permute.xlu1 %4449  ;;  %7482 = vmatprep.subr.mxu1 %v7929_v16  ;;  %7493 = vmatprep.subr.mxu0 %v7929_v16 }
0x1ac5   : > { %v4470_v17 = vsel %vm2766_vm1, %v4422_v14, %v4450_v2  ;;  %7483 = vmatpush3.msra.mxu1 %v9472_v22  ;;  %7494 = vmatpush3.msra.mxu0 %v9477_v13 }
0x1ac6   : > { %7442 = vmatmul.mubr.msk.f32.gmra.mxu1 %vm4491_vm2, %v4470_v17  ;;  %7470 = vmatmul.mubr.msk.f32.gmra.mxu0 %vm4491_vm2, %v4470_v17 }
0x1ac7   : > { %7444 = vmatprep.mubr.msk.f32.mxu1 %vm4491_vm2, %v4471_v19  ;;  %7472 = vmatprep.mubr.msk.f32.mxu0 %vm4491_vm2, %v4471_v19 }
0x1ac8   : > { %v4454_v33 = vpop.permute.xlu1 %4453  ;;  %7484 = vmatprep.subr.mxu1 %v7929_v16  ;;  %7495 = vmatprep.subr.mxu0 %v7929_v16 }
0x1ac9   : > { %v4472_v40 = vsel %vm2766_vm1, %v4424_v31, %v4454_v33  ;;  %7485 = vmatpush3.msra.mxu1 %v9492_v20  ;;  %7496 = vmatpush3.msra.mxu0 %v9497_v30 }
0x1aca   : > { %7445 = vmatmul.mubr.msk.f32.gmra.mxu1 %vm4491_vm2, %v4472_v40  ;;  %7473 = vmatmul.mubr.msk.f32.gmra.mxu0 %vm4491_vm2, %v4472_v40 }
0x1acb   : > { %7447 = vmatprep.mubr.msk.f32.mxu1 %vm4491_vm2, %v4473_v54  ;;  %7475 = vmatprep.mubr.msk.f32.mxu0 %vm4491_vm2, %v4473_v54 }
0x1acc   : > { %v4458_v41 = vpop.permute.xlu1 %4457  ;;  %7500 = vmatprep.subr.mxu1 %v7929_v16  ;;  %7511 = vmatprep.subr.mxu0 %v7929_v16 }
0x1acd   : > { %v4474_v43 = vsel %vm2766_vm1, %v4426_v57, %v4458_v41 }
0x1ace   : > { %7448 = vmatmul.mubr.msk.f32.gmra.mxu1 %vm4491_vm2, %v4474_v43  ;;  %7476 = vmatmul.mubr.msk.f32.gmra.mxu0 %vm4491_vm2, %v4474_v43 }
0x1acf   : > { %7486 = vmatprep.mubr.msk.f32.mxu1 %vm7930_vm9, %v7929_v16  ;;  %7497 = vmatprep.mubr.msk.f32.mxu0 %vm7930_vm9, %v7929_v16 }
0x1ad2   : > { %7487 = vmatmul.mubr.f32.vlgmr.msra.gmra.mxu1 %v7929_v16  ;;  %7498 = vmatmul.mubr.f32.vlgmr.msra.gmra.mxu0 %v7929_v16 }
0x1ad3   : > { %7501 = vmatpush3.msra.mxu1 %v9440_v29  ;;  %7512 = vmatpush3.msra.mxu0 %v9445_v52 }
0x1ad4   : > { %7502 = vmatprep.subr.mxu1 %v7929_v16  ;;  %7513 = vmatprep.subr.mxu0 %v7929_v16 }
0x1ad5   : > { %7503 = vmatpush3.msra.mxu1 %v9456_v0  ;;  %7514 = vmatpush3.msra.mxu0 %v9462_v63 }
0x1ad6   : > { %7504 = vmatprep.subr.mxu1 %v7929_v16  ;;  %7515 = vmatprep.subr.mxu0 %v7929_v16 }
0x1ad7   : > { %7505 = vmatpush3.msra.mxu1 %v9472_v22  ;;  %7516 = vmatpush3.msra.mxu0 %v9477_v13 }
0x1ad8   : > { %7506 = vmatprep.subr.mxu1 %v7929_v16  ;;  %7517 = vmatprep.subr.mxu0 %v7929_v16 }
0x1ad9   : > { %7518 = vmatpush3.msra.mxu0 %v9497_v30  ;;  %7519 = vmatprep.mubr.msk.f32.mxu0 %vm7930_vm9, %v7929_v16 }
0x1ada   : > { %7507 = vmatpush3.msra.mxu1 %v9492_v20  ;;  %7508 = vmatprep.mubr.msk.f32.mxu1 %vm7930_vm9, %v7929_v16 }
0x1adb   : > { %7522 = vmatprep.subr.mxu1 %v7929_v16  ;;  %7533 = vmatprep.subr.mxu0 %v7929_v16 }
0x1b7f   : > { %v7440_v60 = vpop.f32.mrf.mxu1  ;;  %v7468_v23 = vpop.f32.mrf.mxu0 }
0x1b80   : > { %v9548_v32 = vadd.f32 %v7440_v60, %v6865_v56  ;;  %v9550_v11 = vadd.f32 %v7468_v23, %v6874_v6 }
0x1b81   : > { %v4699_v50 = vpop.f32.mrf.mxu0  ;;  %v4582_v62 = vpop.f32.mrf.mxu1 }
0x1b82   : > { %v9552_v26 = vadd.f32 %v6874_v6, %v4699_v50  ;;  %v4583_v1 = vadd.f32 %v6865_v56, %v4582_v62 }
0x1b86   : > { %v7443_v34 = vpop.f32.mrf.mxu1  ;;  %v7471_v4 = vpop.f32.mrf.mxu0 }
0x1b87   : > { %v9554_v36 = vadd.f32 %v7443_v34, %v6865_v56  ;;  %v9556_v21 = vadd.f32 %v7471_v4, %v6874_v6 }
0x1b88   : > { %v4592_v59 = vpop.f32.mrf.mxu1  ;;  %v4709_v44 = vpop.f32.mrf.mxu0 }
0x1b89   : > { %v9558_v45 = vadd.f32 %v6865_v56, %v4592_v59  ;;  %v9560_v7 = vadd.f32 %v6874_v6, %v4709_v44 }
0x1b8a   : > { %v7446_v28 = vpop.f32.mrf.mxu1  ;;  %v7474_v27 = vpop.f32.mrf.mxu0 }
0x1b8b   : > { %v9562_v55 = vadd.f32 %v7446_v28, %v6865_v56  ;;  %v9564_v42 = vadd.f32 %v7474_v27, %v6874_v6 }
0x1b8c   : > { %v4602_v47 = vpop.f32.mrf.mxu1  ;;  %v4719_v61 = vpop.f32.mrf.mxu0 }
0x1b8d   : > { %v9566_v48 = vadd.f32 %v6865_v56, %v4602_v47  ;;  %v9568_v37 = vadd.f32 %v6874_v6, %v4719_v61 }
0x1b8e   : > { %v7449_v35 = vpop.f32.mrf.mxu1  ;;  %v7477_v24 = vpop.f32.mrf.mxu0 }
0x1b8f   : > { %v9570_v53 = vadd.f32 %v7449_v35, %v6865_v56  ;;  %v4735_v14 = vadd.f32 %v7477_v24, %v6874_v6 }
0x1b90   : > { %v4612_v39 = vpop.f32.mrf.mxu1  ;;  %v4729_v9 = vpop.f32.mrf.mxu0 }
0x1b91   : > { %v9582_v8 = vadd.f32 %v6865_v56, %v4612_v39  ;;  %v9584_v49 = vadd.f32 %v6874_v6, %v4729_v9 }
0x1b92   : > { %v4816_v51 = vpop.f32.mrf.mxu1  ;;  %v4916_v46 = vpop.f32.mrf.mxu0 }
0x1b93   : > { %v4817_v10 = vadd.f32 %v9575_v25, %v4816_v51  ;;  %v4917_v5 = vadd.f32 %v9580_v3, %v4916_v46 }
0x1b94   : > { %v7488_v18 = vpop.f32.mrf.mxu1  ;;  %v7499_v12 = vpop.f32.mrf.mxu0 }
0x1b95   : > { %4928 = vrot.lane.b32.xlu1 %v4917_v5, %s7931_s29  ;;  %4828 = vrot.lane.b32.xlu0 %v4817_v10, %s7931_s29  ;;  %v4820_v2 = vadd.f32 %v4817_v10, %v4583_v1  ;;  %v4920_v15 = vadd.f32 %v4917_v5, %v4735_v14 }
0x1b97   : > { %v6884_v17 = vmul.f32 -1.442695, %v4820_v2  ;;  %v6886_v19 = vmul.f32 -1.442695, %v4920_v15 }
0x1b99   : > { %7783 = vpow2.f32 %v6884_v17 }
0x1b9a   : > { %7785 = vpow2.f32 %v6886_v19 }
0x1ba6   : > { %v7784_v58 = vpop.eup %7783 }
0x1ba7   : > { %v7786_v31 = vpop.eup %7785  ;;  %v4824_v33 = vadd.f32 1.0, %v7784_v58 }
0x1ba8   : > { %v4924_v38 = vadd.f32 1.0, %v7786_v31 }
0x1ba9   : > { %7787 = vrcp.f32 %v4824_v33 }
0x1baa   : > { %7789 = vrcp.f32 %v4924_v38 }
0x1bb6   : > { %v7788_v40 = vpop.eup %7787 }
0x1bb7   : > { %v7790_v54 = vpop.eup %7789  ;;  %v4838_v44 = vsub.f32 1.0, %v7788_v40  ;;  %v4844_v61 = vmul.f32 0.0, %v7788_v40 }
0x1bb8   : > { %v4938_v4 = vsub.f32 1.0, %v7790_v54  ;;  %v4944_v28 = vmul.f32 0.0, %v7790_v54 }
0x1c07   : > { %v4929_v57 = vpop.permute.xlu1 %4928  ;;  %v4829_v41 = vpop.permute.xlu0 %4828 }
0x1c08   : > { %v4931_v43 = vmul.f32 %v7790_v54, %v4929_v57  ;;  %v4831_v60 = vmul.f32 %v7788_v40, %v4829_v41 }
0x1c0a   : > { %4933 = vrot.lane.b32.xlu1 %v4931_v43, %s7931_s29  ;;  %4833 = vrot.lane.b32.xlu0 %v4831_v60, %s7931_s29 }
0x1c7c   : > { %v4934_v56 = vpop.permute.xlu1 %4933  ;;  %v4834_v6 = vpop.permute.xlu0 %4833 }
0x1c7d   : > { %v4936_v23 = vadd.f32 %v4934_v56, %v4735_v14  ;;  %v4836_v50 = vadd.f32 %v4834_v6, %v4583_v1 }
0x1c7f   : > { %7791 = vtanh.f32 %v4936_v23 }
0x1c80   : > { %7793 = vtanh.f32 %v4836_v50 }
0x1c8c   : > { %v7792_v62 = vpop.eup %7791 }
0x1c8d   : > { %v7794_v34 = vpop.eup %7793  ;;  %4940 = vrot.lane.b32.xlu1 %v7792_v62, %s7932_s30 }
0x1c8e   : > { %4840 = vrot.lane.b32.xlu0 %v7794_v34, %s7932_s30 }
0x1cff   : > { %v4941_v59 = vpop.permute.xlu1 %4940 }
0x1d00   : > { %v4943_v27 = vmul.f32 %v4941_v59, %v4938_v4  ;;  %v4841_v47 = vpop.permute.xlu0 %4840 }
0x1d01   : > { %v4843_v35 = vmul.f32 %v4841_v47, %v4838_v44 }
0x1d02   : > { %v9594_v24 = vadd.f32 %v4944_v28, %v4943_v27 }
0x1d03   : > { %v9596_v39 = vadd.f32 %v4844_v61, %v4843_v35 }
0x1d04   : > { %5048 = vrot.lane.b32.xlu1 %v9594_v24, %s7932_s30 }
0x1d05   : > { %4947 = vrot.lane.b32.xlu0 %v9596_v39, %s7932_s30 }
0x1d76   : > { %v5049_v9 = vpop.permute.xlu1 %5048 }
0x1d77   : > { %v4948_v51 = vpop.permute.xlu0 %4947  ;;  %7520 = vmatmul.mubr.msk.f32.vlgmr.msra.gmra.mxu0 %vm2766_vm1, %v5049_v9 }
0x1d78   : > { %7509 = vmatmul.mubr.msk.f32.vlgmr.msra.gmra.mxu1 %vm2766_vm1, %v4948_v51  ;;  %7534 = vmatpush3.msra.mxu0 %v9445_v52 }
0x1d79   : > { %7523 = vmatpush3.msra.mxu1 %v9440_v29  ;;  %7535 = vmatprep.subr.mxu0 %v7929_v16 }
0x1d7a   : > { %7524 = vmatprep.subr.mxu1 %v7929_v16  ;;  %7536 = vmatpush3.msra.mxu0 %v9462_v63 }
0x1d7b   : > { %7525 = vmatpush3.msra.mxu1 %v9456_v0  ;;  %7537 = vmatprep.subr.mxu0 %v7929_v16 }
0x1d7c   : > { %7526 = vmatprep.subr.mxu1 %v7929_v16  ;;  %7538 = vmatpush3.msra.mxu0 %v9477_v13 }
0x1d7d   : > { %7527 = vmatpush3.msra.mxu1 %v9472_v22  ;;  %7539 = vmatprep.subr.mxu0 %v7929_v16 }
0x1d7e   : > { %7528 = vmatprep.subr.mxu1 %v7929_v16  ;;  %7540 = vmatpush3.msra.mxu0 %v9497_v30 }
0x1d7f   : > { %7541 = vmatprep.mubr.msk.f32.mxu0 %vm7930_vm9, %v7929_v16  ;;  %7529 = vmatpush3.msra.mxu1 %v9492_v20 }
0x1d80   : > { %7530 = vmatprep.mubr.msk.f32.mxu1 %vm7930_vm9, %v7929_v16  ;;  %7544 = vmatprep.subr.mxu1 %v7929_v16 }
0x1d81   : > { %7555 = vmatprep.subr.mxu0 %v7929_v16 }
0x1e37   : > { %v5118_v46 = vpop.f32.mrf.mxu0 }
0x1e38   : > { %v5017_v10 = vpop.f32.mrf.mxu1  ;;  %v5119_v5 = vadd.f32 %v9580_v3, %v5118_v46 }
0x1e39   : > { %v5018_v18 = vadd.f32 %v9575_v25, %v5017_v10  ;;  %v7521_v12 = vpop.f32.mrf.mxu0 }
0x1e3a   : > { %v7510_v1 = vpop.f32.mrf.mxu1  ;;  %5130 = vrot.lane.b32.xlu1 %v5119_v5, %s7931_s29  ;;  %v5122_v14 = vadd.f32 %v5119_v5, %v9584_v49 }
0x1e3b   : > { %5029 = vrot.lane.b32.xlu0 %v5018_v18, %s7931_s29  ;;  %v5021_v2 = vadd.f32 %v5018_v18, %v9548_v32 }
0x1e3c   : > { %v6890_v15 = vmul.f32 -1.442695, %v5122_v14 }
0x1e3d   : > { %v6888_v17 = vmul.f32 -1.442695, %v5021_v2 }
0x1e3e   : > { %7795 = vpow2.f32 %v6890_v15 }
0x1e3f   : > { %7797 = vpow2.f32 %v6888_v17 }
0x1e4b   : > { %v7796_v19 = vpop.eup %7795 }
0x1e4c   : > { %v7798_v58 = vpop.eup %7797  ;;  %v5126_v31 = vadd.f32 1.0, %v7796_v19 }
0x1e4d   : > { %v5025_v33 = vadd.f32 1.0, %v7798_v58 }
0x1e4e   : > { %7799 = vrcp.f32 %v5126_v31 }
0x1e4f   : > { %7801 = vrcp.f32 %v5025_v33 }
0x1e5b   : > { %v7800_v38 = vpop.eup %7799 }
0x1e5c   : > { %v7802_v54 = vpop.eup %7801  ;;  %v5140_v34 = vsub.f32 1.0, %v7800_v38  ;;  %v5146_v44 = vmul.f32 %v7800_v38, %v9594_v24 }
0x1e5d   : > { %v5039_v59 = vsub.f32 1.0, %v7802_v54 }
0x1eac   : > { %v5131_v40 = vpop.permute.xlu1 %5130 }
0x1ead   : > { %v5133_v57 = vmul.f32 %v7800_v38, %v5131_v40  ;;  %v5030_v41 = vpop.permute.xlu0 %5029 }
0x1eae   : > { %v5032_v43 = vmul.f32 %v7802_v54, %v5030_v41 }
0x1eaf   : > { %5135 = vrot.lane.b32.xlu1 %v5133_v57, %s7931_s29 }
0x1eb0   : > { %5034 = vrot.lane.b32.xlu0 %v5032_v43, %s7931_s29 }
0x1f21   : > { %v5136_v60 = vpop.permute.xlu1 %5135 }
0x1f22   : > { %v5138_v56 = vadd.f32 %v5136_v60, %v9584_v49  ;;  %v5035_v6 = vpop.permute.xlu0 %5034  ;;  %v5045_v49 = vmul.f32 %v7802_v54, %v9596_v39 }
0x1f23   : > { %v5037_v23 = vadd.f32 %v5035_v6, %v9548_v32 }
0x1f24   : > { %7803 = vtanh.f32 %v5138_v56 }
0x1f25   : > { %7805 = vtanh.f32 %v5037_v23 }
0x1f31   : > { %v7804_v50 = vpop.eup %7803 }
0x1f32   : > { %v7806_v62 = vpop.eup %7805  ;;  %5142 = vrot.lane.b32.xlu1 %v7804_v50, %s7932_s30 }
0x1f33   : > { %5041 = vrot.lane.b32.xlu0 %v7806_v62, %s7932_s30 }
0x1fa4   : > { %v5143_v4 = vpop.permute.xlu1 %5142 }
0x1fa5   : > { %v5145_v28 = vmul.f32 %v5143_v4, %v5140_v34  ;;  %v5042_v27 = vpop.permute.xlu0 %5041 }
0x1fa6   : > { %v5044_v47 = vmul.f32 %v5042_v27, %v5039_v59 }
0x1fa7   : > { %v9638_v61 = vadd.f32 %v5146_v44, %v5145_v28 }
0x1fa8   : > { %v9640_v32 = vadd.f32 %v5045_v49, %v5044_v47 }
0x1fa9   : > { %5250 = vrot.lane.b32.xlu1 %v9638_v61, %s7932_s30 }
0x1faa   : > { %5149 = vrot.lane.b32.xlu0 %v9640_v32, %s7932_s30 }
0x201b   : > { %v5251_v35 = vpop.permute.xlu1 %5250 }
0x201c   : > { %v5150_v9 = vpop.permute.xlu0 %5149  ;;  %7542 = vmatmul.mubr.msk.f32.vlgmr.msra.gmra.mxu0 %vm2766_vm1, %v5251_v35 }
0x201d   : > { %7531 = vmatmul.mubr.msk.f32.vlgmr.msra.gmra.mxu1 %vm2766_vm1, %v5150_v9  ;;  %7556 = vmatpush3.msra.mxu0 %v9445_v52 }
0x201e   : > { %7545 = vmatpush3.msra.mxu1 %v9440_v29  ;;  %7557 = vmatprep.subr.mxu0 %v7929_v16 }
0x201f   : > { %7546 = vmatprep.subr.mxu1 %v7929_v16  ;;  %7558 = vmatpush3.msra.mxu0 %v9462_v63 }
0x2020   : > { %7547 = vmatpush3.msra.mxu1 %v9456_v0  ;;  %7559 = vmatprep.subr.mxu0 %v7929_v16 }
0x2021   : > { %7548 = vmatprep.subr.mxu1 %v7929_v16  ;;  %7560 = vmatpush3.msra.mxu0 %v9477_v13 }
0x2022   : > { %7549 = vmatpush3.msra.mxu1 %v9472_v22  ;;  %7561 = vmatprep.subr.mxu0 %v7929_v16 }
0x2023   : > { %7550 = vmatprep.subr.mxu1 %v7929_v16  ;;  %7562 = vmatpush3.msra.mxu0 %v9497_v30 }
0x2024   : > { %7563 = vmatprep.mubr.msk.f32.mxu0 %vm7930_vm9, %v7929_v16  ;;  %7551 = vmatpush3.msra.mxu1 %v9492_v20 }
0x2025   : > { %7552 = vmatprep.mubr.msk.f32.mxu1 %vm7930_vm9, %v7929_v16  ;;  %7566 = vmatprep.subr.mxu1 %v7929_v16 }
0x2026   : > { %7577 = vmatprep.subr.mxu0 %v7929_v16 }
0x20dc   : > { %v5320_v24 = vpop.f32.mrf.mxu0 }
0x20dd   : > { %v5219_v39 = vpop.f32.mrf.mxu1  ;;  %v5321_v51 = vadd.f32 %v9580_v3, %v5320_v24 }
0x20de   : > { %v5220_v46 = vadd.f32 %v9575_v25, %v5219_v39  ;;  %v7543_v10 = vpop.f32.mrf.mxu0 }
0x20df   : > { %v7532_v5 = vpop.f32.mrf.mxu1  ;;  %5332 = vrot.lane.b32.xlu1 %v5321_v51, %s7931_s29  ;;  %v5324_v18 = vadd.f32 %v5321_v51, %v9564_v42 }
0x20e0   : > { %5231 = vrot.lane.b32.xlu0 %v5220_v46, %s7931_s29  ;;  %v5223_v12 = vadd.f32 %v5220_v46, %v9558_v45 }
0x20e1   : > { %v6894_v1 = vmul.f32 -1.442695, %v5324_v18 }
0x20e2   : > { %v6892_v14 = vmul.f32 -1.442695, %v5223_v12 }
0x20e3   : > { %7807 = vpow2.f32 %v6894_v1 }
0x20e4   : > { %7809 = vpow2.f32 %v6892_v14 }
0x20f0   : > { %v7808_v2 = vpop.eup %7807 }
0x20f1   : > { %v7810_v15 = vpop.eup %7809  ;;  %v5328_v17 = vadd.f32 1.0, %v7808_v2 }
0x20f2   : > { %v5227_v19 = vadd.f32 1.0, %v7810_v15 }
0x20f3   : > { %7811 = vrcp.f32 %v5328_v17 }
0x20f4   : > { %7813 = vrcp.f32 %v5227_v19 }
0x2100   : > { %v7812_v58 = vpop.eup %7811 }
0x2101   : > { %v7814_v33 = vpop.eup %7813  ;;  %v5342_v23 = vsub.f32 1.0, %v7812_v58  ;;  %v5348_v34 = vmul.f32 %v7812_v58, %v9638_v61 }
0x2102   : > { %v5241_v62 = vsub.f32 1.0, %v7814_v33 }
0x2151   : > { %v5333_v31 = vpop.permute.xlu1 %5332 }
0x2152   : > { %v5335_v38 = vmul.f32 %v7812_v58, %v5333_v31  ;;  %v5232_v40 = vpop.permute.xlu0 %5231 }
0x2153   : > { %v5234_v54 = vmul.f32 %v7814_v33, %v5232_v40 }
0x2154   : > { %5337 = vrot.lane.b32.xlu1 %v5335_v38, %s7931_s29 }
0x2155   : > { %5236 = vrot.lane.b32.xlu0 %v5234_v54, %s7931_s29 }
0x21c6   : > { %v5338_v57 = vpop.permute.xlu1 %5337 }
0x21c7   : > { %v5340_v41 = vadd.f32 %v5338_v57, %v9564_v42  ;;  %v5237_v43 = vpop.permute.xlu0 %5236  ;;  %v5247_v42 = vmul.f32 %v7814_v33, %v9640_v32 }
0x21c8   : > { %v5239_v60 = vadd.f32 %v5237_v43, %v9558_v45 }
0x21c9   : > { %7815 = vtanh.f32 %v5340_v41 }
0x21ca   : > { %7817 = vtanh.f32 %v5239_v60 }
0x21d6   : > { %v7816_v56 = vpop.eup %7815 }
0x21d7   : > { %v7818_v6 = vpop.eup %7817  ;;  %5344 = vrot.lane.b32.xlu1 %v7816_v56, %s7932_s30 }
0x21d8   : > { %5243 = vrot.lane.b32.xlu0 %v7818_v6, %s7932_s30 }
0x2249   : > { %v5345_v50 = vpop.permute.xlu1 %5344 }
0x224a   : > { %v5347_v4 = vmul.f32 %v5345_v50, %v5342_v23  ;;  %v5244_v59 = vpop.permute.xlu0 %5243 }
0x224b   : > { %v5246_v44 = vmul.f32 %v5244_v59, %v5241_v62 }
0x224c   : > { %v9682_v28 = vadd.f32 %v5348_v34, %v5347_v4 }
0x224d   : > { %v9684_v45 = vadd.f32 %v5247_v42, %v5246_v44 }
0x224e   : > { %5452 = vrot.lane.b32.xlu1 %v9682_v28, %s7932_s30 }
0x224f   : > { %5351 = vrot.lane.b32.xlu0 %v9684_v45, %s7932_s30 }
0x22c0   : > { %v5453_v27 = vpop.permute.xlu1 %5452 }
0x22c1   : > { %v5352_v49 = vpop.permute.xlu0 %5351  ;;  %7564 = vmatmul.mubr.msk.f32.vlgmr.msra.gmra.mxu0 %vm2766_vm1, %v5453_v27 }
0x22c2   : > { %7553 = vmatmul.mubr.msk.f32.vlgmr.msra.gmra.mxu1 %vm2766_vm1, %v5352_v49  ;;  %7578 = vmatpush3.msra.mxu0 %v9445_v52 }
0x22c3   : > { %7567 = vmatpush3.msra.mxu1 %v9440_v29  ;;  %7579 = vmatprep.subr.mxu0 %v7929_v16 }
0x22c4   : > { %7568 = vmatprep.subr.mxu1 %v7929_v16  ;;  %7580 = vmatpush3.msra.mxu0 %v9462_v63 }
0x22c5   : > { %7569 = vmatpush3.msra.mxu1 %v9456_v0  ;;  %7581 = vmatprep.subr.mxu0 %v7929_v16 }
0x22c6   : > { %7570 = vmatprep.subr.mxu1 %v7929_v16  ;;  %7582 = vmatpush3.msra.mxu0 %v9477_v13 }
0x22c7   : > { %7571 = vmatpush3.msra.mxu1 %v9472_v22  ;;  %7583 = vmatprep.subr.mxu0 %v7929_v16 }
0x22c8   : > { %7572 = vmatprep.subr.mxu1 %v7929_v16  ;;  %7584 = vmatpush3.msra.mxu0 %v9497_v30 }
0x22c9   : > { %7585 = vmatprep.mubr.msk.f32.mxu0 %vm7930_vm9, %v7929_v16  ;;  %7573 = vmatpush3.msra.mxu1 %v9492_v20 }
0x22ca   : > { %7574 = vmatprep.mubr.msk.f32.mxu1 %vm7930_vm9, %v7929_v16  ;;  %7588 = vmatprep.subr.mxu1 %v7929_v16 }
0x22cb   : > { %7599 = vmatprep.subr.mxu0 %v7929_v16 }
0x2381   : > { %v5522_v47 = vpop.f32.mrf.mxu0 }
0x2382   : > { %v5421_v61 = vpop.f32.mrf.mxu1  ;;  %v5523_v32 = vadd.f32 %v9580_v3, %v5522_v47 }
0x2383   : > { %v5422_v35 = vadd.f32 %v9575_v25, %v5421_v61  ;;  %v7565_v9 = vpop.f32.mrf.mxu0 }
0x2384   : > { %v7554_v24 = vpop.f32.mrf.mxu1  ;;  %5534 = vrot.lane.b32.xlu1 %v5523_v32, %s7931_s29  ;;  %v5526_v39 = vadd.f32 %v5523_v32, %v9568_v37 }
0x2385   : > { %5433 = vrot.lane.b32.xlu0 %v5422_v35, %s7931_s29  ;;  %v5425_v51 = vadd.f32 %v5422_v35, %v9554_v36 }
0x2386   : > { %v6898_v46 = vmul.f32 -1.442695, %v5526_v39 }
0x2387   : > { %v6896_v10 = vmul.f32 -1.442695, %v5425_v51 }
0x2388   : > { %7819 = vpow2.f32 %v6898_v46 }
0x2389   : > { %7821 = vpow2.f32 %v6896_v10 }
0x2395   : > { %v7820_v5 = vpop.eup %7819 }
0x2396   : > { %v7822_v18 = vpop.eup %7821  ;;  %v5530_v12 = vadd.f32 1.0, %v7820_v5 }
0x2397   : > { %v5429_v1 = vadd.f32 1.0, %v7822_v18 }
0x2398   : > { %7823 = vrcp.f32 %v5530_v12 }
0x2399   : > { %7825 = vrcp.f32 %v5429_v1 }
0x23a5   : > { %v7824_v14 = vpop.eup %7823 }
0x23a6   : > { %v7826_v15 = vpop.eup %7825  ;;  %v5544_v41 = vsub.f32 1.0, %v7824_v14  ;;  %v5550_v56 = vmul.f32 %v7824_v14, %v9682_v28 }
0x23a7   : > { %v5443_v60 = vsub.f32 1.0, %v7826_v15 }
0x23f6   : > { %v5535_v2 = vpop.permute.xlu1 %5534 }
0x23f7   : > { %v5537_v17 = vmul.f32 %v7824_v14, %v5535_v2  ;;  %v5434_v19 = vpop.permute.xlu0 %5433 }
0x23f8   : > { %v5436_v58 = vmul.f32 %v7826_v15, %v5434_v19 }
0x23f9   : > { %5539 = vrot.lane.b32.xlu1 %v5537_v17, %s7931_s29 }
0x23fa   : > { %5438 = vrot.lane.b32.xlu0 %v5436_v58, %s7931_s29 }
0x246b   : > { %v5540_v31 = vpop.permute.xlu1 %5539 }
0x246c   : > { %v5542_v33 = vadd.f32 %v5540_v31, %v9568_v37  ;;  %v5439_v38 = vpop.permute.xlu0 %5438  ;;  %v5449_v37 = vmul.f32 %v7826_v15, %v9684_v45 }
0x246d   : > { %v5441_v40 = vadd.f32 %v5439_v38, %v9554_v36 }
0x246e   : > { %7827 = vtanh.f32 %v5542_v33 }
0x246f   : > { %7829 = vtanh.f32 %v5441_v40 }
0x247b   : > { %v7828_v54 = vpop.eup %7827 }
0x247c   : > { %v7830_v57 = vpop.eup %7829  ;;  %5546 = vrot.lane.b32.xlu1 %v7828_v54, %s7932_s30 }
0x247d   : > { %5445 = vrot.lane.b32.xlu0 %v7830_v57, %s7932_s30 }
0x24ee   : > { %v5547_v43 = vpop.permute.xlu1 %5546 }
0x24ef   : > { %v5549_v6 = vmul.f32 %v5547_v43, %v5544_v41  ;;  %v5446_v23 = vpop.permute.xlu0 %5445 }
0x24f0   : > { %v5448_v50 = vmul.f32 %v5446_v23, %v5443_v60 }
0x24f1   : > { %v9726_v62 = vadd.f32 %v5550_v56, %v5549_v6 }
0x24f2   : > { %v9728_v36 = vadd.f32 %v5449_v37, %v5448_v50 }
0x24f3   : > { %5654 = vrot.lane.b32.xlu1 %v9726_v62, %s7932_s30 }
0x24f4   : > { %5553 = vrot.lane.b32.xlu0 %v9728_v36, %s7932_s30 }
0x2565   : > { %v5655_v34 = vpop.permute.xlu1 %5654 }
0x2566   : > { %v5554_v4 = vpop.permute.xlu0 %5553  ;;  %7586 = vmatmul.mubr.msk.f32.vlgmr.msra.gmra.mxu0 %vm2766_vm1, %v5655_v34 }
0x2567   : > { %7575 = vmatmul.mubr.msk.f32.vlgmr.msra.gmra.mxu1 %vm2766_vm1, %v5554_v4  ;;  %7600 = vmatpush3.msra.mxu0 %v9445_v52 }
0x2568   : > { %7589 = vmatpush3.msra.mxu1 %v9440_v29  ;;  %7601 = vmatprep.subr.mxu0 %v7929_v16 }
0x2569   : > { %7590 = vmatprep.subr.mxu1 %v7929_v16  ;;  %7602 = vmatpush3.msra.mxu0 %v9462_v63 }
0x256a   : > { %7591 = vmatpush3.msra.mxu1 %v9456_v0  ;;  %7603 = vmatprep.subr.mxu0 %v7929_v16 }
0x256b   : > { %7592 = vmatprep.subr.mxu1 %v7929_v16  ;;  %7604 = vmatpush3.msra.mxu0 %v9477_v13 }
0x256c   : > { %7593 = vmatpush3.msra.mxu1 %v9472_v22  ;;  %7605 = vmatprep.subr.mxu0 %v7929_v16 }
0x256d   : > { %7594 = vmatprep.subr.mxu1 %v7929_v16  ;;  %7606 = vmatpush3.msra.mxu0 %v9497_v30 }
0x256e   : > { %7607 = vmatprep.mubr.msk.f32.mxu0 %vm7930_vm9, %v7929_v16  ;;  %7595 = vmatpush3.msra.mxu1 %v9492_v20 }
0x256f   : > { %7596 = vmatprep.mubr.msk.f32.mxu1 %vm7930_vm9, %v7929_v16  ;;  %7610 = vmatprep.subr.mxu1 %v7929_v16 }
0x2570   : > { %7621 = vmatprep.subr.mxu0 %v7929_v16 }
0x2626   : > { %v5724_v59 = vpop.f32.mrf.mxu0 }
0x2627   : > { %v5623_v42 = vpop.f32.mrf.mxu1  ;;  %v5725_v44 = vadd.f32 %v9580_v3, %v5724_v59 }
0x2628   : > { %v5624_v28 = vadd.f32 %v9575_v25, %v5623_v42  ;;  %v7587_v45 = vpop.f32.mrf.mxu0 }
0x2629   : > { %v7576_v27 = vpop.f32.mrf.mxu1  ;;  %5736 = vrot.lane.b32.xlu1 %v5725_v44, %s7931_s29  ;;  %v5728_v49 = vadd.f32 %v5725_v44, %v9556_v21 }
0x262a   : > { %5635 = vrot.lane.b32.xlu0 %v5624_v28, %s7931_s29  ;;  %v5627_v47 = vadd.f32 %v5624_v28, %v9566_v48 }
0x262b   : > { %v6902_v61 = vmul.f32 -1.442695, %v5728_v49 }
0x262c   : > { %v6900_v32 = vmul.f32 -1.442695, %v5627_v47 }
0x262d   : > { %7831 = vpow2.f32 %v6902_v61 }
0x262e   : > { %7833 = vpow2.f32 %v6900_v32 }
0x263a   : > { %v7832_v35 = vpop.eup %7831 }
0x263b   : > { %v7834_v9 = vpop.eup %7833  ;;  %v5732_v24 = vadd.f32 1.0, %v7832_v35 }
0x263c   : > { %v5631_v39 = vadd.f32 1.0, %v7834_v9 }
0x263d   : > { %7835 = vrcp.f32 %v5732_v24 }
0x263e   : > { %7837 = vrcp.f32 %v5631_v39 }
0x264a   : > { %v7836_v51 = vpop.eup %7835 }
0x264b   : > { %v7838_v10 = vpop.eup %7837  ;;  %v5746_v58 = vsub.f32 1.0, %v7836_v51  ;;  %v5752_v38 = vmul.f32 %v7836_v51, %v9726_v62 }
0x264c   : > { %v5645_v33 = vsub.f32 1.0, %v7838_v10 }
0x269b   : > { %v5737_v46 = vpop.permute.xlu1 %5736 }
0x269c   : > { %v5739_v5 = vmul.f32 %v7836_v51, %v5737_v46  ;;  %v5636_v18 = vpop.permute.xlu0 %5635 }
0x269d   : > { %v5638_v12 = vmul.f32 %v7838_v10, %v5636_v18 }
0x269e   : > { %5741 = vrot.lane.b32.xlu1 %v5739_v5, %s7931_s29 }
0x269f   : > { %5640 = vrot.lane.b32.xlu0 %v5638_v12, %s7931_s29 }
0x2710   : > { %v5742_v1 = vpop.permute.xlu1 %5741 }
0x2711   : > { %v5744_v14 = vadd.f32 %v5742_v1, %v9556_v21  ;;  %v5641_v2 = vpop.permute.xlu0 %5640  ;;  %v5651_v21 = vmul.f32 %v7838_v10, %v9728_v36 }
0x2712   : > { %v5643_v15 = vadd.f32 %v5641_v2, %v9566_v48  ;;  %v7892_v2 = vld [vmem:[%s9918_s11 + $0x18] sm:$0xff] }
0x2713   : > { %7839 = vtanh.f32 %v5744_v14  ;;  %v7891_v14 = vld [vmem:[%s9919_s12 + $0x18] sm:$0xff] }
0x2714   : > { %7841 = vtanh.f32 %v5643_v15  ;;  %v7893_v15 = vld [vmem:[%s9919_s12 + $0x10] sm:$0xff] }
0x2720   : > { %v7840_v17 = vpop.eup %7839 }
0x2721   : > { %v7842_v19 = vpop.eup %7841  ;;  %5748 = vrot.lane.b32.xlu1 %v7840_v17, %s7932_s30  ;;  %v7894_v17 = vld [vmem:[%s9918_s11 + $0x10] sm:$0xff] }
0x2722   : > { %5647 = vrot.lane.b32.xlu0 %v7842_v19, %s7932_s30  ;;  %v7895_v19 = vld [vmem:[%s9919_s12 + $0x8] sm:$0xff] }
0x2793   : > { %v5749_v31 = vpop.permute.xlu1 %5748 }
0x2794   : > { %v5751_v40 = vmul.f32 %v5749_v31, %v5746_v58  ;;  %v5648_v54 = vpop.permute.xlu0 %5647  ;;  %v7896_v58 = vld [vmem:[%s9918_s11 + $0x8] sm:$0xff] }
0x2795   : > { %v5650_v57 = vmul.f32 %v5648_v54, %v5645_v33 }
0x2796   : > { %v9770_v41 = vadd.f32 %v5752_v38, %v5751_v40 }
0x2797   : > { %v9772_v48 = vadd.f32 %v5651_v21, %v5650_v57 }
0x2798   : > { %5856 = vrot.lane.b32.xlu1 %v9770_v41, %s7932_s30 }
0x2799   : > { %5755 = vrot.lane.b32.xlu0 %v9772_v48, %s7932_s30 }
0x280a   : > { %v5857_v43 = vpop.permute.xlu1 %5856 }
0x280b   : > { %v5756_v60 = vpop.permute.xlu0 %5755  ;;  %7608 = vmatmul.mubr.msk.f32.vlgmr.msra.gmra.mxu0 %vm2766_vm1, %v5857_v43 }
0x280c   : > { %7597 = vmatmul.mubr.msk.f32.vlgmr.msra.gmra.mxu1 %vm2766_vm1, %v5756_v60  ;;  %7622 = vmatpush3.msra.mxu0 %v9445_v52 }
0x280d   : > { %7611 = vmatpush3.msra.mxu1 %v9440_v29  ;;  %7623 = vmatprep.subr.mxu0 %v7929_v16 }
0x280e   : > { %7612 = vmatprep.subr.mxu1 %v7929_v16  ;;  %7624 = vmatpush3.msra.mxu0 %v9462_v63 }
0x280f   : > { %7613 = vmatpush3.msra.mxu1 %v9456_v0  ;;  %7625 = vmatprep.subr.mxu0 %v7929_v16 }
0x2810   : > { %7614 = vmatprep.subr.mxu1 %v7929_v16  ;;  %7626 = vmatpush3.msra.mxu0 %v9477_v13 }
0x2811   : > { %7615 = vmatpush3.msra.mxu1 %v9472_v22  ;;  %7627 = vmatprep.subr.mxu0 %v7929_v16 }
0x2812   : > { %7616 = vmatprep.subr.mxu1 %v7929_v16  ;;  %7628 = vmatpush3.msra.mxu0 %v9497_v30 }
0x2813   : > { %7629 = vmatprep.mubr.msk.f32.mxu0 %vm7930_vm9, %v7929_v16  ;;  %7617 = vmatpush3.msra.mxu1 %v9492_v20 }
0x2814   : > { %7618 = vmatprep.mubr.msk.f32.mxu1 %vm7930_vm9, %v7929_v16  ;;  %7632 = vmatprep.subr.mxu1 %v7929_v16 }
0x2815   : > { %7643 = vmatprep.subr.mxu0 %v7929_v16 }
0x28cb   : > { %v5926_v29 = vpop.f32.mrf.mxu0 }
0x28cc   : > { %v5825_v52 = vpop.f32.mrf.mxu1  ;;  %v5927_v0 = vadd.f32 %v9580_v3, %v5926_v29 }
0x28cd   : > { %v5826_v63 = vadd.f32 %v9575_v25, %v5825_v52  ;;  %v7609_v22 = vpop.f32.mrf.mxu0 }
0x28ce   : > { %v7598_v13 = vpop.f32.mrf.mxu1  ;;  %5938 = vrot.lane.b32.xlu1 %v5927_v0, %s7931_s29  ;;  %v5930_v56 = vadd.f32 %v5927_v0, %v9560_v7 }
0x28cf   : > { %5837 = vrot.lane.b32.xlu0 %v5826_v63, %s7931_s29  ;;  %v5829_v6 = vadd.f32 %v5826_v63, %v9562_v55 }
0x28d0   : > { %v6906_v23 = vmul.f32 -1.442695, %v5930_v56 }
0x28d1   : > { %v6904_v37 = vmul.f32 -1.442695, %v5829_v6 }
0x28d2   : > { %7843 = vpow2.f32 %v6906_v23 }
0x28d3   : > { %7845 = vpow2.f32 %v6904_v37 }
0x28df   : > { %v7844_v50 = vpop.eup %7843 }
0x28e0   : > { %v7846_v62 = vpop.eup %7845  ;;  %v5934_v36 = vadd.f32 1.0, %v7844_v50 }
0x28e1   : > { %v5833_v34 = vadd.f32 1.0, %v7846_v62 }
0x28e2   : > { %7847 = vrcp.f32 %v5934_v36 }
0x28e3   : > { %7849 = vrcp.f32 %v5833_v34 }
0x28ef   : > { %v7848_v4 = vpop.eup %7847 }
0x28f0   : > { %v7850_v42 = vpop.eup %7849  ;;  %v5948_v9 = vsub.f32 1.0, %v7848_v4  ;;  %v5954_v51 = vmul.f32 %v7848_v4, %v9770_v41 }
0x28f1   : > { %v5847_v39 = vsub.f32 1.0, %v7850_v42 }
0x2940   : > { %v5939_v59 = vpop.permute.xlu1 %5938 }
0x2941   : > { %v5941_v44 = vmul.f32 %v7848_v4, %v5939_v59  ;;  %v5838_v28 = vpop.permute.xlu0 %5837 }
0x2942   : > { %v5840_v45 = vmul.f32 %v7850_v42, %v5838_v28 }
0x2943   : > { %5943 = vrot.lane.b32.xlu1 %v5941_v44, %s7931_s29 }
0x2944   : > { %5842 = vrot.lane.b32.xlu0 %v5840_v45, %s7931_s29 }
0x29b5   : > { %v5944_v27 = vpop.permute.xlu1 %5943 }
0x29b6   : > { %v5946_v49 = vadd.f32 %v5944_v27, %v9560_v7  ;;  %v5843_v47 = vpop.permute.xlu0 %5842  ;;  %v5853_v7 = vmul.f32 %v7850_v42, %v9772_v48 }
0x29b7   : > { %v5845_v61 = vadd.f32 %v5843_v47, %v9562_v55 }
0x29b8   : > { %7851 = vtanh.f32 %v5946_v49 }
0x29b9   : > { %7853 = vtanh.f32 %v5845_v61 }
0x29c5   : > { %v7852_v32 = vpop.eup %7851 }
0x29c6   : > { %v7854_v35 = vpop.eup %7853  ;;  %5950 = vrot.lane.b32.xlu1 %v7852_v32, %s7932_s30 }
0x29c7   : > { %5849 = vrot.lane.b32.xlu0 %v7854_v35, %s7932_s30 }
0x2a38   : > { %v5951_v24 = vpop.permute.xlu1 %5950 }
0x2a39   : > { %v5953_v46 = vmul.f32 %v5951_v24, %v5948_v9  ;;  %v5850_v10 = vpop.permute.xlu0 %5849 }
0x2a3a   : > { %v5852_v5 = vmul.f32 %v5850_v10, %v5847_v39 }
0x2a3b   : > { %v9814_v18 = vadd.f32 %v5954_v51, %v5953_v46 }
0x2a3c   : > { %v9816_v55 = vadd.f32 %v5853_v7, %v5852_v5 }
0x2a3d   : > { %6058 = vrot.lane.b32.xlu1 %v9814_v18, %s7932_s30 }
0x2a3e   : > { %5957 = vrot.lane.b32.xlu0 %v9816_v55, %s7932_s30 }
0x2aaf   : > { %v6059_v12 = vpop.permute.xlu1 %6058 }
0x2ab0   : > { %v5958_v1 = vpop.permute.xlu0 %5957  ;;  %7630 = vmatmul.mubr.msk.f32.vlgmr.msra.gmra.mxu0 %vm2766_vm1, %v6059_v12 }
0x2ab1   : > { %7619 = vmatmul.mubr.msk.f32.vlgmr.msra.gmra.mxu1 %vm2766_vm1, %v5958_v1  ;;  %7644 = vmatpush3.msra.mxu0 %v7891_v14 }
0x2ab2   : > { %7633 = vmatpush3.msra.mxu1 %v7892_v2  ;;  %7645 = vmatprep.subr.mxu0 %v7929_v16 }
0x2ab3   : > { %7634 = vmatprep.subr.mxu1 %v7929_v16  ;;  %7646 = vmatpush3.msra.mxu0 %v7893_v15 }
0x2ab4   : > { %7635 = vmatpush3.msra.mxu1 %v7894_v17  ;;  %7647 = vmatprep.subr.mxu0 %v7929_v16 }
0x2ab5   : > { %7636 = vmatprep.subr.mxu1 %v7929_v16  ;;  %7648 = vmatpush3.msra.mxu0 %v7895_v19 }
0x2ab6   : > { %7637 = vmatpush3.msra.mxu1 %v7896_v58  ;;  %7649 = vmatprep.subr.mxu0 %v7929_v16 }
0x2ab7   : > { %7638 = vmatprep.subr.mxu1 %v7929_v16  ;;  %7650 = vmatpush3.msra.mxu0 %v9497_v30 }
0x2ab8   : > { %7651 = vmatprep.mubr.msk.f32.mxu0 %vm7930_vm9, %v7929_v16  ;;  %7639 = vmatpush3.msra.mxu1 %v9492_v20 }
0x2ab9   : > { %7640 = vmatprep.mubr.msk.f32.mxu1 %vm7930_vm9, %v7929_v16  ;;  %7654 = vmatprep.subr.mxu1 %v7929_v16 }
0x2b70   : > { %v6128_v31 = vpop.f32.mrf.mxu0 }
0x2b71   : > { %v6027_v33 = vpop.f32.mrf.mxu1  ;;  %v6129_v38 = vadd.f32 %v9580_v3, %v6128_v31 }
0x2b72   : > { %v6028_v40 = vadd.f32 %v9575_v25, %v6027_v33  ;;  %v7631_v54 = vpop.f32.mrf.mxu0 }
0x2b73   : > { %v7620_v21 = vpop.f32.mrf.mxu1  ;;  %6140 = vrot.lane.b32.xlu1 %v6129_v38, %s7931_s29  ;;  %v6132_v30 = vadd.f32 %v6129_v38, %v9550_v11 }
0x2b74   : > { %6039 = vrot.lane.b32.xlu0 %v6028_v40, %s7931_s29  ;;  %v6031_v20 = vadd.f32 %v6028_v40, %v9582_v8 }
0x2b75   : > { %v6910_v57 = vmul.f32 -1.442695, %v6132_v30 }
0x2b76   : > { %v6908_v41 = vmul.f32 -1.442695, %v6031_v20 }
0x2b77   : > { %7855 = vpow2.f32 %v6910_v57 }
0x2b78   : > { %7857 = vpow2.f32 %v6908_v41 }
0x2b84   : > { %v7856_v48 = vpop.eup %7855 }
0x2b85   : > { %v7858_v43 = vpop.eup %7857  ;;  %v6136_v60 = vadd.f32 1.0, %v7856_v48 }
0x2b86   : > { %v6035_v29 = vadd.f32 1.0, %v7858_v43 }
0x2b87   : > { %7859 = vrcp.f32 %v6136_v60  ;;  %v6915_v60 = vld [vmem:[%s9921_s14] ss:$0 sm:$0xff] }
0x2b88   : > { %7861 = vrcp.f32 %v6035_v29 }
0x2b94   : > { %v7860_v52 = vpop.eup %7859 }
0x2b95   : > { %v7862_v63 = vpop.eup %7861  ;;  %v6150_v34 = vsub.f32 1.0, %v7860_v52  ;;  %v6156_v42 = vmul.f32 %v7860_v52, %v9814_v18 }
0x2b96   : > { %v6049_v59 = vsub.f32 1.0, %v7862_v63 }
0x2be5   : > { %v6141_v0 = vpop.permute.xlu1 %6140 }
0x2be6   : > { %v6143_v22 = vmul.f32 %v7860_v52, %v6141_v0  ;;  %v6040_v13 = vpop.permute.xlu0 %6039  ;;  %v6916_v52 = vld [vmem:[%s9921_s14 + $0x1] ss:$0 sm:$0xff] }
0x2be7   : > { %v6042_v56 = vmul.f32 %v7862_v63, %v6040_v13  ;;  %v6380_v13 = vld [vmem:[%s9921_s14 + $0x2] sm:$0x1] }
0x2be8   : > { %6145 = vrot.lane.b32.xlu1 %v6143_v22, %s7931_s29 }
0x2be9   : > { %6044 = vrot.lane.b32.xlu0 %v6042_v56, %s7931_s29  ;;  %v6382_v56 = vstv %s6917_s2 }
0x2c5a   : > { %v6146_v6 = vpop.permute.xlu1 %6145 }
0x2c5b   : > { %v6148_v23 = vadd.f32 %v6146_v6, %v9550_v11  ;;  %v6045_v37 = vpop.permute.xlu0 %6044  ;;  %v6055_v11 = vmul.f32 %v7862_v63, %v9816_v55 }
0x2c5c   : > { %v6047_v50 = vadd.f32 %v6045_v37, %v9582_v8 }
0x2c5d   : > { %7863 = vtanh.f32 %v6148_v23 }
0x2c5e   : > { %7865 = vtanh.f32 %v6047_v50 }
0x2c6a   : > { %v7864_v62 = vpop.eup %7863 }
0x2c6b   : > { %v7866_v36 = vpop.eup %7865  ;;  %6152 = vrot.lane.b32.xlu1 %v7864_v62, %s7932_s30 }
0x2c6c   : > { %6051 = vrot.lane.b32.xlu0 %v7866_v36, %s7932_s30 }
0x2cdd   : > { %v6153_v4 = vpop.permute.xlu1 %6152 }
0x2cde   : > { %v6155_v44 = vmul.f32 %v6153_v4, %v6150_v34  ;;  %v6052_v28 = vpop.permute.xlu0 %6051 }
0x2cdf   : > { %v6054_v45 = vmul.f32 %v6052_v28, %v6049_v59 }
0x2ce0   : > { %v6157_v27 = vadd.f32 %v6156_v42, %v6155_v44 }
0x2ce1   : > { %v6056_v8 = vadd.f32 %v6055_v11, %v6054_v45 }
0x2ce2   : > { %6260 = vrot.lane.b32.xlu1 %v6157_v27, %s7932_s30 }
0x2ce3   : > { %6159 = vrot.lane.b32.xlu0 %v6056_v8, %s7932_s30 }
0x2d54   : > { %v6261_v49 = vpop.permute.xlu1 %6260 }
0x2d55   : > { %v6160_v47 = vpop.permute.xlu0 %6159  ;;  %7652 = vmatmul.mubr.msk.f32.vlgmr.msra.gmra.mxu0 %vm2766_vm1, %v6261_v49 }
0x2d56   : > { %7641 = vmatmul.mubr.msk.f32.vlgmr.msra.gmra.mxu1 %vm2766_vm1, %v6160_v47 }
0x2d57   : > { %7656 = vmatprep.mubr.msk.f32.mxu1 %vm7930_vm9, %v7929_v16 }
0x2e15   : > { %v6330_v61 = vpop.f32.mrf.mxu0 }
0x2e16   : > { %v6229_v32 = vpop.f32.mrf.mxu1  ;;  %v6331_v35 = vadd.f32 %v9580_v3, %v6330_v61 }
0x2e17   : > { %v6230_v9 = vadd.f32 %v9575_v25, %v6229_v32  ;;  %v7653_v24 = vpop.f32.mrf.mxu0 }
0x2e18   : > { %v7642_v39 = vpop.f32.mrf.mxu1  ;;  %6342 = vrot.lane.b32.xlu1 %v6331_v35, %s7931_s29  ;;  %v6334_v51 = vadd.f32 %v6331_v35, %v9552_v26 }
0x2e19   : > { %6241 = vrot.lane.b32.xlu0 %v6230_v9, %s7931_s29  ;;  %v6233_v46 = vadd.f32 %v6230_v9, %v9570_v53 }
0x2e1a   : > { %v6914_v10 = vmul.f32 -1.442695, %v6334_v51 }
0x2e1b   : > { %v6912_v7 = vmul.f32 -1.442695, %v6233_v46 }
0x2e1c   : > { %7867 = vpow2.f32 %v6914_v10 }
0x2e1d   : > { %7869 = vpow2.f32 %v6912_v7 }
0x2e29   : > { %v7868_v16 = vpop.eup %7867 }
0x2e2a   : > { %v7870_v5 = vpop.eup %7869  ;;  %v6338_v18 = vadd.f32 1.0, %v7868_v16 }
0x2e2b   : > { %v6237_v3 = vadd.f32 1.0, %v7870_v5 }
0x2e2c   : > { %7871 = vrcp.f32 %v6338_v18 }
0x2e2d   : > { %7873 = vrcp.f32 %v6237_v3 }
0x2e39   : > { %v7872_v25 = vpop.eup %7871 }
0x2e3a   : > { %v7874_v12 = vpop.eup %7873  ;;  %v6358_v41 = vmul.f32 %v7872_v25, %v6157_v27 }
0x2e3b   : > { %v6251_v38 = vsub.f32 1.0, %v7874_v12  ;;  %v6257_v54 = vmul.f32 %v7874_v12, %v6056_v8 }
0x2e8a   : > { %v6343_v55 = vpop.permute.xlu1 %6342 }
0x2e8b   : > { %v6345_v1 = vmul.f32 %v7872_v25, %v6343_v55  ;;  %v6242_v14 = vpop.permute.xlu0 %6241 }
0x2e8c   : > { %v6244_v2 = vmul.f32 %v7874_v12, %v6242_v14 }
0x2e8d   : > { %6347 = vrot.lane.b32.xlu1 %v6345_v1, %s7931_s29 }
0x2e8e   : > { %6246 = vrot.lane.b32.xlu0 %v6244_v2, %s7931_s29 }
0x2eff   : > { %v6348_v15 = vpop.permute.xlu1 %6347 }
0x2f00   : > { %v6350_v17 = vadd.f32 %v6348_v15, %v9552_v26  ;;  %v6247_v19 = vpop.permute.xlu0 %6246  ;;  %v6352_v26 = vsub.f32 1.0, %v7872_v25 }
0x2f01   : > { %v6249_v58 = vadd.f32 %v6247_v19, %v9570_v53 }
0x2f02   : > { %7875 = vtanh.f32 %v6350_v17 }
0x2f03   : > { %7877 = vtanh.f32 %v6249_v58 }
0x2f0f   : > { %v7876_v31 = vpop.eup %7875 }
0x2f10   : > { %v7878_v33 = vpop.eup %7877  ;;  %6354 = vrot.lane.b32.xlu1 %v7876_v31, %s7932_s30 }
0x2f11   : > { %6253 = vrot.lane.b32.xlu0 %v7878_v33, %s7932_s30 }
0x2f82   : > { %v6355_v20 = vpop.permute.xlu1 %6354 }
0x2f83   : > { %v6254_v40 = vpop.permute.xlu0 %6253  ;;  %v6357_v57 = vmul.f32 %v6355_v20, %v6352_v26 }
0x2f84   : > { %v6256_v21 = vmul.f32 %v6254_v40, %v6251_v38 }
0x2f85   : > { %v6359_v53 = vadd.f32 %v6358_v41, %v6357_v57 }
0x2f86   : > { %v6258_v30 = vadd.f32 %v6257_v54, %v6256_v21 }
0x2f88   : > { %6361 = vrot.lane.b32.xlu0 %v6258_v30, %s7932_s30 }
0x2ffa   : > { %v6362_v48 = vpop.permute.xlu0 %6361 }
0x2ffb   : > { %v6364_v43 = vsel %vm2766_vm1, %v6362_v48, %v6359_v53 }
0x2ffc   : > { %vm6365_vm3 = vcmp.gt.f32.partialorder %v6364_v43, 0.0  ;;  %v6366_v29 = vmul.f32 0.1, %v6364_v43 }
0x2ffe   : > { %v6367_v0 = vsel %vm6365_vm3, %v6364_v43, %v6366_v29 }
0x2fff   : > { %v6373_v63 = vmul.f32 %v6915_v60, %v6367_v0 }
0x3001   : > { %v6379_v22 = vadd.f32 %v6916_v52, %v6373_v63 }
0x3003   : > { %7655 = vmatpush3.xpose.msk.msra.mxu1 %vm4491_vm2, %v6379_v22 }
0x3006   : > { %7657 = vmatmul.mubr.msk.f32.vlgmr.msra.gmra.mxu1 %vm4491_vm2, %v6380_v13 }
0x30c6   : > { %v6455_v6 = vpop.f32.mrf.mxu1 }
0x30c7   : > { %v6456_v23 = vadd.f32 %v6455_v6, %v6382_v56 }
0x30c8   : > { %v7658_v37 = vpop.f32.mrf.mxu1 }
0x30c9   : > { %v6920_v50 = vmul.f32 -1.442695, %v6456_v23 }
0x30cb   : > { %7879 = vpow2.f32 %v6920_v50 }
0x30d8   : > { %v7880_v62 = vpop.eup %7879 }
0x30d9   : > { %v6462_v36 = vadd.f32 1.0, %v7880_v62 }
0x30db   : > { %7881 = vrcp.f32 %v6462_v36 }
0x30e8   : > { %v7882_v34 = vpop.eup %7881 }
0x30e9   : > { %6466 = vst.msk [vmem:[%s503_s23] sm:$0x1] %vm6465_vm4, %v7882_v34 }
0x30ea PF: > { %s26_s18 = sadd.s32 1, %s7922_s18  }
0x30eb   : > { %p23_p1 = scmp.ge.s32.totalorder %s26_s18, 4  }
0x30ed   :  { %25 = sbr.rel (!%p23_p1) target bundleno = 5 (0x5), region = 116 }
0x30f2   :  { %6484 = vsyncpa [#allocation4], 1 }
0x30f3   :  { %6486 = vsyncpa [#allocation4 + $0x1], 1 }

</bundles_post_ra>
